<compile_context>
chip_gen: v7x
topology: tpu7x:2x2x1
jax: 0.10.0
libtpu: 0.0.40
codegen_flags: <defaults>
</compile_context>

<pallas_src>
import jax
import jax.numpy as jnp
from jax import lax
from jax.experimental import pallas as pl
from jax.experimental.pallas import tpu as pltpu
import numpy as np


# ---------------------------------------------------------------------------
# Kernel
# ---------------------------------------------------------------------------
def _make_lstm_kernel(num_layers, num_steps, hidden, num_features,
                      compute_dtype):
    L, T, H, F = num_layers, num_steps, hidden, num_features
    use_mask_act = (4 * H <= 128)   # gates fit one 128-lane vreg: 2 EUP passes
    vpu_input_proj = (F < 16)       # tiny K: VPU MACs beat a K=F MXU matmul

    def kernel(*refs):
        if L > 1:
            (x_ref, w_ih0_ref, w_ihr_ref, w_hh_ref, b_ref,
             w_out_ref, b_out_ref, out_ref, gates_ref, seq_ref) = refs
        else:
            (x_ref, w_ih0_ref, w_hh_ref, b_ref,
             w_out_ref, b_out_ref, out_ref, gates_ref) = refs
            w_ihr_ref = None
            seq_ref = None

        bn = x_ref.shape[0]          # rows in this BN block

        # Hoisted lane mask: computed once per kernel (JAX does not CSE
        # broadcast_in_dim, so emitting it per unrolled step is pure waste).
        if use_mask_act:
            lane = lax.broadcasted_iota(jnp.int32, (bn, 4 * H), 1)
            is_g_mask = (lane >= 2 * H) & (lane < 3 * H)

        h_last = None
        for l in range(L):
            bias = b_ref[l:l + 1, :]                           # (1, 4H) f32

            # ---- hoisted input projection for ALL timesteps of this layer.
            if l == 0 and vpu_input_proj:
                # K = F is tiny: F broadcast-multiply-accumulates on the VPU.
                x = x_ref[...].astype(jnp.float32)             # (bn, T, F)
                w = w_ih0_ref[...].astype(jnp.float32)         # (F, 4H)
                g_in = None
                for f in range(F):
                    term = (x[:, :, f:f + 1]
                            * w[f:f + 1, :].reshape(1, 1, 4 * H))
                    g_in = term if g_in is None else g_in + term
                g_in = g_in + bias[:, None, :]                 # (bn, T, 4H)
            else:
                if l == 0:
                    x_in = x_ref[...]                          # (bn, T, F)
                    w_ih = w_ih0_ref[...]                      # (F, 4H)
                else:
                    x_in = seq_ref[...]                        # (bn, T, H)
                    w_ih = w_ihr_ref[l - 1]                    # (H, 4H)
                in_dim = x_in.shape[-1]
                g2 = jnp.dot(x_in.reshape(bn * T, in_dim), w_ih,
                             preferred_element_type=jnp.float32)
                g2 = g2 + bias                                 # bias folded in
                g_in = g2.reshape(bn, T, 4 * H)
            gates_ref[...] = g_in                              # f32 scratch

            w_hh = w_hh_ref[l]                                 # (H, 4H) once/layer
            write_seq = (l < L - 1)                            # top layer: skip

            h = jnp.zeros((bn, H), jnp.float32)
            c = jnp.zeros((bn, H), jnp.float32)
            # Static unroll over time: scheduler overlaps step t+1's MXU push
            # with step t's EUP/VPU tail; all scratch indices are static.
            for t in range(T):
                gates = gates_ref[:, t, :] + jnp.dot(
                    h.astype(compute_dtype), w_hh,
                    preferred_element_type=jnp.float32)        # (bn, 4H)

                if use_mask_act:
                    # full-width sigmoid + tanh (one vreg) + hoisted mask
                    act = jnp.where(is_g_mask, jnp.tanh(gates),
                                    jax.nn.sigmoid(gates))
                    i_g = act[:, 0 * H:1 * H]
                    f_g = act[:, 1 * H:2 * H]
                    g_g = act[:, 2 * H:3 * H]
                    o_g = act[:, 3 * H:4 * H]
                else:
                    # per-gate slices (PyTorch order i, f, g, o)
                    i_g = jax.nn.sigmoid(gates[:, 0 * H:1 * H])
                    f_g = jax.nn.sigmoid(gates[:, 1 * H:2 * H])
                    g_g = jnp.tanh(gates[:, 2 * H:3 * H])
                    o_g = jax.nn.sigmoid(gates[:, 3 * H:4 * H])

                c = f_g * c + i_g * g_g
                h = o_g * jnp.tanh(c)
                if write_seq:
                    seq_ref[:, t, :] = h.astype(seq_ref.dtype)
            h_last = h

        # last-timestep hidden of the top layer -> Linear(H, O_pad)
        out_ref[...] = (jnp.dot(h_last.astype(compute_dtype), w_out_ref[...],
                                preferred_element_type=jnp.float32)
                        + b_out_ref[...]).astype(out_ref.dtype)

    return kernel


# ---------------------------------------------------------------------------
# Wrapper: tiling / VMEM budgeting / pallas_call
# ---------------------------------------------------------------------------
def _round_up(x, m):
    return (x + m - 1) // m * m


def _vmem_budget_and_limit():
    """Generation-aware VMEM sizing (v5e/v6e: 128 MiB parts; v7x: 64 MiB/TC)."""
    cap = 64 << 20
    try:
        info = pltpu.get_tpu_info()
        cap = int(getattr(info, "vmem_capacity_bytes", cap)) or cap
    except Exception:
        pass
    if cap >= (100 << 20):              # v5e / v6e: plenty of VMEM
        return 64 << 20, 100 << 20
    return 24 << 20, 48 << 20           # v7x-sized: leave ~16 MiB headroom


def _vmem_estimate(bn, T, F, H, L, Op, cd):
    """Rough per-block VMEM bytes (double-buffered blocked operands)."""
    weights = ((F * 4 * H + max(L - 1, 0) * H * 4 * H + L * H * 4 * H
                + H * Op) * cd + (L * 4 * H + Op) * 4)
    x_blk = 2 * bn * T * F * cd          # double-buffered input block
    out_blk = 2 * bn * Op * 4
    gates = bn * T * 4 * H * 4           # f32 hoisted-gates scratch
    seq = bn * T * H * cd if L > 1 else 0
    state = 4 * bn * H * 4               # live h/c (+ slack)
    return 2 * weights + x_blk + out_blk + gates + seq + state


def _pick_bn_tile(BN, T, F, H, L, Op, cd, budget_bytes):
    """Largest BN tile (multiple of 16, <=256) fitting the VMEM budget."""
    gran = 16                 # bf16 packs 2 rows/sublane -> unmasked loads
    cap = 256                 # enough MXU M; bounds per-step vreg pressure
    bn = min(_round_up(BN, gran), cap)
    while bn > gran and _vmem_estimate(bn, T, F, H, L, Op, cd) > budget_bytes:
        bn -= gran
    return max(bn, gran)


def lstm_pallas_forward(A_hat, X_joint, X_motion, params,
                        compute_dtype=jnp.bfloat16):
    del A_hat, X_motion  # unused by the reference forward pass
    B, N, T, F = X_joint.shape
    w_hh = params["w_hh"]                 # (L, H, 4H)
    L, H = w_hh.shape[0], w_hh.shape[1]
    O = params["w_out"].shape[1]
    O_pad = _round_up(O, 128)             # lane-dense output block
    BN = B * N
    cd = jnp.dtype(compute_dtype).itemsize

    budget, limit_cap = _vmem_budget_and_limit()
    bn_tile = _pick_bn_tile(BN, T, F, H, L, O_pad, cd, budget)
    BN_pad = _round_up(BN, bn_tile)
    grid = (BN_pad // bn_tile,)

    # Batch-major (B*N, T, F): no standalone HBM transpose before the kernel.
    x = X_joint.reshape(BN, T, F)
    if BN_pad != BN:
        x = jnp.pad(x, ((0, BN_pad - BN), (0, 0), (0, 0)))
    x = x.astype(compute_dtype)

    w_ih0 = params["w_ih0"].astype(compute_dtype)                  # (F, 4H)
    w_hh_c = w_hh.astype(compute_dtype)                            # (L, H, 4H)
    w_out = jnp.pad(params["w_out"],
                    ((0, 0), (0, O_pad - O))).astype(compute_dtype)  # (H, Op)
    b = params["b"].astype(jnp.float32)                            # (L, 4H)
    b_out = jnp.pad(params["b_out"],
                    ((0, 0), (0, O_pad - O))).astype(jnp.float32)  # (1, Op)

    args = [x, w_ih0]
    in_specs = [
        pl.BlockSpec((bn_tile, T, F), lambda i: (i, 0, 0)),
        pl.BlockSpec((F, 4 * H), lambda i: (0, 0)),
    ]
    if L > 1:
        args.append(params["w_ih_rest"].astype(compute_dtype))
        in_specs.append(pl.BlockSpec((L - 1, H, 4 * H), lambda i: (0, 0, 0)))
    args += [w_hh_c, b, w_out, b_out]
    in_specs += [
        pl.BlockSpec((L, H, 4 * H), lambda i: (0, 0, 0)),
        pl.BlockSpec((L, 4 * H), lambda i: (0, 0)),
        pl.BlockSpec((H, O_pad), lambda i: (0, 0)),
        pl.BlockSpec((1, O_pad), lambda i: (0, 0)),
    ]

    scratch_shapes = [pltpu.VMEM((bn_tile, T, 4 * H), jnp.float32)]
    if L > 1:
        scratch_shapes.append(pltpu.VMEM((bn_tile, T, H), compute_dtype))

    est = _vmem_estimate(bn_tile, T, F, H, L, O_pad, cd)
    vmem_limit = int(min(max(est + (16 << 20), 32 << 20), limit_cap))

    out = pl.pallas_call(
        _make_lstm_kernel(L, T, H, F, compute_dtype),
        out_shape=jax.ShapeDtypeStruct((BN_pad, O_pad), jnp.float32),
        grid=grid,
        in_specs=in_specs,
        out_specs=pl.BlockSpec((bn_tile, O_pad), lambda i: (i, 0)),
        scratch_shapes=scratch_shapes,
        compiler_params=pltpu.CompilerParams(
            dimension_semantics=("parallel",),     # megacore sharding
            vmem_limit_bytes=vmem_limit),
    )(*args)

    return out[:BN, :O].reshape(B, N, O)


# ---------------------------------------------------------------------------
# Parameter init (nn.LSTM / nn.Linear shapes) and pure-JAX reference
# ---------------------------------------------------------------------------
def init_params(key, num_features, hidden, num_layers, out_dim):
    k = 1.0 / np.sqrt(hidden)
    raw_layers = []
    keys = jax.random.split(key, 4 * num_layers + 2)
    for l in range(num_layers):
        in_dim = num_features if l == 0 else hidden
        w_ih = jax.random.uniform(keys[4 * l + 0], (4 * hidden, in_dim),
                                  jnp.float32, -k, k)
        w_hh = jax.random.uniform(keys[4 * l + 1], (4 * hidden, hidden),
                                  jnp.float32, -k, k)
        b_ih = jax.random.uniform(keys[4 * l + 2], (4 * hidden,),
                                  jnp.float32, -k, k)
        b_hh = jax.random.uniform(keys[4 * l + 3], (4 * hidden,),
                                  jnp.float32, -k, k)
        raw_layers.append((w_ih, w_hh, b_ih, b_hh))
    w_lin = jax.random.uniform(keys[-2], (out_dim, hidden), jnp.float32, -k, k)
    b_lin = jax.random.uniform(keys[-1], (out_dim,), jnp.float32, -k, k)

    params = {
        "w_ih0": raw_layers[0][0].T,                                   # (F, 4H)
        "w_hh": jnp.stack([wl[1].T for wl in raw_layers], axis=0),     # (L, H, 4H)
        "b": jnp.stack([wl[2] + wl[3] for wl in raw_layers], axis=0),  # (L, 4H)
        "w_out": w_lin.T,                                              # (H, O)
        "b_out": b_lin[None, :],                                       # (1, O)
    }
    if num_layers > 1:
        params["w_ih_rest"] = jnp.stack([wl[0].T for wl in raw_layers[1:]],
                                        axis=0)                        # (L-1, H, 4H)
    return params, (raw_layers, (w_lin, b_lin))


def lstm_jax_reference(X_joint, raw):
    """Pure-JAX f32 reference matching PyTorch nn.LSTM + nn.Linear semantics."""
    raw_layers, (w_lin, b_lin) = raw
    B, N, T, F = X_joint.shape
    H = raw_layers[0][1].shape[1]
    x = X_joint.reshape(B * N, T, F).astype(jnp.float32)
    h_seq = x
    for (w_ih, w_hh, b_ih, b_hh) in raw_layers:
        h = jnp.zeros((B * N, H), jnp.float32)
        c = jnp.zeros((B * N, H), jnp.float32)
        outs = []
        for t in range(T):
            gates = h_seq[:, t, :] @ w_ih.T + h @ w_hh.T + b_ih + b_hh
            i_g, f_g, g_g, o_g = jnp.split(gates, 4, axis=-1)
            i_g = jax.nn.sigmoid(i_g)
            f_g = jax.nn.sigmoid(f_g)
            g_g = jnp.tanh(g_g)
            o_g = jax.nn.sigmoid(o_g)
            c = f_g * c + i_g * g_g
            h = o_g * jnp.tanh(c)
            outs.append(h)
        h_seq = jnp.stack(outs, axis=1)
    last = h_seq[:, -1, :]
    out = last @ w_lin.T + b_lin
    return out.reshape(B, N, -1)


# ---------------------------------------------------------------------------
# Main
# ---------------------------------------------------------------------------
if __name__ == "__main__":
    # Small shapes consistent with the module's forward:
    #   X_joint: (batch, num_nodes, num_timesteps, num_features)
    batch, num_nodes, num_timesteps, num_features = 2, 4, 8, 4
    hidden, num_layers, num_timesteps_output = 32, 2, 6

    key = jax.random.PRNGKey(0)
    k_x, k_m, k_p = jax.random.split(key, 3)
    A_hat = jnp.eye(num_nodes, dtype=jnp.float32)
    X_joint = jax.random.normal(
        k_x, (batch, num_nodes, num_timesteps, num_features), jnp.float32)
    X_motion = jax.random.normal(
        k_m, (batch, num_nodes, num_timesteps, num_features), jnp.float32)

    params, raw = init_params(k_p, num_features, hidden, num_layers,
                              num_timesteps_output)

    ref = jax.block_until_ready(lstm_jax_reference(X_joint, raw))

    # f32 compute path: tight numerical check of the restructured kernel.
    out_f32 = jax.block_until_ready(
        lstm_pallas_forward(A_hat, X_joint, X_motion, params,
                            compute_dtype=jnp.float32))
    assert out_f32.shape == (batch, num_nodes, num_timesteps_output)
    np.testing.assert_allclose(np.asarray(out_f32), np.asarray(ref),
                               rtol=1e-4, atol=1e-4)

    # bf16 compute path (default / fast): loose check against f32 reference.
    out_bf16 = jax.block_until_ready(
        lstm_pallas_forward(A_hat, X_joint, X_motion, params,
                            compute_dtype=jnp.bfloat16))
    assert out_bf16.shape == (batch, num_nodes, num_timesteps_output)
    np.testing.assert_allclose(np.asarray(out_bf16), np.asarray(ref),
                               rtol=3e-2, atol=3e-2)

    print("KERNEL_OK")
</pallas_src>

<mosaic_0001>
module attributes {stable_mosaic.version = 11 : i64} {
  func.func @kernel(%arg0: i32, %arg1: memref<16x8x4xf32, #tpu.memory_space<vmem>>, %arg2: memref<4x128xf32, #tpu.memory_space<vmem>>, %arg3: memref<1x32x128xf32, #tpu.memory_space<vmem>>, %arg4: memref<2x32x128xf32, #tpu.memory_space<vmem>>, %arg5: memref<2x128xf32, #tpu.memory_space<vmem>>, %arg6: memref<32x128xf32, #tpu.memory_space<vmem>>, %arg7: memref<1x128xf32, #tpu.memory_space<vmem>>, %arg8: memref<16x128xf32, #tpu.memory_space<vmem>>, %arg9: memref<16x8x128xf32, #tpu.memory_space<vmem>>, %arg10: memref<16x8x32xf32, #tpu.memory_space<vmem>>) attributes {dimension_semantics = [#tpu.dimension_semantics<parallel>], iteration_bounds = array<i64: 1>, scalar_prefetch = 0 : i64, scratch_operands = 2 : i64, tpu.core_type = #tpu.core_type<tc>, window_params = [{transform_indices = @transform_0, window_bounds = array<i64: 16, 8, 4>}, {pipeline_mode = #tpu.pipeline_mode<synchronous>, transform_indices = @transform_1, window_bounds = array<i64: 4, 128>}, {pipeline_mode = #tpu.pipeline_mode<synchronous>, transform_indices = @transform_2, window_bounds = array<i64: 1, 32, 128>}, {pipeline_mode = #tpu.pipeline_mode<synchronous>, transform_indices = @transform_3, window_bounds = array<i64: 2, 32, 128>}, {pipeline_mode = #tpu.pipeline_mode<synchronous>, transform_indices = @transform_4, window_bounds = array<i64: 2, 128>}, {pipeline_mode = #tpu.pipeline_mode<synchronous>, transform_indices = @transform_5, window_bounds = array<i64: 32, 128>}, {pipeline_mode = #tpu.pipeline_mode<synchronous>, transform_indices = @transform_6, window_bounds = array<i64: 1, 128>}, {transform_indices = @transform_7, window_bounds = array<i64: 16, 128>}]} {
    %0 = tpu.iota {dimensions = array<i32: 1>} : vector<16x128xi32>
    %c64_i32 = arith.constant 64 : i32
    %1 = vector.broadcast %c64_i32 : i32 to vector<16x128xi32>
    %2 = arith.cmpi sge, %0, %1 : vector<16x128xi32>
    %c96_i32 = arith.constant 96 : i32
    %3 = vector.broadcast %c96_i32 : i32 to vector<16x128xi32>
    %4 = arith.cmpi slt, %0, %3 : vector<16x128xi32>
    %5 = arith.andi %2, %4 : vector<16x128xi1>
    %c0 = arith.constant 0 : index
    %c0_0 = arith.constant 0 : index
    %6 = vector.load %arg5[%c0, %c0_0] : memref<2x128xf32, #tpu.memory_space<vmem>>, vector<1x128xf32>
    %c0_1 = arith.constant 0 : index
    %c0_2 = arith.constant 0 : index
    %c0_3 = arith.constant 0 : index
    %7 = vector.load %arg1[%c0_1, %c0_2, %c0_3] : memref<16x8x4xf32, #tpu.memory_space<vmem>>, vector<16x8x4xf32>
    %c0_4 = arith.constant 0 : index
    %c0_5 = arith.constant 0 : index
    %8 = vector.load %arg2[%c0_4, %c0_5] : memref<4x128xf32, #tpu.memory_space<vmem>>, vector<4x128xf32>
    %9 = vector.extract_strided_slice %7 {offsets = [0, 0, 0], sizes = [16, 8, 1], strides = [1, 1, 1]} : vector<16x8x4xf32> to vector<16x8x1xf32>
    %10 = vector.extract_strided_slice %8 {offsets = [0, 0], sizes = [1, 128], strides = [1, 1]} : vector<4x128xf32> to vector<1x128xf32>
    %11 = vector.shape_cast %10 : vector<1x128xf32> to vector<1x1x128xf32>
    %12 = vector.broadcast %9 : vector<16x8x1xf32> to vector<16x8x128xf32>
    %13 = vector.broadcast %11 : vector<1x1x128xf32> to vector<16x8x128xf32>
    %14 = arith.mulf %12, %13 : vector<16x8x128xf32>
    %15 = vector.extract_strided_slice %7 {offsets = [0, 0, 1], sizes = [16, 8, 1], strides = [1, 1, 1]} : vector<16x8x4xf32> to vector<16x8x1xf32>
    %16 = vector.extract_strided_slice %8 {offsets = [1, 0], sizes = [1, 128], strides = [1, 1]} : vector<4x128xf32> to vector<1x128xf32>
    %17 = vector.shape_cast %16 : vector<1x128xf32> to vector<1x1x128xf32>
    %18 = vector.broadcast %15 : vector<16x8x1xf32> to vector<16x8x128xf32>
    %19 = vector.broadcast %17 : vector<1x1x128xf32> to vector<16x8x128xf32>
    %20 = arith.mulf %18, %19 : vector<16x8x128xf32>
    %21 = arith.addf %14, %20 : vector<16x8x128xf32>
    %22 = vector.extract_strided_slice %7 {offsets = [0, 0, 2], sizes = [16, 8, 1], strides = [1, 1, 1]} : vector<16x8x4xf32> to vector<16x8x1xf32>
    %23 = vector.extract_strided_slice %8 {offsets = [2, 0], sizes = [1, 128], strides = [1, 1]} : vector<4x128xf32> to vector<1x128xf32>
    %24 = vector.shape_cast %23 : vector<1x128xf32> to vector<1x1x128xf32>
    %25 = vector.broadcast %22 : vector<16x8x1xf32> to vector<16x8x128xf32>
    %26 = vector.broadcast %24 : vector<1x1x128xf32> to vector<16x8x128xf32>
    %27 = arith.mulf %25, %26 : vector<16x8x128xf32>
    %28 = arith.addf %21, %27 : vector<16x8x128xf32>
    %29 = vector.extract_strided_slice %7 {offsets = [0, 0, 3], sizes = [16, 8, 1], strides = [1, 1, 1]} : vector<16x8x4xf32> to vector<16x8x1xf32>
    %30 = vector.extract_strided_slice %8 {offsets = [3, 0], sizes = [1, 128], strides = [1, 1]} : vector<4x128xf32> to vector<1x128xf32>
    %31 = vector.shape_cast %30 : vector<1x128xf32> to vector<1x1x128xf32>
    %32 = vector.broadcast %29 : vector<16x8x1xf32> to vector<16x8x128xf32>
    %33 = vector.broadcast %31 : vector<1x1x128xf32> to vector<16x8x128xf32>
    %34 = arith.mulf %32, %33 : vector<16x8x128xf32>
    %35 = arith.addf %28, %34 : vector<16x8x128xf32>
    %36 = vector.shape_cast %6 : vector<1x128xf32> to vector<1x1x128xf32>
    %37 = vector.broadcast %36 : vector<1x1x128xf32> to vector<16x8x128xf32>
    %38 = arith.addf %35, %37 : vector<16x8x128xf32>
    %c0_6 = arith.constant 0 : index
    %c0_7 = arith.constant 0 : index
    %c0_8 = arith.constant 0 : index
    %39 = vector.load %arg9[%c0_6, %c0_7, %c0_8] : memref<16x8x128xf32, #tpu.memory_space<vmem>>, vector<16x8x128xf32>
    tpu.vector_store %arg9[%c0_6, %c0_7, %c0_8], %38 {strides = array<i32>} : memref<16x8x128xf32, #tpu.memory_space<vmem>>, vector<16x8x128xf32>,
    %c0_9 = arith.constant 0 : index
    %c0_10 = arith.constant 0 : index
    %c0_11 = arith.constant 0 : index
    %40 = vector.load %arg4[%c0_9, %c0_10, %c0_11] : memref<2x32x128xf32, #tpu.memory_space<vmem>>, vector<1x32x128xf32>
    %41 = vector.shape_cast %40 : vector<1x32x128xf32> to vector<32x128xf32>
    %cst = arith.constant 0.000000e+00 : f32
    %42 = vector.broadcast %cst : f32 to vector<16x32xf32>
    %cst_12 = arith.constant 0.000000e+00 : f32
    %43 = vector.broadcast %cst_12 : f32 to vector<16x32xf32>
    %c0_13 = arith.constant 0 : index
    %c0_14 = arith.constant 0 : index
    %c0_15 = arith.constant 0 : index
    %44 = vector.load %arg9[%c0_13, %c0_14, %c0_15] : memref<16x8x128xf32, #tpu.memory_space<vmem>>, vector<16x1x128xf32>
    %45 = vector.shape_cast %44 : vector<16x1x128xf32> to vector<16x128xf32>
    %cst_16 = arith.constant dense<0.000000e+00> : vector<16x128xf32>
    %46 = tpu.matmul %42, %41, %cst_16 {dimension_numbers = #tpu.dot_dimension_numbers<[1], [0], [0], [1], [0, 0, 1, 1], [], []>} : vector<16x32xf32>, vector<32x128xf32>, vector<16x128xf32> -> vector<16x128xf32>
    %47 = arith.addf %45, %46 : vector<16x128xf32>
    %48 = math.tanh %47 : vector<16x128xf32>
    %49 = arith.negf %47 : vector<16x128xf32>
    %50 = math.exp %49 : vector<16x128xf32>
    %cst_17 = arith.constant 1.000000e+00 : f32
    %51 = vector.broadcast %cst_17 : f32 to vector<16x128xf32>
    %52 = arith.addf %51, %50 : vector<16x128xf32>
    %53 = arith.divf %51, %52 : vector<16x128xf32>
    %54 = arith.select %5, %48, %53 : vector<16x128xi1>, vector<16x128xf32>
    %55 = vector.extract_strided_slice %54 {offsets = [0, 0], sizes = [16, 32], strides = [1, 1]} : vector<16x128xf32> to vector<16x32xf32>
    %56 = vector.extract_strided_slice %54 {offsets = [0, 32], sizes = [16, 32], strides = [1, 1]} : vector<16x128xf32> to vector<16x32xf32>
    %57 = vector.extract_strided_slice %54 {offsets = [0, 64], sizes = [16, 32], strides = [1, 1]} : vector<16x128xf32> to vector<16x32xf32>
    %58 = vector.extract_strided_slice %54 {offsets = [0, 96], sizes = [16, 32], strides = [1, 1]} : vector<16x128xf32> to vector<16x32xf32>
    %59 = arith.mulf %56, %43 : vector<16x32xf32>
    %60 = arith.mulf %55, %57 : vector<16x32xf32>
    %61 = arith.addf %59, %60 : vector<16x32xf32>
    %62 = math.tanh %61 : vector<16x32xf32>
    %63 = arith.mulf %58, %62 : vector<16x32xf32>
    %c0_18 = arith.constant 0 : index
    %c0_19 = arith.constant 0 : index
    %c0_20 = arith.constant 0 : index
    %64 = vector.load %arg10[%c0_18, %c0_19, %c0_20] : memref<16x8x32xf32, #tpu.memory_space<vmem>>, vector<16x1x32xf32>
    %65 = vector.shape_cast %64 : vector<16x1x32xf32> to vector<16x32xf32>
    %66 = vector.shape_cast %63 : vector<16x32xf32> to vector<16x1x32xf32>
    tpu.vector_store %arg10[%c0_18, %c0_19, %c0_20], %66 {strides = array<i32>} : memref<16x8x32xf32, #tpu.memory_space<vmem>>, vector<16x1x32xf32>,
    %c0_21 = arith.constant 0 : index
    %c1 = arith.constant 1 : index
    %c0_22 = arith.constant 0 : index
    %67 = vector.load %arg9[%c0_21, %c1, %c0_22] : memref<16x8x128xf32, #tpu.memory_space<vmem>>, vector<16x1x128xf32>
    %68 = vector.shape_cast %67 : vector<16x1x128xf32> to vector<16x128xf32>
    %cst_23 = arith.constant dense<0.000000e+00> : vector<16x128xf32>
    %69 = tpu.matmul %63, %41, %cst_23 {dimension_numbers = #tpu.dot_dimension_numbers<[1], [0], [0], [1], [0, 0, 1, 1], [], []>} : vector<16x32xf32>, vector<32x128xf32>, vector<16x128xf32> -> vector<16x128xf32>
    %70 = arith.addf %68, %69 : vector<16x128xf32>
    %71 = math.tanh %70 : vector<16x128xf32>
    %72 = arith.negf %70 : vector<16x128xf32>
    %73 = math.exp %72 : vector<16x128xf32>
    %cst_24 = arith.constant 1.000000e+00 : f32
    %74 = vector.broadcast %cst_24 : f32 to vector<16x128xf32>
    %75 = arith.addf %74, %73 : vector<16x128xf32>
    %76 = arith.divf %74, %75 : vector<16x128xf32>
    %77 = arith.select %5, %71, %76 : vector<16x128xi1>, vector<16x128xf32>
    %78 = vector.extract_strided_slice %77 {offsets = [0, 0], sizes = [16, 32], strides = [1, 1]} : vector<16x128xf32> to vector<16x32xf32>
    %79 = vector.extract_strided_slice %77 {offsets = [0, 32], sizes = [16, 32], strides = [1, 1]} : vector<16x128xf32> to vector<16x32xf32>
    %80 = vector.extract_strided_slice %77 {offsets = [0, 64], sizes = [16, 32], strides = [1, 1]} : vector<16x128xf32> to vector<16x32xf32>
    %81 = vector.extract_strided_slice %77 {offsets = [0, 96], sizes = [16, 32], strides = [1, 1]} : vector<16x128xf32> to vector<16x32xf32>
    %82 = arith.mulf %79, %61 : vector<16x32xf32>
    %83 = arith.mulf %78, %80 : vector<16x32xf32>
    %84 = arith.addf %82, %83 : vector<16x32xf32>
    %85 = math.tanh %84 : vector<16x32xf32>
    %86 = arith.mulf %81, %85 : vector<16x32xf32>
    %c0_25 = arith.constant 0 : index
    %c1_26 = arith.constant 1 : index
    %c0_27 = arith.constant 0 : index
    %87 = vector.load %arg10[%c0_25, %c1_26, %c0_27] : memref<16x8x32xf32, #tpu.memory_space<vmem>>, vector<16x1x32xf32>
    %88 = vector.shape_cast %87 : vector<16x1x32xf32> to vector<16x32xf32>
    %89 = vector.shape_cast %86 : vector<16x32xf32> to vector<16x1x32xf32>
    tpu.vector_store %arg10[%c0_25, %c1_26, %c0_27], %89 {strides = array<i32>} : memref<16x8x32xf32, #tpu.memory_space<vmem>>, vector<16x1x32xf32>,
    %c0_28 = arith.constant 0 : index
    %c2 = arith.constant 2 : index
    %c0_29 = arith.constant 0 : index
    %90 = vector.load %arg9[%c0_28, %c2, %c0_29] : memref<16x8x128xf32, #tpu.memory_space<vmem>>, vector<16x1x128xf32>
    %91 = vector.shape_cast %90 : vector<16x1x128xf32> to vector<16x128xf32>
    %cst_30 = arith.constant dense<0.000000e+00> : vector<16x128xf32>
    %92 = tpu.matmul %86, %41, %cst_30 {dimension_numbers = #tpu.dot_dimension_numbers<[1], [0], [0], [1], [0, 0, 1, 1], [], []>} : vector<16x32xf32>, vector<32x128xf32>, vector<16x128xf32> -> vector<16x128xf32>
    %93 = arith.addf %91, %92 : vector<16x128xf32>
    %94 = math.tanh %93 : vector<16x128xf32>
    %95 = arith.negf %93 : vector<16x128xf32>
    %96 = math.exp %95 : vector<16x128xf32>
    %cst_31 = arith.constant 1.000000e+00 : f32
    %97 = vector.broadcast %cst_31 : f32 to vector<16x128xf32>
    %98 = arith.addf %97, %96 : vector<16x128xf32>
    %99 = arith.divf %97, %98 : vector<16x128xf32>
    %100 = arith.select %5, %94, %99 : vector<16x128xi1>, vector<16x128xf32>
    %101 = vector.extract_strided_slice %100 {offsets = [0, 0], sizes = [16, 32], strides = [1, 1]} : vector<16x128xf32> to vector<16x32xf32>
    %102 = vector.extract_strided_slice %100 {offsets = [0, 32], sizes = [16, 32], strides = [1, 1]} : vector<16x128xf32> to vector<16x32xf32>
    %103 = vector.extract_strided_slice %100 {offsets = [0, 64], sizes = [16, 32], strides = [1, 1]} : vector<16x128xf32> to vector<16x32xf32>
    %104 = vector.extract_strided_slice %100 {offsets = [0, 96], sizes = [16, 32], strides = [1, 1]} : vector<16x128xf32> to vector<16x32xf32>
    %105 = arith.mulf %102, %84 : vector<16x32xf32>
    %106 = arith.mulf %101, %103 : vector<16x32xf32>
    %107 = arith.addf %105, %106 : vector<16x32xf32>
    %108 = math.tanh %107 : vector<16x32xf32>
    %109 = arith.mulf %104, %108 : vector<16x32xf32>
    %c0_32 = arith.constant 0 : index
    %c2_33 = arith.constant 2 : index
    %c0_34 = arith.constant 0 : index
    %110 = vector.load %arg10[%c0_32, %c2_33, %c0_34] : memref<16x8x32xf32, #tpu.memory_space<vmem>>, vector<16x1x32xf32>
    %111 = vector.shape_cast %110 : vector<16x1x32xf32> to vector<16x32xf32>
    %112 = vector.shape_cast %109 : vector<16x32xf32> to vector<16x1x32xf32>
    tpu.vector_store %arg10[%c0_32, %c2_33, %c0_34], %112 {strides = array<i32>} : memref<16x8x32xf32, #tpu.memory_space<vmem>>, vector<16x1x32xf32>,
    %c0_35 = arith.constant 0 : index
    %c3 = arith.constant 3 : index
    %c0_36 = arith.constant 0 : index
    %113 = vector.load %arg9[%c0_35, %c3, %c0_36] : memref<16x8x128xf32, #tpu.memory_space<vmem>>, vector<16x1x128xf32>
    %114 = vector.shape_cast %113 : vector<16x1x128xf32> to vector<16x128xf32>
    %cst_37 = arith.constant dense<0.000000e+00> : vector<16x128xf32>
    %115 = tpu.matmul %109, %41, %cst_37 {dimension_numbers = #tpu.dot_dimension_numbers<[1], [0], [0], [1], [0, 0, 1, 1], [], []>} : vector<16x32xf32>, vector<32x128xf32>, vector<16x128xf32> -> vector<16x128xf32>
    %116 = arith.addf %114, %115 : vector<16x128xf32>
    %117 = math.tanh %116 : vector<16x128xf32>
    %118 = arith.negf %116 : vector<16x128xf32>
    %119 = math.exp %118 : vector<16x128xf32>
    %cst_38 = arith.constant 1.000000e+00 : f32
    %120 = vector.broadcast %cst_38 : f32 to vector<16x128xf32>
    %121 = arith.addf %120, %119 : vector<16x128xf32>
    %122 = arith.divf %120, %121 : vector<16x128xf32>
    %123 = arith.select %5, %117, %122 : vector<16x128xi1>, vector<16x128xf32>
    %124 = vector.extract_strided_slice %123 {offsets = [0, 0], sizes = [16, 32], strides = [1, 1]} : vector<16x128xf32> to vector<16x32xf32>
    %125 = vector.extract_strided_slice %123 {offsets = [0, 32], sizes = [16, 32], strides = [1, 1]} : vector<16x128xf32> to vector<16x32xf32>
    %126 = vector.extract_strided_slice %123 {offsets = [0, 64], sizes = [16, 32], strides = [1, 1]} : vector<16x128xf32> to vector<16x32xf32>
    %127 = vector.extract_strided_slice %123 {offsets = [0, 96], sizes = [16, 32], strides = [1, 1]} : vector<16x128xf32> to vector<16x32xf32>
    %128 = arith.mulf %125, %107 : vector<16x32xf32>
    %129 = arith.mulf %124, %126 : vector<16x32xf32>
    %130 = arith.addf %128, %129 : vector<16x32xf32>
    %131 = math.tanh %130 : vector<16x32xf32>
    %132 = arith.mulf %127, %131 : vector<16x32xf32>
    %c0_39 = arith.constant 0 : index
    %c3_40 = arith.constant 3 : index
    %c0_41 = arith.constant 0 : index
    %133 = vector.load %arg10[%c0_39, %c3_40, %c0_41] : memref<16x8x32xf32, #tpu.memory_space<vmem>>, vector<16x1x32xf32>
    %134 = vector.shape_cast %133 : vector<16x1x32xf32> to vector<16x32xf32>
    %135 = vector.shape_cast %132 : vector<16x32xf32> to vector<16x1x32xf32>
    tpu.vector_store %arg10[%c0_39, %c3_40, %c0_41], %135 {strides = array<i32>} : memref<16x8x32xf32, #tpu.memory_space<vmem>>, vector<16x1x32xf32>,
    %c0_42 = arith.constant 0 : index
    %c4 = arith.constant 4 : index
    %c0_43 = arith.constant 0 : index
    %136 = vector.load %arg9[%c0_42, %c4, %c0_43] : memref<16x8x128xf32, #tpu.memory_space<vmem>>, vector<16x1x128xf32>
    %137 = vector.shape_cast %136 : vector<16x1x128xf32> to vector<16x128xf32>
    %cst_44 = arith.constant dense<0.000000e+00> : vector<16x128xf32>
    %138 = tpu.matmul %132, %41, %cst_44 {dimension_numbers = #tpu.dot_dimension_numbers<[1], [0], [0], [1], [0, 0, 1, 1], [], []>} : vector<16x32xf32>, vector<32x128xf32>, vector<16x128xf32> -> vector<16x128xf32>
    %139 = arith.addf %137, %138 : vector<16x128xf32>
    %140 = math.tanh %139 : vector<16x128xf32>
    %141 = arith.negf %139 : vector<16x128xf32>
    %142 = math.exp %141 : vector<16x128xf32>
    %cst_45 = arith.constant 1.000000e+00 : f32
    %143 = vector.broadcast %cst_45 : f32 to vector<16x128xf32>
    %144 = arith.addf %143, %142 : vector<16x128xf32>
    %145 = arith.divf %143, %144 : vector<16x128xf32>
    %146 = arith.select %5, %140, %145 : vector<16x128xi1>, vector<16x128xf32>
    %147 = vector.extract_strided_slice %146 {offsets = [0, 0], sizes = [16, 32], strides = [1, 1]} : vector<16x128xf32> to vector<16x32xf32>
    %148 = vector.extract_strided_slice %146 {offsets = [0, 32], sizes = [16, 32], strides = [1, 1]} : vector<16x128xf32> to vector<16x32xf32>
    %149 = vector.extract_strided_slice %146 {offsets = [0, 64], sizes = [16, 32], strides = [1, 1]} : vector<16x128xf32> to vector<16x32xf32>
    %150 = vector.extract_strided_slice %146 {offsets = [0, 96], sizes = [16, 32], strides = [1, 1]} : vector<16x128xf32> to vector<16x32xf32>
    %151 = arith.mulf %148, %130 : vector<16x32xf32>
    %152 = arith.mulf %147, %149 : vector<16x32xf32>
    %153 = arith.addf %151, %152 : vector<16x32xf32>
    %154 = math.tanh %153 : vector<16x32xf32>
    %155 = arith.mulf %150, %154 : vector<16x32xf32>
    %c0_46 = arith.constant 0 : index
    %c4_47 = arith.constant 4 : index
    %c0_48 = arith.constant 0 : index
    %156 = vector.load %arg10[%c0_46, %c4_47, %c0_48] : memref<16x8x32xf32, #tpu.memory_space<vmem>>, vector<16x1x32xf32>
    %157 = vector.shape_cast %156 : vector<16x1x32xf32> to vector<16x32xf32>
    %158 = vector.shape_cast %155 : vector<16x32xf32> to vector<16x1x32xf32>
    tpu.vector_store %arg10[%c0_46, %c4_47, %c0_48], %158 {strides = array<i32>} : memref<16x8x32xf32, #tpu.memory_space<vmem>>, vector<16x1x32xf32>,
    %c0_49 = arith.constant 0 : index
    %c5 = arith.constant 5 : index
    %c0_50 = arith.constant 0 : index
    %159 = vector.load %arg9[%c0_49, %c5, %c0_50] : memref<16x8x128xf32, #tpu.memory_space<vmem>>, vector<16x1x128xf32>
    %160 = vector.shape_cast %159 : vector<16x1x128xf32> to vector<16x128xf32>
    %cst_51 = arith.constant dense<0.000000e+00> : vector<16x128xf32>
    %161 = tpu.matmul %155, %41, %cst_51 {dimension_numbers = #tpu.dot_dimension_numbers<[1], [0], [0], [1], [0, 0, 1, 1], [], []>} : vector<16x32xf32>, vector<32x128xf32>, vector<16x128xf32> -> vector<16x128xf32>
    %162 = arith.addf %160, %161 : vector<16x128xf32>
    %163 = math.tanh %162 : vector<16x128xf32>
    %164 = arith.negf %162 : vector<16x128xf32>
    %165 = math.exp %164 : vector<16x128xf32>
    %cst_52 = arith.constant 1.000000e+00 : f32
    %166 = vector.broadcast %cst_52 : f32 to vector<16x128xf32>
    %167 = arith.addf %166, %165 : vector<16x128xf32>
    %168 = arith.divf %166, %167 : vector<16x128xf32>
    %169 = arith.select %5, %163, %168 : vector<16x128xi1>, vector<16x128xf32>
    %170 = vector.extract_strided_slice %169 {offsets = [0, 0], sizes = [16, 32], strides = [1, 1]} : vector<16x128xf32> to vector<16x32xf32>
    %171 = vector.extract_strided_slice %169 {offsets = [0, 32], sizes = [16, 32], strides = [1, 1]} : vector<16x128xf32> to vector<16x32xf32>
    %172 = vector.extract_strided_slice %169 {offsets = [0, 64], sizes = [16, 32], strides = [1, 1]} : vector<16x128xf32> to vector<16x32xf32>
    %173 = vector.extract_strided_slice %169 {offsets = [0, 96], sizes = [16, 32], strides = [1, 1]} : vector<16x128xf32> to vector<16x32xf32>
    %174 = arith.mulf %171, %153 : vector<16x32xf32>
    %175 = arith.mulf %170, %172 : vector<16x32xf32>
    %176 = arith.addf %174, %175 : vector<16x32xf32>
    %177 = math.tanh %176 : vector<16x32xf32>
    %178 = arith.mulf %173, %177 : vector<16x32xf32>
    %c0_53 = arith.constant 0 : index
    %c5_54 = arith.constant 5 : index
    %c0_55 = arith.constant 0 : index
    %179 = vector.load %arg10[%c0_53, %c5_54, %c0_55] : memref<16x8x32xf32, #tpu.memory_space<vmem>>, vector<16x1x32xf32>
    %180 = vector.shape_cast %179 : vector<16x1x32xf32> to vector<16x32xf32>
    %181 = vector.shape_cast %178 : vector<16x32xf32> to vector<16x1x32xf32>
    tpu.vector_store %arg10[%c0_53, %c5_54, %c0_55], %181 {strides = array<i32>} : memref<16x8x32xf32, #tpu.memory_space<vmem>>, vector<16x1x32xf32>,
    %c0_56 = arith.constant 0 : index
    %c6 = arith.constant 6 : index
    %c0_57 = arith.constant 0 : index
    %182 = vector.load %arg9[%c0_56, %c6, %c0_57] : memref<16x8x128xf32, #tpu.memory_space<vmem>>, vector<16x1x128xf32>
    %183 = vector.shape_cast %182 : vector<16x1x128xf32> to vector<16x128xf32>
    %cst_58 = arith.constant dense<0.000000e+00> : vector<16x128xf32>
    %184 = tpu.matmul %178, %41, %cst_58 {dimension_numbers = #tpu.dot_dimension_numbers<[1], [0], [0], [1], [0, 0, 1, 1], [], []>} : vector<16x32xf32>, vector<32x128xf32>, vector<16x128xf32> -> vector<16x128xf32>
    %185 = arith.addf %183, %184 : vector<16x128xf32>
    %186 = math.tanh %185 : vector<16x128xf32>
    %187 = arith.negf %185 : vector<16x128xf32>
    %188 = math.exp %187 : vector<16x128xf32>
    %cst_59 = arith.constant 1.000000e+00 : f32
    %189 = vector.broadcast %cst_59 : f32 to vector<16x128xf32>
    %190 = arith.addf %189, %188 : vector<16x128xf32>
    %191 = arith.divf %189, %190 : vector<16x128xf32>
    %192 = arith.select %5, %186, %191 : vector<16x128xi1>, vector<16x128xf32>
    %193 = vector.extract_strided_slice %192 {offsets = [0, 0], sizes = [16, 32], strides = [1, 1]} : vector<16x128xf32> to vector<16x32xf32>
    %194 = vector.extract_strided_slice %192 {offsets = [0, 32], sizes = [16, 32], strides = [1, 1]} : vector<16x128xf32> to vector<16x32xf32>
    %195 = vector.extract_strided_slice %192 {offsets = [0, 64], sizes = [16, 32], strides = [1, 1]} : vector<16x128xf32> to vector<16x32xf32>
    %196 = vector.extract_strided_slice %192 {offsets = [0, 96], sizes = [16, 32], strides = [1, 1]} : vector<16x128xf32> to vector<16x32xf32>
    %197 = arith.mulf %194, %176 : vector<16x32xf32>
    %198 = arith.mulf %193, %195 : vector<16x32xf32>
    %199 = arith.addf %197, %198 : vector<16x32xf32>
    %200 = math.tanh %199 : vector<16x32xf32>
    %201 = arith.mulf %196, %200 : vector<16x32xf32>
    %c0_60 = arith.constant 0 : index
    %c6_61 = arith.constant 6 : index
    %c0_62 = arith.constant 0 : index
    %202 = vector.load %arg10[%c0_60, %c6_61, %c0_62] : memref<16x8x32xf32, #tpu.memory_space<vmem>>, vector<16x1x32xf32>
    %203 = vector.shape_cast %202 : vector<16x1x32xf32> to vector<16x32xf32>
    %204 = vector.shape_cast %201 : vector<16x32xf32> to vector<16x1x32xf32>
    tpu.vector_store %arg10[%c0_60, %c6_61, %c0_62], %204 {strides = array<i32>} : memref<16x8x32xf32, #tpu.memory_space<vmem>>, vector<16x1x32xf32>,
    %c0_63 = arith.constant 0 : index
    %c7 = arith.constant 7 : index
    %c0_64 = arith.constant 0 : index
    %205 = vector.load %arg9[%c0_63, %c7, %c0_64] : memref<16x8x128xf32, #tpu.memory_space<vmem>>, vector<16x1x128xf32>
    %206 = vector.shape_cast %205 : vector<16x1x128xf32> to vector<16x128xf32>
    %cst_65 = arith.constant dense<0.000000e+00> : vector<16x128xf32>
    %207 = tpu.matmul %201, %41, %cst_65 {dimension_numbers = #tpu.dot_dimension_numbers<[1], [0], [0], [1], [0, 0, 1, 1], [], []>} : vector<16x32xf32>, vector<32x128xf32>, vector<16x128xf32> -> vector<16x128xf32>
    %208 = arith.addf %206, %207 : vector<16x128xf32>
    %209 = math.tanh %208 : vector<16x128xf32>
    %210 = arith.negf %208 : vector<16x128xf32>
    %211 = math.exp %210 : vector<16x128xf32>
    %cst_66 = arith.constant 1.000000e+00 : f32
    %212 = vector.broadcast %cst_66 : f32 to vector<16x128xf32>
    %213 = arith.addf %212, %211 : vector<16x128xf32>
    %214 = arith.divf %212, %213 : vector<16x128xf32>
    %215 = arith.select %5, %209, %214 : vector<16x128xi1>, vector<16x128xf32>
    %216 = vector.extract_strided_slice %215 {offsets = [0, 0], sizes = [16, 32], strides = [1, 1]} : vector<16x128xf32> to vector<16x32xf32>
    %217 = vector.extract_strided_slice %215 {offsets = [0, 32], sizes = [16, 32], strides = [1, 1]} : vector<16x128xf32> to vector<16x32xf32>
    %218 = vector.extract_strided_slice %215 {offsets = [0, 64], sizes = [16, 32], strides = [1, 1]} : vector<16x128xf32> to vector<16x32xf32>
    %219 = vector.extract_strided_slice %215 {offsets = [0, 96], sizes = [16, 32], strides = [1, 1]} : vector<16x128xf32> to vector<16x32xf32>
    %220 = arith.mulf %217, %199 : vector<16x32xf32>
    %221 = arith.mulf %216, %218 : vector<16x32xf32>
    %222 = arith.addf %220, %221 : vector<16x32xf32>
    %223 = math.tanh %222 : vector<16x32xf32>
    %224 = arith.mulf %219, %223 : vector<16x32xf32>
    %c0_67 = arith.constant 0 : index
    %c7_68 = arith.constant 7 : index
    %c0_69 = arith.constant 0 : index
    %225 = vector.load %arg10[%c0_67, %c7_68, %c0_69] : memref<16x8x32xf32, #tpu.memory_space<vmem>>, vector<16x1x32xf32>
    %226 = vector.shape_cast %225 : vector<16x1x32xf32> to vector<16x32xf32>
    %227 = vector.shape_cast %224 : vector<16x32xf32> to vector<16x1x32xf32>
    tpu.vector_store %arg10[%c0_67, %c7_68, %c0_69], %227 {strides = array<i32>} : memref<16x8x32xf32, #tpu.memory_space<vmem>>, vector<16x1x32xf32>,
    %c1_70 = arith.constant 1 : index
    %c0_71 = arith.constant 0 : index
    %228 = vector.load %arg5[%c1_70, %c0_71] : memref<2x128xf32, #tpu.memory_space<vmem>>, vector<1x128xf32>
    %c0_72 = arith.constant 0 : index
    %c0_73 = arith.constant 0 : index
    %c0_74 = arith.constant 0 : index
    %229 = vector.load %arg10[%c0_72, %c0_73, %c0_74] : memref<16x8x32xf32, #tpu.memory_space<vmem>>, vector<16x8x32xf32>
    %c0_75 = arith.constant 0 : index
    %c0_76 = arith.constant 0 : index
    %c0_77 = arith.constant 0 : index
    %230 = vector.load %arg3[%c0_75, %c0_76, %c0_77] : memref<1x32x128xf32, #tpu.memory_space<vmem>>, vector<1x32x128xf32>
    %231 = vector.shape_cast %230 : vector<1x32x128xf32> to vector<32x128xf32>
    %232 = vector.shape_cast %229 : vector<16x8x32xf32> to vector<128x32xf32>
    %cst_78 = arith.constant dense<0.000000e+00> : vector<128x128xf32>
    %233 = tpu.matmul %232, %231, %cst_78 {dimension_numbers = #tpu.dot_dimension_numbers<[1], [0], [0], [1], [0, 0, 1, 1], [], []>} : vector<128x32xf32>, vector<32x128xf32>, vector<128x128xf32> -> vector<128x128xf32>
    %234 = vector.broadcast %228 : vector<1x128xf32> to vector<128x128xf32>
    %235 = arith.addf %233, %234 : vector<128x128xf32>
    %236 = vector.shape_cast %235 : vector<128x128xf32> to vector<16x8x128xf32>
    %c0_79 = arith.constant 0 : index
    %c0_80 = arith.constant 0 : index
    %c0_81 = arith.constant 0 : index
    %237 = vector.load %arg9[%c0_79, %c0_80, %c0_81] : memref<16x8x128xf32, #tpu.memory_space<vmem>>, vector<16x8x128xf32>
    tpu.vector_store %arg9[%c0_79, %c0_80, %c0_81], %236 {strides = array<i32>} : memref<16x8x128xf32, #tpu.memory_space<vmem>>, vector<16x8x128xf32>,
    %c1_82 = arith.constant 1 : index
    %c0_83 = arith.constant 0 : index
    %c0_84 = arith.constant 0 : index
    %238 = vector.load %arg4[%c1_82, %c0_83, %c0_84] : memref<2x32x128xf32, #tpu.memory_space<vmem>>, vector<1x32x128xf32>
    %239 = vector.shape_cast %238 : vector<1x32x128xf32> to vector<32x128xf32>
    %cst_85 = arith.constant 0.000000e+00 : f32
    %240 = vector.broadcast %cst_85 : f32 to vector<16x32xf32>
    %cst_86 = arith.constant 0.000000e+00 : f32
    %241 = vector.broadcast %cst_86 : f32 to vector<16x32xf32>
    %c0_87 = arith.constant 0 : index
    %c0_88 = arith.constant 0 : index
    %c0_89 = arith.constant 0 : index
    %242 = vector.load %arg9[%c0_87, %c0_88, %c0_89] : memref<16x8x128xf32, #tpu.memory_space<vmem>>, vector<16x1x128xf32>
    %243 = vector.shape_cast %242 : vector<16x1x128xf32> to vector<16x128xf32>
    %cst_90 = arith.constant dense<0.000000e+00> : vector<16x128xf32>
    %244 = tpu.matmul %240, %239, %cst_90 {dimension_numbers = #tpu.dot_dimension_numbers<[1], [0], [0], [1], [0, 0, 1, 1], [], []>} : vector<16x32xf32>, vector<32x128xf32>, vector<16x128xf32> -> vector<16x128xf32>
    %245 = arith.addf %243, %244 : vector<16x128xf32>
    %246 = math.tanh %245 : vector<16x128xf32>
    %247 = arith.negf %245 : vector<16x128xf32>
    %248 = math.exp %247 : vector<16x128xf32>
    %cst_91 = arith.constant 1.000000e+00 : f32
    %249 = vector.broadcast %cst_91 : f32 to vector<16x128xf32>
    %250 = arith.addf %249, %248 : vector<16x128xf32>
    %251 = arith.divf %249, %250 : vector<16x128xf32>
    %252 = arith.select %5, %246, %251 : vector<16x128xi1>, vector<16x128xf32>
    %253 = vector.extract_strided_slice %252 {offsets = [0, 0], sizes = [16, 32], strides = [1, 1]} : vector<16x128xf32> to vector<16x32xf32>
    %254 = vector.extract_strided_slice %252 {offsets = [0, 32], sizes = [16, 32], strides = [1, 1]} : vector<16x128xf32> to vector<16x32xf32>
    %255 = vector.extract_strided_slice %252 {offsets = [0, 64], sizes = [16, 32], strides = [1, 1]} : vector<16x128xf32> to vector<16x32xf32>
    %256 = vector.extract_strided_slice %252 {offsets = [0, 96], sizes = [16, 32], strides = [1, 1]} : vector<16x128xf32> to vector<16x32xf32>
    %257 = arith.mulf %254, %241 : vector<16x32xf32>
    %258 = arith.mulf %253, %255 : vector<16x32xf32>
    %259 = arith.addf %257, %258 : vector<16x32xf32>
    %260 = math.tanh %259 : vector<16x32xf32>
    %261 = arith.mulf %256, %260 : vector<16x32xf32>
    %c0_92 = arith.constant 0 : index
    %c1_93 = arith.constant 1 : index
    %c0_94 = arith.constant 0 : index
    %262 = vector.load %arg9[%c0_92, %c1_93, %c0_94] : memref<16x8x128xf32, #tpu.memory_space<vmem>>, vector<16x1x128xf32>
    %263 = vector.shape_cast %262 : vector<16x1x128xf32> to vector<16x128xf32>
    %cst_95 = arith.constant dense<0.000000e+00> : vector<16x128xf32>
    %264 = tpu.matmul %261, %239, %cst_95 {dimension_numbers = #tpu.dot_dimension_numbers<[1], [0], [0], [1], [0, 0, 1, 1], [], []>} : vector<16x32xf32>, vector<32x128xf32>, vector<16x128xf32> -> vector<16x128xf32>
    %265 = arith.addf %263, %264 : vector<16x128xf32>
    %266 = math.tanh %265 : vector<16x128xf32>
    %267 = arith.negf %265 : vector<16x128xf32>
    %268 = math.exp %267 : vector<16x128xf32>
    %cst_96 = arith.constant 1.000000e+00 : f32
    %269 = vector.broadcast %cst_96 : f32 to vector<16x128xf32>
    %270 = arith.addf %269, %268 : vector<16x128xf32>
    %271 = arith.divf %269, %270 : vector<16x128xf32>
    %272 = arith.select %5, %266, %271 : vector<16x128xi1>, vector<16x128xf32>
    %273 = vector.extract_strided_slice %272 {offsets = [0, 0], sizes = [16, 32], strides = [1, 1]} : vector<16x128xf32> to vector<16x32xf32>
    %274 = vector.extract_strided_slice %272 {offsets = [0, 32], sizes = [16, 32], strides = [1, 1]} : vector<16x128xf32> to vector<16x32xf32>
    %275 = vector.extract_strided_slice %272 {offsets = [0, 64], sizes = [16, 32], strides = [1, 1]} : vector<16x128xf32> to vector<16x32xf32>
    %276 = vector.extract_strided_slice %272 {offsets = [0, 96], sizes = [16, 32], strides = [1, 1]} : vector<16x128xf32> to vector<16x32xf32>
    %277 = arith.mulf %274, %259 : vector<16x32xf32>
    %278 = arith.mulf %273, %275 : vector<16x32xf32>
    %279 = arith.addf %277, %278 : vector<16x32xf32>
    %280 = math.tanh %279 : vector<16x32xf32>
    %281 = arith.mulf %276, %280 : vector<16x32xf32>
    %c0_97 = arith.constant 0 : index
    %c2_98 = arith.constant 2 : index
    %c0_99 = arith.constant 0 : index
    %282 = vector.load %arg9[%c0_97, %c2_98, %c0_99] : memref<16x8x128xf32, #tpu.memory_space<vmem>>, vector<16x1x128xf32>
    %283 = vector.shape_cast %282 : vector<16x1x128xf32> to vector<16x128xf32>
    %cst_100 = arith.constant dense<0.000000e+00> : vector<16x128xf32>
    %284 = tpu.matmul %281, %239, %cst_100 {dimension_numbers = #tpu.dot_dimension_numbers<[1], [0], [0], [1], [0, 0, 1, 1], [], []>} : vector<16x32xf32>, vector<32x128xf32>, vector<16x128xf32> -> vector<16x128xf32>
    %285 = arith.addf %283, %284 : vector<16x128xf32>
    %286 = math.tanh %285 : vector<16x128xf32>
    %287 = arith.negf %285 : vector<16x128xf32>
    %288 = math.exp %287 : vector<16x128xf32>
    %cst_101 = arith.constant 1.000000e+00 : f32
    %289 = vector.broadcast %cst_101 : f32 to vector<16x128xf32>
    %290 = arith.addf %289, %288 : vector<16x128xf32>
    %291 = arith.divf %289, %290 : vector<16x128xf32>
    %292 = arith.select %5, %286, %291 : vector<16x128xi1>, vector<16x128xf32>
    %293 = vector.extract_strided_slice %292 {offsets = [0, 0], sizes = [16, 32], strides = [1, 1]} : vector<16x128xf32> to vector<16x32xf32>
    %294 = vector.extract_strided_slice %292 {offsets = [0, 32], sizes = [16, 32], strides = [1, 1]} : vector<16x128xf32> to vector<16x32xf32>
    %295 = vector.extract_strided_slice %292 {offsets = [0, 64], sizes = [16, 32], strides = [1, 1]} : vector<16x128xf32> to vector<16x32xf32>
    %296 = vector.extract_strided_slice %292 {offsets = [0, 96], sizes = [16, 32], strides = [1, 1]} : vector<16x128xf32> to vector<16x32xf32>
    %297 = arith.mulf %294, %279 : vector<16x32xf32>
    %298 = arith.mulf %293, %295 : vector<16x32xf32>
    %299 = arith.addf %297, %298 : vector<16x32xf32>
    %300 = math.tanh %299 : vector<16x32xf32>
    %301 = arith.mulf %296, %300 : vector<16x32xf32>
    %c0_102 = arith.constant 0 : index
    %c3_103 = arith.constant 3 : index
    %c0_104 = arith.constant 0 : index
    %302 = vector.load %arg9[%c0_102, %c3_103, %c0_104] : memref<16x8x128xf32, #tpu.memory_space<vmem>>, vector<16x1x128xf32>
    %303 = vector.shape_cast %302 : vector<16x1x128xf32> to vector<16x128xf32>
    %cst_105 = arith.constant dense<0.000000e+00> : vector<16x128xf32>
    %304 = tpu.matmul %301, %239, %cst_105 {dimension_numbers = #tpu.dot_dimension_numbers<[1], [0], [0], [1], [0, 0, 1, 1], [], []>} : vector<16x32xf32>, vector<32x128xf32>, vector<16x128xf32> -> vector<16x128xf32>
    %305 = arith.addf %303, %304 : vector<16x128xf32>
    %306 = math.tanh %305 : vector<16x128xf32>
    %307 = arith.negf %305 : vector<16x128xf32>
    %308 = math.exp %307 : vector<16x128xf32>
    %cst_106 = arith.constant 1.000000e+00 : f32
    %309 = vector.broadcast %cst_106 : f32 to vector<16x128xf32>
    %310 = arith.addf %309, %308 : vector<16x128xf32>
    %311 = arith.divf %309, %310 : vector<16x128xf32>
    %312 = arith.select %5, %306, %311 : vector<16x128xi1>, vector<16x128xf32>
    %313 = vector.extract_strided_slice %312 {offsets = [0, 0], sizes = [16, 32], strides = [1, 1]} : vector<16x128xf32> to vector<16x32xf32>
    %314 = vector.extract_strided_slice %312 {offsets = [0, 32], sizes = [16, 32], strides = [1, 1]} : vector<16x128xf32> to vector<16x32xf32>
    %315 = vector.extract_strided_slice %312 {offsets = [0, 64], sizes = [16, 32], strides = [1, 1]} : vector<16x128xf32> to vector<16x32xf32>
    %316 = vector.extract_strided_slice %312 {offsets = [0, 96], sizes = [16, 32], strides = [1, 1]} : vector<16x128xf32> to vector<16x32xf32>
    %317 = arith.mulf %314, %299 : vector<16x32xf32>
    %318 = arith.mulf %313, %315 : vector<16x32xf32>
    %319 = arith.addf %317, %318 : vector<16x32xf32>
    %320 = math.tanh %319 : vector<16x32xf32>
    %321 = arith.mulf %316, %320 : vector<16x32xf32>
    %c0_107 = arith.constant 0 : index
    %c4_108 = arith.constant 4 : index
    %c0_109 = arith.constant 0 : index
    %322 = vector.load %arg9[%c0_107, %c4_108, %c0_109] : memref<16x8x128xf32, #tpu.memory_space<vmem>>, vector<16x1x128xf32>
    %323 = vector.shape_cast %322 : vector<16x1x128xf32> to vector<16x128xf32>
    %cst_110 = arith.constant dense<0.000000e+00> : vector<16x128xf32>
    %324 = tpu.matmul %321, %239, %cst_110 {dimension_numbers = #tpu.dot_dimension_numbers<[1], [0], [0], [1], [0, 0, 1, 1], [], []>} : vector<16x32xf32>, vector<32x128xf32>, vector<16x128xf32> -> vector<16x128xf32>
    %325 = arith.addf %323, %324 : vector<16x128xf32>
    %326 = math.tanh %325 : vector<16x128xf32>
    %327 = arith.negf %325 : vector<16x128xf32>
    %328 = math.exp %327 : vector<16x128xf32>
    %cst_111 = arith.constant 1.000000e+00 : f32
    %329 = vector.broadcast %cst_111 : f32 to vector<16x128xf32>
    %330 = arith.addf %329, %328 : vector<16x128xf32>
    %331 = arith.divf %329, %330 : vector<16x128xf32>
    %332 = arith.select %5, %326, %331 : vector<16x128xi1>, vector<16x128xf32>
    %333 = vector.extract_strided_slice %332 {offsets = [0, 0], sizes = [16, 32], strides = [1, 1]} : vector<16x128xf32> to vector<16x32xf32>
    %334 = vector.extract_strided_slice %332 {offsets = [0, 32], sizes = [16, 32], strides = [1, 1]} : vector<16x128xf32> to vector<16x32xf32>
    %335 = vector.extract_strided_slice %332 {offsets = [0, 64], sizes = [16, 32], strides = [1, 1]} : vector<16x128xf32> to vector<16x32xf32>
    %336 = vector.extract_strided_slice %332 {offsets = [0, 96], sizes = [16, 32], strides = [1, 1]} : vector<16x128xf32> to vector<16x32xf32>
    %337 = arith.mulf %334, %319 : vector<16x32xf32>
    %338 = arith.mulf %333, %335 : vector<16x32xf32>
    %339 = arith.addf %337, %338 : vector<16x32xf32>
    %340 = math.tanh %339 : vector<16x32xf32>
    %341 = arith.mulf %336, %340 : vector<16x32xf32>
    %c0_112 = arith.constant 0 : index
    %c5_113 = arith.constant 5 : index
    %c0_114 = arith.constant 0 : index
    %342 = vector.load %arg9[%c0_112, %c5_113, %c0_114] : memref<16x8x128xf32, #tpu.memory_space<vmem>>, vector<16x1x128xf32>
    %343 = vector.shape_cast %342 : vector<16x1x128xf32> to vector<16x128xf32>
    %cst_115 = arith.constant dense<0.000000e+00> : vector<16x128xf32>
    %344 = tpu.matmul %341, %239, %cst_115 {dimension_numbers = #tpu.dot_dimension_numbers<[1], [0], [0], [1], [0, 0, 1, 1], [], []>} : vector<16x32xf32>, vector<32x128xf32>, vector<16x128xf32> -> vector<16x128xf32>
    %345 = arith.addf %343, %344 : vector<16x128xf32>
    %346 = math.tanh %345 : vector<16x128xf32>
    %347 = arith.negf %345 : vector<16x128xf32>
    %348 = math.exp %347 : vector<16x128xf32>
    %cst_116 = arith.constant 1.000000e+00 : f32
    %349 = vector.broadcast %cst_116 : f32 to vector<16x128xf32>
    %350 = arith.addf %349, %348 : vector<16x128xf32>
    %351 = arith.divf %349, %350 : vector<16x128xf32>
    %352 = arith.select %5, %346, %351 : vector<16x128xi1>, vector<16x128xf32>
    %353 = vector.extract_strided_slice %352 {offsets = [0, 0], sizes = [16, 32], strides = [1, 1]} : vector<16x128xf32> to vector<16x32xf32>
    %354 = vector.extract_strided_slice %352 {offsets = [0, 32], sizes = [16, 32], strides = [1, 1]} : vector<16x128xf32> to vector<16x32xf32>
    %355 = vector.extract_strided_slice %352 {offsets = [0, 64], sizes = [16, 32], strides = [1, 1]} : vector<16x128xf32> to vector<16x32xf32>
    %356 = vector.extract_strided_slice %352 {offsets = [0, 96], sizes = [16, 32], strides = [1, 1]} : vector<16x128xf32> to vector<16x32xf32>
    %357 = arith.mulf %354, %339 : vector<16x32xf32>
    %358 = arith.mulf %353, %355 : vector<16x32xf32>
    %359 = arith.addf %357, %358 : vector<16x32xf32>
    %360 = math.tanh %359 : vector<16x32xf32>
    %361 = arith.mulf %356, %360 : vector<16x32xf32>
    %c0_117 = arith.constant 0 : index
    %c6_118 = arith.constant 6 : index
    %c0_119 = arith.constant 0 : index
    %362 = vector.load %arg9[%c0_117, %c6_118, %c0_119] : memref<16x8x128xf32, #tpu.memory_space<vmem>>, vector<16x1x128xf32>
    %363 = vector.shape_cast %362 : vector<16x1x128xf32> to vector<16x128xf32>
    %cst_120 = arith.constant dense<0.000000e+00> : vector<16x128xf32>
    %364 = tpu.matmul %361, %239, %cst_120 {dimension_numbers = #tpu.dot_dimension_numbers<[1], [0], [0], [1], [0, 0, 1, 1], [], []>} : vector<16x32xf32>, vector<32x128xf32>, vector<16x128xf32> -> vector<16x128xf32>
    %365 = arith.addf %363, %364 : vector<16x128xf32>
    %366 = math.tanh %365 : vector<16x128xf32>
    %367 = arith.negf %365 : vector<16x128xf32>
    %368 = math.exp %367 : vector<16x128xf32>
    %cst_121 = arith.constant 1.000000e+00 : f32
    %369 = vector.broadcast %cst_121 : f32 to vector<16x128xf32>
    %370 = arith.addf %369, %368 : vector<16x128xf32>
    %371 = arith.divf %369, %370 : vector<16x128xf32>
    %372 = arith.select %5, %366, %371 : vector<16x128xi1>, vector<16x128xf32>
    %373 = vector.extract_strided_slice %372 {offsets = [0, 0], sizes = [16, 32], strides = [1, 1]} : vector<16x128xf32> to vector<16x32xf32>
    %374 = vector.extract_strided_slice %372 {offsets = [0, 32], sizes = [16, 32], strides = [1, 1]} : vector<16x128xf32> to vector<16x32xf32>
    %375 = vector.extract_strided_slice %372 {offsets = [0, 64], sizes = [16, 32], strides = [1, 1]} : vector<16x128xf32> to vector<16x32xf32>
    %376 = vector.extract_strided_slice %372 {offsets = [0, 96], sizes = [16, 32], strides = [1, 1]} : vector<16x128xf32> to vector<16x32xf32>
    %377 = arith.mulf %374, %359 : vector<16x32xf32>
    %378 = arith.mulf %373, %375 : vector<16x32xf32>
    %379 = arith.addf %377, %378 : vector<16x32xf32>
    %380 = math.tanh %379 : vector<16x32xf32>
    %381 = arith.mulf %376, %380 : vector<16x32xf32>
    %c0_122 = arith.constant 0 : index
    %c7_123 = arith.constant 7 : index
    %c0_124 = arith.constant 0 : index
    %382 = vector.load %arg9[%c0_122, %c7_123, %c0_124] : memref<16x8x128xf32, #tpu.memory_space<vmem>>, vector<16x1x128xf32>
    %383 = vector.shape_cast %382 : vector<16x1x128xf32> to vector<16x128xf32>
    %cst_125 = arith.constant dense<0.000000e+00> : vector<16x128xf32>
    %384 = tpu.matmul %381, %239, %cst_125 {dimension_numbers = #tpu.dot_dimension_numbers<[1], [0], [0], [1], [0, 0, 1, 1], [], []>} : vector<16x32xf32>, vector<32x128xf32>, vector<16x128xf32> -> vector<16x128xf32>
    %385 = arith.addf %383, %384 : vector<16x128xf32>
    %386 = math.tanh %385 : vector<16x128xf32>
    %387 = arith.negf %385 : vector<16x128xf32>
    %388 = math.exp %387 : vector<16x128xf32>
    %cst_126 = arith.constant 1.000000e+00 : f32
    %389 = vector.broadcast %cst_126 : f32 to vector<16x128xf32>
    %390 = arith.addf %389, %388 : vector<16x128xf32>
    %391 = arith.divf %389, %390 : vector<16x128xf32>
    %392 = arith.select %5, %386, %391 : vector<16x128xi1>, vector<16x128xf32>
    %393 = vector.extract_strided_slice %392 {offsets = [0, 0], sizes = [16, 32], strides = [1, 1]} : vector<16x128xf32> to vector<16x32xf32>
    %394 = vector.extract_strided_slice %392 {offsets = [0, 32], sizes = [16, 32], strides = [1, 1]} : vector<16x128xf32> to vector<16x32xf32>
    %395 = vector.extract_strided_slice %392 {offsets = [0, 64], sizes = [16, 32], strides = [1, 1]} : vector<16x128xf32> to vector<16x32xf32>
    %396 = vector.extract_strided_slice %392 {offsets = [0, 96], sizes = [16, 32], strides = [1, 1]} : vector<16x128xf32> to vector<16x32xf32>
    %397 = arith.mulf %394, %379 : vector<16x32xf32>
    %398 = arith.mulf %393, %395 : vector<16x32xf32>
    %399 = arith.addf %397, %398 : vector<16x32xf32>
    %400 = math.tanh %399 : vector<16x32xf32>
    %401 = arith.mulf %396, %400 : vector<16x32xf32>
    %c0_127 = arith.constant 0 : index
    %c0_128 = arith.constant 0 : index
    %402 = vector.load %arg6[%c0_127, %c0_128] : memref<32x128xf32, #tpu.memory_space<vmem>>, vector<32x128xf32>
    %cst_129 = arith.constant dense<0.000000e+00> : vector<16x128xf32>
    %403 = tpu.matmul %401, %402, %cst_129 {dimension_numbers = #tpu.dot_dimension_numbers<[1], [0], [0], [1], [0, 0, 1, 1], [], []>} : vector<16x32xf32>, vector<32x128xf32>, vector<16x128xf32> -> vector<16x128xf32>
    %c0_130 = arith.constant 0 : index
    %c0_131 = arith.constant 0 : index
    %404 = vector.load %arg7[%c0_130, %c0_131] : memref<1x128xf32, #tpu.memory_space<vmem>>, vector<1x128xf32>
    %405 = vector.broadcast %404 : vector<1x128xf32> to vector<16x128xf32>
    %406 = arith.addf %403, %405 : vector<16x128xf32>
    %c0_132 = arith.constant 0 : index
    %c0_133 = arith.constant 0 : index
    %407 = vector.load %arg8[%c0_132, %c0_133] : memref<16x128xf32, #tpu.memory_space<vmem>>, vector<16x128xf32>
    tpu.vector_store %arg8[%c0_132, %c0_133], %406 {strides = array<i32>} : memref<16x128xf32, #tpu.memory_space<vmem>>, vector<16x128xf32>,
    return
  }
  func.func @transform_0(%arg0: i32) -> (i32, i32, i32) {
    %c0_i32 = arith.constant 0 : i32
    %c0_i32_0 = arith.constant 0 : i32
    %c0_i32_1 = arith.constant 0 : i32
    return %arg0, %c0_i32, %c0_i32_0 : i32, i32, i32
  }
  func.func @transform_1(%arg0: i32) -> (i32, i32) {
    %c0_i32 = arith.constant 0 : i32
    %c0_i32_0 = arith.constant 0 : i32
    %c0_i32_1 = arith.constant 0 : i32
    return %c0_i32, %c0_i32_0 : i32, i32
  }
  func.func @transform_2(%arg0: i32) -> (i32, i32, i32) {
    %c0_i32 = arith.constant 0 : i32
    %c0_i32_0 = arith.constant 0 : i32
    %c0_i32_1 = arith.constant 0 : i32
    %c0_i32_2 = arith.constant 0 : i32
    return %c0_i32, %c0_i32_0, %c0_i32_1 : i32, i32, i32
  }
  func.func @transform_3(%arg0: i32) -> (i32, i32, i32) {
    %c0_i32 = arith.constant 0 : i32
    %c0_i32_0 = arith.constant 0 : i32
    %c0_i32_1 = arith.constant 0 : i32
    %c0_i32_2 = arith.constant 0 : i32
    return %c0_i32, %c0_i32_0, %c0_i32_1 : i32, i32, i32
  }
  func.func @transform_4(%arg0: i32) -> (i32, i32) {
    %c0_i32 = arith.constant 0 : i32
    %c0_i32_0 = arith.constant 0 : i32
    %c0_i32_1 = arith.constant 0 : i32
    return %c0_i32, %c0_i32_0 : i32, i32
  }
  func.func @transform_5(%arg0: i32) -> (i32, i32) {
    %c0_i32 = arith.constant 0 : i32
    %c0_i32_0 = arith.constant 0 : i32
    %c0_i32_1 = arith.constant 0 : i32
    return %c0_i32, %c0_i32_0 : i32, i32
  }
  func.func @transform_6(%arg0: i32) -> (i32, i32) {
    %c0_i32 = arith.constant 0 : i32
    %c0_i32_0 = arith.constant 0 : i32
    %c0_i32_1 = arith.constant 0 : i32
    return %c0_i32, %c0_i32_0 : i32, i32
  }
  func.func @transform_7(%arg0: i32) -> (i32, i32) {
    %c0_i32 = arith.constant 0 : i32
    %c0_i32_0 = arith.constant 0 : i32
    return %arg0, %c0_i32 : i32, i32
  }
}

</mosaic_0001>

<bundles_post_ra>
// kernel: tpu_custom_call.1
= control target key start
LH: loop header
LB: loop body
LE: loop exit
PB: predicated region body
PF: predicated region fallthrough
CT: control target
= control target key end

     0   :  { %v11327_v3 = vmov 0   ;;  %v14277_v11 = vmov 0.0   ;;  %s14269_s0 = inlined_call_operand.vmem [shape: f32[16,8,4], index: 0, kind: input, shape index: {}]   ;;  %s14270_s1 = inlined_call_operand.vmem [shape: f32[4,128], index: 1, kind: input, shape index: {}]   ;;  %s14271_s2 = inlined_call_operand.vmem [shape: f32[1,32,128], index: 2, kind: input, shape index: {}]   ;;  %s14272_s3 = inlined_call_operand.vmem [shape: f32[2,32,128], index: 3, kind: input, shape index: {}]   ;;  %s14273_s4 = inlined_call_operand.vmem [shape: f32[2,128], index: 4, kind: input, shape index: {}]   ;;  %s14274_s5 = inlined_call_operand.vmem [shape: f32[32,128], index: 5, kind: input, shape index: {}]   ;;  %s14275_s6 = inlined_call_operand.vmem [shape: f32[1,128], index: 6, kind: input, shape index: {}]   ;;  %s14276_s7 = inlined_call_operand.hbm [shape: f32[16,128], index: 7, kind: output, shape index: {}]  }
   0x1   :  { %v11381_v0 = vld [vmem:[%s14269_s0 + $0x10] sm:$0xff]  ;;  %v11386_v1 = vld [vmem:[%s14269_s0 + $0x8] sm:$0xff]  ;;  %v486_v2 = vld [vmem:[%s14272_s3] sm:$0xff]  ;;  %9675 = vset.pattern.permute.xlu1 %v11327_v3  ;;  %9674 = vset.pattern.permute.xlu0 %v11327_v3 }
   0x2   :  { %v487_v4 = vld [vmem:[%s14272_s3 + $0x8] sm:$0xff]  ;;  %62 = vperm.xlu1 %9675, %v11381_v0   ;;  %57 = vperm.xlu0 %9674, %v11386_v1   ;;  %v488_v6 = vld [vmem:[%s14272_s3 + $0x10] sm:$0xff]  ;;  %v489_v7 = vld [vmem:[%s14272_s3 + $0x18] sm:$0xff] }
   0x3   :  { %v11398_v5 = vpack.c.bf16 %v487_v4, %v486_v2  ;;  %v11409_v8 = vld [vmem:[%s14269_s0 + $0x48] sm:$0xff]  ;;  %v11414_v9 = vld [vmem:[%s14269_s0 + $0x18] sm:$0xff]  ;;  %v11416_v10 = vpack.c.bf16 %v489_v7, %v488_v6  ;;  %9308 = vmatprep.mubr.f32.mxu0 %v14277_v11  ;;  %v11429_v12 = vld [vmem:[%s14269_s0 + $0x20] sm:$0xff] }
   0x5   :  { %9520 = vmatprep.subr.bf16.mxu0 %v11398_v5  ;;  %9528 = vmatprep.subr.bf16.mxu1 %v11398_v5 }
   0x6   :  { %9522 = vmatpush3.bf16.msra.mxu0 %v11398_v5  ;;  %9530 = vmatpush3.bf16.msra.mxu1 %v11398_v5 }
   0x7   :  { %97 = vperm.xlu1 %9675, %v11409_v8   ;;  %67 = vperm.xlu0 %9674, %v11414_v9  }
   0x8   :  { %9524 = vmatprep.subr.bf16.mxu0 %v11416_v10  ;;  %9532 = vmatprep.subr.bf16.mxu1 %v11416_v10 }
   0x9   :  { %12 = vsyncpa [#allocation5], 0  ;;  %v11329_v13 = vmov 1   ;;  %v11440_v14 = vld [vmem:[%s14269_s0 + $0x60] sm:$0xff]  ;;  %v43_v16 = vld [vmem:[%s14269_s0 + $0x50] sm:$0xff]  ;;  %v11330_v18 = vmov 2   ;;  %v27_v50 = vlaneseq }
   0xa   :  { %9526 = vmatpush3.bf16.msra.mxu0 %v11416_v10  ;;  %9534 = vmatpush3.bf16.msra.mxu1 %v11416_v10  ;;  %v11448_v15 = vld [vmem:[%s14269_s0] sm:$0xff]  ;;  %v11470_v17 = vld [vmem:[%s14269_s0 + $0x30] sm:$0xff]  ;;  %v11478_v19 = vld [vmem:[%s14269_s0 + $0x38] sm:$0xff]  ;;  %v11331_v25 = vmov 3   ;;  %vm762_vm0 = vcmask 1041409   ;;  %vm765_vm1 = vcmask 1042434  }
   0xb   :  { %9676 = vset.pattern.permute.xlu1 %v11329_v13  ;;  %72 = vperm.xlu0 %9674, %v11429_v12   ;;  %v41_v20 = vld [vmem:[%s14269_s0 + $0x40] sm:$0xff]  ;;  %v11488_v21 = vld [vmem:[%s14269_s0 + $0x58] sm:$0xff]  ;;  %v11502_v22 = vld [vmem:[%s14269_s0 + $0x28] sm:$0xff]  ;;  %v11588_v53 = vshrl.u32 %v27_v50, 7  ;;  %vm768_vm2 = vcmask 1043459   ;;  %vm771_vm5 = vcmask 1044484  }
   0xc   :  { %159 = vperm.xlu1 %9676, %v11381_v0   ;;  %9536 = vmatprep.subr.bf16.mxu0 %v11398_v5  ;;  %v11509_v23 = vld [vmem:[%s14269_s0 + $0x70] sm:$0xff]  ;;  %v48_v24 = vld [vmem:[%s14269_s0 + $0x78] sm:$0xff]  ;;  %v46_v26 = vld [vmem:[%s14269_s0 + $0x68] sm:$0xff]  ;;  %vm774_vm6 = vcmask 1045509   ;;  %vm777_vm7 = vcmask 1046534   ;;  %vm780_vm8 = vcmask 1047559  }
   0xd   :  { %9309 = vmatmul.mubr.f32.vlgmr.msra.gmra.mrb[0].mxu0 %v14277_v11  ;;  %9544 = vmatprep.subr.bf16.mxu1 %v11398_v5  ;;  %v11594_v56 = vsub.s32 0, %v11588_v53  ;;  %v216_v57 = vsub.s32 1, %v11588_v53  ;;  %v49_v59 = vld [vmem:[%s14270_s1] sm:$0xf]  ;;  %v316_v60 = vsub.s32 2, %v11588_v53  ;;  %v416_v4 = vsub.s32 3, %v11588_v53 }
   0xe   :  { %9538 = vmatpush3.bf16.msra.mxu0 %v11398_v5  ;;  %s11332_s20 = smov 64   ;;  %s11333_s21 = smov 32   ;;  %vm506_vm10 = vcmask 261120   ;;  %vm1092_vm11 = vcmask 253952  }
   0xf   :  { %112 = vperm.xlu0 %9674, %v11440_v14   ;;  %9540 = vmatprep.subr.bf16.mxu0 %v11416_v10  ;;  %v11606_v62 = vrot.slane %v49_v59, %v11594_v56  ;;  %v11608_v63 = vrot.slane %v49_v59, %v216_v57  ;;  %s11335_s23 = smov [#allocation4]  }
  0x10   :  { %9677 = vset.pattern.permute.xlu1 %v11327_v3 }
  0x11   :  { %52 = vperm.xlu1 %9677, %v11448_v15  }
  0x12   :  { %9542 = vmatpush3.bf16.msra.mxu0 %v11416_v10 }
  0x13   :  { %9684 = vset.pattern.permute.xlu0 %v11329_v13  ;;  %9552 = vmatprep.subr.bf16.mxu0 %v11398_v5 }
  0x14   :  { %155 = vperm.xlu0 %9684, %v11386_v1  }
  0x15   :  { %102 = vperm.xlu1 %9677, %v43_v16  }
  0x18   :  { %187 = vperm.xlu0 %9684, %v11409_v8  }
  0x19   :  { %9678 = vset.pattern.permute.xlu1 %v11329_v13 }
  0x1a   :  { %151 = vperm.xlu1 %9678, %v11448_v15  }
  0x1c   :  { %163 = vperm.xlu0 %9684, %v11414_v9  }
  0x1e   :  { %191 = vperm.xlu1 %9678, %v43_v16  }
  0x20   :  { %167 = vperm.xlu0 %9684, %v11429_v12  }
  0x22   :  { %9679 = vset.pattern.permute.xlu1 %v11330_v18 }
  0x23   :  { %255 = vperm.xlu1 %9679, %v11386_v1  }
  0x24   :  { %175 = vperm.xlu0 %9684, %v11470_v17  }
  0x27   :  { %9680 = vset.pattern.permute.xlu1 %v11327_v3 }
  0x28   :  { %179 = vperm.xlu0 %9684, %v11478_v19   ;;  %92 = vperm.xlu1 %9680, %v41_v20  }
  0x2c   :  { %9692 = vset.pattern.permute.xlu0 %v11330_v18  ;;  %107 = vperm.xlu1 %9680, %v11488_v21  }
  0x2d   :  { %259 = vperm.xlu0 %9692, %v11381_v0  }
  0x30   :  { %9681 = vset.pattern.permute.xlu1 %v11329_v13 }
  0x31   :  { %251 = vperm.xlu0 %9692, %v11448_v15   ;;  %183 = vperm.xlu1 %9681, %v41_v20  }
  0x35   :  { %283 = vperm.xlu0 %9692, %v41_v20   ;;  %195 = vperm.xlu1 %9681, %v11488_v21  }
  0x39   :  { %299 = vperm.xlu0 %9692, %v11440_v14   ;;  %9682 = vset.pattern.permute.xlu1 %v11330_v18 }
  0x3a   :  { %287 = vperm.xlu1 %9682, %v11409_v8  }
  0x3d   :  { %275 = vperm.xlu0 %9692, %v11470_v17  }
  0x3e   :  { %9683 = vset.pattern.permute.xlu1 %v11327_v3 }
  0x3f   :  { %77 = vperm.xlu1 %9683, %v11502_v22  }
  0x41   :  { %307 = vperm.xlu0 %9692, %v11509_v23  }
  0x43   :  { %9685 = vset.pattern.permute.xlu1 %v11329_v13 }
  0x44   :  { %171 = vperm.xlu1 %9685, %v11502_v22  }
  0x45   :  { %311 = vperm.xlu0 %9692, %v48_v24  }
  0x48   :  { %199 = vperm.xlu1 %9685, %v11440_v14  }
  0x49   :  { %9702 = vset.pattern.permute.xlu0 %v11331_v25 }
  0x4a   :  { %355 = vperm.xlu0 %9702, %v11386_v1  }
  0x4c   :  { %9686 = vset.pattern.permute.xlu1 %v11330_v18 }
  0x4d   :  { %263 = vperm.xlu1 %9686, %v11414_v9  }
  0x4e   :  { %387 = vperm.xlu0 %9702, %v11409_v8  }
  0x51   :  { %291 = vperm.xlu1 %9686, %v43_v16  }
  0x52   :  { %391 = vperm.xlu0 %9702, %v43_v16  }
  0x55   :  { %9687 = vset.pattern.permute.xlu1 %v11327_v3 }
  0x56   :  { %383 = vperm.xlu0 %9702, %v41_v20   ;;  %82 = vperm.xlu1 %9687, %v11470_v17   ;;  %v11634_v20 = vld [vmem:[%s14273_s4] ss:$0 sm:$0xff] }
  0x5a   :  { %117 = vperm.xlu1 %9687, %v46_v26   ;;  %403 = vperm.xlu0 %9702, %v46_v26  }
  0x5e   :  { %9688 = vset.pattern.permute.xlu1 %v11329_v13  ;;  %411 = vperm.xlu0 %9702, %v48_v24  }
  0x5f   :  { %203 = vperm.xlu1 %9688, %v46_v26  }
  0x63   :  { %9689 = vset.pattern.permute.xlu1 %v11330_v18 }
  0x64   :  { %267 = vperm.xlu1 %9689, %v11429_v12  }
  0x68   :  { %295 = vperm.xlu1 %9689, %v11488_v21  }
  0x6c   :  { %9690 = vset.pattern.permute.xlu1 %v11331_v25 }
  0x6d   :  { %359 = vperm.xlu1 %9690, %v11381_v0  }
  0x71   :  { %9691 = vset.pattern.permute.xlu1 %v11327_v3 }
  0x72   :  { %87 = vperm.xlu1 %9691, %v11478_v19  }
  0x76   :  { %122 = vperm.xlu1 %9691, %v11509_v23  }
  0x7a   :  { %9693 = vset.pattern.permute.xlu1 %v11329_v13 }
  0x7b   :  { %207 = vperm.xlu1 %9693, %v11509_v23  }
  0x7f   :  { %9694 = vset.pattern.permute.xlu1 %v11330_v18 }
  0x80   :  { %271 = vperm.xlu1 %9694, %v11502_v22  }
  0x81   :  { %v11540_v27 = vpop.permute.xlu1 %62  ;;  %v58_v28 = vpop.permute.xlu0 %57 }
  0x82   :  { %v135_v1 = vmul.f32 %v11606_v62, %v58_v28 }
  0x84   :  { %9695 = vset.pattern.permute.xlu1 %v11331_v25 }
  0x85   :  { %351 = vperm.xlu1 %9695, %v11448_v15  }
  0x86   :  { %v11543_v29 = vpop.permute.xlu1 %97  ;;  %v11545_v30 = vpop.permute.xlu0 %67 }
  0x87   :  { %v143_v16 = vmul.f32 %v11606_v62, %v11543_v29 }
  0x89   :  { %363 = vperm.xlu1 %9695, %v11414_v9  }
  0x8a   :  { %v11548_v31 = vpop.permute.xlu0 %72 }
  0x8b   :  { %v11550_v32 = vpop.permute.xlu1 %159 }
  0x8d   :  { %9696 = vset.pattern.permute.xlu1 %v11327_v3  ;;  %v11614_v3 = vrot.slane %v49_v59, %v316_v60 }
  0x8e   :  { %127 = vperm.xlu1 %9696, %v48_v24   ;;  %v11553_v33 = vpop.permute.xlu0 %112 }
  0x90   :  { %v11555_v34 = vpop.permute.xlu1 %52 }
  0x92   :  { %9697 = vset.pattern.permute.xlu1 %v11329_v13 }
  0x93   :  { %v156_v35 = vpop.permute.xlu0 %155  ;;  %211 = vperm.xlu1 %9697, %v48_v24  }
  0x94   :  { %v11558_v36 = vpop.permute.xlu1 %102  ;;  %v219_v2 = vmul.f32 %v11608_v63, %v156_v35 }
  0x95   :  { %v144_v35 = vmul.f32 %v11606_v62, %v11558_v36 }
  0x96   :  { %v235_v8 = vadd.f32 %v219_v2, %v135_v1 }
  0x97   :  { %v188_v37 = vpop.permute.xlu0 %187  ;;  %9698 = vset.pattern.permute.xlu1 %v11330_v18 }
  0x98   :  { %303 = vperm.xlu1 %9698, %v46_v26  }
  0x99   :  { %v11561_v38 = vpop.permute.xlu1 %151 }
  0x9b   :  { %v11563_v39 = vpop.permute.xlu0 %163 }
  0x9c   :  { %9699 = vset.pattern.permute.xlu1 %v11331_v25 }
  0x9d   :  { %367 = vperm.xlu1 %9699, %v11429_v12   ;;  %v192_v40 = vpop.permute.xlu1 %191  ;;  %v11622_v12 = vrot.slane %v49_v59, %v416_v4 }
  0x9e   :  { %v228_v24 = vmul.f32 %v11608_v63, %v192_v40 }
  0x9f   :  { %v11566_v41 = vpop.permute.xlu0 %167 }
  0xa0   :  { %v244_v57 = vadd.f32 %v228_v24, %v144_v35 }
  0xa1   :  { %395 = vperm.xlu1 %9699, %v11488_v21  }
  0xa2   :  { %v256_v42 = vpop.permute.xlu1 %255 }
  0xa3   :  { %v11569_v43 = vpop.permute.xlu0 %175  ;;  %v319_v9 = vmul.f32 %v11614_v3, %v256_v42 }
  0xa5   :  { %9700 = vset.pattern.permute.xlu1 %v11330_v18 }
  0xa6   :  { %279 = vperm.xlu1 %9700, %v11478_v19  }
  0xa7   :  { %v93_v44 = vpop.permute.xlu1 %92  ;;  %v11573_v45 = vpop.permute.xlu0 %179 }
  0xa8   :  { %v142_v40 = vmul.f32 %v11606_v62, %v93_v44 }
  0xaa   :  { %9701 = vset.pattern.permute.xlu1 %v11331_v25 }
  0xab   :  { %371 = vperm.xlu1 %9701, %v11502_v22   ;;  %v11576_v46 = vpop.permute.xlu1 %107 }
  0xac   :  { %v11578_v47 = vpop.permute.xlu0 %259 }
  0xaf   :  { %399 = vperm.xlu1 %9701, %v11440_v14   ;;  %v227_v14 = vmul.f32 %v11608_v63, %v188_v37 }
  0xb0   :  { %v11581_v48 = vpop.permute.xlu0 %251  ;;  %v184_v49 = vpop.permute.xlu1 %183 }
  0xb1   :  { %v243_v21 = vadd.f32 %v227_v14, %v143_v16  ;;  %v226_v37 = vmul.f32 %v11608_v63, %v184_v49 }
  0xb3   :  { %375 = vperm.xlu1 %9701, %v11470_v17   ;;  %v335_v17 = vadd.f32 %v319_v9, %v235_v8  ;;  %v242_v9 = vadd.f32 %v226_v37, %v142_v40 }
  0xb4   :  { %v284_v51 = vpop.permute.xlu0 %283  ;;  %v11584_v52 = vpop.permute.xlu1 %195 }
  0xb5   :  { %v326_v1 = vmul.f32 %v11614_v3, %v284_v51 }
  0xb7   :  { %379 = vperm.xlu1 %9701, %v11478_v19  }
  0xb8   :  { %v11590_v54 = vpop.permute.xlu0 %299 }
  0xb9   :  { %v288_v55 = vpop.permute.xlu1 %287 }
  0xba   :  { %v327_v18 = vmul.f32 %v11614_v3, %v288_v55 }
  0xbb   :  { %407 = vperm.xlu1 %9701, %v11509_v23  }
  0xbc   :  { %v11597_v58 = vpop.permute.xlu0 %275  ;;  %v343_v26 = vadd.f32 %v327_v18, %v243_v21 }
  0xbe   :  { %v11603_v61 = vpop.permute.xlu1 %77 }
  0xc0   :  { %v11610_v0 = vpop.permute.xlu0 %307 }
  0xc3   :  { %v11617_v6 = vpop.permute.xlu1 %171 }
  0xc4   :  { %v11619_v7 = vpop.permute.xlu0 %311 }
  0xc7   :  { %v11624_v13 = vpop.permute.xlu1 %199 }
  0xc9   :  { %v356_v15 = vpop.permute.xlu0 %355 }
  0xca   :  { %v419_v19 = vmul.f32 %v11622_v12, %v356_v15  ;;  %v342_v15 = vadd.f32 %v326_v1, %v242_v9 }
  0xcc   :  { %v435_v22 = vadd.f32 %v419_v19, %v335_v17  ;;  %v264_v23 = vpop.permute.xlu1 %263 }
  0xcd   :  { %v388_v25 = vpop.permute.xlu0 %387 }
  0xce   :  { %v455_v28 = vadd.f32 %v11634_v20, %v435_v22  ;;  %v427_v29 = vmul.f32 %v11622_v12, %v388_v25  ;;  %v220_v25 = vmul.f32 %v11608_v63, %v11550_v32 }
  0xd0   :  { %471 = vst [vmem:[#allocation2 + $0x8] sm:$0xff] %v455_v28  ;;  %v443_v42 = vadd.f32 %v427_v29, %v343_v26  ;;  %v292_v55 = vpop.permute.xlu1 %291  ;;  %v136_v28 = vmul.f32 %v11606_v62, %v11540_v27  ;;  %v320_v29 = vmul.f32 %v11614_v3, %v11578_v47  ;;  %v218_v27 = vmul.f32 %v11608_v63, %v11561_v38 }
  0xd1   :  { %v328_v59 = vmul.f32 %v11614_v3, %v292_v55  ;;  %v392_v60 = vpop.permute.xlu0 %391  ;;  %v137_v47 = vmul.f32 %v11606_v62, %v11545_v30  ;;  %v321_v38 = vmul.f32 %v11614_v3, %v264_v23 }
  0xd2   :  { %v463_v2 = vadd.f32 %v11634_v20, %v443_v42  ;;  %v428_v4 = vmul.f32 %v11622_v12, %v392_v60  ;;  %v236_v35 = vadd.f32 %v220_v25, %v136_v28 }
  0xd3   :  { %v344_v8 = vadd.f32 %v328_v59, %v244_v57 }
  0xd4   :  { %479 = vst [vmem:[#allocation2 + $0x48] sm:$0xff] %v463_v2  ;;  %v336_v42 = vadd.f32 %v320_v29, %v236_v35  ;;  %v134_v2 = vmul.f32 %v11606_v62, %v11555_v34 }
  0xd5   :  { %v444_v36 = vadd.f32 %v428_v4, %v344_v8  ;;  %v384_v49 = vpop.permute.xlu0 %383  ;;  %v11647_v14 = vpop.permute.xlu1 %82  ;;  %v221_v4 = vmul.f32 %v11608_v63, %v11563_v39  ;;  %v318_v8 = vmul.f32 %v11614_v3, %v11581_v48 }
  0xd6   :  { %v426_v16 = vmul.f32 %v11622_v12, %v384_v49  ;;  %v234_v9 = vadd.f32 %v218_v27, %v134_v2 }
  0xd7   :  { %v464_v17 = vadd.f32 %v11634_v20, %v444_v36  ;;  %v237_v49 = vadd.f32 %v221_v4, %v137_v47 }
  0xd8   :  { %v442_v18 = vadd.f32 %v426_v16, %v342_v15  ;;  %v334_v15 = vadd.f32 %v318_v8, %v234_v9 }
  0xd9   :  { %480 = vst [vmem:[#allocation2 + $0x50] sm:$0xff] %v464_v17  ;;  %v118_v44 = vpop.permute.xlu1 %117  ;;  %v337_v30 = vadd.f32 %v321_v38, %v237_v49  ;;  %v404_v25 = vpop.permute.xlu0 %403 }
  0xda   :  { %v462_v51 = vadd.f32 %v11634_v20, %v442_v18  ;;  %v147_v2 = vmul.f32 %v11606_v62, %v118_v44 }
  0xdc   :  { %478 = vst [vmem:[#allocation2 + $0x40] sm:$0xff] %v462_v51 }
  0xdd   :  { %v412_v35 = vpop.permute.xlu0 %411 }
  0xde   :  { %v204_v19 = vpop.permute.xlu1 %203  ;;  %v433_v47 = vmul.f32 %v11622_v12, %v412_v35 }
  0xe0   :  { %v11652_v21 = vpop.f32.mrb[0].mxu0  ;;  %v500_v44 = vld [vmem:[#allocation2 + $0x50] sm:$0x1] }
  0xe1   :  { %v11654_v22 = vpop.f32.mrb[1].mxu0  ;;  %v594_v49 = vrot.slane %v11652_v21, 1 }
  0xe3   :  { %v268_v24 = vpop.permute.xlu1 %267 }
  0xe7   :  { %v11658_v26 = vpop.permute.xlu1 %295 }
  0xec   :  { %v360_v37 = vpop.permute.xlu1 %359 }
  0xed   :  { %v420_v55 = vmul.f32 %v11622_v12, %v360_v37 }
  0xef   :  { %v436_v57 = vadd.f32 %v420_v55, %v336_v42  ;;  %v138_v42 = vmul.f32 %v11606_v62, %v11548_v31  ;;  %v231_v55 = vmul.f32 %v11608_v63, %v204_v19  ;;  %v431_v31 = vmul.f32 %v11622_v12, %v404_v25 }
  0xf1   :  { %v456_v59 = vadd.f32 %v11634_v20, %v436_v57  ;;  %v11666_v60 = vpop.permute.xlu1 %87  ;;  %v222_v57 = vmul.f32 %v11608_v63, %v11566_v41  ;;  %v247_v9 = vadd.f32 %v231_v55, %v147_v2  ;;  %v595_v41 = vrot.slane %v11652_v21, 2 }
  0xf3   :  { %472 = vst [vmem:[#allocation2 + $0x10] sm:$0xff] %v456_v59  ;;  %v333_v59 = vmul.f32 %v11614_v3, %v11619_v7  ;;  %v322_v7 = vmul.f32 %v11614_v3, %v268_v24 }
  0xf5   :  { %v11668_v32 = vpop.permute.xlu1 %122 }
  0xfa   :  { %v11670_v40 = vpop.permute.xlu1 %207  ;;  %v492_v2 = vld [vmem:[#allocation2 + $0x10] sm:$0x1] }
  0xff   :  { %v11674_v1 = vpop.permute.xlu1 %271 }
 0x104   :  { %v352_v36 = vpop.permute.xlu1 %351 }
 0x105   :  { %v418_v16 = vmul.f32 %v11622_v12, %v352_v36  ;;  %v498_v36 = vld [vmem:[#allocation2 + $0x40] sm:$0x1] }
 0x107   :  { %v434_v17 = vadd.f32 %v418_v16, %v334_v15  ;;  %v238_v15 = vadd.f32 %v222_v57, %v138_v42  ;;  %v229_v16 = vmul.f32 %v11608_v63, %v11584_v52  ;;  %v329_v52 = vmul.f32 %v11614_v3, %v11658_v26 }
 0x108   :  { %v364_v18 = vpop.permute.xlu1 %363 }
 0x109   :  { %v454_v51 = vadd.f32 %v11634_v20, %v434_v17  ;;  %v421_v34 = vmul.f32 %v11622_v12, %v364_v18  ;;  %v499_v18 = vld [vmem:[#allocation2 + $0x48] sm:$0x1] }
 0x10a   :  { %v626_v25 = vadd.f32 %v594_v49, %v499_v18 }
 0x10b   :  { %470 = vst [vmem:[#allocation2] sm:$0xff] %v454_v51  ;;  %v437_v39 = vadd.f32 %v421_v34, %v337_v30  ;;  %v11708_v30 = vadd.f32 %v11652_v21, %v498_v36  ;;  %v587_v51 = vrot.slane %v11654_v22, 1 }
 0x10d   :  { %v457_v48 = vadd.f32 %v11634_v20, %v437_v39  ;;  %v128_v28 = vpop.permute.xlu1 %127  ;;  %v145_v39 = vmul.f32 %v11606_v62, %v11576_v46  ;;  %v8878_v55 = vmul.f32 -1.442695, %v11708_v30  ;;  %v588_v46 = vrot.slane %v11654_v22, 2 }
 0x10e   :  { %v149_v23 = vmul.f32 %v11606_v62, %v128_v28  ;;  %v11714_v28 = vadd.f32 %v595_v41, %v500_v44  ;;  %v589_v41 = vrot.slane %v11654_v22, 3  ;;  %v139_v44 = vmul.f32 %v11606_v62, %v11603_v61 }
 0x10f   :  { %473 = vst [vmem:[#allocation2 + $0x18] sm:$0xff] %v457_v48  ;;  %9703 = vpow2.f32 %v8878_v55  ;;  %v330_v61 = vmul.f32 %v11614_v3, %v11590_v54  ;;  %v324_v54 = vmul.f32 %v11614_v3, %v11597_v58 }
 0x110   :  { %v8880_v26 = vmul.f32 -1.442695, %v11714_v28 }
 0x112   :  { %v212_v29 = vpop.permute.xlu1 %211 }
 0x113   :  { %v233_v37 = vmul.f32 %v11608_v63, %v212_v29  ;;  %v338_v29 = vadd.f32 %v322_v7, %v238_v15  ;;  %v223_v15 = vmul.f32 %v11608_v63, %v11617_v6  ;;  %v323_v6 = vmul.f32 %v11614_v3, %v11674_v1 }
 0x115   :  { %v249_v27 = vadd.f32 %v233_v37, %v149_v23  ;;  %v245_v23 = vadd.f32 %v229_v16, %v145_v39  ;;  %v491_v37 = vld [vmem:[#allocation2 + $0x8] sm:$0x1]  ;;  %v146_v16 = vmul.f32 %v11606_v62, %v11553_v33  ;;  %v239_v39 = vadd.f32 %v223_v15, %v139_v44 }
 0x116   :  { %v11722_v57 = vadd.f32 %v587_v51, %v491_v37  ;;  %v493_v18 = vld [vmem:[#allocation2 + $0x18] sm:$0x1]  ;;  %v224_v33 = vmul.f32 %v11608_v63, %v11569_v43  ;;  %v590_v37 = vrot.slane %v11654_v22, 4  ;;  %v232_v15 = vmul.f32 %v11608_v63, %v11670_v40 }
 0x117   :  { %v349_v4 = vadd.f32 %v333_v59, %v249_v27  ;;  %v304_v8 = vpop.permute.xlu1 %303  ;;  %v8879_v27 = vmul.f32 -1.442695, %v626_v25 }
 0x118   :  { %v331_v19 = vmul.f32 %v11614_v3, %v304_v8  ;;  %v8871_v36 = vmul.f32 -1.442695, %v11722_v57 }
 0x119   :  { %v449_v38 = vadd.f32 %v433_v47, %v349_v4  ;;  %v345_v4 = vadd.f32 %v329_v52, %v245_v23  ;;  %9705 = vpow2.f32 %v8879_v27  ;;  %v9704_v23 = vpop.eup %9703 }
 0x11a   :  { %v347_v17 = vadd.f32 %v331_v19, %v247_v9  ;;  %v490_v19 = vld [vmem:[#allocation2] sm:$0x1]  ;;  %9707 = vpow2.f32 %v8880_v26  ;;  %v705_v58 = vadd.f32 1.0, %v9704_v23 }
 0x11b   :  { %v469_v34 = vadd.f32 %v11634_v20, %v449_v38  ;;  %9709 = vpow2.f32 %v8871_v36  ;;  %v11743_v51 = vadd.f32 %v11654_v22, %v490_v19 }
 0x11c   :  { %v447_v48 = vadd.f32 %v431_v31, %v347_v17  ;;  %v368_v24 = vpop.permute.xlu1 %367  ;;  %v11728_v31 = vadd.f32 %v588_v46, %v492_v2  ;;  %v230_v17 = vmul.f32 %v11608_v63, %v11624_v13  ;;  %v596_v2 = vrot.slane %v11652_v21, 3 }
 0x11d   :  { %485 = vst [vmem:[#allocation2 + $0x78] sm:$0xff] %v469_v34  ;;  %v422_v35 = vmul.f32 %v11622_v12, %v368_v24  ;;  %v140_v24 = vmul.f32 %v11606_v62, %v11647_v14  ;;  %v8870_v52 = vmul.f32 -1.442695, %v11743_v51 }
 0x11e   :  { %v467_v42 = vadd.f32 %v11634_v20, %v447_v48  ;;  %v8872_v34 = vmul.f32 -1.442695, %v11728_v31  ;;  %v11746_v48 = vadd.f32 %v589_v41, %v493_v18  ;;  %v246_v13 = vadd.f32 %v230_v17, %v146_v16 }
 0x11f   :  { %v438_v59 = vadd.f32 %v422_v35, %v338_v29  ;;  %v339_v29 = vadd.f32 %v323_v6, %v239_v39  ;;  %v240_v46 = vadd.f32 %v224_v33, %v140_v24  ;;  %v591_v17 = vrot.slane %v11654_v22, 5 }
 0x120   :  { %483 = vst [vmem:[#allocation2 + $0x68] sm:$0xff] %v467_v42  ;;  %v396_v47 = vpop.permute.xlu1 %395  ;;  %9711 = vpow2.f32 %v8872_v34  ;;  %v8873_v43 = vmul.f32 -1.442695, %v11746_v48 }
 0x121   :  { %v458_v8 = vadd.f32 %v11634_v20, %v438_v59  ;;  %v429_v9 = vmul.f32 %v11622_v12, %v396_v47  ;;  %9713 = vtanh.f32 %v626_v25  ;;  %v346_v59 = vadd.f32 %v330_v61, %v246_v13 }
 0x122   :  { %9715 = vtanh.f32 %v11708_v30  ;;  %v141_v30 = vmul.f32 %v11606_v62, %v11666_v60  ;;  %v340_v41 = vadd.f32 %v324_v54, %v240_v46  ;;  %v600_v61 = vrot.slane %v11652_v21, 7 }
 0x123   :  { %474 = vst [vmem:[#allocation2 + $0x20] sm:$0xff] %v458_v8  ;;  %v445_v49 = vadd.f32 %v429_v9, %v345_v4  ;;  %v9706_v55 = vpop.eup %9705  ;;  %9717 = vpow2.f32 %v8870_v52  ;;  %v225_v4 = vmul.f32 %v11608_v63, %v11573_v45 }
 0x124   :  { %v9708_v47 = vpop.eup %9707  ;;  %9719 = vtanh.f32 %v11714_v28  ;;  %v706_v19 = vadd.f32 1.0, %v9706_v55 }
 0x125   :  { %v465_v7 = vadd.f32 %v11634_v20, %v445_v49  ;;  %v280_v38 = vpop.permute.xlu1 %279  ;;  %v9710_v9 = vpop.eup %9709  ;;  %9721 = vpow2.f32 %v8873_v43  ;;  %v707_v28 = vadd.f32 1.0, %v9708_v47  ;;  %v241_v63 = vadd.f32 %v225_v4, %v141_v30 }
 0x126   :  { %9723 = vtanh.f32 %v11722_v57  ;;  %v148_v57 = vmul.f32 %v11606_v62, %v11668_v32  ;;  %v698_v18 = vadd.f32 1.0, %v9710_v9 }
 0x127   :  { %481 = vst [vmem:[#allocation2 + $0x58] sm:$0xff] %v465_v7  ;;  %v325_v7 = vmul.f32 %v11614_v3, %v280_v38  ;;  %9725 = vrcp.f32 %v705_v58  ;;  %v332_v38 = vmul.f32 %v11614_v3, %v11610_v0  ;;  %v503_v55 = vld [vmem:[#allocation2 + $0x68] sm:$0x1] }
 0x128   :  { %9727 = vrcp.f32 %v706_v19  ;;  %v248_v39 = vadd.f32 %v232_v15, %v148_v57 }
 0x129   :  { %9729 = vrcp.f32 %v707_v28  ;;  %v341_v24 = vadd.f32 %v325_v7, %v241_v63 }
 0x12a   :  { %v372_v1 = vpop.permute.xlu1 %371  ;;  %v494_v27 = vld [vmem:[#allocation2 + $0x20] sm:$0x1]  ;;  %v9712_v6 = vpop.eup %9711  ;;  %9731 = vrcp.f32 %v698_v18 }
 0x12b   :  { %v423_v35 = vmul.f32 %v11622_v12, %v372_v1  ;;  %v11769_v49 = vadd.f32 %v590_v37, %v494_v27  ;;  %v11786_v13 = vpop.eup %9713  ;;  %v505_v1 = vld [vmem:[#allocation2 + $0x78] sm:$0x1]  ;;  %v699_v3 = vadd.f32 1.0, %v9712_v6  ;;  %v597_v37 = vrot.slane %v11652_v21, 4 }
 0x12c   :  { %v11791_v52 = vpop.eup %9715 }
 0x12d   :  { %v439_v42 = vadd.f32 %v423_v35, %v339_v29  ;;  %v8874_v34 = vmul.f32 -1.442695, %v11769_v49  ;;  %v598_v35 = vrot.slane %v11652_v21, 5  ;;  %v9718_v23 = vpop.eup %9717 }
 0x12e   :  { %v400_v14 = vpop.permute.xlu1 %399  ;;  %v501_v8 = vld [vmem:[#allocation2 + $0x58] sm:$0x1]  ;;  %v11795_v54 = vpop.eup %9719  ;;  %v697_v4 = vadd.f32 1.0, %v9718_v23 }
 0x12f   :  { %v459_v25 = vadd.f32 %v11634_v20, %v439_v42  ;;  %v430_v26 = vmul.f32 %v11622_v12, %v400_v14  ;;  %v11777_v44 = vadd.f32 %v596_v2, %v501_v8  ;;  %9733 = vpow2.f32 %v8874_v34  ;;  %v9722_v27 = vpop.eup %9721 }
 0x130   :  { %v348_v14 = vadd.f32 %v332_v38, %v248_v39  ;;  %9735 = vtanh.f32 %v11728_v31  ;;  %v11804_v30 = vadd.f32 %v598_v35, %v503_v55  ;;  %v592_v8 = vrot.slane %v11654_v22, 6 }
 0x131   :  { %475 = vst [vmem:[#allocation2 + $0x28] sm:$0xff] %v459_v25  ;;  %v446_v36 = vadd.f32 %v430_v26, %v346_v59  ;;  %v8881_v29 = vmul.f32 -1.442695, %v11777_v44  ;;  %v11798_v59 = vadd.f32 %v600_v61, %v505_v1  ;;  %v11802_v26 = vpop.eup %9723 }
 0x132   :  { %v376_v45 = vpop.permute.xlu1 %375  ;;  %v8883_v7 = vmul.f32 -1.442695, %v11804_v30 }
 0x133   :  { %v466_v60 = vadd.f32 %v11634_v20, %v446_v36  ;;  %v424_v16 = vmul.f32 %v11622_v12, %v376_v45  ;;  %9737 = vpow2.f32 %v8881_v29  ;;  %v11808_v36 = vpop.eup %9725 }
 0x134   :  { %9739 = vrcp.f32 %v699_v3  ;;  %v11811_v19 = vpop.eup %9727 }
 0x135   :  { %482 = vst [vmem:[#allocation2 + $0x60] sm:$0xff] %v466_v60  ;;  %v440_v40 = vadd.f32 %v424_v16, %v340_v41  ;;  %9741 = vtanh.f32 %v11743_v51  ;;  %v8885_v41 = vmul.f32 -1.442695, %v11798_v59  ;;  %v11815_v28 = vpop.eup %9729 }
 0x136   :  { %v380_v33 = vpop.permute.xlu1 %379  ;;  %9743 = vtanh.f32 %v11746_v48  ;;  %v11818_v16 = vpop.eup %9731 }
 0x137   :  { %v460_v62 = vadd.f32 %v11634_v20, %v440_v40  ;;  %v425_v32 = vmul.f32 %v11622_v12, %v380_v33  ;;  %v599_v33 = vrot.slane %v11652_v21, 6 }
 0x138   :  { %v495_v0 = vld [vmem:[#allocation2 + $0x28] sm:$0x1] }
 0x139   :  { %476 = vst [vmem:[#allocation2 + $0x30] sm:$0xff] %v460_v62  ;;  %v441_v42 = vadd.f32 %v425_v32, %v341_v24  ;;  %v622_v43 = vadd.f32 %v591_v17, %v495_v0  ;;  %v9734_v48 = vpop.eup %9733  ;;  %v593_v17 = vrot.slane %v11654_v22, 7 }
 0x13a   :  { %v408_v46 = vpop.permute.xlu1 %407  ;;  %v11821_v57 = vpop.eup %9735  ;;  %v701_v34 = vadd.f32 1.0, %v9734_v48 }
 0x13b   :  { %v461_v47 = vadd.f32 %v11634_v20, %v441_v42  ;;  %v432_v2 = vmul.f32 %v11622_v12, %v408_v46  ;;  %v8875_v25 = vmul.f32 -1.442695, %v622_v43  ;;  %v700_v12 = vadd.f32 1.0, %v9722_v27 }
 0x13c   :  { %v502_v58 = vld [vmem:[#allocation2 + $0x60] sm:$0x1]  ;;  %v11843_v46 = vand.u32 127, %v27_v50  ;;  %v784_v50 = vrot.slane %v11795_v54, 6 }
 0x13d   :  { %477 = vst [vmem:[#allocation2 + $0x38] sm:$0xff] %v461_v47  ;;  %v448_v31 = vadd.f32 %v432_v2, %v348_v14  ;;  %v629_v9 = vadd.f32 %v597_v37, %v502_v58  ;;  %9745 = vpow2.f32 %v8875_v25  ;;  %v9738_v6 = vpop.eup %9737  ;;  %v782_v47 = vrot.slane %v11786_v13, 7 }
 0x13e   :  { %9747 = vrcp.f32 %v697_v4  ;;  %v11823_v40 = vpop.eup %9739  ;;  %v708_v24 = vadd.f32 1.0, %v9738_v6  ;;  %vm29_vm3 = vcmp.ge.s32.totalorder %v11843_v46, 64  ;;  %vm30_vm4 = vcmp.lt.s32.totalorder %v11843_v46, 96 }
 0x13f   :  { %v468_v15 = vadd.f32 %v11634_v20, %v448_v31  ;;  %v8882_v45 = vmul.f32 -1.442695, %v629_v9  ;;  %v11826_v38 = vpop.eup %9741  ;;  %vm11893_vm9 = vmand %vm29_vm3, %vm30_vm4 }
 0x140   :  { %v496_v51 = vld [vmem:[#allocation2 + $0x30] sm:$0x1]  ;;  %v11830_v22 = vpop.eup %9743 }
 0x141   :  { %484 = vst [vmem:[#allocation2 + $0x70] sm:$0xff] %v468_v15  ;;  %v623_v60 = vadd.f32 %v592_v8, %v496_v51  ;;  %9749 = vpow2.f32 %v8882_v45  ;;  %v761_v8 = vrot.slane %v11802_v26, 7  ;;  %v828_v15 = vrot.slane %v11811_v19, 7 }
 0x142   :  { %9751 = vrcp.f32 %v700_v12  ;;  %v767_v54 = vrot.slane %v11830_v22, 5  ;;  %v814_v26 = vrot.slane %v11818_v16, 7 }
 0x143   :  { %v8876_v20 = vmul.f32 -1.442695, %v623_v60  ;;  %9753 = vpow2.f32 %v8885_v41  ;;  %v763_v41 = vsel %vm762_vm0, %v761_v8, %v11826_v38 }
 0x144   :  { %v497_v18 = vld [vmem:[#allocation2 + $0x38] sm:$0x1]  ;;  %9755 = vpow2.f32 %v8883_v7  ;;  %v764_v7 = vrot.slane %v11821_v57, 6 }
 0x145   :  { %v624_v63 = vadd.f32 %v593_v17, %v497_v18  ;;  %9757 = vpow2.f32 %v8876_v20  ;;  %v816_v17 = vrot.slane %v11823_v40, 6 }
 0x146   :  { %9759 = vtanh.f32 %v11769_v49  ;;  %v766_v18 = vsel %vm765_vm1, %v764_v7, %v763_v41 }
 0x147   :  { %v8877_v39 = vmul.f32 -1.442695, %v624_v63  ;;  %9761 = vtanh.f32 %v11777_v44  ;;  %v9746_v62 = vpop.eup %9745 }
 0x148   :  { %9763 = vtanh.f32 %v622_v43  ;;  %v504_v61 = vld [vmem:[#allocation2 + $0x70] sm:$0x1]  ;;  %v11832_v1 = vpop.eup %9747  ;;  %v702_v0 = vadd.f32 1.0, %v9746_v62 }
 0x149   :  { %9765 = vpow2.f32 %v8877_v39  ;;  %v631_v32 = vadd.f32 %v599_v33, %v504_v61  ;;  %v815_v48 = vsel %vm762_vm0, %v814_v26, %v11832_v1  ;;  %v829_v39 = vsel %vm762_vm0, %v828_v15, %v11808_v36 }
 0x14a   :  { %9767 = vrcp.f32 %v701_v34  ;;  %v817_v22 = vsel %vm765_vm1, %v816_v17, %v815_v48 }
 0x14b   :  { %v9750_v49 = vpop.eup %9749  ;;  %9769 = vtanh.f32 %v629_v9  ;;  %v8884_v29 = vmul.f32 -1.442695, %v631_v32 }
 0x14c   :  { %v11834_v35 = vpop.eup %9751  ;;  %9771 = vrcp.f32 %v708_v24  ;;  %v709_v44 = vadd.f32 1.0, %v9750_v49 }
 0x14d   :  { %v9754_v21 = vpop.eup %9753  ;;  %9773 = vpow2.f32 %v8884_v29  ;;  %v818_v20 = vrot.slane %v11834_v35, 5 }
 0x14e   :  { %v9756_v3 = vpop.eup %9755  ;;  %9775 = vtanh.f32 %v623_v60  ;;  %v712_v58 = vadd.f32 1.0, %v9754_v21 }
 0x14f   :  { %v9758_v23 = vpop.eup %9757  ;;  %9777 = vtanh.f32 %v624_v63  ;;  %v710_v27 = vadd.f32 1.0, %v9756_v3  ;;  %v819_v49 = vsel %vm768_vm2, %v818_v20, %v817_v22 }
 0x150   :  { %v11836_v37 = vpop.eup %9759  ;;  %v703_v42 = vadd.f32 1.0, %v9758_v23  ;;  %9779 = vrcp.f32 %v702_v0 }
 0x151   :  { %v11838_v43 = vpop.eup %9761  ;;  %9781 = vrcp.f32 %v709_v44  ;;  %v770_v19 = vrot.slane %v11836_v37, 4 }
 0x152   :  { %v11840_v55 = vpop.eup %9763  ;;  %9783 = vrcp.f32 %v703_v42  ;;  %v786_v63 = vrot.slane %v11838_v43, 5 }
 0x153   :  { %v9766_v14 = vpop.eup %9765  ;;  %9785 = vtanh.f32 %v631_v32  ;;  %v773_v57 = vrot.slane %v11840_v55, 3 }
 0x154   :  { %v11846_v2 = vpop.eup %9767  ;;  %v704_v25 = vadd.f32 1.0, %v9766_v14  ;;  %9787 = vtanh.f32 %v11804_v30  ;;  %v783_v30 = vsel %vm762_vm0, %v782_v47, %v11791_v52 }
 0x155   :  { %v11848_v4 = vpop.eup %9769  ;;  %v785_v52 = vsel %vm765_vm1, %v784_v50, %v783_v30  ;;  %v820_v6 = vrot.slane %v11846_v2, 4 }
 0x156   :  { %v11851_v31 = vpop.eup %9771  ;;  %9789 = vrcp.f32 %v704_v25  ;;  %v788_v38 = vrot.slane %v11848_v4, 4  ;;  %v787_v36 = vsel %vm768_vm2, %v786_v63, %v785_v52 }
 0x157   :  { %v9774_v13 = vpop.eup %9773  ;;  %9791 = vrcp.f32 %v710_v27  ;;  %v832_v24 = vrot.slane %v11851_v31, 5  ;;  %v821_v21 = vsel %vm771_vm5, %v820_v6, %v819_v49 }
 0x158   :  { %v9776_v9 = vpop.eup %9775  ;;  %9793 = vtanh.f32 %v11798_v59  ;;  %v711_v12 = vadd.f32 1.0, %v9774_v13  ;;  %v830_v59 = vrot.slane %v11815_v28, 6  ;;  %v769_v28 = vsel %vm768_vm2, %v767_v54, %v766_v18 }
 0x159   :  { %v9778_v45 = vpop.eup %9777  ;;  %9795 = vrcp.f32 %v712_v58  ;;  %v776_v33 = vrot.slane %v9776_v9, 2  ;;  %v772_v32 = vsel %vm771_vm5, %v770_v19, %v769_v28  ;;  %v789_v43 = vsel %vm771_vm5, %v788_v38, %v787_v36 }
 0x15a   :  { %v9780_v51 = vpop.eup %9779  ;;  %9797 = vrcp.f32 %v711_v12  ;;  %v779_v1 = vrot.slane %v9778_v45, 1  ;;  %v775_v0 = vsel %vm774_vm6, %v773_v57, %v772_v32  ;;  %v831_v44 = vsel %vm765_vm1, %v830_v59, %v829_v39 }
 0x15b   :  { %v9782_v60 = vpop.eup %9781  ;;  %v822_v34 = vrot.slane %v9780_v51, 3  ;;  %v778_v27 = vsel %vm777_vm7, %v776_v33, %v775_v0  ;;  %v833_v25 = vsel %vm768_vm2, %v832_v24, %v831_v44 }
 0x15c   :  { %v9784_v16 = vpop.eup %9783  ;;  %v834_v29 = vrot.slane %v9782_v60, 4  ;;  %v781_v46 = vsel %vm780_vm8, %v779_v1, %v778_v27 }
 0x15d   :  { %v9786_v40 = vpop.eup %9785  ;;  %v824_v61 = vrot.slane %v9784_v16, 2  ;;  %v823_v37 = vsel %vm774_vm6, %v822_v34, %v821_v21  ;;  %v1120_v21 = vld [vmem:[#allocation2 + $0x59] sm:$0x1] }
 0x15e   :  { %v9788_v62 = vpop.eup %9787  ;;  %v792_v55 = vrot.slane %v9786_v40, 2  ;;  %v835_v31 = vsel %vm771_vm5, %v834_v29, %v833_v25  ;;  %v1118_v29 = vld [vmem:[#allocation2 + $0x49] sm:$0x1] }
 0x15f   :  { %v825_v47 = vsel %vm777_vm7, %v824_v61, %v823_v37  ;;  %v790_v2 = vrot.slane %v9788_v62, 3  ;;  %v1117_v61 = vld [vmem:[#allocation2 + $0x41] sm:$0x1] }
 0x160   :  { %v9790_v35 = vpop.eup %9789 }
 0x161   :  { %v9792_v3 = vpop.eup %9791  ;;  %v826_v42 = vrot.slane %v9790_v35, 1  ;;  %v791_v8 = vsel %vm774_vm6, %v790_v2, %v789_v43  ;;  %v1119_v35 = vld [vmem:[#allocation2 + $0x51] sm:$0x1]  ;;  %v1110_v2 = vld [vmem:[#allocation2 + $0x9] sm:$0x1] }
 0x162   :  { %v9794_v14 = vpop.eup %9793  ;;  %v836_v30 = vrot.slane %v9792_v3, 3  ;;  %v793_v9 = vsel %vm777_vm7, %v792_v55, %v791_v8 }
 0x163   :  { %v9796_v4 = vpop.eup %9795  ;;  %v827_v58 = vsel %vm780_vm8, %v826_v42, %v825_v47  ;;  %v794_v15 = vrot.slane %v9794_v14, 1  ;;  %v1109_v14 = vld [vmem:[#allocation2 + $0x1] sm:$0x1] }
 0x164   :  { %v9798_v50 = vpop.eup %9797  ;;  %v844_v13 = vsel %vm11893_vm9, %v781_v46, %v827_v58  ;;  %v837_v45 = vsel %vm774_vm6, %v836_v30, %v835_v31  ;;  %v840_v41 = vrot.slane %v9796_v4, 1  ;;  %v1111_v4 = vld [vmem:[#allocation2 + $0x11] sm:$0x1]  ;;  %v1112_v31 = vld [vmem:[#allocation2 + $0x19] sm:$0x1] }
 0x165   :  { %850 = vrot.lane.b32.xlu1 %v844_v13, %s11332_s20  ;;  %v838_v12 = vrot.slane %v9798_v50, 2  ;;  %v795_v26 = vsel %vm780_vm8, %v794_v15, %v793_v9  ;;  %v846_v48 = vmul.f32 0.0, %v844_v13  ;;  %v1121_v15 = vld [vmem:[#allocation2 + $0x61] sm:$0x1] }
 0x167   :  { %v839_v54 = vsel %vm777_vm7, %v838_v12, %v837_v45 }
 0x168   :  { %v841_v51 = vsel %vm780_vm8, %v840_v41, %v839_v54  ;;  %v1122_v41 = vld [vmem:[#allocation2 + $0x69] sm:$0x1] }
 0x169   :  { %v845_v7 = vsel %vm11893_vm9, %v795_v26, %v841_v51 }
 0x16a   :  { %852 = vrot.lane.b32.xlu0 %v845_v7, %s11332_s20  ;;  %v847_v16 = vmul.f32 0.0, %v845_v7 }
 0x1d7   :  { %v851_v52 = vpop.permute.xlu1 %850 }
 0x1d8   :  { %v856_v59 = vmul.f32 %v851_v52, %v844_v13 }
 0x1da   :  { %860 = vrot.lane.b32.xlu1 %v856_v59, %s11333_s21 }
 0x1dc   :  { %v853_v60 = vpop.permute.xlu0 %852 }
 0x1dd   :  { %v857_v19 = vmul.f32 %v853_v60, %v845_v7 }
 0x1df   :  { %862 = vrot.lane.b32.xlu0 %v857_v19, %s11333_s21 }
 0x24c   :  { %v861_v17 = vpop.permute.xlu1 %860 }
 0x24d   :  { %v11919_v20 = vadd.f32 %v861_v17, %v846_v48  ;;  %v1124_v48 = vld [vmem:[#allocation2 + $0x79] sm:$0x1] }
 0x24f   :  { %9799 = vtanh.f32 %v11919_v20 }
 0x251   :  { %v863_v18 = vpop.permute.xlu0 %862 }
 0x252   :  { %v11922_v57 = vadd.f32 %v863_v18, %v847_v16 }
 0x254   :  { %9801 = vtanh.f32 %v11922_v57 }
 0x259   :  { %v9800_v6 = vpop.eup %9799 }
 0x25a   :  { %872 = vrot.lane.b32.xlu1 %v9800_v6, %s11332_s20 }
 0x25e   :  { %v9802_v63 = vpop.eup %9801 }
 0x25f   :  { %874 = vrot.lane.b32.xlu0 %v9802_v63, %s11332_s20 }
 0x2cc   :  { %v873_v28 = vpop.permute.xlu1 %872 }
 0x2cd   :  { %v11927_v34 = vmul.f32 %v873_v28, %v844_v13 }
 0x2cf   :  { %1125 = vrot.lane.b32.xlu1 %v11927_v34, %s11333_s21 }
 0x2d1   :  { %v875_v38 = vpop.permute.xlu0 %874 }
 0x2d2   :  { %v11931_v39 = vmul.f32 %v875_v38, %v845_v7  ;;  %v1123_v7 = vld [vmem:[#allocation2 + $0x71] sm:$0x1] }
 0x2d4   :  { %1127 = vrot.lane.b32.xlu0 %v11931_v39, %s11333_s21 }
 0x341   :  { %v1126_v40 = vpop.permute.xlu1 %1125 }
 0x342   :  { %9319 = vmatprep.mubr.msk.f32.mxu1 %vm506_vm10, %v1126_v40 }
 0x346   :  { %v1128_v33 = vpop.permute.xlu0 %1127 }
 0x347   :  { %9320 = vmatmul.mubr.msk.f32.vlgmr.msra.gmra.mrb[0].mxu1 %vm506_vm10, %v1128_v33 }
 0x348   :  { %9546 = vmatpush3.bf16.msra.mxu1 %v11398_v5 }
 0x349   :  { %9548 = vmatprep.subr.bf16.mxu1 %v11416_v10 }
 0x34c   :  { %9550 = vmatpush3.bf16.msra.mxu1 %v11416_v10 }
 0x34d   :  { %9560 = vmatprep.subr.bf16.mxu1 %v11398_v5 }
 0x41a   :  { %v9321_v22 = vpop.f32.mrb[0].mxu1 }
 0x41b   :  { %v1217_v24 = vrot.slane %v9321_v22, 1  ;;  %v1218_v62 = vrot.slane %v9321_v22, 2  ;;  %v11941_v32 = vpop.f32.mrb[1].mxu1  ;;  %v1219_v1 = vrot.slane %v9321_v22, 3  ;;  %v1248_v49 = vadd.f32 %v9321_v22, %v1117_v61 }
 0x41c   :  { %v1210_v37 = vrot.slane %v11941_v32, 1  ;;  %v1211_v43 = vrot.slane %v11941_v32, 2  ;;  %v1212_v27 = vrot.slane %v11941_v32, 3  ;;  %v1240_v25 = vadd.f32 %v11941_v32, %v1109_v14 }
 0x41d   :  { %v1249_v0 = vadd.f32 %v1217_v24, %v1118_v29  ;;  %v1250_v36 = vadd.f32 %v1218_v62, %v1119_v35  ;;  %v1251_v44 = vadd.f32 %v1219_v1, %v1120_v21  ;;  %v8896_v3 = vmul.f32 -1.442695, %v1248_v49 }
 0x41e   :  { %9803 = vtanh.f32 %v1248_v49  ;;  %v1241_v46 = vadd.f32 %v1210_v37, %v1110_v2  ;;  %v1220_v58 = vrot.slane %v9321_v22, 4  ;;  %v1242_v50 = vadd.f32 %v1211_v43, %v1111_v4  ;;  %v1113_v43 = vld [vmem:[#allocation2 + $0x21] sm:$0x1]  ;;  %v1115_v4 = vld [vmem:[#allocation2 + $0x31] sm:$0x1] }
 0x41f   :  { %v8897_v42 = vmul.f32 -1.442695, %v1249_v0  ;;  %9805 = vtanh.f32 %v1249_v0  ;;  %v8898_v55 = vmul.f32 -1.442695, %v1250_v36  ;;  %v8899_v47 = vmul.f32 -1.442695, %v1251_v44 }
 0x420   :  { %9807 = vpow2.f32 %v8896_v3  ;;  %v1221_v13 = vrot.slane %v9321_v22, 5  ;;  %v11947_v8 = vadd.f32 %v1212_v27, %v1112_v31  ;;  %v8888_v30 = vmul.f32 -1.442695, %v1240_v25 }
 0x421   :  { %9809 = vtanh.f32 %v1250_v36  ;;  %v1222_v9 = vrot.slane %v9321_v22, 6  ;;  %v8889_v12 = vmul.f32 -1.442695, %v1241_v46  ;;  %v8890_v45 = vmul.f32 -1.442695, %v1242_v50 }
 0x422   :  { %9811 = vpow2.f32 %v8897_v42  ;;  %v1223_v54 = vrot.slane %v9321_v22, 7  ;;  %v1252_v26 = vadd.f32 %v1220_v58, %v1121_v15  ;;  %v8891_v51 = vmul.f32 -1.442695, %v11947_v8  ;;  %v1116_v58 = vld [vmem:[#allocation2 + $0x39] sm:$0x1] }
 0x423   :  { %9813 = vpow2.f32 %v8898_v55  ;;  %v1253_v52 = vadd.f32 %v1221_v13, %v1122_v41  ;;  %v1254_v60 = vadd.f32 %v1222_v9, %v1123_v7  ;;  %v1213_v0 = vrot.slane %v11941_v32, 4 }
 0x424   :  { %9815 = vpow2.f32 %v8899_v47  ;;  %v1255_v16 = vadd.f32 %v1223_v54, %v1124_v48  ;;  %v8900_v18 = vmul.f32 -1.442695, %v1252_v26  ;;  %v1214_v3 = vrot.slane %v11941_v32, 5 }
 0x425   :  { %9817 = vtanh.f32 %v1240_v25  ;;  %v8901_v63 = vmul.f32 -1.442695, %v1253_v52  ;;  %v8902_v38 = vmul.f32 -1.442695, %v1254_v60  ;;  %v1215_v37 = vrot.slane %v11941_v32, 6 }
 0x426   :  { %9819 = vtanh.f32 %v1241_v46  ;;  %v8903_v61 = vmul.f32 -1.442695, %v1255_v16  ;;  %v1216_v55 = vrot.slane %v11941_v32, 7  ;;  %v1244_v47 = vadd.f32 %v1213_v0, %v1113_v43  ;;  %v1114_v25 = vld [vmem:[#allocation2 + $0x29] sm:$0x1] }
 0x427   :  { %9821 = vtanh.f32 %v1242_v50  ;;  %v1245_v31 = vadd.f32 %v1214_v3, %v1114_v25  ;;  %v11967_v50 = vadd.f32 %v1215_v37, %v1115_v4 }
 0x428   :  { %v11950_v59 = vpop.eup %9803  ;;  %9823 = vpow2.f32 %v8888_v30  ;;  %v11970_v32 = vadd.f32 %v1216_v55, %v1116_v58  ;;  %v8892_v41 = vmul.f32 -1.442695, %v1244_v47 }
 0x429   :  { %v11952_v19 = vpop.eup %9805  ;;  %9825 = vpow2.f32 %v8889_v12  ;;  %v8893_v7 = vmul.f32 -1.442695, %v1245_v31 }
 0x42a   :  { %v9808_v17 = vpop.eup %9807  ;;  %9827 = vpow2.f32 %v8890_v45  ;;  %v1398_v27 = vrot.slane %v11952_v19, 7 }
 0x42b   :  { %v11954_v6 = vpop.eup %9809  ;;  %9829 = vpow2.f32 %v8891_v51  ;;  %v1328_v33 = vadd.f32 1.0, %v9808_v17 }
 0x42c   :  { %v9812_v28 = vpop.eup %9811  ;;  %9831 = vtanh.f32 %v1251_v44  ;;  %v1400_v9 = vrot.slane %v11954_v6, 6  ;;  %v1399_v45 = vsel %vm762_vm0, %v1398_v27, %v11950_v59  ;;  %v8895_v59 = vmul.f32 -1.442695, %v11970_v32 }
 0x42d   :  { %v9814_v40 = vpop.eup %9813  ;;  %9833 = vtanh.f32 %v1252_v26  ;;  %v1329_v62 = vadd.f32 1.0, %v9812_v28 }
 0x42e   :  { %v9816_v22 = vpop.eup %9815  ;;  %9835 = vpow2.f32 %v8900_v18  ;;  %v1330_v49 = vadd.f32 1.0, %v9814_v40  ;;  %v1401_v19 = vsel %vm765_vm1, %v1400_v9, %v1399_v45 }
 0x42f   :  { %v11956_v24 = vpop.eup %9817  ;;  %9837 = vpow2.f32 %v8901_v63  ;;  %v1331_v21 = vadd.f32 1.0, %v9816_v22 }
 0x430   :  { %v11958_v1 = vpop.eup %9819  ;;  %9839 = vpow2.f32 %v8902_v38 }
 0x431   :  { %v11960_v29 = vpop.eup %9821  ;;  %9841 = vrcp.f32 %v1328_v33 }
 0x432   :  { %v9824_v35 = vpop.eup %9823  ;;  %9843 = vpow2.f32 %v8903_v61 }
 0x433   :  { %v9826_v36 = vpop.eup %9825  ;;  %9845 = vrcp.f32 %v1329_v62  ;;  %v1320_v61 = vadd.f32 1.0, %v9824_v35  ;;  %v1384_v35 = vrot.slane %v11958_v1, 7 }
 0x434   :  { %v9828_v44 = vpop.eup %9827  ;;  %9847 = vrcp.f32 %v1330_v49  ;;  %v1321_v63 = vadd.f32 1.0, %v9826_v36 }
 0x435   :  { %v9830_v42 = vpop.eup %9829  ;;  %9849 = vtanh.f32 %v1253_v52  ;;  %v1322_v33 = vadd.f32 1.0, %v9828_v44  ;;  %v1385_v45 = vsel %vm762_vm0, %v1384_v35, %v11956_v24 }
 0x436   :  { %v9832_v14 = vpop.eup %9831  ;;  %9851 = vrcp.f32 %v1331_v21  ;;  %v1323_v21 = vadd.f32 1.0, %v9830_v42 }
 0x437   :  { %v9834_v2 = vpop.eup %9833  ;;  %9853 = vtanh.f32 %v1254_v60  ;;  %v1402_v17 = vrot.slane %v9832_v14, 5 }
 0x438   :  { %v9836_v46 = vpop.eup %9835  ;;  %9855 = vtanh.f32 %v1255_v16  ;;  %v1404_v62 = vrot.slane %v9834_v2, 4 }
 0x439   :  { %v9838_v13 = vpop.eup %9837  ;;  %v1332_v30 = vadd.f32 1.0, %v9836_v46  ;;  %9857 = vtanh.f32 %v11947_v8  ;;  %v8894_v8 = vmul.f32 -1.442695, %v11967_v50  ;;  %v1403_v38 = vsel %vm768_vm2, %v1402_v17, %v1401_v19 }
 0x43a   :  { %v9840_v12 = vpop.eup %9839  ;;  %v1333_v15 = vadd.f32 1.0, %v9838_v13  ;;  %9859 = vtanh.f32 %v1244_v47  ;;  %v1405_v37 = vsel %vm771_vm5, %v1404_v62, %v1403_v38 }
 0x43b   :  { %v9842_v54 = vpop.eup %9841  ;;  %v1334_v26 = vadd.f32 1.0, %v9840_v12  ;;  %9861 = vrcp.f32 %v1332_v30  ;;  %v1386_v30 = vrot.slane %v11960_v29, 6 }
 0x43c   :  { %v9844_v51 = vpop.eup %9843  ;;  %9863 = vrcp.f32 %v1333_v15 }
 0x43d   :  { %v9846_v52 = vpop.eup %9845  ;;  %v1335_v60 = vadd.f32 1.0, %v9844_v51  ;;  %9865 = vrcp.f32 %v1334_v26  ;;  %v1387_v17 = vsel %vm765_vm1, %v1386_v30, %v1385_v45 }
 0x43e   :  { %v9848_v48 = vpop.eup %9847  ;;  %v1444_v16 = vrot.slane %v9846_v52, 7  ;;  %9867 = vpow2.f32 %v8892_v41 }
 0x43f   :  { %v9850_v18 = vpop.eup %9849  ;;  %9869 = vrcp.f32 %v1335_v60  ;;  %v1446_v6 = vrot.slane %v9848_v48, 6 }
 0x440   :  { %v9852_v28 = vpop.eup %9851  ;;  %v1445_v40 = vsel %vm762_vm0, %v1444_v16, %v9842_v54  ;;  %9871 = vpow2.f32 %v8893_v7  ;;  %v1406_v55 = vrot.slane %v9850_v18, 3 }
 0x441   :  { %v9854_v22 = vpop.eup %9853  ;;  %9873 = vpow2.f32 %v8894_v8  ;;  %v1447_v0 = vsel %vm765_vm1, %v1446_v6, %v1445_v40  ;;  %v1448_v36 = vrot.slane %v9852_v28, 5 }
 0x442   :  { %v9856_v49 = vpop.eup %9855  ;;  %9875 = vpow2.f32 %v8895_v59  ;;  %v1407_v47 = vsel %vm774_vm6, %v1406_v55, %v1405_v37  ;;  %v1408_v25 = vrot.slane %v9854_v22, 2 }
 0x443   :  { %v9858_v3 = vpop.eup %9857  ;;  %9877 = vrcp.f32 %v1321_v63  ;;  %v1449_v44 = vsel %vm768_vm2, %v1448_v36, %v1447_v0  ;;  %v1410_v54 = vrot.slane %v9856_v49, 1 }
 0x444   :  { %v9860_v43 = vpop.eup %9859  ;;  %9879 = vrcp.f32 %v1322_v33  ;;  %v1409_v12 = vsel %vm777_vm7, %v1408_v25, %v1407_v47  ;;  %v1388_v16 = vrot.slane %v9858_v3, 5 }
 0x445   :  { %v9862_v14 = vpop.eup %9861  ;;  %9881 = vrcp.f32 %v1320_v61  ;;  %v1411_v52 = vsel %vm780_vm8, %v1410_v54, %v1409_v12  ;;  %v1390_v40 = vrot.slane %v9860_v43, 4 }
 0x446   :  { %v9864_v27 = vpop.eup %9863  ;;  %v1450_v2 = vrot.slane %v9862_v14, 4  ;;  %9883 = vrcp.f32 %v1323_v21 }
 0x447   :  { %v9866_v42 = vpop.eup %9865  ;;  %v1452_v4 = vrot.slane %v9864_v27, 3  ;;  %9885 = vtanh.f32 %v1245_v31 }
 0x448   :  { %v9868_v46 = vpop.eup %9867  ;;  %v1451_v58 = vsel %vm771_vm5, %v1450_v2, %v1449_v44  ;;  %v1454_v13 = vrot.slane %v9866_v42, 2  ;;  %9887 = vtanh.f32 %v11967_v50 }
 0x449   :  { %v9870_v9 = vpop.eup %9869  ;;  %v1453_v1 = vsel %vm774_vm6, %v1452_v4, %v1451_v58  ;;  %v1324_v15 = vadd.f32 1.0, %v9868_v46 }
 0x44a   :  { %v9872_v41 = vpop.eup %9871  ;;  %v1455_v26 = vsel %vm777_vm7, %v1454_v13, %v1453_v1  ;;  %v1456_v31 = vrot.slane %v9870_v9, 1 }
 0x44b   :  { %v9874_v51 = vpop.eup %9873  ;;  %v1325_v7 = vadd.f32 1.0, %v9872_v41  ;;  %9889 = vrcp.f32 %v1324_v15 }
 0x44c   :  { %v9876_v29 = vpop.eup %9875  ;;  %v1457_v60 = vsel %vm780_vm8, %v1456_v31, %v1455_v26  ;;  %9891 = vtanh.f32 %v11970_v32  ;;  %v1326_v19 = vadd.f32 1.0, %v9874_v51  ;;  %v1389_v32 = vsel %vm768_vm2, %v1388_v16, %v1387_v17 }
 0x44d   :  { %v9878_v8 = vpop.eup %9877  ;;  %v1461_v24 = vsel %vm11893_vm9, %v1411_v52, %v1457_v60  ;;  %v1327_v48 = vadd.f32 1.0, %v9876_v29  ;;  %9893 = vrcp.f32 %v1325_v7  ;;  %v1391_v22 = vsel %vm771_vm5, %v1390_v40, %v1389_v32 }
 0x44e   :  { %v9880_v50 = vpop.eup %9879  ;;  %1468 = vrot.lane.b32.xlu0 %v1461_v24, %s11332_s20  ;;  %9895 = vrcp.f32 %v1326_v19  ;;  %v1430_v59 = vrot.slane %v9878_v8, 7  ;;  %v1463_v45 = vmul.f32 %v1461_v24, %v11922_v57 }
 0x44f   :  { %v9882_v18 = vpop.eup %9881  ;;  %9897 = vrcp.f32 %v1327_v48  ;;  %v1432_v6 = vrot.slane %v9880_v50, 6  ;;  %v1732_v48 = vld [vmem:[#allocation2 + $0x42] sm:$0x1] }
 0x450   :  { %v9884_v63 = vpop.eup %9883  ;;  %v1431_v28 = vsel %vm762_vm0, %v1430_v59, %v9882_v18 }
 0x451   :  { %v9886_v38 = vpop.eup %9885  ;;  %v1433_v33 = vsel %vm765_vm1, %v1432_v6, %v1431_v28  ;;  %v1434_v61 = vrot.slane %v9884_v63, 5  ;;  %v1733_v6 = vld [vmem:[#allocation2 + $0x4a] sm:$0x1]  ;;  %v1734_v63 = vld [vmem:[#allocation2 + $0x52] sm:$0x1] }
 0x452   :  { %v9888_v62 = vpop.eup %9887  ;;  %v1392_v49 = vrot.slane %v9886_v38, 3  ;;  %v1735_v28 = vld [vmem:[#allocation2 + $0x5a] sm:$0x1] }
 0x453   :  { %v1435_v21 = vsel %vm768_vm2, %v1434_v61, %v1433_v33  ;;  %v1394_v14 = vrot.slane %v9888_v62, 2 }
 0x454   :  { %v1393_v37 = vsel %vm774_vm6, %v1392_v49, %v1391_v22 }
 0x455   :  { %v9890_v0 = vpop.eup %9889  ;;  %v1395_v47 = vsel %vm777_vm7, %v1394_v14, %v1393_v37  ;;  %v1725_v37 = vld [vmem:[#allocation2 + $0xa] sm:$0x1] }
 0x456   :  { %v9892_v3 = vpop.eup %9891  ;;  %v1436_v36 = vrot.slane %v9890_v0, 4  ;;  %v1724_v0 = vld [vmem:[#allocation2 + $0x2] sm:$0x1] }
 0x457   :  { %v9894_v55 = vpop.eup %9893  ;;  %v1396_v42 = vrot.slane %v9892_v3, 1 }
 0x458   :  { %v9896_v44 = vpop.eup %9895  ;;  %v1437_v35 = vsel %vm771_vm5, %v1436_v36, %v1435_v21  ;;  %v1438_v43 = vrot.slane %v9894_v55, 3  ;;  %v1726_v55 = vld [vmem:[#allocation2 + $0x12] sm:$0x1] }
 0x459   :  { %v9898_v27 = vpop.eup %9897  ;;  %v1440_v2 = vrot.slane %v9896_v44, 2  ;;  %v1397_v58 = vsel %vm780_vm8, %v1396_v42, %v1395_v47 }
 0x45a   :  { %v1439_v25 = vsel %vm774_vm6, %v1438_v43, %v1437_v35  ;;  %v1442_v4 = vrot.slane %v9898_v27, 1  ;;  %v1727_v35 = vld [vmem:[#allocation2 + $0x1a] sm:$0x1] }
 0x45b   :  { %v1441_v46 = vsel %vm777_vm7, %v1440_v2, %v1439_v25 }
 0x45c   :  { %v1443_v13 = vsel %vm780_vm8, %v1442_v4, %v1441_v46  ;;  %v1736_v4 = vld [vmem:[#allocation2 + $0x62] sm:$0x1] }
 0x45d   :  { %v1460_v30 = vsel %vm11893_vm9, %v1397_v58, %v1443_v13  ;;  %v1737_v58 = vld [vmem:[#allocation2 + $0x6a] sm:$0x1] }
 0x45e   :  { %1466 = vrot.lane.b32.xlu1 %v1460_v30, %s11332_s20  ;;  %v1462_v31 = vmul.f32 %v1460_v30, %v11919_v20 }
 0x4c0   :  { %v1469_v9 = vpop.permute.xlu0 %1468 }
 0x4c1   :  { %v1473_v12 = vmul.f32 %v1469_v9, %v1461_v24 }
 0x4c3   :  { %1478 = vrot.lane.b32.xlu0 %v1473_v12, %s11333_s21  ;;  %v1738_v12 = vld [vmem:[#allocation2 + $0x72] sm:$0x1] }
 0x4d0   :  { %v1467_v1 = vpop.permute.xlu1 %1466 }
 0x4d1   :  { %v1472_v15 = vmul.f32 %v1467_v1, %v1460_v30 }
 0x4d3   :  { %1476 = vrot.lane.b32.xlu1 %v1472_v15, %s11333_s21 }
 0x535   :  { %v1479_v41 = vpop.permute.xlu0 %1478 }
 0x536   :  { %v12018_v54 = vadd.f32 %v1479_v41, %v1463_v45 }
 0x538   :  { %9899 = vtanh.f32 %v12018_v54 }
 0x542   :  { %v9900_v26 = vpop.eup %9899 }
 0x543   :  { %1490 = vrot.lane.b32.xlu0 %v9900_v26, %s11332_s20  ;;  %v1739_v26 = vld [vmem:[#allocation2 + $0x7a] sm:$0x1] }
 0x545   :  { %v1477_v51 = vpop.permute.xlu1 %1476 }
 0x546   :  { %v12023_v7 = vadd.f32 %v1477_v51, %v1462_v31 }
 0x548   :  { %9901 = vtanh.f32 %v12023_v7 }
 0x552   :  { %v9902_v29 = vpop.eup %9901 }
 0x553   :  { %1488 = vrot.lane.b32.xlu1 %v9902_v29, %s11332_s20 }
 0x5b5   :  { %v1491_v52 = vpop.permute.xlu0 %1490 }
 0x5b6   :  { %v12027_v57 = vmul.f32 %v1491_v52, %v1461_v24 }
 0x5b8   :  { %1742 = vrot.lane.b32.xlu0 %v12027_v57, %s11333_s21 }
 0x5c5   :  { %v1489_v60 = vpop.permute.xlu1 %1488 }
 0x5c6   :  { %v12031_v19 = vmul.f32 %v1489_v60, %v1460_v30 }
 0x5c8   :  { %1740 = vrot.lane.b32.xlu1 %v12031_v19, %s11333_s21 }
 0x62a   :  { %v1743_v8 = vpop.permute.xlu0 %1742 }
 0x63a   :  { %v1741_v20 = vpop.permute.xlu1 %1740 }
 0x63b   :  { %9330 = vmatprep.mubr.msk.f32.mxu0 %vm506_vm10, %v1741_v20 }
 0x63c   :  { %9331 = vmatmul.mubr.msk.f32.vlgmr.msra.gmra.mrb[2].mxu0 %vm506_vm10, %v1743_v8 }
 0x63d   :  { %9554 = vmatpush3.bf16.msra.mxu0 %v11398_v5 }
 0x63e   :  { %9556 = vmatprep.subr.bf16.mxu0 %v11416_v10 }
 0x641   :  { %9558 = vmatpush3.bf16.msra.mxu0 %v11416_v10 }
 0x642   :  { %9568 = vmatprep.subr.bf16.mxu0 %v11398_v5 }
 0x70f   :  { %v9332_v24 = vpop.f32.mrb[2].mxu0 }
 0x710   :  { %v1832_v17 = vrot.slane %v9332_v24, 1  ;;  %v1833_v50 = vrot.slane %v9332_v24, 2  ;;  %v12041_v16 = vpop.f32.mrb[3].mxu0  ;;  %v1834_v59 = vrot.slane %v9332_v24, 3  ;;  %v1863_v18 = vadd.f32 %v9332_v24, %v1732_v48 }
 0x711   :  { %v1825_v22 = vrot.slane %v12041_v16, 1  ;;  %v1826_v62 = vrot.slane %v12041_v16, 2  ;;  %v1827_v21 = vrot.slane %v12041_v16, 3  ;;  %v1855_v36 = vadd.f32 %v12041_v16, %v1724_v0  ;;  %v1728_v0 = vld [vmem:[#allocation2 + $0x22] sm:$0x1] }
 0x712   :  { %v1864_v32 = vadd.f32 %v1832_v17, %v1733_v6  ;;  %v1865_v38 = vadd.f32 %v1833_v50, %v1734_v63  ;;  %v1866_v40 = vadd.f32 %v1834_v59, %v1735_v28  ;;  %v8914_v33 = vmul.f32 -1.442695, %v1863_v18 }
 0x713   :  { %9903 = vtanh.f32 %v1863_v18  ;;  %v1856_v14 = vadd.f32 %v1825_v22, %v1725_v37  ;;  %v1835_v44 = vrot.slane %v9332_v24, 4  ;;  %v1857_v43 = vadd.f32 %v1826_v62, %v1726_v55 }
 0x714   :  { %v8915_v61 = vmul.f32 -1.442695, %v1864_v32  ;;  %9905 = vtanh.f32 %v1864_v32  ;;  %v8916_v49 = vmul.f32 -1.442695, %v1865_v38  ;;  %v8917_v3 = vmul.f32 -1.442695, %v1866_v40 }
 0x715   :  { %9907 = vpow2.f32 %v8914_v33  ;;  %v1836_v27 = vrot.slane %v9332_v24, 5  ;;  %v12047_v47 = vadd.f32 %v1827_v21, %v1727_v35  ;;  %v8906_v2 = vmul.f32 -1.442695, %v1855_v36 }
 0x716   :  { %9909 = vtanh.f32 %v1865_v38  ;;  %v1837_v42 = vrot.slane %v9332_v24, 6  ;;  %v8907_v25 = vmul.f32 -1.442695, %v1856_v14  ;;  %v8908_v46 = vmul.f32 -1.442695, %v1857_v43 }
 0x717   :  { %9911 = vpow2.f32 %v8915_v61  ;;  %v1838_v13 = vrot.slane %v9332_v24, 7  ;;  %v1867_v30 = vadd.f32 %v1835_v44, %v1736_v4  ;;  %v8909_v9 = vmul.f32 -1.442695, %v12047_v47  ;;  %v1730_v44 = vld [vmem:[#allocation2 + $0x32] sm:$0x1] }
 0x718   :  { %9913 = vpow2.f32 %v8916_v49  ;;  %v1868_v1 = vadd.f32 %v1836_v27, %v1737_v58  ;;  %v1869_v45 = vadd.f32 %v1837_v42, %v1738_v12  ;;  %v1828_v38 = vrot.slane %v12041_v16, 4 }
 0x719   :  { %9915 = vpow2.f32 %v8917_v3  ;;  %v1870_v51 = vadd.f32 %v1838_v13, %v1739_v26  ;;  %v8918_v29 = vmul.f32 -1.442695, %v1867_v30  ;;  %v1829_v61 = vrot.slane %v12041_v16, 5 }
 0x71a   :  { %9917 = vtanh.f32 %v1855_v36  ;;  %v8919_v60 = vmul.f32 -1.442695, %v1868_v1  ;;  %v8920_v8 = vmul.f32 -1.442695, %v1869_v45  ;;  %v1830_v62 = vrot.slane %v12041_v16, 6 }
 0x71b   :  { %9919 = vtanh.f32 %v1856_v14  ;;  %v8921_v50 = vmul.f32 -1.442695, %v1870_v51  ;;  %v1831_v21 = vrot.slane %v12041_v16, 7  ;;  %v1859_v36 = vadd.f32 %v1828_v38, %v1728_v0  ;;  %v1729_v14 = vld [vmem:[#allocation2 + $0x2a] sm:$0x1] }
 0x71c   :  { %9921 = vtanh.f32 %v1857_v43  ;;  %v1731_v43 = vld [vmem:[#allocation2 + $0x3a] sm:$0x1]  ;;  %v1860_v27 = vadd.f32 %v1829_v61, %v1729_v14 }
 0x71d   :  { %v12050_v15 = vpop.eup %9903  ;;  %9923 = vpow2.f32 %v8906_v2  ;;  %v12067_v2 = vadd.f32 %v1830_v62, %v1730_v44  ;;  %v12070_v16 = vadd.f32 %v1831_v21, %v1731_v43 }
 0x71e   :  { %v12052_v41 = vpop.eup %9905  ;;  %9925 = vpow2.f32 %v8907_v25 }
 0x71f   :  { %v9908_v31 = vpop.eup %9907  ;;  %9927 = vpow2.f32 %v8908_v46  ;;  %v2013_v37 = vrot.slane %v12052_v41, 7 }
 0x720   :  { %v12054_v52 = vpop.eup %9909  ;;  %9929 = vpow2.f32 %v8909_v9  ;;  %v1943_v48 = vadd.f32 1.0, %v9908_v31 }
 0x721   :  { %v9912_v20 = vpop.eup %9911  ;;  %9931 = vtanh.f32 %v1866_v40  ;;  %v2015_v4 = vrot.slane %v12054_v52, 6  ;;  %v2014_v13 = vsel %vm762_vm0, %v2013_v37, %v12050_v15  ;;  %v8913_v15 = vmul.f32 -1.442695, %v12070_v16 }
 0x722   :  { %v9914_v24 = vpop.eup %9913  ;;  %9933 = vtanh.f32 %v1867_v30  ;;  %v1944_v18 = vadd.f32 1.0, %v9912_v20  ;;  %v8910_v30 = vmul.f32 -1.442695, %v1859_v36 }
 0x723   :  { %v9916_v17 = vpop.eup %9915  ;;  %9935 = vpow2.f32 %v8918_v29  ;;  %v1945_v63 = vadd.f32 1.0, %v9914_v24  ;;  %v2016_v31 = vsel %vm765_vm1, %v2015_v4, %v2014_v13 }
 0x724   :  { %v12056_v59 = vpop.eup %9917  ;;  %9937 = vpow2.f32 %v8919_v60  ;;  %v1946_v40 = vadd.f32 1.0, %v9916_v17 }
 0x725   :  { %v12058_v6 = vpop.eup %9919  ;;  %9939 = vpow2.f32 %v8920_v8 }
 0x726   :  { %v12060_v32 = vpop.eup %9921  ;;  %9941 = vrcp.f32 %v1943_v48 }
 0x727   :  { %v9924_v28 = vpop.eup %9923  ;;  %9943 = vpow2.f32 %v8921_v50 }
 0x728   :  { %v9926_v33 = vpop.eup %9925  ;;  %9945 = vrcp.f32 %v1944_v18 }
 0x729   :  { %v9928_v22 = vpop.eup %9927  ;;  %9947 = vrcp.f32 %v1945_v63  ;;  %v1936_v8 = vadd.f32 1.0, %v9926_v33  ;;  %v1935_v63 = vadd.f32 1.0, %v9924_v28  ;;  %v1999_v28 = vrot.slane %v12058_v6, 7 }
 0x72a   :  { %v9930_v49 = vpop.eup %9929  ;;  %9949 = vtanh.f32 %v1868_v1  ;;  %v1937_v50 = vadd.f32 1.0, %v9928_v22 }
 0x72b   :  { %v9932_v3 = vpop.eup %9931  ;;  %9951 = vrcp.f32 %v1946_v40  ;;  %v1938_v62 = vadd.f32 1.0, %v9930_v49 }
 0x72c   :  { %v9934_v55 = vpop.eup %9933  ;;  %9953 = vtanh.f32 %v1869_v45  ;;  %v8911_v45 = vmul.f32 -1.442695, %v1860_v27  ;;  %v2017_v29 = vrot.slane %v9932_v3, 5 }
 0x72d   :  { %v9936_v35 = vpop.eup %9935  ;;  %9955 = vtanh.f32 %v1870_v51  ;;  %v2019_v38 = vrot.slane %v9934_v55, 4 }
 0x72e   :  { %v9938_v42 = vpop.eup %9937  ;;  %v1947_v25 = vadd.f32 1.0, %v9936_v35  ;;  %9957 = vtanh.f32 %v12047_v47  ;;  %v8912_v47 = vmul.f32 -1.442695, %v12067_v2  ;;  %v2018_v48 = vsel %vm768_vm2, %v2017_v29, %v2016_v31 }
 0x72f   :  { %v9940_v46 = vpop.eup %9939  ;;  %v1948_v58 = vadd.f32 1.0, %v9938_v42  ;;  %9959 = vtanh.f32 %v1859_v36  ;;  %v2020_v21 = vsel %vm771_vm5, %v2019_v38, %v2018_v48 }
 0x730   :  { %v9942_v9 = vpop.eup %9941  ;;  %v1949_v12 = vadd.f32 1.0, %v9940_v46  ;;  %9961 = vrcp.f32 %v1947_v25  ;;  %v2001_v46 = vrot.slane %v12060_v32, 6 }
 0x731   :  { %v9944_v1 = vpop.eup %9943  ;;  %9963 = vrcp.f32 %v1948_v58 }
 0x732   :  { %v9946_v41 = vpop.eup %9945  ;;  %v1950_v26 = vadd.f32 1.0, %v9944_v1  ;;  %9965 = vrcp.f32 %v1949_v12 }
 0x733   :  { %v9948_v51 = vpop.eup %9947  ;;  %v2059_v52 = vrot.slane %v9946_v41, 7  ;;  %9967 = vpow2.f32 %v8910_v30 }
 0x734   :  { %v9950_v60 = vpop.eup %9949  ;;  %9969 = vrcp.f32 %v1950_v26  ;;  %v2061_v20 = vrot.slane %v9948_v51, 6 }
 0x735   :  { %v9952_v24 = vpop.eup %9951  ;;  %v2060_v17 = vsel %vm762_vm0, %v2059_v52, %v9942_v9  ;;  %9971 = vpow2.f32 %v8911_v45  ;;  %v2021_v37 = vrot.slane %v9950_v60, 3  ;;  %v2000_v9 = vsel %vm762_vm0, %v1999_v28, %v12056_v59 }
 0x736   :  { %v9954_v18 = vpop.eup %9953  ;;  %9973 = vpow2.f32 %v8912_v47  ;;  %v2062_v61 = vsel %vm765_vm1, %v2061_v20, %v2060_v17  ;;  %v2063_v33 = vrot.slane %v9952_v24, 5 }
 0x737   :  { %v9956_v40 = vpop.eup %9955  ;;  %9975 = vpow2.f32 %v8913_v15  ;;  %v2022_v14 = vsel %vm774_vm6, %v2021_v37, %v2020_v21  ;;  %v2023_v35 = vrot.slane %v9954_v18, 2  ;;  %v2002_v15 = vsel %vm765_vm1, %v2001_v46, %v2000_v9 }
 0x738   :  { %v9958_v0 = vpop.eup %9957  ;;  %9977 = vrcp.f32 %v1936_v8  ;;  %v2064_v22 = vsel %vm768_vm2, %v2063_v33, %v2062_v61  ;;  %v2025_v1 = vrot.slane %v9956_v40, 1 }
 0x739   :  { %v9960_v3 = vpop.eup %9959  ;;  %9979 = vrcp.f32 %v1937_v50  ;;  %v2024_v13 = vsel %vm777_vm7, %v2023_v35, %v2022_v14  ;;  %v2003_v60 = vrot.slane %v9958_v0, 5 }
 0x73a   :  { %v9962_v36 = vpop.eup %9961  ;;  %9981 = vrcp.f32 %v1935_v63  ;;  %v2026_v31 = vsel %vm780_vm8, %v2025_v1, %v2024_v13  ;;  %v2005_v18 = vrot.slane %v9960_v3, 4 }
 0x73b   :  { %v9964_v55 = vpop.eup %9963  ;;  %v2065_v44 = vrot.slane %v9962_v36, 4  ;;  %9983 = vrcp.f32 %v1938_v62 }
 0x73c   :  { %v9966_v49 = vpop.eup %9965  ;;  %v2067_v43 = vrot.slane %v9964_v55, 3  ;;  %9985 = vtanh.f32 %v1860_v27 }
 0x73d   :  { %v9968_v42 = vpop.eup %9967  ;;  %v2066_v25 = vsel %vm771_vm5, %v2065_v44, %v2064_v22  ;;  %v2069_v4 = vrot.slane %v9966_v49, 2  ;;  %9987 = vtanh.f32 %v12067_v2 }
 0x73e   :  { %v9970_v58 = vpop.eup %9969  ;;  %v2068_v6 = vsel %vm774_vm6, %v2067_v43, %v2066_v25  ;;  %v1939_v30 = vadd.f32 1.0, %v9968_v42 }
 0x73f   :  { %v9972_v12 = vpop.eup %9971  ;;  %v2070_v45 = vsel %vm777_vm7, %v2069_v4, %v2068_v6  ;;  %v2071_v27 = vrot.slane %v9970_v58, 1 }
 0x740   :  { %v9974_v41 = vpop.eup %9973  ;;  %v1940_v26 = vadd.f32 1.0, %v9972_v12  ;;  %9989 = vrcp.f32 %v1939_v30 }
 0x741   :  { %v9976_v32 = vpop.eup %9975  ;;  %v2072_v47 = vsel %vm780_vm8, %v2071_v27, %v2070_v45  ;;  %9991 = vtanh.f32 %v12070_v16  ;;  %v1941_v51 = vadd.f32 1.0, %v9974_v41  ;;  %v2004_v16 = vsel %vm768_vm2, %v2003_v60, %v2002_v15 }
 0x742   :  { %v9978_v29 = vpop.eup %9977  ;;  %v2076_v59 = vsel %vm11893_vm9, %v2026_v31, %v2072_v47  ;;  %v1942_v52 = vadd.f32 1.0, %v9976_v32  ;;  %9993 = vrcp.f32 %v1940_v26  ;;  %v2006_v38 = vsel %vm771_vm5, %v2005_v18, %v2004_v16  ;;  %v2348_v16 = vld [vmem:[#allocation2 + $0x4b] sm:$0x1]  ;;  %v2350_v18 = vld [vmem:[#allocation2 + $0x5b] sm:$0x1] }
 0x743   :  { %v9980_v2 = vpop.eup %9979  ;;  %2083 = vrot.lane.b32.xlu0 %v2076_v59, %s11332_s20  ;;  %9995 = vrcp.f32 %v1941_v51  ;;  %v2045_v20 = vrot.slane %v9978_v29, 7  ;;  %v2078_v1 = vmul.f32 %v2076_v59, %v12018_v54 }
 0x744   :  { %v9982_v8 = vpop.eup %9981  ;;  %9997 = vrcp.f32 %v1942_v52  ;;  %v2047_v24 = vrot.slane %v9980_v2, 6  ;;  %v2347_v2 = vld [vmem:[#allocation2 + $0x43] sm:$0x1] }
 0x745   :  { %v9984_v48 = vpop.eup %9983  ;;  %v2046_v17 = vsel %vm762_vm0, %v2045_v20, %v9982_v8 }
 0x746   :  { %v9986_v50 = vpop.eup %9985  ;;  %v2048_v63 = vsel %vm765_vm1, %v2047_v24, %v2046_v17  ;;  %v2049_v40 = vrot.slane %v9984_v48, 5  ;;  %v2349_v17 = vld [vmem:[#allocation2 + $0x53] sm:$0x1] }
 0x747   :  { %v9988_v61 = vpop.eup %9987  ;;  %v2007_v62 = vrot.slane %v9986_v50, 3 }
 0x748   :  { %v2050_v0 = vsel %vm768_vm2, %v2049_v40, %v2048_v63  ;;  %v2009_v28 = vrot.slane %v9988_v61, 2 }
 0x749   :  { %v2008_v37 = vsel %vm774_vm6, %v2007_v62, %v2006_v38 }
 0x74a   :  { %v9990_v21 = vpop.eup %9989  ;;  %v2010_v49 = vsel %vm777_vm7, %v2009_v28, %v2008_v37 }
 0x74b   :  { %v9992_v33 = vpop.eup %9991  ;;  %v2051_v36 = vrot.slane %v9990_v21, 4 }
 0x74c   :  { %v9994_v22 = vpop.eup %9993  ;;  %v2011_v43 = vrot.slane %v9992_v33, 1  ;;  %v2339_v33 = vld [vmem:[#allocation2 + $0x3] sm:$0x1] }
 0x74d   :  { %v9996_v55 = vpop.eup %9995  ;;  %v2052_v14 = vsel %vm771_vm5, %v2051_v36, %v2050_v0  ;;  %v2053_v3 = vrot.slane %v9994_v22, 3  ;;  %v2340_v22 = vld [vmem:[#allocation2 + $0xb] sm:$0x1] }
 0x74e   :  { %v9998_v44 = vpop.eup %9997  ;;  %v2055_v35 = vrot.slane %v9996_v55, 2  ;;  %v2012_v46 = vsel %vm780_vm8, %v2011_v43, %v2010_v49  ;;  %v2341_v55 = vld [vmem:[#allocation2 + $0x13] sm:$0x1] }
 0x74f   :  { %v2054_v42 = vsel %vm774_vm6, %v2053_v3, %v2052_v14  ;;  %v2057_v25 = vrot.slane %v9998_v44, 1  ;;  %v2342_v44 = vld [vmem:[#allocation2 + $0x1b] sm:$0x1] }
 0x750   :  { %v2056_v4 = vsel %vm777_vm7, %v2055_v35, %v2054_v42 }
 0x751   :  { %v2058_v58 = vsel %vm780_vm8, %v2057_v25, %v2056_v4 }
 0x752   :  { %v2075_v13 = vsel %vm11893_vm9, %v2012_v46, %v2058_v58  ;;  %v2351_v46 = vld [vmem:[#allocation2 + $0x63] sm:$0x1] }
 0x753   :  { %2081 = vrot.lane.b32.xlu1 %v2075_v13, %s11332_s20  ;;  %v2077_v26 = vmul.f32 %v2075_v13, %v12023_v7 }
 0x7b5   :  { %v2084_v6 = vpop.permute.xlu0 %2083 }
 0x7b6   :  { %v2088_v30 = vmul.f32 %v2084_v6, %v2076_v59 }
 0x7b8   :  { %2093 = vrot.lane.b32.xlu0 %v2088_v30, %s11333_s21 }
 0x7c5   :  { %v2082_v9 = vpop.permute.xlu1 %2081 }
 0x7c6   :  { %v2087_v12 = vmul.f32 %v2082_v9, %v2075_v13 }
 0x7c8   :  { %2091 = vrot.lane.b32.xlu1 %v2087_v12, %s11333_s21  ;;  %v2353_v12 = vld [vmem:[#allocation2 + $0x73] sm:$0x1] }
 0x82a   :  { %v2094_v45 = vpop.permute.xlu0 %2093 }
 0x82b   :  { %v12118_v27 = vadd.f32 %v2094_v45, %v2078_v1 }
 0x82d   :  { %9999 = vtanh.f32 %v12118_v27 }
 0x837   :  { %v10000_v41 = vpop.eup %9999 }
 0x838   :  { %2105 = vrot.lane.b32.xlu0 %v10000_v41, %s11332_s20 }
 0x83a   :  { %v2092_v32 = vpop.permute.xlu1 %2091 }
 0x83b   :  { %v12123_v31 = vadd.f32 %v2092_v32, %v2077_v26  ;;  %v2354_v32 = vld [vmem:[#allocation2 + $0x7b] sm:$0x1] }
 0x83d   :  { %10001 = vtanh.f32 %v12123_v31 }
 0x847   :  { %v10002_v47 = vpop.eup %10001 }
 0x848   :  { %2103 = vrot.lane.b32.xlu1 %v10002_v47, %s11332_s20 }
 0x8aa   :  { %v2106_v51 = vpop.permute.xlu0 %2105 }
 0x8ab   :  { %v12127_v54 = vmul.f32 %v2106_v51, %v2076_v59 }
 0x8ad   :  { %2357 = vrot.lane.b32.xlu0 %v12127_v54, %s11333_s21 }
 0x8ba   :  { %v2104_v29 = vpop.permute.xlu1 %2103 }
 0x8bb   :  { %v12131_v52 = vmul.f32 %v2104_v29, %v2075_v13  ;;  %v2352_v13 = vld [vmem:[#allocation2 + $0x6b] sm:$0x1] }
 0x8bd   :  { %2355 = vrot.lane.b32.xlu1 %v12131_v52, %s11333_s21 }
 0x91f   :  { %v2358_v15 = vpop.permute.xlu0 %2357 }
 0x92f   :  { %v2356_v7 = vpop.permute.xlu1 %2355 }
 0x930   :  { %9341 = vmatprep.mubr.msk.f32.mxu1 %vm506_vm10, %v2356_v7 }
 0x931   :  { %9342 = vmatmul.mubr.msk.f32.vlgmr.msra.gmra.mrb[2].mxu1 %vm506_vm10, %v2358_v15 }
 0x932   :  { %9562 = vmatpush3.bf16.msra.mxu1 %v11398_v5 }
 0x933   :  { %9564 = vmatprep.subr.bf16.mxu1 %v11416_v10 }
 0x936   :  { %9566 = vmatpush3.bf16.msra.mxu1 %v11416_v10 }
 0x937   :  { %9576 = vmatprep.subr.bf16.mxu1 %v11398_v5 }
 0xa04   :  { %v9343_v59 = vpop.f32.mrb[2].mxu1 }
 0xa05   :  { %v2447_v60 = vrot.slane %v9343_v59, 1  ;;  %v2448_v20 = vrot.slane %v9343_v59, 2  ;;  %v12141_v8 = vpop.f32.mrb[3].mxu1  ;;  %v2449_v24 = vrot.slane %v9343_v59, 3  ;;  %v2478_v48 = vadd.f32 %v9343_v59, %v2347_v2 }
 0xa06   :  { %v2440_v61 = vrot.slane %v12141_v8, 1  ;;  %v2441_v21 = vrot.slane %v12141_v8, 2  ;;  %v2442_v37 = vrot.slane %v12141_v8, 3  ;;  %v2470_v28 = vadd.f32 %v12141_v8, %v2339_v33 }
 0xa07   :  { %v2479_v50 = vadd.f32 %v2447_v60, %v2348_v16  ;;  %v2480_v63 = vadd.f32 %v2448_v20, %v2349_v17  ;;  %v2481_v38 = vadd.f32 %v2449_v24, %v2350_v18  ;;  %v8932_v40 = vmul.f32 -1.442695, %v2478_v48 }
 0xa08   :  { %10003 = vtanh.f32 %v2478_v48  ;;  %v2471_v14 = vadd.f32 %v2440_v61, %v2340_v22  ;;  %v2450_v3 = vrot.slane %v9343_v59, 4  ;;  %v2472_v49 = vadd.f32 %v2441_v21, %v2341_v55 }
 0xa09   :  { %v8933_v62 = vmul.f32 -1.442695, %v2479_v50  ;;  %10005 = vtanh.f32 %v2479_v50  ;;  %v8934_v0 = vmul.f32 -1.442695, %v2480_v63  ;;  %v8935_v36 = vmul.f32 -1.442695, %v2481_v38 }
 0xa0a   :  { %10007 = vpow2.f32 %v8932_v40  ;;  %v2451_v35 = vrot.slane %v9343_v59, 5  ;;  %v12147_v43 = vadd.f32 %v2442_v37, %v2342_v44  ;;  %v8924_v42 = vmul.f32 -1.442695, %v2470_v28  ;;  %v2344_v44 = vld [vmem:[#allocation2 + $0x2b] sm:$0x1] }
 0xa0b   :  { %10009 = vtanh.f32 %v2480_v63  ;;  %v2452_v25 = vrot.slane %v9343_v59, 6  ;;  %v8925_v4 = vmul.f32 -1.442695, %v2471_v14  ;;  %v8926_v58 = vmul.f32 -1.442695, %v2472_v49 }
 0xa0c   :  { %10011 = vpow2.f32 %v8933_v62  ;;  %v2453_v6 = vrot.slane %v9343_v59, 7  ;;  %v2482_v30 = vadd.f32 %v2450_v3, %v2351_v46  ;;  %v8927_v9 = vmul.f32 -1.442695, %v12147_v43 }
 0xa0d   :  { %10013 = vpow2.f32 %v8934_v0  ;;  %v2483_v1 = vadd.f32 %v2451_v35, %v2352_v13  ;;  %v2484_v41 = vadd.f32 %v2452_v25, %v2353_v12  ;;  %v2444_v0 = vrot.slane %v12141_v8, 5 }
 0xa0e   :  { %10015 = vpow2.f32 %v8935_v36  ;;  %v2485_v51 = vadd.f32 %v2453_v6, %v2354_v32  ;;  %v8936_v29 = vmul.f32 -1.442695, %v2482_v30  ;;  %v2445_v33 = vrot.slane %v12141_v8, 6  ;;  %v2343_v36 = vld [vmem:[#allocation2 + $0x23] sm:$0x1] }
 0xa0f   :  { %10017 = vtanh.f32 %v2470_v28  ;;  %v8937_v15 = vmul.f32 -1.442695, %v2483_v1  ;;  %v8938_v2 = vmul.f32 -1.442695, %v2484_v41  ;;  %v2446_v22 = vrot.slane %v12141_v8, 7 }
 0xa10   :  { %10019 = vtanh.f32 %v2471_v14  ;;  %v8939_v48 = vmul.f32 -1.442695, %v2485_v51  ;;  %v2475_v25 = vadd.f32 %v2444_v0, %v2344_v44 }
 0xa11   :  { %10021 = vtanh.f32 %v2472_v49  ;;  %v2345_v49 = vld [vmem:[#allocation2 + $0x33] sm:$0x1] }
 0xa12   :  { %v12150_v45 = vpop.eup %10003  ;;  %10023 = vpow2.f32 %v8924_v42  ;;  %v2346_v42 = vld [vmem:[#allocation2 + $0x3b] sm:$0x1]  ;;  %v8929_v32 = vmul.f32 -1.442695, %v2475_v25 }
 0xa13   :  { %v12152_v26 = vpop.eup %10005  ;;  %10025 = vpow2.f32 %v8925_v4  ;;  %v12167_v4 = vadd.f32 %v2445_v33, %v2345_v49 }
 0xa14   :  { %v10008_v47 = vpop.eup %10007  ;;  %10027 = vpow2.f32 %v8926_v58  ;;  %v2628_v55 = vrot.slane %v12152_v26, 7 }
 0xa15   :  { %v12154_v7 = vpop.eup %10009  ;;  %10029 = vpow2.f32 %v8927_v9  ;;  %v2558_v20 = vadd.f32 1.0, %v10008_v47 }
 0xa16   :  { %v10012_v59 = vpop.eup %10011  ;;  %10031 = vtanh.f32 %v2481_v38  ;;  %v2443_v38 = vrot.slane %v12141_v8, 4  ;;  %v2630_v13 = vrot.slane %v12154_v7, 6  ;;  %v12170_v8 = vadd.f32 %v2446_v22, %v2346_v42 }
 0xa17   :  { %v10014_v60 = vpop.eup %10013  ;;  %10033 = vtanh.f32 %v2482_v30  ;;  %v2559_v17 = vadd.f32 1.0, %v10012_v59  ;;  %v2629_v9 = vsel %vm762_vm0, %v2628_v55, %v12150_v45 }
 0xa18   :  { %v10016_v24 = vpop.eup %10015  ;;  %10035 = vpow2.f32 %v8936_v29  ;;  %v2560_v18 = vadd.f32 1.0, %v10014_v60  ;;  %v2474_v14 = vadd.f32 %v2443_v38, %v2343_v36  ;;  %v2631_v29 = vsel %vm765_vm1, %v2630_v13, %v2629_v9 }
 0xa19   :  { %v12156_v16 = vpop.eup %10017  ;;  %10037 = vpow2.f32 %v8937_v15  ;;  %v2561_v61 = vadd.f32 1.0, %v10016_v24  ;;  %v8931_v45 = vmul.f32 -1.442695, %v12170_v8 }
 0xa1a   :  { %v12158_v50 = vpop.eup %10019  ;;  %10039 = vpow2.f32 %v8938_v2  ;;  %v8928_v12 = vmul.f32 -1.442695, %v2474_v14 }
 0xa1b   :  { %v12160_v63 = vpop.eup %10021  ;;  %10041 = vrcp.f32 %v2558_v20 }
 0xa1c   :  { %v10024_v40 = vpop.eup %10023  ;;  %10043 = vpow2.f32 %v8939_v48  ;;  %v2616_v9 = vrot.slane %v12160_v63, 6 }
 0xa1d   :  { %v10026_v62 = vpop.eup %10025  ;;  %10045 = vrcp.f32 %v2559_v17 }
 0xa1e   :  { %v10028_v21 = vpop.eup %10027  ;;  %10047 = vrcp.f32 %v2560_v18  ;;  %v2551_v20 = vadd.f32 1.0, %v10026_v62 }
 0xa1f   :  { %v10030_v37 = vpop.eup %10029  ;;  %10049 = vtanh.f32 %v2483_v1  ;;  %v2552_v18 = vadd.f32 1.0, %v10028_v21 }
 0xa20   :  { %v10032_v28 = vpop.eup %10031  ;;  %10051 = vrcp.f32 %v2561_v61  ;;  %v2550_v61 = vadd.f32 1.0, %v10024_v40  ;;  %v2553_v22 = vadd.f32 1.0, %v10030_v37  ;;  %v2614_v40 = vrot.slane %v12158_v50, 7 }
 0xa21   :  { %v10034_v3 = vpop.eup %10033  ;;  %10053 = vtanh.f32 %v2484_v41  ;;  %v2632_v15 = vrot.slane %v10032_v28, 5 }
 0xa22   :  { %v10036_v35 = vpop.eup %10035  ;;  %10055 = vtanh.f32 %v2485_v51  ;;  %v2634_v0 = vrot.slane %v10034_v3, 4 }
 0xa23   :  { %v10038_v46 = vpop.eup %10037  ;;  %v2562_v58 = vadd.f32 1.0, %v10036_v35  ;;  %10057 = vtanh.f32 %v12147_v43  ;;  %v8930_v43 = vmul.f32 -1.442695, %v12167_v4  ;;  %v2633_v48 = vsel %vm768_vm2, %v2632_v15, %v2631_v29 }
 0xa24   :  { %v10040_v6 = vpop.eup %10039  ;;  %v2563_v30 = vadd.f32 1.0, %v10038_v46  ;;  %10059 = vtanh.f32 %v2474_v14  ;;  %v2635_v55 = vsel %vm771_vm5, %v2634_v0, %v2633_v48 }
 0xa25   :  { %v10042_v1 = vpop.eup %10041  ;;  %v2564_v41 = vadd.f32 1.0, %v10040_v6  ;;  %10061 = vrcp.f32 %v2562_v58 }
 0xa26   :  { %v10044_v26 = vpop.eup %10043  ;;  %10063 = vrcp.f32 %v2563_v30 }
 0xa27   :  { %v10046_v47 = vpop.eup %10045  ;;  %v2565_v51 = vadd.f32 1.0, %v10044_v26  ;;  %10065 = vrcp.f32 %v2564_v41  ;;  %v2615_v26 = vsel %vm762_vm0, %v2614_v40, %v12156_v16 }
 0xa28   :  { %v10048_v7 = vpop.eup %10047  ;;  %v2674_v59 = vrot.slane %v10046_v47, 7  ;;  %10067 = vpow2.f32 %v8928_v12 }
 0xa29   :  { %v10050_v2 = vpop.eup %10049  ;;  %10069 = vrcp.f32 %v2565_v51  ;;  %v2676_v60 = vrot.slane %v10048_v7, 6 }
 0xa2a   :  { %v10052_v24 = vpop.eup %10051  ;;  %v2675_v17 = vsel %vm762_vm0, %v2674_v59, %v10042_v1  ;;  %10071 = vpow2.f32 %v8929_v32  ;;  %v2636_v44 = vrot.slane %v10050_v2, 3 }
 0xa2b   :  { %v10054_v38 = vpop.eup %10053  ;;  %10073 = vpow2.f32 %v8930_v43  ;;  %v2677_v36 = vsel %vm765_vm1, %v2676_v60, %v2675_v17  ;;  %v2678_v62 = vrot.slane %v10052_v24, 5  ;;  %v2617_v60 = vsel %vm765_vm1, %v2616_v9, %v2615_v26 }
 0xa2c   :  { %v10056_v33 = vpop.eup %10055  ;;  %10075 = vpow2.f32 %v8931_v45  ;;  %v2637_v35 = vsel %vm774_vm6, %v2636_v44, %v2635_v55  ;;  %v2638_v46 = vrot.slane %v10054_v38, 2 }
 0xa2d   :  { %v10058_v28 = vpop.eup %10057  ;;  %10077 = vrcp.f32 %v2551_v20  ;;  %v2679_v21 = vsel %vm768_vm2, %v2678_v62, %v2677_v36  ;;  %v2640_v47 = vrot.slane %v10056_v33, 1 }
 0xa2e   :  { %v10060_v14 = vpop.eup %10059  ;;  %10079 = vrcp.f32 %v2552_v18  ;;  %v2639_v1 = vsel %vm777_vm7, %v2638_v46, %v2637_v35  ;;  %v2618_v20 = vrot.slane %v10058_v28, 5 }
 0xa2f   :  { %v10062_v49 = vpop.eup %10061  ;;  %10081 = vrcp.f32 %v2550_v61  ;;  %v2641_v7 = vsel %vm780_vm8, %v2640_v47, %v2639_v1  ;;  %v2620_v0 = vrot.slane %v10060_v14, 4 }
 0xa30   :  { %v10064_v3 = vpop.eup %10063  ;;  %v2680_v42 = vrot.slane %v10062_v49, 4  ;;  %10083 = vrcp.f32 %v2553_v22 }
 0xa31   :  { %v10066_v37 = vpop.eup %10065  ;;  %v2682_v58 = vrot.slane %v10064_v3, 3  ;;  %10085 = vtanh.f32 %v2475_v25 }
 0xa32   :  { %v10068_v13 = vpop.eup %10067  ;;  %v2681_v6 = vsel %vm771_vm5, %v2680_v42, %v2679_v21  ;;  %v2684_v30 = vrot.slane %v10066_v37, 2  ;;  %10087 = vtanh.f32 %v12167_v4 }
 0xa33   :  { %v10070_v12 = vpop.eup %10069  ;;  %v2683_v50 = vsel %vm774_vm6, %v2682_v58, %v2681_v6  ;;  %v2554_v41 = vadd.f32 1.0, %v10068_v13 }
 0xa34   :  { %v10072_v32 = vpop.eup %10071  ;;  %v2685_v51 = vsel %vm777_vm7, %v2684_v30, %v2683_v50  ;;  %v2686_v25 = vrot.slane %v10070_v12, 1 }
 0xa35   :  { %v10074_v29 = vpop.eup %10073  ;;  %v2555_v43 = vadd.f32 1.0, %v10072_v32  ;;  %10089 = vrcp.f32 %v2554_v41 }
 0xa36   :  { %v10076_v63 = vpop.eup %10075  ;;  %v2687_v15 = vsel %vm780_vm8, %v2686_v25, %v2685_v51  ;;  %10091 = vtanh.f32 %v12170_v8  ;;  %v2556_v59 = vadd.f32 1.0, %v10074_v29  ;;  %v2619_v8 = vsel %vm768_vm2, %v2618_v20, %v2617_v60 }
 0xa37   :  { %v10078_v45 = vpop.eup %10077  ;;  %v2691_v16 = vsel %vm11893_vm9, %v2641_v7, %v2687_v15  ;;  %v2557_v2 = vadd.f32 1.0, %v10076_v63  ;;  %10093 = vrcp.f32 %v2555_v43  ;;  %v2621_v36 = vsel %vm771_vm5, %v2620_v0, %v2619_v8  ;;  %v2964_v0 = vld [vmem:[#allocation2 + $0x54] sm:$0x1] }
 0xa38   :  { %v10080_v4 = vpop.eup %10079  ;;  %2698 = vrot.lane.b32.xlu0 %v2691_v16, %s11332_s20  ;;  %10095 = vrcp.f32 %v2556_v59  ;;  %v2660_v24 = vrot.slane %v10078_v45, 7  ;;  %v2693_v25 = vmul.f32 %v2691_v16, %v12118_v27 }
 0xa39   :  { %v10082_v48 = vpop.eup %10081  ;;  %10097 = vrcp.f32 %v2557_v2  ;;  %v2662_v17 = vrot.slane %v10080_v4, 6 }
 0xa3a   :  { %v10084_v18 = vpop.eup %10083  ;;  %v2661_v38 = vsel %vm762_vm0, %v2660_v24, %v10082_v48  ;;  %v2962_v24 = vld [vmem:[#allocation2 + $0x44] sm:$0x1] }
 0xa3b   :  { %v10086_v61 = vpop.eup %10085  ;;  %v2663_v33 = vsel %vm765_vm1, %v2662_v17, %v2661_v38  ;;  %v2664_v22 = vrot.slane %v10084_v18, 5 }
 0xa3c   :  { %v10088_v55 = vpop.eup %10087  ;;  %v2622_v62 = vrot.slane %v10086_v61, 3  ;;  %v2963_v61 = vld [vmem:[#allocation2 + $0x4c] sm:$0x1] }
 0xa3d   :  { %v2665_v28 = vsel %vm768_vm2, %v2664_v22, %v2663_v33  ;;  %v2624_v35 = vrot.slane %v10088_v55, 2 }
 0xa3e   :  { %v2623_v21 = vsel %vm774_vm6, %v2622_v62, %v2621_v36  ;;  %v2965_v36 = vld [vmem:[#allocation2 + $0x5c] sm:$0x1] }
 0xa3f   :  { %v10090_v44 = vpop.eup %10089  ;;  %v2625_v58 = vsel %vm777_vm7, %v2624_v35, %v2623_v21 }
 0xa40   :  { %v10092_v49 = vpop.eup %10091  ;;  %v2666_v40 = vrot.slane %v10090_v44, 4 }
 0xa41   :  { %v10094_v3 = vpop.eup %10093  ;;  %v2626_v6 = vrot.slane %v10092_v49, 1 }
 0xa42   :  { %v10096_v42 = vpop.eup %10095  ;;  %v2667_v37 = vsel %vm771_vm5, %v2666_v40, %v2665_v28  ;;  %v2668_v14 = vrot.slane %v10094_v3, 3  ;;  %v2954_v40 = vld [vmem:[#allocation2 + $0x4] sm:$0x1] }
 0xa43   :  { %v10098_v46 = vpop.eup %10097  ;;  %v2670_v13 = vrot.slane %v10096_v42, 2  ;;  %v2627_v1 = vsel %vm780_vm8, %v2626_v6, %v2625_v58  ;;  %v2955_v42 = vld [vmem:[#allocation2 + $0xc] sm:$0x1] }
 0xa44   :  { %v2669_v30 = vsel %vm774_vm6, %v2668_v14, %v2667_v37  ;;  %v2672_v9 = vrot.slane %v10098_v46, 1  ;;  %v2956_v14 = vld [vmem:[#allocation2 + $0x14] sm:$0x1] }
 0xa45   :  { %v2671_v12 = vsel %vm777_vm7, %v2670_v13, %v2669_v30  ;;  %v2957_v13 = vld [vmem:[#allocation2 + $0x1c] sm:$0x1] }
 0xa46   :  { %v2673_v50 = vsel %vm780_vm8, %v2672_v9, %v2671_v12 }
 0xa47   :  { %v2690_v41 = vsel %vm11893_vm9, %v2627_v1, %v2673_v50 }
 0xa48   :  { %2696 = vrot.lane.b32.xlu1 %v2690_v41, %s11332_s20  ;;  %v2692_v7 = vmul.f32 %v2690_v41, %v12123_v31 }
 0xaaa   :  { %v2699_v26 = vpop.permute.xlu0 %2698 }
 0xaab   :  { %v2703_v32 = vmul.f32 %v2699_v26, %v2691_v16 }
 0xaad   :  { %2708 = vrot.lane.b32.xlu0 %v2703_v32, %s11333_s21  ;;  %v2967_v32 = vld [vmem:[#allocation2 + $0x6c] sm:$0x1] }
 0xaba   :  { %v2697_v47 = vpop.permute.xlu1 %2696 }
 0xabb   :  { %v2702_v51 = vmul.f32 %v2697_v47, %v2690_v41 }
 0xabd   :  { %2706 = vrot.lane.b32.xlu1 %v2702_v51, %s11333_s21 }
 0xb1f   :  { %v2709_v29 = vpop.permute.xlu0 %2708 }
 0xb20   :  { %v12218_v43 = vadd.f32 %v2709_v29, %v2693_v25  ;;  %v2968_v29 = vld [vmem:[#allocation2 + $0x74] sm:$0x1] }
 0xb22   :  { %10099 = vtanh.f32 %v12218_v43 }
 0xb2c   :  { %v10100_v63 = vpop.eup %10099 }
 0xb2d   :  { %2720 = vrot.lane.b32.xlu0 %v10100_v63, %s11332_s20 }
 0xb2f   :  { %v2707_v15 = vpop.permute.xlu1 %2706 }
 0xb30   :  { %v12223_v59 = vadd.f32 %v2707_v15, %v2692_v7 }
 0xb32   :  { %10101 = vtanh.f32 %v12223_v59 }
 0xb3c   :  { %v10102_v45 = vpop.eup %10101 }
 0xb3d   :  { %2718 = vrot.lane.b32.xlu1 %v10102_v45, %s11332_s20 }
 0xb9f   :  { %v2721_v2 = vpop.permute.xlu0 %2720 }
 0xba0   :  { %v12227_v27 = vmul.f32 %v2721_v2, %v2691_v16  ;;  %v2969_v2 = vld [vmem:[#allocation2 + $0x7c] sm:$0x1] }
 0xba2   :  { %2972 = vrot.lane.b32.xlu0 %v12227_v27, %s11333_s21 }
 0xbaf   :  { %v2719_v60 = vpop.permute.xlu1 %2718 }
 0xbb0   :  { %v12231_v4 = vmul.f32 %v2719_v60, %v2690_v41  ;;  %v2966_v41 = vld [vmem:[#allocation2 + $0x64] sm:$0x1] }
 0xbb2   :  { %2970 = vrot.lane.b32.xlu1 %v12231_v4, %s11333_s21 }
 0xc14   :  { %v2973_v20 = vpop.permute.xlu0 %2972 }
 0xc24   :  { %v2971_v31 = vpop.permute.xlu1 %2970 }
 0xc25   :  { %9352 = vmatprep.mubr.msk.f32.mxu0 %vm506_vm10, %v2971_v31 }
 0xc26   :  { %9353 = vmatmul.mubr.msk.f32.vlgmr.msra.gmra.mrb[4].mxu0 %vm506_vm10, %v2973_v20 }
 0xc27   :  { %9570 = vmatpush3.bf16.msra.mxu0 %v11398_v5 }
 0xc28   :  { %9572 = vmatprep.subr.bf16.mxu0 %v11416_v10 }
 0xc2b   :  { %9574 = vmatpush3.bf16.msra.mxu0 %v11416_v10 }
 0xcf9   :  { %v9354_v16 = vpop.f32.mrb[4].mxu0 }
 0xcfa   :  { %v3062_v48 = vrot.slane %v9354_v16, 1  ;;  %v3063_v17 = vrot.slane %v9354_v16, 2  ;;  %v12240_v18 = vpop.f32.mrb[5].mxu0  ;;  %v3064_v8 = vrot.slane %v9354_v16, 3  ;;  %v3093_v38 = vadd.f32 %v9354_v16, %v2962_v24 }
 0xcfb   :  { %v3055_v44 = vrot.slane %v12240_v18, 1  ;;  %v3056_v49 = vrot.slane %v12240_v18, 2  ;;  %v3057_v3 = vrot.slane %v12240_v18, 3  ;;  %v3085_v37 = vadd.f32 %v12240_v18, %v2954_v40 }
 0xcfc   :  { %v3094_v33 = vadd.f32 %v3062_v48, %v2963_v61  ;;  %v3095_v22 = vadd.f32 %v3063_v17, %v2964_v0  ;;  %v3096_v55 = vadd.f32 %v3064_v8, %v2965_v36  ;;  %v8950_v62 = vmul.f32 -1.442695, %v3093_v38 }
 0xcfd   :  { %10103 = vtanh.f32 %v3093_v38  ;;  %v3086_v46 = vadd.f32 %v3055_v44, %v2955_v42  ;;  %v3065_v58 = vrot.slane %v9354_v16, 4  ;;  %v3087_v6 = vadd.f32 %v3056_v49, %v2956_v14 }
 0xcfe   :  { %v8951_v28 = vmul.f32 -1.442695, %v3094_v33  ;;  %10105 = vtanh.f32 %v3094_v33  ;;  %v8952_v21 = vmul.f32 -1.442695, %v3095_v22  ;;  %v8953_v35 = vmul.f32 -1.442695, %v3096_v55 }
 0xcff   :  { %10107 = vpow2.f32 %v8950_v62  ;;  %v3066_v30 = vrot.slane %v9354_v16, 5  ;;  %v12246_v9 = vadd.f32 %v3057_v3, %v2957_v13  ;;  %v8942_v12 = vmul.f32 -1.442695, %v3085_v37 }
 0xd00   :  { %10109 = vtanh.f32 %v3095_v22  ;;  %v3067_v1 = vrot.slane %v9354_v16, 6  ;;  %v8943_v50 = vmul.f32 -1.442695, %v3086_v46  ;;  %v8944_v26 = vmul.f32 -1.442695, %v3087_v6 }
 0xd01   :  { %10111 = vpow2.f32 %v8951_v28  ;;  %v3068_v47 = vrot.slane %v9354_v16, 7  ;;  %v3097_v51 = vadd.f32 %v3065_v58, %v2966_v41  ;;  %v8945_v25 = vmul.f32 -1.442695, %v12246_v9 }
 0xd02   :  { %10113 = vpow2.f32 %v8952_v21  ;;  %v3098_v63 = vadd.f32 %v3066_v30, %v2967_v32  ;;  %v3099_v15 = vadd.f32 %v3067_v1, %v2968_v29  ;;  %v3059_v3 = vrot.slane %v12240_v18, 5  ;;  %v2959_v30 = vld [vmem:[#allocation2 + $0x2c] sm:$0x1] }
 0xd03   :  { %10115 = vpow2.f32 %v8953_v35  ;;  %v3100_v31 = vadd.f32 %v3068_v47, %v2969_v2  ;;  %v8954_v20 = vmul.f32 -1.442695, %v3097_v51  ;;  %v3060_v35 = vrot.slane %v12240_v18, 6 }
 0xd04   :  { %10117 = vtanh.f32 %v3085_v37  ;;  %v8955_v16 = vmul.f32 -1.442695, %v3098_v63  ;;  %v8956_v17 = vmul.f32 -1.442695, %v3099_v15  ;;  %v2958_v37 = vld [vmem:[#allocation2 + $0x24] sm:$0x1]  ;;  %v3090_v41 = vadd.f32 %v3059_v3, %v2959_v30 }
 0xd05   :  { %10119 = vtanh.f32 %v3086_v46  ;;  %v8957_v0 = vmul.f32 -1.442695, %v3100_v31  ;;  %v3061_v14 = vrot.slane %v12240_v18, 7 }
 0xd06   :  { %10121 = vtanh.f32 %v3087_v6 }
 0xd07   :  { %v12249_v7 = vpop.eup %10103  ;;  %10123 = vpow2.f32 %v8942_v12  ;;  %v2960_v12 = vld [vmem:[#allocation2 + $0x34] sm:$0x1] }
 0xd08   :  { %v12251_v45 = vpop.eup %10105  ;;  %10125 = vpow2.f32 %v8943_v50  ;;  %v2961_v50 = vld [vmem:[#allocation2 + $0x3c] sm:$0x1] }
 0xd09   :  { %v10108_v60 = vpop.eup %10107  ;;  %10127 = vpow2.f32 %v8944_v26  ;;  %v3243_v58 = vrot.slane %v12251_v45, 7  ;;  %v12266_v26 = vadd.f32 %v3060_v35, %v2960_v12 }
 0xd0a   :  { %v12253_v24 = vpop.eup %10109  ;;  %10129 = vpow2.f32 %v8945_v25  ;;  %v3173_v38 = vadd.f32 1.0, %v10108_v60 }
 0xd0b   :  { %v10112_v48 = vpop.eup %10111  ;;  %10131 = vtanh.f32 %v3096_v55  ;;  %v3058_v55 = vrot.slane %v12240_v18, 4  ;;  %v12269_v18 = vadd.f32 %v3061_v14, %v2961_v50 }
 0xd0c   :  { %v10114_v8 = vpop.eup %10113  ;;  %10133 = vtanh.f32 %v3097_v51  ;;  %v3174_v36 = vadd.f32 1.0, %v10112_v48  ;;  %v3245_v51 = vrot.slane %v12253_v24, 6 }
 0xd0d   :  { %v10116_v61 = vpop.eup %10115  ;;  %10135 = vpow2.f32 %v8954_v20  ;;  %v3175_v62 = vadd.f32 1.0, %v10114_v8  ;;  %v3089_v13 = vadd.f32 %v3058_v55, %v2958_v37 }
 0xd0e   :  { %v12255_v33 = vpop.eup %10117  ;;  %10137 = vpow2.f32 %v8955_v16  ;;  %v3176_v49 = vadd.f32 1.0, %v10116_v61 }
 0xd0f   :  { %v12257_v22 = vpop.eup %10119  ;;  %10139 = vpow2.f32 %v8956_v17 }
 0xd10   :  { %v12259_v44 = vpop.eup %10121  ;;  %10141 = vrcp.f32 %v3173_v38 }
 0xd11   :  { %v10124_v28 = vpop.eup %10123  ;;  %10143 = vpow2.f32 %v8957_v0 }
 0xd12   :  { %v10126_v21 = vpop.eup %10125  ;;  %10145 = vrcp.f32 %v3174_v36  ;;  %v3165_v35 = vadd.f32 1.0, %v10124_v28  ;;  %v3229_v28 = vrot.slane %v12257_v22, 7 }
 0xd13   :  { %v10128_v40 = vpop.eup %10127  ;;  %10147 = vrcp.f32 %v3175_v62  ;;  %v3166_v0 = vadd.f32 1.0, %v10126_v21 }
 0xd14   :  { %v10130_v42 = vpop.eup %10129  ;;  %10149 = vtanh.f32 %v3098_v63  ;;  %v3244_v63 = vsel %vm762_vm0, %v3243_v58, %v12249_v7  ;;  %v8949_v7 = vmul.f32 -1.442695, %v12269_v18 }
 0xd15   :  { %v10132_v46 = vpop.eup %10131  ;;  %10151 = vrcp.f32 %v3176_v49  ;;  %v3246_v24 = vsel %vm765_vm1, %v3245_v51, %v3244_v63  ;;  %v3167_v49 = vadd.f32 1.0, %v10128_v40  ;;  %v3168_v58 = vadd.f32 1.0, %v10130_v42 }
 0xd16   :  { %v10134_v6 = vpop.eup %10133  ;;  %10153 = vtanh.f32 %v3099_v15  ;;  %v8946_v15 = vmul.f32 -1.442695, %v3089_v13  ;;  %v3247_v17 = vrot.slane %v10132_v46, 5 }
 0xd17   :  { %v10136_v1 = vpop.eup %10135  ;;  %10155 = vtanh.f32 %v3100_v31  ;;  %v8947_v31 = vmul.f32 -1.442695, %v3090_v41  ;;  %v3249_v37 = vrot.slane %v10134_v6, 4 }
 0xd18   :  { %v10138_v32 = vpop.eup %10137  ;;  %v3177_v47 = vadd.f32 1.0, %v10136_v1  ;;  %10157 = vtanh.f32 %v12246_v9  ;;  %v8948_v9 = vmul.f32 -1.442695, %v12266_v26  ;;  %v3248_v62 = vsel %vm768_vm2, %v3247_v17, %v3246_v24 }
 0xd19   :  { %v10140_v25 = vpop.eup %10139  ;;  %v3178_v29 = vadd.f32 1.0, %v10138_v32  ;;  %10159 = vtanh.f32 %v3089_v13  ;;  %v3250_v30 = vsel %vm771_vm5, %v3249_v37, %v3248_v62 }
 0xd1a   :  { %v10142_v45 = vpop.eup %10141  ;;  %v3179_v2 = vadd.f32 1.0, %v10140_v25  ;;  %10161 = vrcp.f32 %v3177_v47 }
 0xd1b   :  { %v10144_v60 = vpop.eup %10143  ;;  %10163 = vrcp.f32 %v3178_v29 }
 0xd1c   :  { %v10146_v20 = vpop.eup %10145  ;;  %v3180_v16 = vadd.f32 1.0, %v10144_v60  ;;  %10165 = vrcp.f32 %v3179_v2 }
 0xd1d   :  { %v10148_v48 = vpop.eup %10147  ;;  %v3289_v8 = vrot.slane %v10146_v20, 7  ;;  %10167 = vpow2.f32 %v8946_v15  ;;  %v3230_v20 = vsel %vm762_vm0, %v3229_v28, %v12255_v33 }
 0xd1e   :  { %v10150_v38 = vpop.eup %10149  ;;  %10169 = vrcp.f32 %v3180_v16  ;;  %v3291_v61 = vrot.slane %v10148_v48, 6 }
 0xd1f   :  { %v10152_v36 = vpop.eup %10151  ;;  %v3290_v55 = vsel %vm762_vm0, %v3289_v8, %v10142_v45  ;;  %10171 = vpow2.f32 %v8947_v31  ;;  %v3251_v1 = vrot.slane %v10150_v38, 3  ;;  %v3231_v45 = vrot.slane %v12259_v44, 6 }
 0xd20   :  { %v10154_v3 = vpop.eup %10153  ;;  %10173 = vpow2.f32 %v8948_v9  ;;  %v3292_v46 = vsel %vm765_vm1, %v3291_v61, %v3290_v55  ;;  %v3293_v21 = vrot.slane %v10152_v36, 5 }
 0xd21   :  { %v10156_v14 = vpop.eup %10155  ;;  %10175 = vpow2.f32 %v8949_v7  ;;  %v3252_v32 = vsel %vm774_vm6, %v3251_v1, %v3250_v30  ;;  %v3253_v51 = vrot.slane %v10154_v3, 2  ;;  %v3232_v36 = vsel %vm765_vm1, %v3231_v45, %v3230_v20 }
 0xd22   :  { %v10158_v13 = vpop.eup %10157  ;;  %10177 = vrcp.f32 %v3166_v0  ;;  %v3294_v40 = vsel %vm768_vm2, %v3293_v21, %v3292_v46  ;;  %v3255_v24 = vrot.slane %v10156_v14, 1 }
 0xd23   :  { %v10160_v12 = vpop.eup %10159  ;;  %10179 = vrcp.f32 %v3167_v49  ;;  %v3254_v60 = vsel %vm777_vm7, %v3253_v51, %v3252_v32  ;;  %v3233_v62 = vrot.slane %v10158_v13, 5 }
 0xd24   :  { %v10162_v50 = vpop.eup %10161  ;;  %10181 = vrcp.f32 %v3165_v35  ;;  %v3256_v8 = vsel %vm780_vm8, %v3255_v24, %v3254_v60  ;;  %v3235_v46 = vrot.slane %v10160_v12, 4 }
 0xd25   :  { %v10164_v6 = vpop.eup %10163  ;;  %v3295_v47 = vrot.slane %v10162_v50, 4  ;;  %10183 = vrcp.f32 %v3168_v58 }
 0xd26   :  { %v10166_v42 = vpop.eup %10165  ;;  %v3297_v25 = vrot.slane %v10164_v6, 3  ;;  %10185 = vtanh.f32 %v3090_v41 }
 0xd27   :  { %v10168_v29 = vpop.eup %10167  ;;  %v3296_v63 = vsel %vm771_vm5, %v3295_v47, %v3294_v40  ;;  %v3299_v15 = vrot.slane %v10166_v42, 2  ;;  %10187 = vtanh.f32 %v12266_v26 }
 0xd28   :  { %v10170_v2 = vpop.eup %10169  ;;  %v3298_v22 = vsel %vm774_vm6, %v3297_v25, %v3296_v63  ;;  %v3169_v31 = vadd.f32 1.0, %v10168_v29 }
 0xd29   :  { %v10172_v16 = vpop.eup %10171  ;;  %v3300_v9 = vsel %vm777_vm7, %v3299_v15, %v3298_v22  ;;  %v3301_v41 = vrot.slane %v10170_v2, 1 }
 0xd2a   :  { %v10174_v48 = vpop.eup %10173  ;;  %v3170_v17 = vadd.f32 1.0, %v10172_v16  ;;  %10189 = vrcp.f32 %v3169_v31 }
 0xd2b   :  { %v10176_v44 = vpop.eup %10175  ;;  %v3302_v7 = vsel %vm780_vm8, %v3301_v41, %v3300_v9  ;;  %10191 = vtanh.f32 %v12269_v18  ;;  %v3171_v38 = vadd.f32 1.0, %v10174_v48  ;;  %v3234_v18 = vsel %vm768_vm2, %v3233_v62, %v3232_v36 }
 0xd2c   :  { %v10178_v61 = vpop.eup %10177  ;;  %v3306_v33 = vsel %vm11893_vm9, %v3256_v8, %v3302_v7  ;;  %v3172_v0 = vadd.f32 1.0, %v10176_v44  ;;  %10193 = vrcp.f32 %v3170_v17  ;;  %v3236_v30 = vsel %vm771_vm5, %v3235_v46, %v3234_v18 }
 0xd2d   :  { %v10180_v26 = vpop.eup %10179  ;;  %3313 = vrot.lane.b32.xlu0 %v3306_v33, %s11332_s20  ;;  %10195 = vrcp.f32 %v3171_v38  ;;  %v3275_v55 = vrot.slane %v10178_v61, 7  ;;  %v3308_v17 = vmul.f32 %v3306_v33, %v12218_v43 }
 0xd2e   :  { %v10182_v49 = vpop.eup %10181  ;;  %10197 = vrcp.f32 %v3172_v0  ;;  %v3277_v3 = vrot.slane %v10180_v26, 6 }
 0xd2f   :  { %v10184_v35 = vpop.eup %10183  ;;  %v3276_v37 = vsel %vm762_vm0, %v3275_v55, %v10182_v49 }
 0xd30   :  { %v10186_v14 = vpop.eup %10185  ;;  %v3278_v58 = vsel %vm765_vm1, %v3277_v3, %v3276_v37  ;;  %v3279_v21 = vrot.slane %v10184_v35, 5  ;;  %v3577_v3 = vld [vmem:[#allocation2 + $0x45] sm:$0x1] }
 0xd31   :  { %v10188_v1 = vpop.eup %10187  ;;  %v3237_v50 = vrot.slane %v10186_v14, 3 }
 0xd32   :  { %v3280_v13 = vsel %vm768_vm2, %v3279_v21, %v3278_v58  ;;  %v3239_v42 = vrot.slane %v10188_v1, 2  ;;  %v3578_v58 = vld [vmem:[#allocation2 + $0x4d] sm:$0x1]  ;;  %v3580_v1 = vld [vmem:[#allocation2 + $0x5d] sm:$0x1] }
 0xd33   :  { %v3238_v6 = vsel %vm774_vm6, %v3237_v50, %v3236_v30  ;;  %v3579_v30 = vld [vmem:[#allocation2 + $0x55] sm:$0x1] }
 0xd34   :  { %v10190_v40 = vpop.eup %10189  ;;  %v3240_v63 = vsel %vm777_vm7, %v3239_v42, %v3238_v6 }
 0xd35   :  { %v10192_v28 = vpop.eup %10191  ;;  %v3281_v32 = vrot.slane %v10190_v40, 4 }
 0xd36   :  { %v10194_v47 = vpop.eup %10193  ;;  %v3241_v45 = vrot.slane %v10192_v28, 1 }
 0xd37   :  { %v10196_v51 = vpop.eup %10195  ;;  %v3282_v25 = vsel %vm771_vm5, %v3281_v32, %v3280_v13  ;;  %v3283_v12 = vrot.slane %v10194_v47, 3  ;;  %v3569_v32 = vld [vmem:[#allocation2 + $0x5] sm:$0x1] }
 0xd38   :  { %v10198_v29 = vpop.eup %10197  ;;  %v3285_v15 = vrot.slane %v10196_v51, 2  ;;  %v3242_v31 = vsel %vm780_vm8, %v3241_v45, %v3240_v63  ;;  %v3570_v51 = vld [vmem:[#allocation2 + $0xd] sm:$0x1] }
 0xd39   :  { %v3284_v2 = vsel %vm774_vm6, %v3283_v12, %v3282_v25  ;;  %v3287_v60 = vrot.slane %v10198_v29, 1  ;;  %v3571_v12 = vld [vmem:[#allocation2 + $0x15] sm:$0x1] }
 0xd3a   :  { %v3286_v22 = vsel %vm777_vm7, %v3285_v15, %v3284_v2  ;;  %v3572_v15 = vld [vmem:[#allocation2 + $0x1d] sm:$0x1] }
 0xd3b   :  { %v3288_v20 = vsel %vm780_vm8, %v3287_v60, %v3286_v22 }
 0xd3c   :  { %v3305_v16 = vsel %vm11893_vm9, %v3242_v31, %v3288_v20 }
 0xd3d   :  { %3311 = vrot.lane.b32.xlu1 %v3305_v16, %s11332_s20  ;;  %v3307_v38 = vmul.f32 %v3305_v16, %v12223_v59 }
 0xd9f   :  { %v3314_v24 = vpop.permute.xlu0 %3313 }
 0xda0   :  { %v3318_v9 = vmul.f32 %v3314_v24, %v3306_v33 }
 0xda2   :  { %3323 = vrot.lane.b32.xlu0 %v3318_v9, %s11333_s21  ;;  %v3582_v9 = vld [vmem:[#allocation2 + $0x6d] sm:$0x1] }
 0xdaf   :  { %v3312_v41 = vpop.permute.xlu1 %3311 }
 0xdb0   :  { %v3317_v48 = vmul.f32 %v3312_v41, %v3305_v16 }
 0xdb2   :  { %3321 = vrot.lane.b32.xlu1 %v3317_v48, %s11333_s21 }
 0xe14   :  { %v3324_v44 = vpop.permute.xlu0 %3323 }
 0xe15   :  { %v12317_v8 = vadd.f32 %v3324_v44, %v3308_v17  ;;  %v3583_v44 = vld [vmem:[#allocation2 + $0x75] sm:$0x1] }
 0xe17   :  { %10199 = vtanh.f32 %v12317_v8 }
 0xe21   :  { %v10200_v7 = vpop.eup %10199 }
 0xe22   :  { %3335 = vrot.lane.b32.xlu0 %v10200_v7, %s11332_s20 }
 0xe24   :  { %v3322_v61 = vpop.permute.xlu1 %3321 }
 0xe25   :  { %v12322_v0 = vadd.f32 %v3322_v61, %v3307_v38 }
 0xe27   :  { %10201 = vtanh.f32 %v12322_v0 }
 0xe31   :  { %v10202_v36 = vpop.eup %10201 }
 0xe32   :  { %3333 = vrot.lane.b32.xlu1 %v10202_v36, %s11332_s20 }
 0xe94   :  { %v3336_v26 = vpop.permute.xlu0 %3335 }
 0xe95   :  { %v12326_v43 = vmul.f32 %v3336_v26, %v3306_v33  ;;  %v3584_v26 = vld [vmem:[#allocation2 + $0x7d] sm:$0x1] }
 0xe97   :  { %3587 = vrot.lane.b32.xlu0 %v12326_v43, %s11333_s21 }
 0xea4   :  { %v3334_v62 = vpop.permute.xlu1 %3333 }
 0xea5   :  { %v12330_v55 = vmul.f32 %v3334_v62, %v3305_v16  ;;  %v3581_v16 = vld [vmem:[#allocation2 + $0x65] sm:$0x1] }
 0xea7   :  { %3585 = vrot.lane.b32.xlu1 %v12330_v55, %s11333_s21 }
 0xf09   :  { %v3588_v49 = vpop.permute.xlu0 %3587 }
 0xf19   :  { %v3586_v59 = vpop.permute.xlu1 %3585 }
 0xf1a   :  { %9363 = vmatprep.mubr.msk.f32.mxu1 %vm506_vm10, %v3586_v59 }
 0xf1b   :  { %9364 = vmatmul.mubr.msk.f32.vlgmr.msra.gmra.mrb[4].mxu1 %vm506_vm10, %v3588_v49 }
 0xf1c   :  { %9578 = vmatpush3.bf16.msra.mxu1 %v11398_v5 }
 0xf1d   :  { %9580 = vmatprep.subr.bf16.mxu1 %v11416_v10 }
 0xf20   :  { %9582 = vmatpush3.bf16.msra.mxu1 %v11416_v10 }
 0xfee   :  { %v9365_v33 = vpop.f32.mrb[4].mxu1 }
 0xfef   :  { %v3677_v35 = vrot.slane %v9365_v33, 1  ;;  %v3678_v18 = vrot.slane %v9365_v33, 2  ;;  %v12339_v37 = vpop.f32.mrb[5].mxu1  ;;  %v3679_v14 = vrot.slane %v9365_v33, 3  ;;  %v3708_v46 = vadd.f32 %v9365_v33, %v3577_v3 }
 0xff0   :  { %v3670_v5 = vrot.slane %v12339_v37, 1  ;;  %v3671_v10 = vrot.slane %v12339_v37, 2  ;;  %v3672_v47 = vrot.slane %v12339_v37, 3  ;;  %v3700_v25 = vadd.f32 %v12339_v37, %v3569_v32 }
 0xff1   :  { %v3709_v21 = vadd.f32 %v3677_v35, %v3578_v58  ;;  %v3710_v50 = vadd.f32 %v3678_v18, %v3579_v30  ;;  %v3711_v40 = vadd.f32 %v3679_v14, %v3580_v1  ;;  %v8968_v13 = vmul.f32 -1.442695, %v3708_v46 }
 0xff2   :  { %10203 = vtanh.f32 %v3708_v46  ;;  %v3701_v29 = vadd.f32 %v3670_v5, %v3570_v51  ;;  %v3680_v63 = vrot.slane %v9365_v33, 4  ;;  %v3702_v45 = vadd.f32 %v3671_v10, %v3571_v12 }
 0xff3   :  { %v8969_v28 = vmul.f32 -1.442695, %v3709_v21  ;;  %10205 = vtanh.f32 %v3709_v21  ;;  %v8970_v6 = vmul.f32 -1.442695, %v3710_v50  ;;  %v8971_v42 = vmul.f32 -1.442695, %v3711_v40 }
 0xff4   :  { %10207 = vpow2.f32 %v8968_v13  ;;  %v3681_v2 = vrot.slane %v9365_v33, 5  ;;  %v12345_v60 = vadd.f32 %v3672_v47, %v3572_v15  ;;  %v8960_v22 = vmul.f32 -1.442695, %v3700_v25 }
 0xff5   :  { %10209 = vtanh.f32 %v3710_v50  ;;  %v3682_v31 = vrot.slane %v9365_v33, 6  ;;  %v8961_v20 = vmul.f32 -1.442695, %v3701_v29  ;;  %v8962_v24 = vmul.f32 -1.442695, %v3702_v45 }
 0xff6   :  { %10211 = vpow2.f32 %v8969_v28  ;;  %v3683_v41 = vrot.slane %v9365_v33, 7  ;;  %v3712_v48 = vadd.f32 %v3680_v63, %v3581_v16  ;;  %v8963_v17 = vmul.f32 -1.442695, %v12345_v60 }
 0xff7   :  { %10213 = vpow2.f32 %v8970_v6  ;;  %v3713_v7 = vadd.f32 %v3681_v2, %v3582_v9  ;;  %v3714_v61 = vadd.f32 %v3682_v31, %v3583_v44  ;;  %v3674_v47 = vrot.slane %v12339_v37, 5  ;;  %v3574_v2 = vld [vmem:[#allocation2 + $0x2d] sm:$0x1] }
 0xff8   :  { %10215 = vpow2.f32 %v8971_v42  ;;  %v3715_v59 = vadd.f32 %v3683_v41, %v3584_v26  ;;  %v8972_v49 = vmul.f32 -1.442695, %v3712_v48  ;;  %v3675_v42 = vrot.slane %v12339_v37, 6 }
 0xff9   :  { %10217 = vtanh.f32 %v3700_v25  ;;  %v8973_v33 = vmul.f32 -1.442695, %v3713_v7  ;;  %v8974_v18 = vmul.f32 -1.442695, %v3714_v61  ;;  %v3573_v25 = vld [vmem:[#allocation2 + $0x25] sm:$0x1]  ;;  %v3705_v16 = vadd.f32 %v3674_v47, %v3574_v2 }
 0xffa   :  { %10219 = vtanh.f32 %v3701_v29  ;;  %v8975_v30 = vmul.f32 -1.442695, %v3715_v59  ;;  %v3676_v12 = vrot.slane %v12339_v37, 7 }
 0xffb   :  { %10221 = vtanh.f32 %v3702_v45 }
 0xffc   :  { %v12348_v38 = vpop.eup %10203  ;;  %10223 = vpow2.f32 %v8960_v22  ;;  %v3575_v22 = vld [vmem:[#allocation2 + $0x35] sm:$0x1] }
 0xffd   :  { %v12350_v36 = vpop.eup %10205  ;;  %10225 = vpow2.f32 %v8961_v20  ;;  %v3576_v20 = vld [vmem:[#allocation2 + $0x3d] sm:$0x1] }
 0xffe   :  { %v10208_v62 = vpop.eup %10207  ;;  %10227 = vpow2.f32 %v8962_v24  ;;  %v3858_v63 = vrot.slane %v12350_v36, 7  ;;  %v12365_v24 = vadd.f32 %v3675_v42, %v3575_v22 }
 0xfff   :  { %v12352_v3 = vpop.eup %10209  ;;  %10229 = vpow2.f32 %v8963_v17  ;;  %v3788_v46 = vadd.f32 1.0, %v10208_v62 }
0x1000   :  { %v10212_v35 = vpop.eup %10211  ;;  %10231 = vtanh.f32 %v3711_v40  ;;  %v3673_v40 = vrot.slane %v12339_v37, 4  ;;  %v12368_v37 = vadd.f32 %v3676_v12, %v3576_v20 }
0x1001   :  { %v10214_v14 = vpop.eup %10213  ;;  %10233 = vtanh.f32 %v3712_v48  ;;  %v3789_v1 = vadd.f32 1.0, %v10212_v35  ;;  %v3860_v48 = vrot.slane %v12352_v3, 6 }
0x1002   :  { %v10216_v58 = vpop.eup %10215  ;;  %10235 = vpow2.f32 %v8972_v49  ;;  %v3790_v13 = vadd.f32 1.0, %v10214_v14  ;;  %v3704_v15 = vadd.f32 %v3673_v40, %v3573_v25 }
0x1003   :  { %v12354_v21 = vpop.eup %10217  ;;  %10237 = vpow2.f32 %v8973_v33  ;;  %v3791_v10 = vadd.f32 1.0, %v10216_v58 }
0x1004   :  { %v12356_v50 = vpop.eup %10219  ;;  %10239 = vpow2.f32 %v8974_v18 }
0x1005   :  { %v12358_v5 = vpop.eup %10221  ;;  %10241 = vrcp.f32 %v3788_v46 }
0x1006   :  { %v10224_v28 = vpop.eup %10223  ;;  %10243 = vpow2.f32 %v8975_v30 }
0x1007   :  { %v10226_v6 = vpop.eup %10225  ;;  %10245 = vrcp.f32 %v3789_v1  ;;  %v3780_v42 = vadd.f32 1.0, %v10224_v28  ;;  %v3844_v28 = vrot.slane %v12356_v50, 7 }
0x1008   :  { %v10228_v32 = vpop.eup %10227  ;;  %10247 = vrcp.f32 %v3790_v13  ;;  %v3781_v30 = vadd.f32 1.0, %v10226_v6 }
0x1009   :  { %v10230_v51 = vpop.eup %10229  ;;  %10249 = vtanh.f32 %v3713_v7  ;;  %v3859_v7 = vsel %vm762_vm0, %v3858_v63, %v12348_v38  ;;  %v8967_v38 = vmul.f32 -1.442695, %v12368_v37 }
0x100a   :  { %v10232_v29 = vpop.eup %10231  ;;  %10251 = vrcp.f32 %v3791_v10  ;;  %v3861_v3 = vsel %vm765_vm1, %v3860_v48, %v3859_v7  ;;  %v3782_v10 = vadd.f32 1.0, %v10228_v32  ;;  %v3783_v63 = vadd.f32 1.0, %v10230_v51 }
0x100b   :  { %v10234_v45 = vpop.eup %10233  ;;  %10253 = vtanh.f32 %v3714_v61  ;;  %v8964_v61 = vmul.f32 -1.442695, %v3704_v15  ;;  %v3862_v18 = vrot.slane %v10232_v29, 5 }
0x100c   :  { %v10236_v31 = vpop.eup %10235  ;;  %10255 = vtanh.f32 %v3715_v59  ;;  %v8965_v59 = vmul.f32 -1.442695, %v3705_v16  ;;  %v3864_v25 = vrot.slane %v10234_v45, 4 }
0x100d   :  { %v10238_v9 = vpop.eup %10237  ;;  %v3792_v41 = vadd.f32 1.0, %v10236_v31  ;;  %10257 = vtanh.f32 %v12345_v60  ;;  %v8966_v60 = vmul.f32 -1.442695, %v12365_v24  ;;  %v3863_v13 = vsel %vm768_vm2, %v3862_v18, %v3861_v3 }
0x100e   :  { %v10240_v17 = vpop.eup %10239  ;;  %v3793_v44 = vadd.f32 1.0, %v10238_v9  ;;  %10259 = vtanh.f32 %v3704_v15  ;;  %v3865_v2 = vsel %vm771_vm5, %v3864_v25, %v3863_v13 }
0x100f   :  { %v10242_v36 = vpop.eup %10241  ;;  %v3794_v26 = vadd.f32 1.0, %v10240_v17  ;;  %10261 = vrcp.f32 %v3792_v41 }
0x1010   :  { %v10244_v62 = vpop.eup %10243  ;;  %10263 = vrcp.f32 %v3793_v44 }
0x1011   :  { %v10246_v49 = vpop.eup %10245  ;;  %v3795_v33 = vadd.f32 1.0, %v10244_v62  ;;  %10265 = vrcp.f32 %v3794_v26 }
0x1012   :  { %v10248_v35 = vpop.eup %10247  ;;  %v3904_v14 = vrot.slane %v10246_v49, 7  ;;  %10267 = vpow2.f32 %v8964_v61  ;;  %v3845_v49 = vsel %vm762_vm0, %v3844_v28, %v12354_v21 }
0x1013   :  { %v10250_v46 = vpop.eup %10249  ;;  %10269 = vrcp.f32 %v3795_v33  ;;  %v3906_v58 = vrot.slane %v10248_v35, 6 }
0x1014   :  { %v10252_v1 = vpop.eup %10251  ;;  %v3905_v40 = vsel %vm762_vm0, %v3904_v14, %v10242_v36  ;;  %10271 = vpow2.f32 %v8965_v59  ;;  %v3866_v31 = vrot.slane %v10250_v46, 3  ;;  %v3846_v36 = vrot.slane %v12358_v5, 6 }
0x1015   :  { %v10254_v47 = vpop.eup %10253  ;;  %10273 = vpow2.f32 %v8966_v60  ;;  %v3907_v29 = vsel %vm765_vm1, %v3906_v58, %v3905_v40  ;;  %v3908_v6 = vrot.slane %v10252_v1, 5 }
0x1016   :  { %v10256_v12 = vpop.eup %10255  ;;  %10275 = vpow2.f32 %v8967_v38  ;;  %v3867_v9 = vsel %vm774_vm6, %v3866_v31, %v3865_v2  ;;  %v3868_v48 = vrot.slane %v10254_v47, 2  ;;  %v3847_v1 = vsel %vm765_vm1, %v3846_v36, %v3845_v49 }
0x1017   :  { %v10258_v15 = vpop.eup %10257  ;;  %10277 = vrcp.f32 %v3781_v30  ;;  %v3909_v32 = vsel %vm768_vm2, %v3908_v6, %v3907_v29  ;;  %v3870_v3 = vrot.slane %v10256_v12, 1 }
0x1018   :  { %v10260_v22 = vpop.eup %10259  ;;  %10279 = vrcp.f32 %v3782_v10  ;;  %v3869_v62 = vsel %vm777_vm7, %v3868_v48, %v3867_v9  ;;  %v3848_v13 = vrot.slane %v10258_v15, 5 }
0x1019   :  { %v10262_v20 = vpop.eup %10261  ;;  %10281 = vrcp.f32 %v3780_v42  ;;  %v3871_v14 = vsel %vm780_vm8, %v3870_v3, %v3869_v62  ;;  %v3850_v29 = vrot.slane %v10260_v22, 4 }
0x101a   :  { %v10264_v45 = vpop.eup %10263  ;;  %v3910_v41 = vrot.slane %v10262_v20, 4  ;;  %10283 = vrcp.f32 %v3783_v63 }
0x101b   :  { %v10266_v51 = vpop.eup %10265  ;;  %v3912_v17 = vrot.slane %v10264_v45, 3  ;;  %10285 = vtanh.f32 %v3705_v16 }
0x101c   :  { %v10268_v44 = vpop.eup %10267  ;;  %v3911_v7 = vsel %vm771_vm5, %v3910_v41, %v3909_v32  ;;  %v3914_v61 = vrot.slane %v10266_v51, 2  ;;  %10287 = vtanh.f32 %v12365_v24 }
0x101d   :  { %v10270_v26 = vpop.eup %10269  ;;  %v3913_v50 = vsel %vm774_vm6, %v3912_v17, %v3911_v7  ;;  %v3784_v59 = vadd.f32 1.0, %v10268_v44 }
0x101e   :  { %v10272_v33 = vpop.eup %10271  ;;  %v3915_v60 = vsel %vm777_vm7, %v3914_v61, %v3913_v50  ;;  %v3916_v16 = vrot.slane %v10270_v26, 1 }
0x101f   :  { %v10274_v35 = vpop.eup %10273  ;;  %v3785_v18 = vadd.f32 1.0, %v10272_v33  ;;  %10289 = vrcp.f32 %v3784_v59 }
0x1020   :  { %v10276_v5 = vpop.eup %10275  ;;  %v3917_v38 = vsel %vm780_vm8, %v3916_v16, %v3915_v60  ;;  %10291 = vtanh.f32 %v12368_v37  ;;  %v3786_v46 = vadd.f32 1.0, %v10274_v35  ;;  %v3849_v37 = vsel %vm768_vm2, %v3848_v13, %v3847_v1 }
0x1021   :  { %v10278_v58 = vpop.eup %10277  ;;  %v3921_v21 = vsel %vm11893_vm9, %v3871_v14, %v3917_v38  ;;  %v3787_v30 = vadd.f32 1.0, %v10276_v5  ;;  %10293 = vrcp.f32 %v3785_v18  ;;  %v3851_v2 = vsel %vm771_vm5, %v3850_v29, %v3849_v37 }
0x1022   :  { %v10280_v24 = vpop.eup %10279  ;;  %3928 = vrot.lane.b32.xlu0 %v3921_v21, %s11332_s20  ;;  %10295 = vrcp.f32 %v3786_v46  ;;  %v3890_v40 = vrot.slane %v10278_v58, 7  ;;  %v3923_v18 = vmul.f32 %v3921_v21, %v12317_v8 }
0x1023   :  { %v10282_v10 = vpop.eup %10281  ;;  %10297 = vrcp.f32 %v3787_v30  ;;  %v3892_v47 = vrot.slane %v10280_v24, 6 }
0x1024   :  { %v10284_v42 = vpop.eup %10283  ;;  %v3891_v25 = vsel %vm762_vm0, %v3890_v40, %v10282_v10 }
0x1025   :  { %v10286_v12 = vpop.eup %10285  ;;  %v3893_v63 = vsel %vm765_vm1, %v3892_v47, %v3891_v25  ;;  %v3894_v6 = vrot.slane %v10284_v42, 5  ;;  %v4192_v42 = vld [vmem:[#allocation2 + $0x46] sm:$0x1] }
0x1026   :  { %v10288_v31 = vpop.eup %10287  ;;  %v3852_v20 = vrot.slane %v10286_v12, 3 }
0x1027   :  { %v3895_v15 = vsel %vm768_vm2, %v3894_v6, %v3893_v63  ;;  %v3854_v51 = vrot.slane %v10288_v31, 2  ;;  %v4193_v63 = vld [vmem:[#allocation2 + $0x4e] sm:$0x1]  ;;  %v4195_v31 = vld [vmem:[#allocation2 + $0x5e] sm:$0x1] }
0x1028   :  { %v3853_v45 = vsel %vm774_vm6, %v3852_v20, %v3851_v2  ;;  %v4194_v2 = vld [vmem:[#allocation2 + $0x56] sm:$0x1] }
0x1029   :  { %v10290_v32 = vpop.eup %10289  ;;  %v3855_v7 = vsel %vm777_vm7, %v3854_v51, %v3853_v45  ;;  %v4184_v51 = vld [vmem:[#allocation2 + $0x6] sm:$0x1] }
0x102a   :  { %v10292_v28 = vpop.eup %10291  ;;  %v3896_v9 = vrot.slane %v10290_v32, 4 }
0x102b   :  { %v10294_v41 = vpop.eup %10293  ;;  %v3856_v36 = vrot.slane %v10292_v28, 1 }
0x102c   :  { %v10296_v48 = vpop.eup %10295  ;;  %v3897_v17 = vsel %vm771_vm5, %v3896_v9, %v3895_v15  ;;  %v3898_v22 = vrot.slane %v10294_v41, 3 }
0x102d   :  { %v10298_v44 = vpop.eup %10297  ;;  %v3900_v61 = vrot.slane %v10296_v48, 2  ;;  %v3857_v59 = vsel %vm780_vm8, %v3856_v36, %v3855_v7  ;;  %v4186_v7 = vld [vmem:[#allocation2 + $0x16] sm:$0x1] }
0x102e   :  { %v3899_v26 = vsel %vm774_vm6, %v3898_v22, %v3897_v17  ;;  %v3902_v62 = vrot.slane %v10298_v44, 1  ;;  %v4185_v22 = vld [vmem:[#allocation2 + $0xe] sm:$0x1] }
0x102f   :  { %v3901_v50 = vsel %vm777_vm7, %v3900_v61, %v3899_v26  ;;  %v4187_v26 = vld [vmem:[#allocation2 + $0x1e] sm:$0x1] }
0x1030   :  { %v3903_v49 = vsel %vm780_vm8, %v3902_v62, %v3901_v50 }
0x1031   :  { %v3920_v33 = vsel %vm11893_vm9, %v3857_v59, %v3903_v49 }
0x1032   :  { %3926 = vrot.lane.b32.xlu1 %v3920_v33, %s11332_s20  ;;  %v3922_v46 = vmul.f32 %v3920_v33, %v12322_v0 }
0x1094   :  { %v3929_v3 = vpop.permute.xlu0 %3928 }
0x1095   :  { %v3933_v60 = vmul.f32 %v3929_v3, %v3921_v21 }
0x1097   :  { %3938 = vrot.lane.b32.xlu0 %v3933_v60, %s11333_s21  ;;  %v4196_v60 = vld [vmem:[#allocation2 + $0x66] sm:$0x1] }
0x10a4   :  { %v3927_v16 = vpop.permute.xlu1 %3926 }
0x10a5   :  { %v3932_v35 = vmul.f32 %v3927_v16, %v3920_v33 }
0x10a7   :  { %3936 = vrot.lane.b32.xlu1 %v3932_v35, %s11333_s21  ;;  %v4197_v35 = vld [vmem:[#allocation2 + $0x6e] sm:$0x1] }
0x1109   :  { %v3939_v5 = vpop.permute.xlu0 %3938 }
0x110a   :  { %v12416_v14 = vadd.f32 %v3939_v5, %v3923_v18 }
0x110c   :  { %10299 = vtanh.f32 %v12416_v14 }
0x1116   :  { %v10300_v38 = vpop.eup %10299 }
0x1117   :  { %3950 = vrot.lane.b32.xlu0 %v10300_v38, %s11332_s20 }
0x1119   :  { %v3937_v58 = vpop.permute.xlu1 %3936 }
0x111a   :  { %v12421_v30 = vadd.f32 %v3937_v58, %v3922_v46  ;;  %v4198_v46 = vld [vmem:[#allocation2 + $0x76] sm:$0x1] }
0x111c   :  { %10301 = vtanh.f32 %v12421_v30 }
0x1126   :  { %v10302_v1 = vpop.eup %10301 }
0x1127   :  { %3948 = vrot.lane.b32.xlu1 %v10302_v1, %s11332_s20 }
0x1189   :  { %v3951_v24 = vpop.permute.xlu0 %3950 }
0x118a   :  { %v12425_v8 = vmul.f32 %v3951_v24, %v3921_v21 }
0x118c   :  { %4202 = vrot.lane.b32.xlu0 %v12425_v8, %s11333_s21 }
0x1199   :  { %v3949_v13 = vpop.permute.xlu1 %3948 }
0x119a   :  { %v12429_v40 = vmul.f32 %v3949_v13, %v3920_v33 }
0x119c   :  { %4200 = vrot.lane.b32.xlu1 %v12429_v40, %s11333_s21 }
0x11fe   :  { %v4203_v10 = vpop.permute.xlu0 %4202 }
0x120e   :  { %v4201_v0 = vpop.permute.xlu1 %4200 }
0x120f   :  { %9374 = vmatprep.mubr.msk.f32.mxu0 %vm506_vm10, %v4201_v0  ;;  %v4199_v0 = vld [vmem:[#allocation2 + $0x7e] sm:$0x1] }
0x1210   :  { %9375 = vmatmul.mubr.msk.f32.vlgmr.msra.gmra.mrb[6].mxu0 %vm506_vm10, %v4203_v10 }
0x12e3   :  { %v9376_v47 = vpop.f32.mrb[6].mxu0 }
0x12e4   :  { %v4292_v37 = vrot.slane %v9376_v47, 1  ;;  %v4293_v21 = vrot.slane %v9376_v47, 2  ;;  %v12435_v25 = vpop.f32.mrb[7].mxu0  ;;  %v4294_v12 = vrot.slane %v9376_v47, 3  ;;  %v4323_v29 = vadd.f32 %v9376_v47, %v4192_v42 }
0x12e5   :  { %v4285_v28 = vrot.slane %v12435_v25, 1  ;;  %v4286_v9 = vrot.slane %v12435_v25, 2  ;;  %v4287_v48 = vrot.slane %v12435_v25, 3  ;;  %v4315_v44 = vadd.f32 %v12435_v25, %v4184_v51 }
0x12e6   :  { %v4324_v6 = vadd.f32 %v4292_v37, %v4193_v63  ;;  %v4325_v20 = vadd.f32 %v4293_v21, %v4194_v2  ;;  %v4326_v32 = vadd.f32 %v4294_v12, %v4195_v31  ;;  %v8986_v15 = vmul.f32 -1.442695, %v4323_v29 }
0x12e7   :  { %10303 = vtanh.f32 %v4323_v29  ;;  %v4316_v61 = vadd.f32 %v4285_v28, %v4185_v22  ;;  %v4295_v36 = vrot.slane %v9376_v47, 4  ;;  %v4317_v62 = vadd.f32 %v4286_v9, %v4186_v7 }
0x12e8   :  { %v8987_v45 = vmul.f32 -1.442695, %v4324_v6  ;;  %10305 = vtanh.f32 %v4324_v6  ;;  %v8988_v41 = vmul.f32 -1.442695, %v4325_v20  ;;  %v8989_v17 = vmul.f32 -1.442695, %v4326_v32 }
0x12e9   :  { %10307 = vpow2.f32 %v8986_v15  ;;  %v4296_v50 = vrot.slane %v9376_v47, 5  ;;  %v12441_v59 = vadd.f32 %v4287_v48, %v4187_v26  ;;  %v8978_v49 = vmul.f32 -1.442695, %v4315_v44 }
0x12ea   :  { %10309 = vtanh.f32 %v4325_v20  ;;  %v4297_v33 = vrot.slane %v9376_v47, 6  ;;  %v8979_v3 = vmul.f32 -1.442695, %v4316_v61  ;;  %v8980_v16 = vmul.f32 -1.442695, %v4317_v62 }
0x12eb   :  { %10311 = vpow2.f32 %v8987_v45  ;;  %v4298_v18 = vrot.slane %v9376_v47, 7  ;;  %v4327_v5 = vadd.f32 %v4295_v36, %v4196_v60  ;;  %v8981_v38 = vmul.f32 -1.442695, %v12441_v59 }
0x12ec   :  { %10313 = vpow2.f32 %v8988_v41  ;;  %v4328_v58 = vadd.f32 %v4296_v50, %v4197_v35  ;;  %v4329_v24 = vadd.f32 %v4297_v33, %v4198_v46  ;;  %v4289_v22 = vrot.slane %v12435_v25, 5  ;;  %v4189_v33 = vld [vmem:[#allocation2 + $0x2e] sm:$0x1] }
0x12ed   :  { %10315 = vpow2.f32 %v8989_v17  ;;  %v4330_v42 = vadd.f32 %v4298_v18, %v4199_v0  ;;  %v8990_v37 = vmul.f32 -1.442695, %v4327_v5  ;;  %v4291_v36 = vrot.slane %v12435_v25, 7 }
0x12ee   :  { %10317 = vtanh.f32 %v4315_v44  ;;  %v8991_v47 = vmul.f32 -1.442695, %v4328_v58  ;;  %v8992_v29 = vmul.f32 -1.442695, %v4329_v24  ;;  %v4290_v44 = vrot.slane %v12435_v25, 6 }
0x12ef   :  { %10319 = vtanh.f32 %v4316_v61  ;;  %v8993_v31 = vmul.f32 -1.442695, %v4330_v42  ;;  %v4188_v61 = vld [vmem:[#allocation2 + $0x26] sm:$0x1]  ;;  %v4320_v35 = vadd.f32 %v4289_v22, %v4189_v33 }
0x12f0   :  { %10321 = vtanh.f32 %v4317_v62 }
0x12f1   :  { %v12444_v1 = vpop.eup %10303  ;;  %10323 = vpow2.f32 %v8978_v49 }
0x12f2   :  { %v12446_v13 = vpop.eup %10305  ;;  %10325 = vpow2.f32 %v8979_v3  ;;  %v4190_v3 = vld [vmem:[#allocation2 + $0x36] sm:$0x1] }
0x12f3   :  { %v10308_v10 = vpop.eup %10307  ;;  %10327 = vpow2.f32 %v8980_v16  ;;  %v4473_v62 = vrot.slane %v12446_v13, 7  ;;  %v4191_v16 = vld [vmem:[#allocation2 + $0x3e] sm:$0x1]  ;;  %v12461_v18 = vadd.f32 %v4290_v44, %v4190_v3 }
0x12f4   :  { %v12448_v21 = vpop.eup %10309  ;;  %10329 = vpow2.f32 %v8981_v38  ;;  %v4403_v2 = vadd.f32 1.0, %v10308_v10 }
0x12f5   :  { %v10312_v12 = vpop.eup %10311  ;;  %10331 = vtanh.f32 %v4326_v32  ;;  %v4288_v32 = vrot.slane %v12435_v25, 4  ;;  %v4475_v46 = vrot.slane %v12448_v21, 6  ;;  %v12464_v25 = vadd.f32 %v4291_v36, %v4191_v16 }
0x12f6   :  { %v10314_v63 = vpop.eup %10313  ;;  %10333 = vtanh.f32 %v4327_v5  ;;  %v4404_v15 = vadd.f32 1.0, %v10312_v12 }
0x12f7   :  { %v10316_v6 = vpop.eup %10315  ;;  %10335 = vpow2.f32 %v8990_v37  ;;  %v4405_v45 = vadd.f32 1.0, %v10314_v63  ;;  %v4319_v50 = vadd.f32 %v4288_v32, %v4188_v61 }
0x12f8   :  { %v12450_v20 = vpop.eup %10317  ;;  %10337 = vpow2.f32 %v8991_v47  ;;  %v4406_v51 = vadd.f32 1.0, %v10316_v6  ;;  %v8983_v47 = vmul.f32 -1.442695, %v4320_v35 }
0x12f9   :  { %v12452_v28 = vpop.eup %10319  ;;  %10339 = vpow2.f32 %v8992_v29  ;;  %v8982_v0 = vmul.f32 -1.442695, %v4319_v50 }
0x12fa   :  { %v12454_v9 = vpop.eup %10321  ;;  %10341 = vrcp.f32 %v4403_v2 }
0x12fb   :  { %v10324_v41 = vpop.eup %10323  ;;  %10343 = vpow2.f32 %v8993_v31 }
0x12fc   :  { %v10326_v48 = vpop.eup %10325  ;;  %10345 = vrcp.f32 %v4404_v15  ;;  %v4395_v36 = vadd.f32 1.0, %v10324_v41  ;;  %v4459_v41 = vrot.slane %v12452_v28, 7 }
0x12fd   :  { %v10328_v17 = vpop.eup %10327  ;;  %10347 = vrcp.f32 %v4405_v45  ;;  %v4396_v45 = vadd.f32 1.0, %v10326_v48 }
0x12fe   :  { %v10330_v7 = vpop.eup %10329  ;;  %10349 = vtanh.f32 %v4328_v58  ;;  %v4397_v44 = vadd.f32 1.0, %v10328_v17 }
0x12ff   :  { %v10332_v26 = vpop.eup %10331  ;;  %10351 = vrcp.f32 %v4406_v51  ;;  %v4398_v33 = vadd.f32 1.0, %v10330_v7 }
0x1300   :  { %v10334_v49 = vpop.eup %10333  ;;  %10353 = vtanh.f32 %v4329_v24  ;;  %v4474_v24 = vsel %vm762_vm0, %v4473_v62, %v12444_v1  ;;  %v4477_v2 = vrot.slane %v10332_v26, 5  ;;  %v8985_v1 = vmul.f32 -1.442695, %v12464_v25 }
0x1301   :  { %v10336_v60 = vpop.eup %10335  ;;  %10355 = vtanh.f32 %v4330_v42  ;;  %v4476_v21 = vsel %vm765_vm1, %v4475_v46, %v4474_v24  ;;  %v4479_v62 = vrot.slane %v10334_v49, 4 }
0x1302   :  { %v10338_v5 = vpop.eup %10337  ;;  %v4407_v38 = vadd.f32 1.0, %v10336_v60  ;;  %10357 = vtanh.f32 %v12441_v59  ;;  %v8984_v59 = vmul.f32 -1.442695, %v12461_v18  ;;  %v4478_v51 = vsel %vm768_vm2, %v4477_v2, %v4476_v21 }
0x1303   :  { %v10340_v58 = vpop.eup %10339  ;;  %v4408_v13 = vadd.f32 1.0, %v10338_v5  ;;  %10359 = vtanh.f32 %v4319_v50  ;;  %v4480_v60 = vsel %vm771_vm5, %v4479_v62, %v4478_v51  ;;  %v4460_v21 = vsel %vm762_vm0, %v4459_v41, %v12450_v20 }
0x1304   :  { %v10342_v10 = vpop.eup %10341  ;;  %v4409_v42 = vadd.f32 1.0, %v10340_v58  ;;  %10361 = vrcp.f32 %v4407_v38 }
0x1305   :  { %v10344_v37 = vpop.eup %10343  ;;  %10363 = vrcp.f32 %v4408_v13 }
0x1306   :  { %v10346_v12 = vpop.eup %10345  ;;  %v4410_v29 = vadd.f32 1.0, %v10344_v37  ;;  %10365 = vrcp.f32 %v4409_v42  ;;  %v4461_v37 = vrot.slane %v12454_v9, 6 }
0x1307   :  { %v10348_v63 = vpop.eup %10347  ;;  %v4519_v6 = vrot.slane %v10346_v12, 7  ;;  %10367 = vpow2.f32 %v8982_v0 }
0x1308   :  { %v10350_v31 = vpop.eup %10349  ;;  %10369 = vrcp.f32 %v4410_v29  ;;  %v4521_v15 = vrot.slane %v10348_v63, 6 }
0x1309   :  { %v10352_v32 = vpop.eup %10351  ;;  %v4520_v22 = vsel %vm762_vm0, %v4519_v6, %v10342_v10  ;;  %10371 = vpow2.f32 %v8983_v47  ;;  %v4481_v5 = vrot.slane %v10350_v31, 3 }
0x130a   :  { %v10354_v61 = vpop.eup %10353  ;;  %10373 = vpow2.f32 %v8984_v59  ;;  %v4522_v50 = vsel %vm765_vm1, %v4521_v15, %v4520_v22  ;;  %v4523_v48 = vrot.slane %v10352_v32, 5 }
0x130b   :  { %v10356_v26 = vpop.eup %10355  ;;  %10375 = vpow2.f32 %v8985_v1  ;;  %v4482_v46 = vsel %vm774_vm6, %v4481_v5, %v4480_v60  ;;  %v4483_v13 = vrot.slane %v10354_v61, 2 }
0x130c   :  { %v10358_v3 = vpop.eup %10357  ;;  %10377 = vrcp.f32 %v4396_v45  ;;  %v4524_v17 = vsel %vm768_vm2, %v4523_v48, %v4522_v50  ;;  %v4485_v63 = vrot.slane %v10356_v26, 1 }
0x130d   :  { %v10360_v16 = vpop.eup %10359  ;;  %10379 = vrcp.f32 %v4397_v44  ;;  %v4484_v12 = vsel %vm777_vm7, %v4483_v13, %v4482_v46  ;;  %v4463_v44 = vrot.slane %v10358_v3, 5 }
0x130e   :  { %v10362_v38 = vpop.eup %10361  ;;  %10381 = vrcp.f32 %v4395_v36  ;;  %v4486_v31 = vsel %vm780_vm8, %v4485_v63, %v4484_v12  ;;  %v4465_v60 = vrot.slane %v10360_v16, 4 }
0x130f   :  { %v10364_v49 = vpop.eup %10363  ;;  %v4525_v58 = vrot.slane %v10362_v38, 4  ;;  %10383 = vrcp.f32 %v4398_v33 }
0x1310   :  { %v10366_v7 = vpop.eup %10365  ;;  %v4527_v24 = vrot.slane %v10364_v49, 3  ;;  %10385 = vtanh.f32 %v4320_v35 }
0x1311   :  { %v10368_v0 = vpop.eup %10367  ;;  %v4526_v10 = vsel %vm771_vm5, %v4525_v58, %v4524_v17  ;;  %v4529_v42 = vrot.slane %v10366_v7, 2  ;;  %10387 = vtanh.f32 %v12461_v18  ;;  %v4462_v18 = vsel %vm765_vm1, %v4461_v37, %v4460_v21 }
0x1312   :  { %v10370_v47 = vpop.eup %10369  ;;  %v4528_v28 = vsel %vm774_vm6, %v4527_v24, %v4526_v10  ;;  %v4399_v29 = vadd.f32 1.0, %v10368_v0  ;;  %v4464_v26 = vsel %vm768_vm2, %v4463_v44, %v4462_v18 }
0x1313   :  { %v10372_v59 = vpop.eup %10371  ;;  %v4530_v2 = vsel %vm777_vm7, %v4529_v42, %v4528_v28  ;;  %v4531_v35 = vrot.slane %v10370_v47, 1  ;;  %v4466_v5 = vsel %vm771_vm5, %v4465_v60, %v4464_v26 }
0x1314   :  { %v10374_v6 = vpop.eup %10373  ;;  %v4400_v1 = vadd.f32 1.0, %v10372_v59  ;;  %10389 = vrcp.f32 %v4399_v29 }
0x1315   :  { %v10376_v9 = vpop.eup %10375  ;;  %v4532_v15 = vsel %vm780_vm8, %v4531_v35, %v4530_v2  ;;  %10391 = vtanh.f32 %v12464_v25  ;;  %v4401_v45 = vadd.f32 1.0, %v10374_v6 }
0x1316   :  { %v10378_v32 = vpop.eup %10377  ;;  %v12492_v20 = vsel %vm11893_vm9, %v4486_v31, %v4532_v15  ;;  %v4402_v51 = vadd.f32 1.0, %v10376_v9  ;;  %10393 = vrcp.f32 %v4400_v1 }
0x1317   :  { %v10380_v22 = vpop.eup %10379  ;;  %4543 = vrot.lane.b32.xlu0 %v12492_v20, %s11332_s20  ;;  %10395 = vrcp.f32 %v4401_v45  ;;  %v4505_v61 = vrot.slane %v10378_v32, 7  ;;  %v4538_v31 = vmul.f32 %v12492_v20, %v12416_v14 }
0x1318   :  { %v10382_v36 = vpop.eup %10381  ;;  %10397 = vrcp.f32 %v4402_v51  ;;  %v4507_v25 = vrot.slane %v10380_v22, 6 }
0x1319   :  { %v10384_v62 = vpop.eup %10383  ;;  %v4506_v50 = vsel %vm762_vm0, %v4505_v61, %v10382_v36  ;;  %v11334_v61 = vmov 1966171168  }
0x131a   :  { %v10386_v33 = vpop.eup %10385  ;;  %v4508_v48 = vsel %vm765_vm1, %v4507_v25, %v4506_v50  ;;  %v4509_v38 = vrot.slane %v10384_v62, 5  ;;  %v884_v14 = vunpack.c.l.s4 %v11334_v61 }
0x131b   :  { %v10388_v17 = vpop.eup %10387  ;;  %v4467_v41 = vrot.slane %v10386_v33, 3 }
0x131c   :  { %v4510_v3 = vsel %vm768_vm2, %v4509_v38, %v4508_v48  ;;  %v4469_v24 = vrot.slane %v10388_v17, 2  ;;  %v885_v36 = vunpack.c.0.s8 %v884_v14 }
0x131d   :  { %v4468_v58 = vsel %vm774_vm6, %v4467_v41, %v4466_v5 }
0x131e   :  { %v10390_v49 = vpop.eup %10389  ;;  %v4470_v37 = vsel %vm777_vm7, %v4469_v24, %v4468_v58  ;;  %v12527_v25 = vsub.s32 %v885_v36, %v11588_v53 }
0x131f   :  { %v10392_v46 = vpop.eup %10391  ;;  %v4511_v7 = vrot.slane %v10390_v49, 4 }
0x1320   :  { %v10394_v13 = vpop.eup %10393  ;;  %v4471_v12 = vrot.slane %v10392_v46, 1  ;;  %v1505_v62 = vrot.slane %v12031_v19, %v12527_v25  ;;  %v2735_v50 = vrot.slane %v12231_v4, %v12527_v25  ;;  %v3965_v53 = vrot.slane %v12429_v40, %v12527_v25 }
0x1321   :  { %v10396_v0 = vpop.eup %10395  ;;  %v4512_v10 = vsel %vm771_vm5, %v4511_v7, %v4510_v3  ;;  %v4513_v16 = vrot.slane %v10394_v13, 3  ;;  %v889_v17 = vrot.slane %v11927_v34, %v12527_v25  ;;  %v2120_v13 = vrot.slane %v12131_v52, %v12527_v25 }
0x1322   :  { %v10398_v42 = vpop.eup %10397  ;;  %v4515_v47 = vrot.slane %v10396_v0, 2  ;;  %v4472_v59 = vsel %vm780_vm8, %v4471_v12, %v4470_v37  ;;  %v12540_v60 = vrot.slane %v2735_v50, %v12527_v25  ;;  %v1513_v5 = vcombine.high %v1505_v62, %v1505_v62 }
0x1323   :  { %v4514_v28 = vsel %vm774_vm6, %v4513_v16, %v4512_v10  ;;  %v4517_v29 = vrot.slane %v10398_v42, 1  ;;  %v12547_v38 = vrot.slane %v3965_v53, %v12527_v25  ;;  %v2743_v49 = vcombine.high %v2735_v50, %v2735_v50 }
0x1324   :  { %v4516_v21 = vsel %vm777_vm7, %v4515_v47, %v4514_v28  ;;  %v12555_v41 = vrot.slane %v1513_v5, %v12527_v25  ;;  %v905_v46 = vrot.slane %v889_v17, %v12527_v25  ;;  %v3973_v24 = vcombine.high %v3965_v53, %v3965_v53 }
0x1325   :  { %v4518_v63 = vsel %vm780_vm8, %v4517_v29, %v4516_v21  ;;  %v4059_v3 = vrot.slane %v12547_v38, %v11594_v56  ;;  %v12568_v10 = vrot.slane %v2743_v49, %v12527_v25  ;;  %v12575_v42 = vrot.slane %v2120_v13, %v12527_v25 }
0x1326   :  { %v4535_v2 = vsel %vm11893_vm9, %v4472_v59, %v4518_v63  ;;  %v1603_v7 = vrot.slane %v12555_v41, %v11594_v56  ;;  %v983_v16 = vrot.slane %v905_v46, %v11594_v56  ;;  %v3350_v37 = vrot.slane %v12330_v55, %v12527_v25 }
0x1327   :  { %4541 = vrot.lane.b32.xlu1 %v4535_v2, %s11332_s20  ;;  %v4537_v51 = vmul.f32 %v4535_v2, %v12421_v30  ;;  %v1521_v30 = vrot.slane %v1505_v62, %v12527_v25  ;;  %v2833_v47 = vrot.slane %v12568_v10, %v11594_v56  ;;  %v12582_v12 = vrot.slane %v3973_v24, %v12527_v25 }
0x1328   :  { %v897_v28 = vcombine.high %v889_v17, %v889_v17  ;;  %v12587_v29 = vrot.slane %v3350_v37, %v12527_v25  ;;  %v2214_v21 = vrot.slane %v12575_v42, %v11594_v56  ;;  %v927_v61 = vcombine.high %v905_v46, %v905_v46 }
0x1329   :  { %v1599_v48 = vrot.slane %v1521_v30, %v11594_v56  ;;  %v4063_v59 = vrot.slane %v12582_v12, %v11594_v56  ;;  %v1543_v63 = vcombine.high %v1521_v30, %v1521_v30 }
0x132a   :  { %v991_v62 = vrot.slane %v927_v61, %v11594_v56 }
0x1389   :  { %v4544_v35 = vpop.permute.xlu0 %4543 }
0x138a   :  { %v4548_v6 = vmul.f32 %v4544_v35, %v12492_v20  ;;  %v3444_v35 = vrot.slane %v12587_v29, %v11594_v56 }
0x138c   :  { %4553 = vrot.lane.b32.xlu0 %v4548_v6, %s11333_s21  ;;  %v12598_v6 = vrot.slane %v897_v28, %v12527_v25 }
0x1399   :  { %v4542_v1 = vpop.permute.xlu1 %4541 }
0x139a   :  { %v4547_v9 = vmul.f32 %v4542_v1, %v4535_v2  ;;  %v1607_v1 = vrot.slane %v1543_v63, %v11594_v56 }
0x139c   :  { %4551 = vrot.lane.b32.xlu1 %v4547_v9, %s11333_s21  ;;  %v3358_v9 = vcombine.high %v3350_v37, %v3350_v37 }
0x13fe   :  { %v4554_v15 = vpop.permute.xlu0 %4553 }
0x13ff   :  { %v12517_v45 = vadd.f32 %v4554_v15, %v4538_v31  ;;  %v987_v31 = vrot.slane %v12598_v6, %v11594_v56 }
0x1401   :  { %10399 = vtanh.f32 %v12517_v45 }
0x140b   :  { %v10400_v32 = vpop.eup %10399 }
0x140c   :  { %4565 = vrot.lane.b32.xlu0 %v10400_v32, %s11332_s20 }
0x140e   :  { %v4552_v18 = vpop.permute.xlu1 %4551 }
0x140f   :  { %v12522_v22 = vadd.f32 %v4552_v18, %v4537_v51  ;;  %v12612_v51 = vrot.slane %v3358_v9, %v12527_v25 }
0x1411   :  { %14281 = vst [vmem:[#allocation7_spill] sm:$0xff] %v12522_v22  ;;  %10401 = vtanh.f32 %v12522_v22 }
0x141b   :  { %v10402_v44 = vpop.eup %10401 }
0x141c   :  { %4563 = vrot.lane.b32.xlu1 %v10402_v44, %s11332_s20  ;;  %v3448_v44 = vrot.slane %v12612_v51, %v11594_v56 }
0x147e   :  { %v4566_v26 = vpop.permute.xlu0 %4565 }
0x147f   :  { %v12535_v33 = vmul.f32 %v4566_v26, %v12492_v20  ;;  %v2829_v20 = vrot.slane %v12540_v60, %v11594_v56 }
0x1481   :  { %4817 = vrot.lane.b32.xlu0 %v12535_v33, %s11333_s21 }
0x1485   :  { %1660 = vrot.lane.b32.xlu0 %v1599_v48, %s11333_s21 }
0x1489   :  { %2890 = vrot.lane.b32.xlu0 %v2829_v20, %s11333_s21 }
0x148d   :  { %4120 = vrot.lane.b32.xlu0 %v4059_v3, %s11333_s21 }
0x148e   :  { %v4564_v58 = vpop.permute.xlu1 %4563 }
0x148f   :  { %v12565_v0 = vmul.f32 %v4564_v58, %v4535_v2  ;;  %v2128_v2 = vcombine.high %v2120_v13, %v2120_v13 }
0x1491   :  { %4815 = vrot.lane.b32.xlu1 %v12565_v0, %s11333_s21  ;;  %1662 = vrot.lane.b32.xlu0 %v1603_v7, %s11333_s21  ;;  %v12606_v15 = vrot.slane %v2128_v2, %v12527_v25  ;;  %v4580_v18 = vrot.slane %v12565_v0, %v12527_v25  ;;  %v4807_v2 = vld [vmem:[#allocation2 + $0x47] sm:$0x1] }
0x1493   :  { %v2218_v32 = vrot.slane %v12606_v15, %v11594_v56  ;;  %v4588_v14 = vcombine.high %v4580_v18, %v4580_v18  ;;  %v12621_v36 = vrot.slane %v4580_v18, %v12527_v25  ;;  %v4808_v18 = vld [vmem:[#allocation2 + $0x4f] sm:$0x1] }
0x1495   :  { %1044 = vrot.lane.b32.xlu1 %v983_v16, %s11333_s21  ;;  %2892 = vrot.lane.b32.xlu0 %v2833_v47, %s11333_s21  ;;  %v4674_v26 = vrot.slane %v12621_v36, %v11594_v56  ;;  %v12628_v30 = vrot.slane %v4588_v14, %v12527_v25  ;;  %v4810_v14 = vld [vmem:[#allocation2 + $0x5f] sm:$0x1] }
0x1497   :  { %v4678_v50 = vrot.slane %v12628_v30, %v11594_v56 }
0x1499   :  { %2275 = vrot.lane.b32.xlu1 %v2214_v21, %s11333_s21  ;;  %4122 = vrot.lane.b32.xlu0 %v4063_v59, %s11333_s21 }
0x149d   :  { %3505 = vrot.lane.b32.xlu1 %v3444_v35, %s11333_s21  ;;  %1664 = vrot.lane.b32.xlu0 %v1607_v1, %s11333_s21 }
0x14a1   :  { %1046 = vrot.lane.b32.xlu1 %v987_v31, %s11333_s21 }
0x14a5   :  { %2277 = vrot.lane.b32.xlu1 %v2218_v32, %s11333_s21 }
0x14a9   :  { %3507 = vrot.lane.b32.xlu1 %v3448_v44, %s11333_s21  ;;  %v4809_v44 = vld [vmem:[#allocation2 + $0x57] sm:$0x1] }
0x14ad   :  { %1048 = vrot.lane.b32.xlu1 %v991_v62, %s11333_s21 }
0x14b1   :  { %4735 = vrot.lane.b32.xlu1 %v4674_v26, %s11333_s21 }
0x14b5   :  { %4737 = vrot.lane.b32.xlu1 %v4678_v50, %s11333_s21 }
0x14f3   :  { %v4818_v53 = vpop.permute.xlu0 %4817 }
0x14f7   :  { %v1661_v48 = vpop.permute.xlu0 %1660 }
0x14f8   :  { %1708 = vst.msk [vmem:[#allocation3 + $0x1] sm:$0x1] %vm1092_vm11, %v1661_v48 }
0x14fb   :  { %v2891_v5 = vpop.permute.xlu0 %2890 }
0x14fc   :  { %2938 = vst.msk [vmem:[#allocation3 + $0x3] sm:$0x1] %vm1092_vm11, %v2891_v5 }
0x14ff   :  { %v4121_v20 = vpop.permute.xlu0 %4120 }
0x1500   :  { %4168 = vst.msk [vmem:[#allocation3 + $0x5] sm:$0x1] %vm1092_vm11, %v4121_v20 }
0x1503   :  { %v4816_v17 = vpop.permute.xlu1 %4815  ;;  %v1663_v49 = vpop.permute.xlu0 %1662 }
0x1504   :  { %9385 = vmatprep.mubr.msk.f32.mxu1 %vm506_vm10, %v4816_v17  ;;  %1709 = vst.msk [vmem:[#allocation3 + $0x9] sm:$0x1] %vm1092_vm11, %v1663_v49  ;;  %v4799_v17 = vld [vmem:[#allocation2 + $0x7] sm:$0x1] }
0x1505   :  { %9386 = vmatmul.mubr.msk.f32.vlgmr.msra.gmra.mrb[6].mxu1 %vm506_vm10, %v4818_v53 }
0x1506   :  { %9428 = vmatprep.mubr.f32.mxu1 %v14277_v11 }
0x1507   :  { %v1045_v3 = vpop.permute.xlu1 %1044  ;;  %v2893_v46 = vpop.permute.xlu0 %2892 }
0x1508   :  { %1093 = vst.msk [vmem:[#allocation3] sm:$0x1] %vm1092_vm11, %v1045_v3  ;;  %2939 = vst.msk [vmem:[#allocation3 + $0xb] sm:$0x1] %vm1092_vm11, %v2893_v46  ;;  %v4800_v46 = vld [vmem:[#allocation2 + $0xf] sm:$0x1] }
0x150b   :  { %v2276_v58 = vpop.permute.xlu1 %2275  ;;  %v4123_v7 = vpop.permute.xlu0 %4122 }
0x150c   :  { %2323 = vst.msk [vmem:[#allocation3 + $0x2] sm:$0x1] %vm1092_vm11, %v2276_v58  ;;  %4169 = vst.msk [vmem:[#allocation3 + $0xd] sm:$0x1] %vm1092_vm11, %v4123_v7  ;;  %v4801_v7 = vld [vmem:[#allocation2 + $0x17] sm:$0x1] }
0x150f   :  { %v3506_v13 = vpop.permute.xlu1 %3505  ;;  %v1665_v24 = vpop.permute.xlu0 %1664 }
0x1510   :  { %3553 = vst.msk [vmem:[#allocation3 + $0x4] sm:$0x1] %vm1092_vm11, %v3506_v13  ;;  %1710 = vst.msk [vmem:[#allocation3 + $0x11] sm:$0x1] %vm1092_vm11, %v1665_v24 }
0x1513   :  { %v1047_v16 = vpop.permute.xlu1 %1046 }
0x1514   :  { %1094 = vst.msk [vmem:[#allocation3 + $0x8] sm:$0x1] %vm1092_vm11, %v1047_v16  ;;  %v4802_v16 = vld [vmem:[#allocation2 + $0x1f] sm:$0x1] }
0x1517   :  { %v2278_v37 = vpop.permute.xlu1 %2277 }
0x1518   :  { %2324 = vst.msk [vmem:[#allocation3 + $0xa] sm:$0x1] %vm1092_vm11, %v2278_v37 }
0x151b   :  { %v3508_v47 = vpop.permute.xlu1 %3507 }
0x151c   :  { %3554 = vst.msk [vmem:[#allocation3 + $0xc] sm:$0x1] %vm1092_vm11, %v3508_v47 }
0x151f   :  { %v1049_v28 = vpop.permute.xlu1 %1048 }
0x1520   :  { %1095 = vst.msk [vmem:[#allocation3 + $0x10] sm:$0x1] %vm1092_vm11, %v1049_v28 }
0x1523   :  { %v4736_v21 = vpop.permute.xlu1 %4735 }
0x1524   :  { %4783 = vst.msk [vmem:[#allocation3 + $0x6] sm:$0x1] %vm1092_vm11, %v4736_v21 }
0x1527   :  { %v4738_v59 = vpop.permute.xlu1 %4737 }
0x1528   :  { %4784 = vst.msk [vmem:[#allocation3 + $0xe] sm:$0x1] %vm1092_vm11, %v4738_v59 }
0x15d8   :  { %v9387_v63 = vpop.f32.mrb[6].mxu1 }
0x15d9   :  { %v4907_v35 = vrot.slane %v9387_v63, 1  ;;  %v4908_v1 = vrot.slane %v9387_v63, 2  ;;  %v12653_v9 = vpop.f32.mrb[7].mxu1  ;;  %v4909_v31 = vrot.slane %v9387_v63, 3  ;;  %v4938_v32 = vadd.f32 %v9387_v63, %v4807_v2 }
0x15da   :  { %v4900_v53 = vrot.slane %v12653_v9, 1  ;;  %v4901_v5 = vrot.slane %v12653_v9, 2  ;;  %v4902_v49 = vrot.slane %v12653_v9, 3  ;;  %v4930_v58 = vadd.f32 %v12653_v9, %v4799_v17 }
0x15db   :  { %v4939_v61 = vadd.f32 %v4907_v35, %v4808_v18  ;;  %v4940_v62 = vadd.f32 %v4908_v1, %v4809_v44  ;;  %v4941_v26 = vadd.f32 %v4909_v31, %v4810_v14  ;;  %v9004_v50 = vmul.f32 -1.442695, %v4938_v32  ;;  %v4811_v35 = vld [vmem:[#allocation2 + $0x67] sm:$0x1]  ;;  %v4812_v31 = vld [vmem:[#allocation2 + $0x6f] sm:$0x1] }
0x15dc   :  { %10403 = vtanh.f32 %v4938_v32  ;;  %v4931_v13 = vadd.f32 %v4900_v53, %v4800_v46  ;;  %v4910_v24 = vrot.slane %v9387_v63, 4  ;;  %v4932_v37 = vadd.f32 %v4901_v5, %v4801_v7 }
0x15dd   :  { %v9005_v48 = vmul.f32 -1.442695, %v4939_v61  ;;  %10405 = vtanh.f32 %v4939_v61  ;;  %v9006_v20 = vmul.f32 -1.442695, %v4940_v62  ;;  %v9007_v3 = vmul.f32 -1.442695, %v4941_v26 }
0x15de   :  { %10407 = vpow2.f32 %v9004_v50  ;;  %v4911_v47 = vrot.slane %v9387_v63, 5  ;;  %v12659_v28 = vadd.f32 %v4902_v49, %v4802_v16  ;;  %v8996_v21 = vmul.f32 -1.442695, %v4930_v58  ;;  %v4813_v61 = vld [vmem:[#allocation2 + $0x77] sm:$0x1] }
0x15df   :  { %10409 = vtanh.f32 %v4940_v62  ;;  %v4912_v59 = vrot.slane %v9387_v63, 6  ;;  %v8997_v2 = vmul.f32 -1.442695, %v4931_v13  ;;  %v8998_v1 = vmul.f32 -1.442695, %v4932_v37 }
0x15e0   :  { %10411 = vpow2.f32 %v9005_v48  ;;  %v4913_v32 = vrot.slane %v9387_v63, 7  ;;  %v4942_v18 = vadd.f32 %v4910_v24, %v4811_v35  ;;  %v8999_v44 = vmul.f32 -1.442695, %v12659_v28  ;;  %v4814_v48 = vld [vmem:[#allocation2 + $0x7f] sm:$0x1] }
0x15e1   :  { %10413 = vpow2.f32 %v9006_v20  ;;  %v4943_v14 = vadd.f32 %v4911_v47, %v4812_v31  ;;  %v4944_v50 = vadd.f32 %v4912_v59, %v4813_v61  ;;  %v4803_v61 = vld [vmem:[#allocation2 + $0x27] sm:$0x1] }
0x15e2   :  { %10415 = vpow2.f32 %v9007_v3  ;;  %v4945_v20 = vadd.f32 %v4913_v32, %v4814_v48  ;;  %v9008_v17 = vmul.f32 -1.442695, %v4942_v18  ;;  %v4904_v32 = vrot.slane %v12653_v9, 5 }
0x15e3   :  { %10417 = vtanh.f32 %v4930_v58  ;;  %v9009_v63 = vmul.f32 -1.442695, %v4943_v14  ;;  %v9010_v46 = vmul.f32 -1.442695, %v4944_v50  ;;  %v4906_v48 = vrot.slane %v12653_v9, 7 }
0x15e4   :  { %10419 = vtanh.f32 %v4931_v13  ;;  %v9011_v24 = vmul.f32 -1.442695, %v4945_v20 }
0x15e5   :  { %10421 = vtanh.f32 %v4932_v37 }
0x15e6   :  { %v12662_v62 = vpop.eup %10403  ;;  %10423 = vpow2.f32 %v8996_v21 }
0x15e7   :  { %v12664_v53 = vpop.eup %10405  ;;  %10425 = vpow2.f32 %v8997_v2 }
0x15e8   :  { %v10408_v5 = vpop.eup %10407  ;;  %10427 = vpow2.f32 %v8998_v1 }
0x15e9   :  { %v12666_v49 = vpop.eup %10409  ;;  %10429 = vpow2.f32 %v8999_v44  ;;  %v5018_v7 = vadd.f32 1.0, %v10408_v5 }
0x15ea   :  { %v10412_v3 = vpop.eup %10411  ;;  %10431 = vtanh.f32 %v4941_v26  ;;  %v4903_v26 = vrot.slane %v12653_v9, 4  ;;  %v5090_v11 = vrot.slane %v12666_v49, 6 }
0x15eb   :  { %v10414_v58 = vpop.eup %10413  ;;  %10433 = vtanh.f32 %v4942_v18  ;;  %v5019_v37 = vadd.f32 1.0, %v10412_v3  ;;  %v4905_v18 = vrot.slane %v12653_v9, 6 }
0x15ec   :  { %v10416_v13 = vpop.eup %10415  ;;  %10435 = vpow2.f32 %v9008_v17  ;;  %v5020_v21 = vadd.f32 1.0, %v10414_v58  ;;  %v5088_v17 = vrot.slane %v12664_v53, 7  ;;  %v4805_v58 = vld [vmem:[#allocation2 + $0x37] sm:$0x1] }
0x15ed   :  { %v12668_v16 = vpop.eup %10417  ;;  %10437 = vpow2.f32 %v9009_v63  ;;  %v5021_v35 = vadd.f32 1.0, %v10416_v13  ;;  %v4934_v63 = vadd.f32 %v4903_v26, %v4803_v61  ;;  %v4806_v13 = vld [vmem:[#allocation2 + $0x3f] sm:$0x1] }
0x15ee   :  { %v12670_v47 = vpop.eup %10419  ;;  %10439 = vpow2.f32 %v9010_v46  ;;  %v4804_v46 = vld [vmem:[#allocation2 + $0x2f] sm:$0x1]  ;;  %v12682_v9 = vadd.f32 %v4906_v48, %v4806_v13 }
0x15ef   :  { %v12672_v59 = vpop.eup %10421  ;;  %10441 = vrcp.f32 %v5018_v7 }
0x15f0   :  { %v10424_v2 = vpop.eup %10423  ;;  %10443 = vpow2.f32 %v9011_v24  ;;  %v4935_v24 = vadd.f32 %v4904_v32, %v4804_v46 }
0x15f1   :  { %v10426_v1 = vpop.eup %10425  ;;  %10445 = vrcp.f32 %v5019_v37  ;;  %v12679_v37 = vadd.f32 %v4905_v18, %v4805_v58 }
0x15f2   :  { %v10428_v31 = vpop.eup %10427  ;;  %10447 = vrcp.f32 %v5020_v21  ;;  %v9001_v18 = vmul.f32 -1.442695, %v4935_v24 }
0x15f3   :  { %v10430_v44 = vpop.eup %10429  ;;  %10449 = vtanh.f32 %v4943_v14 }
0x15f4   :  { %v10432_v5 = vpop.eup %10431  ;;  %10451 = vrcp.f32 %v5021_v35  ;;  %v9000_v35 = vmul.f32 -1.442695, %v4934_v63 }
0x15f5   :  { %v10434_v3 = vpop.eup %10433  ;;  %10453 = vtanh.f32 %v4944_v50  ;;  %v5089_v50 = vsel %vm762_vm0, %v5088_v17, %v12662_v62  ;;  %v9003_v62 = vmul.f32 -1.442695, %v12682_v9 }
0x15f6   :  { %v10436_v7 = vpop.eup %10435  ;;  %10455 = vtanh.f32 %v4945_v20  ;;  %v5091_v49 = vsel %vm765_vm1, %v5090_v11, %v5089_v50  ;;  %v5010_v50 = vadd.f32 1.0, %v10424_v2  ;;  %v5074_v2 = vrot.slane %v12670_v47, 7 }
0x15f7   :  { %v10438_v21 = vpop.eup %10437  ;;  %v5022_v14 = vadd.f32 1.0, %v10436_v7  ;;  %10457 = vtanh.f32 %v12659_v28  ;;  %v9002_v28 = vmul.f32 -1.442695, %v12679_v37  ;;  %v5092_v7 = vrot.slane %v10432_v5, 5 }
0x15f8   :  { %v10440_v53 = vpop.eup %10439  ;;  %v5023_v26 = vadd.f32 1.0, %v10438_v21  ;;  %10459 = vtanh.f32 %v4934_v63  ;;  %v5011_v21 = vadd.f32 1.0, %v10426_v1 }
0x15f9   :  { %v10442_v20 = vpop.eup %10441  ;;  %v5024_v61 = vadd.f32 1.0, %v10440_v53  ;;  %10461 = vrcp.f32 %v5022_v14  ;;  %v5093_v53 = vsel %vm768_vm2, %v5092_v7, %v5091_v49 }
0x15fa   :  { %v10444_v32 = vpop.eup %10443  ;;  %10463 = vrcp.f32 %v5023_v26 }
0x15fb   :  { %v10446_v46 = vpop.eup %10445  ;;  %v5025_v58 = vadd.f32 1.0, %v10444_v32  ;;  %10465 = vrcp.f32 %v5024_v61  ;;  %v5012_v61 = vadd.f32 1.0, %v10428_v31  ;;  %v5094_v32 = vrot.slane %v10434_v3, 4 }
0x15fc   :  { %v10448_v48 = vpop.eup %10447  ;;  %v5134_v13 = vrot.slane %v10446_v46, 7  ;;  %10467 = vpow2.f32 %v9000_v35  ;;  %v5013_v46 = vadd.f32 1.0, %v10430_v44 }
0x15fd   :  { %v10450_v17 = vpop.eup %10449  ;;  %10469 = vrcp.f32 %v5025_v58  ;;  %v5136_v63 = vrot.slane %v10448_v48, 6  ;;  %v5095_v58 = vsel %vm771_vm5, %v5094_v32, %v5093_v53 }
0x15fe   :  { %v10452_v14 = vpop.eup %10451  ;;  %v5135_v26 = vsel %vm762_vm0, %v5134_v13, %v10442_v20  ;;  %10471 = vpow2.f32 %v9001_v18  ;;  %v5096_v49 = vrot.slane %v10450_v17, 3 }
0x15ff   :  { %v10454_v11 = vpop.eup %10453  ;;  %10473 = vpow2.f32 %v9002_v28  ;;  %v5137_v35 = vsel %vm765_vm1, %v5136_v63, %v5135_v26  ;;  %v5138_v1 = vrot.slane %v10452_v14, 5 }
0x1600   :  { %v10456_v5 = vpop.eup %10455  ;;  %10475 = vpow2.f32 %v9003_v62  ;;  %v5097_v18 = vsel %vm774_vm6, %v5096_v49, %v5095_v58  ;;  %v5098_v7 = vrot.slane %v10454_v11, 2 }
0x1601   :  { %v10458_v22 = vpop.eup %10457  ;;  %10477 = vrcp.f32 %v5011_v21  ;;  %v5139_v31 = vsel %vm768_vm2, %v5138_v1, %v5137_v35  ;;  %v5076_v21 = vrot.slane %v12672_v59, 6  ;;  %v5100_v32 = vrot.slane %v10456_v5, 1 }
0x1602   :  { %v10460_v48 = vpop.eup %10459  ;;  %10479 = vrcp.f32 %v5012_v61  ;;  %v5099_v53 = vsel %vm777_vm7, %v5098_v7, %v5097_v18  ;;  %v5075_v61 = vsel %vm762_vm0, %v5074_v2, %v12668_v16  ;;  %v2773_v59 = vcombine.high %v12540_v60, %v12540_v60 }
0x1603   :  { %v10462_v20 = vpop.eup %10461  ;;  %10481 = vrcp.f32 %v5010_v50  ;;  %v5101_v1 = vsel %vm780_vm8, %v5100_v32, %v5099_v53  ;;  %v5078_v60 = vrot.slane %v10458_v22, 5 }
0x1604   :  { %v10464_v3 = vpop.eup %10463  ;;  %v5140_v28 = vrot.slane %v10462_v20, 4  ;;  %10483 = vrcp.f32 %v5013_v46 }
0x1605   :  { %v10466_v44 = vpop.eup %10465  ;;  %v5142_v13 = vrot.slane %v10464_v3, 3  ;;  %10485 = vtanh.f32 %v4935_v24 }
0x1606   :  { %v10468_v62 = vpop.eup %10467  ;;  %v5141_v63 = vsel %vm771_vm5, %v5140_v28, %v5139_v31  ;;  %v5144_v17 = vrot.slane %v10466_v44, 2  ;;  %10487 = vtanh.f32 %v12679_v37  ;;  %v5077_v31 = vsel %vm765_vm1, %v5076_v21, %v5075_v61 }
0x1607   :  { %v10470_v14 = vpop.eup %10469  ;;  %v5143_v47 = vsel %vm774_vm6, %v5142_v13, %v5141_v63  ;;  %v5014_v26 = vadd.f32 1.0, %v10468_v62  ;;  %v5079_v44 = vsel %vm768_vm2, %v5078_v60, %v5077_v31  ;;  %v2837_v13 = vrot.slane %v2773_v59, %v11594_v56 }
0x1608   :  { %v10472_v50 = vpop.eup %10471  ;;  %v5145_v11 = vsel %vm777_vm7, %v5144_v17, %v5143_v47  ;;  %v5146_v24 = vrot.slane %v10470_v14, 1  ;;  %v4003_v62 = vcombine.high %v12547_v38, %v12547_v38  ;;  %v5080_v17 = vrot.slane %v10460_v48, 4 }
0x1609   :  { %v10474_v35 = vpop.eup %10473  ;;  %v5015_v46 = vadd.f32 1.0, %v10472_v50  ;;  %10489 = vrcp.f32 %v5014_v26  ;;  %v1545_v61 = vcombine.high %v12555_v41, %v12555_v41 }
0x160a   :  { %v10476_v58 = vpop.eup %10475  ;;  %v5147_v49 = vsel %vm780_vm8, %v5146_v24, %v5145_v11  ;;  %10491 = vtanh.f32 %v12682_v9  ;;  %v5016_v16 = vadd.f32 1.0, %v10474_v35  ;;  %v5081_v22 = vsel %vm771_vm5, %v5080_v17, %v5079_v44 }
0x160b   :  { %v10478_v5 = vpop.eup %10477  ;;  %v12712_v20 = vsel %vm11893_vm9, %v5101_v1, %v5147_v49  ;;  %v5017_v37 = vadd.f32 1.0, %v10476_v58  ;;  %10493 = vrcp.f32 %v5015_v46  ;;  %v4067_v26 = vrot.slane %v4003_v62, %v11594_v56 }
0x160c   :  { %v10480_v2 = vpop.eup %10479  ;;  %5158 = vrot.lane.b32.xlu0 %v12712_v20, %s11332_s20  ;;  %10495 = vrcp.f32 %v5016_v16  ;;  %v5120_v3 = vrot.slane %v10478_v5, 7  ;;  %v1498_v35 = vcombine.high %v12031_v19, %v12031_v19  ;;  %v1611_v41 = vrot.slane %v1545_v61, %v11594_v56 }
0x160d   :  { %v10482_v18 = vpop.eup %10481  ;;  %10497 = vrcp.f32 %v5017_v37  ;;  %v5122_v9 = vrot.slane %v10480_v2, 6  ;;  %v2775_v49 = vcombine.high %v12568_v10, %v12568_v10  ;;  %v2158_v10 = vcombine.high %v12575_v42, %v12575_v42 }
0x160e   :  { %v10484_v28 = vpop.eup %10483  ;;  %v5121_v7 = vsel %vm762_vm0, %v5120_v3, %v10482_v18  ;;  %v1512_v19 = vrot.slane %v1498_v35, %v12527_v25  ;;  %v2728_v3 = vcombine.high %v12231_v4, %v12231_v4 }
0x160f   :  { %v10486_v63 = vpop.eup %10485  ;;  %v5123_v21 = vsel %vm765_vm1, %v5122_v9, %v5121_v7  ;;  %v5124_v14 = vrot.slane %v10484_v28, 5  ;;  %v2841_v44 = vrot.slane %v2775_v49, %v11594_v56  ;;  %v4005_v7 = vcombine.high %v12582_v12, %v12582_v12 }
0x1610   :  { %2894 = vrot.lane.b32.xlu0 %v2837_v13, %s11333_s21  ;;  %v10488_v53 = vpop.eup %10487  ;;  %v5082_v47 = vrot.slane %v10486_v63, 3  ;;  %v2222_v4 = vrot.slane %v2158_v10, %v11594_v56  ;;  %v12760_v42 = vrot.slane %v1512_v19, %v12527_v25  ;;  %v2742_v62 = vrot.slane %v2728_v3, %v12527_v25 }
0x1611   :  { %v5125_v32 = vsel %vm768_vm2, %v5124_v14, %v5123_v21  ;;  %v5084_v46 = vrot.slane %v10488_v53, 2  ;;  %v3958_v63 = vcombine.high %v12429_v40, %v12429_v40  ;;  %v3388_v12 = vcombine.high %v12587_v29, %v12587_v29 }
0x1612   :  { %v5083_v48 = vsel %vm774_vm6, %v5082_v47, %v5081_v22  ;;  %v4071_v17 = vrot.slane %v4005_v7, %v11594_v56  ;;  %v1615_v21 = vrot.slane %v12760_v42, %v11594_v56  ;;  %v4618_v53 = vcombine.high %v12621_v36, %v12621_v36 }
0x1613   :  { %v10490_v50 = vpop.eup %10489  ;;  %v5085_v5 = vsel %vm777_vm7, %v5084_v46, %v5083_v48  ;;  %v3972_v22 = vrot.slane %v3958_v63, %v12527_v25  ;;  %v3452_v14 = vrot.slane %v3388_v12, %v11594_v56  ;;  %v12777_v40 = vrot.slane %v2742_v62, %v12527_v25 }
0x1614   :  { %v10492_v38 = vpop.eup %10491  ;;  %v5126_v11 = vrot.slane %v10490_v50, 4  ;;  %4124 = vrot.lane.b32.xlu0 %v4067_v26, %s11333_s21  ;;  %v1514_v29 = vcombine.high %v1512_v19, %v1512_v19  ;;  %v4682_v47 = vrot.slane %v4618_v53, %v11594_v56  ;;  %v929_v26 = vcombine.high %v12598_v6, %v12598_v6 }
0x1615   :  { %v10494_v24 = vpop.eup %10493  ;;  %v5086_v31 = vrot.slane %v10492_v38, 1  ;;  %v2845_v61 = vrot.slane %v12777_v40, %v11594_v56  ;;  %v12787_v50 = vrot.slane %v3972_v22, %v12527_v25  ;;  %v2160_v48 = vcombine.high %v12606_v15, %v12606_v15 }
0x1616   :  { %v10496_v59 = vpop.eup %10495  ;;  %v5127_v58 = vsel %vm771_vm5, %v5126_v11, %v5125_v32  ;;  %v5128_v1 = vrot.slane %v10494_v24, 3  ;;  %v12792_v36 = vrot.slane %v1514_v29, %v12527_v25  ;;  %v2744_v32 = vcombine.high %v2742_v62, %v2742_v62 }
0x1617   :  { %v10498_v16 = vpop.eup %10497  ;;  %v5130_v37 = vrot.slane %v10496_v59, 2  ;;  %v5087_v9 = vsel %vm780_vm8, %v5086_v31, %v5085_v5  ;;  %v995_v38 = vrot.slane %v929_v26, %v11594_v56  ;;  %v4075_v6 = vrot.slane %v12787_v50, %v11594_v56 }
0x1618   :  { %v5129_v2 = vsel %vm774_vm6, %v5128_v1, %v5127_v58  ;;  %v5132_v60 = vrot.slane %v10498_v16, 1  ;;  %1666 = vrot.lane.b32.xlu0 %v1611_v41, %s11333_s21  ;;  %v882_v11 = vcombine.high %v11927_v34, %v11927_v34  ;;  %v1619_v24 = vrot.slane %v12792_v36, %v11594_v56 }
0x1619   :  { %v5131_v18 = vsel %vm777_vm7, %v5130_v37, %v5129_v2  ;;  %v3974_v35 = vcombine.high %v3972_v22, %v3972_v22  ;;  %v2226_v46 = vrot.slane %v2160_v48, %v11594_v56  ;;  %v3390_v59 = vcombine.high %v12612_v51, %v12612_v51 }
0x161a   :  { %v5133_v28 = vsel %vm780_vm8, %v5132_v60, %v5131_v18  ;;  %v12809_v15 = vrot.slane %v2744_v32, %v12527_v25  ;;  %v896_v58 = vrot.slane %v882_v11, %v12527_v25  ;;  %v2113_v34 = vcombine.high %v12131_v52, %v12131_v52 }
0x161b   :  { %v12753_v13 = vsel %vm11893_vm9, %v5087_v9, %v5133_v28  ;;  %v3456_v1 = vrot.slane %v3390_v59, %v11594_v56  ;;  %v4620_v41 = vcombine.high %v12628_v30, %v12628_v30  ;;  %v12822_v49 = vrot.slane %v3974_v35, %v12527_v25 }
0x161c   :  { %5156 = vrot.lane.b32.xlu1 %v12753_v13, %s11332_s20  ;;  %2896 = vrot.lane.b32.xlu0 %v2841_v44, %s11333_s21  ;;  %v2849_v51 = vrot.slane %v12809_v15, %v11594_v56  ;;  %v12827_v16 = vrot.slane %v896_v58, %v12527_v25  ;;  %v2127_v52 = vrot.slane %v2113_v34, %v12527_v25 }
0x161d   :  { %v3343_v5 = vcombine.high %v12330_v55, %v12330_v55  ;;  %v4686_v30 = vrot.slane %v4620_v41, %v11594_v56  ;;  %v4079_v37 = vrot.slane %v12822_v49, %v11594_v56  ;;  %v4573_v2 = vcombine.high %v12565_v0, %v12565_v0 }
0x161e   :  { %v999_v60 = vrot.slane %v12827_v16, %v11594_v56  ;;  %v12843_v19 = vrot.slane %v2127_v52, %v12527_v25  ;;  %v898_v10 = vcombine.high %v896_v58, %v896_v58  ;;  %v2129_v28 = vcombine.high %v2127_v52, %v2127_v52 }
0x161f   :  { %v3357_v31 = vrot.slane %v3343_v5, %v12527_v25  ;;  %v4587_v55 = vrot.slane %v4573_v2, %v12527_v25  ;;  %v1544_v53 = vcombine.high %v12760_v42, %v12760_v42  ;;  %v2774_v26 = vcombine.high %v12777_v40, %v12777_v40 }
0x1620   :  { %2279 = vrot.lane.b32.xlu1 %v2222_v4, %s11333_s21  ;;  %4126 = vrot.lane.b32.xlu0 %v4071_v17, %s11333_s21  ;;  %v2230_v3 = vrot.slane %v12843_v19, %v11594_v56  ;;  %v12862_v7 = vrot.slane %v898_v10, %v12527_v25  ;;  %v12868_v63 = vrot.slane %v2129_v28, %v12527_v25 }
0x1621   :  { %v12850_v18 = vrot.slane %v3357_v31, %v12527_v25  ;;  %v12856_v9 = vrot.slane %v4587_v55, %v12527_v25  ;;  %v3359_v4 = vcombine.high %v3357_v31, %v3357_v31  ;;  %v2853_v32 = vrot.slane %v2774_v26, %v11594_v56 }
0x1622   :  { %v1003_v62 = vrot.slane %v12862_v7, %v11594_v56  ;;  %v2234_v12 = vrot.slane %v12868_v63, %v11594_v56  ;;  %v4004_v42 = vcombine.high %v12787_v50, %v12787_v50  ;;  %v4589_v48 = vcombine.high %v4587_v55, %v4587_v55 }
0x1623   :  { %v3460_v0 = vrot.slane %v12850_v18, %v11594_v56  ;;  %v4690_v44 = vrot.slane %v12856_v9, %v11594_v56  ;;  %v12874_v17 = vrot.slane %v3359_v4, %v12527_v25  ;;  %v1546_v40 = vcombine.high %v12792_v36, %v12792_v36 }
0x1624   :  { %3509 = vrot.lane.b32.xlu1 %v3452_v14, %s11333_s21  ;;  %1668 = vrot.lane.b32.xlu0 %v1615_v21, %s11333_s21  ;;  %v2776_v59 = vcombine.high %v12809_v15, %v12809_v15  ;;  %v1554_v36 = vrot.slane %v12027_v57, %v12527_v25  ;;  %v928_v41 = vcombine.high %v12827_v16, %v12827_v16 }
0x1625   :  { %v3464_v21 = vrot.slane %v12874_v17, %v11594_v56  ;;  %v1627_v50 = vrot.slane %v1546_v40, %v11594_v56  ;;  %v2159_v31 = vcombine.high %v12843_v19, %v12843_v19  ;;  %v4014_v10 = vrot.slane %v12425_v8, %v12527_v25 }
0x1626   :  { %v2857_v15 = vrot.slane %v2776_v59, %v11594_v56  ;;  %v12923_v52 = vrot.slane %v1554_v36, %v12527_v25  ;;  %v1007_v16 = vrot.slane %v928_v41, %v11594_v56  ;;  %v1562_v28 = vcombine.high %v1554_v36, %v1554_v36 }
0x1627   :  { %v2238_v19 = vrot.slane %v2159_v31, %v11594_v56  ;;  %v938_v36 = vrot.slane %v11931_v39, %v12527_v25 }
0x1628   :  { %4739 = vrot.lane.b32.xlu1 %v4682_v47, %s11333_s21  ;;  %2898 = vrot.lane.b32.xlu0 %v2845_v61, %s11333_s21  ;;  %v1623_v47 = vrot.slane %v1544_v53, %v11594_v56  ;;  %v1631_v55 = vrot.slane %v12923_v52, %v11594_v56  ;;  %v12969_v26 = vrot.slane %v1562_v28, %v12527_v25 }
0x1629   :  { %v13008_v41 = vrot.slane %v938_v36, %v12527_v25 }
0x162c   :  { %1050 = vrot.lane.b32.xlu1 %v995_v38, %s11333_s21  ;;  %4128 = vrot.lane.b32.xlu0 %v4075_v6, %s11333_s21  ;;  %v4083_v6 = vrot.slane %v4004_v42, %v11594_v56  ;;  %v4022_v42 = vcombine.high %v4014_v10, %v4014_v10 }
0x1630   :  { %2281 = vrot.lane.b32.xlu1 %v2226_v46, %s11333_s21  ;;  %1670 = vrot.lane.b32.xlu0 %v1619_v24, %s11333_s21  ;;  %v12901_v46 = vrot.slane %v4589_v48, %v12527_v25  ;;  %v1635_v48 = vrot.slane %v12969_v26, %v11594_v56 }
0x1634   :  { %3511 = vrot.lane.b32.xlu1 %v3456_v1, %s11333_s21  ;;  %2900 = vrot.lane.b32.xlu0 %v2849_v51, %s11333_s21  ;;  %v4694_v1 = vrot.slane %v12901_v46, %v11594_v56  ;;  %v4006_v51 = vcombine.high %v12822_v49, %v12822_v49 }
0x1636   :  { %v4087_v49 = vrot.slane %v4006_v51, %v11594_v56 }
0x1638   :  { %4741 = vrot.lane.b32.xlu1 %v4686_v30, %s11333_s21  ;;  %4130 = vrot.lane.b32.xlu0 %v4079_v37, %s11333_s21  ;;  %v2784_v37 = vrot.slane %v12227_v27, %v12527_v25 }
0x163c   :  { %1052 = vrot.lane.b32.xlu1 %v999_v60, %s11333_s21 }
0x1640   :  { %2283 = vrot.lane.b32.xlu1 %v2230_v3, %s11333_s21  ;;  %v12938_v3 = vrot.slane %v2784_v37, %v12527_v25 }
0x1644   :  { %3513 = vrot.lane.b32.xlu1 %v3460_v0, %s11333_s21  ;;  %v3389_v0 = vcombine.high %v12850_v18, %v12850_v18  ;;  %v2861_v18 = vrot.slane %v12938_v3, %v11594_v56 }
0x1648   :  { %4743 = vrot.lane.b32.xlu1 %v4690_v44, %s11333_s21 }
0x164c   :  { %1054 = vrot.lane.b32.xlu1 %v1003_v62, %s11333_s21  ;;  %v12950_v62 = vrot.slane %v4014_v10, %v12527_v25 }
0x1650   :  { %2285 = vrot.lane.b32.xlu1 %v2234_v12, %s11333_s21  ;;  %v3468_v12 = vrot.slane %v3389_v0, %v11594_v56 }
0x1654   :  { %3515 = vrot.lane.b32.xlu1 %v3464_v21, %s11333_s21  ;;  %v4619_v21 = vcombine.high %v12856_v9, %v12856_v9  ;;  %v4091_v9 = vrot.slane %v12950_v62, %v11594_v56 }
0x167e   :  { %v5159_v22 = vpop.permute.xlu0 %5158 }
0x167f   :  { %v5163_v14 = vmul.f32 %v5159_v22, %v12712_v20 }
0x1681   :  { %5168 = vrot.lane.b32.xlu0 %v5163_v14, %s11333_s21  ;;  %v930_v14 = vcombine.high %v12862_v7, %v12862_v7 }
0x1682   :  { %v2895_v29 = vpop.permute.xlu0 %2894 }
0x1683   :  { %2940 = vst.msk [vmem:[#allocation3 + $0x13] sm:$0x1] %vm1092_vm11, %v2895_v29  ;;  %v2792_v29 = vcombine.high %v2784_v37, %v2784_v37  ;;  %v1011_v7 = vrot.slane %v930_v14, %v11594_v56  ;;  %v1015_v37 = vrot.slane %v13008_v41, %v11594_v56 }
0x1685   :  { %1672 = vrot.lane.b32.xlu0 %v1623_v47, %s11333_s21  ;;  %v4698_v47 = vrot.slane %v4619_v21, %v11594_v56 }
0x1686   :  { %v4125_v61 = vpop.permute.xlu0 %4124 }
0x1687   :  { %4170 = vst.msk [vmem:[#allocation3 + $0x15] sm:$0x1] %vm1092_vm11, %v4125_v61 }
0x1689   :  { %2902 = vrot.lane.b32.xlu0 %v2853_v32, %s11333_s21 }
0x168a   :  { %v1667_v38 = vpop.permute.xlu0 %1666 }
0x168b   :  { %1711 = vst.msk [vmem:[#allocation3 + $0x19] sm:$0x1] %vm1092_vm11, %v1667_v38  ;;  %v2161_v38 = vcombine.high %v12868_v63, %v12868_v63  ;;  %v3391_v63 = vcombine.high %v12874_v17, %v12874_v17 }
0x168d   :  { %4132 = vrot.lane.b32.xlu0 %v4083_v6, %s11333_s21  ;;  %v12981_v6 = vrot.slane %v2792_v29, %v12527_v25  ;;  %v3472_v17 = vrot.slane %v3391_v63, %v11594_v56  ;;  %v14282_v63 = vld [vmem:[#allocation7_spill] sm:$0xff] }
0x168e   :  { %v5157_v11 = vpop.permute.xlu1 %5156  ;;  %v2897_v24 = vpop.permute.xlu0 %2896 }
0x168f   :  { %v5162_v35 = vmul.f32 %v5157_v11, %v12753_v13  ;;  %2941 = vst.msk [vmem:[#allocation3 + $0x1b] sm:$0x1] %vm1092_vm11, %v2897_v24  ;;  %v2242_v24 = vrot.slane %v2161_v38, %v11594_v56 }
0x1691   :  { %5166 = vrot.lane.b32.xlu1 %v5162_v35, %s11333_s21  ;;  %1674 = vrot.lane.b32.xlu0 %v1627_v50, %s11333_s21  ;;  %v2865_v35 = vrot.slane %v12981_v6, %v11594_v56  ;;  %v12993_v50 = vrot.slane %v4022_v42, %v12527_v25 }
0x1692   :  { %v2280_v58 = vpop.permute.xlu1 %2279  ;;  %v4127_v34 = vpop.permute.xlu0 %4126 }
0x1693   :  { %2325 = vst.msk [vmem:[#allocation3 + $0x12] sm:$0x1] %vm1092_vm11, %v2280_v58  ;;  %4171 = vst.msk [vmem:[#allocation3 + $0x1d] sm:$0x1] %vm1092_vm11, %v4127_v34  ;;  %v4621_v58 = vcombine.high %v12901_v46, %v12901_v46  ;;  %v4095_v34 = vrot.slane %v12993_v50, %v11594_v56 }
0x1695   :  { %4745 = vrot.lane.b32.xlu1 %v4694_v1, %s11333_s21  ;;  %2904 = vrot.lane.b32.xlu0 %v2857_v15, %s11333_s21  ;;  %v2169_v15 = vrot.slane %v12127_v54, %v12527_v25  ;;  %v4702_v51 = vrot.slane %v4621_v58, %v11594_v56 }
0x1696   :  { %v3510_v5 = vpop.permute.xlu1 %3509  ;;  %v1669_v30 = vpop.permute.xlu0 %1668 }
0x1697   :  { %3555 = vst.msk [vmem:[#allocation3 + $0x14] sm:$0x1] %vm1092_vm11, %v3510_v5  ;;  %1712 = vst.msk [vmem:[#allocation3 + $0x21] sm:$0x1] %vm1092_vm11, %v1669_v30  ;;  %v13016_v5 = vrot.slane %v2169_v15, %v12527_v25  ;;  %v3399_v30 = vrot.slane %v12326_v43, %v12527_v25  ;;  %v2177_v28 = vcombine.high %v2169_v15, %v2169_v15 }
0x1698   :  { %v4052_v15 = vcombine.high %v12950_v62, %v12950_v62  ;;  %v1547_v62 = vcombine.high %v12027_v57, %v12027_v57 }
0x1699   :  { %1056 = vrot.lane.b32.xlu1 %v1007_v16, %s11333_s21  ;;  %4134 = vrot.lane.b32.xlu0 %v4087_v49, %s11333_s21  ;;  %v13025_v31 = vrot.slane %v3399_v30, %v12527_v25  ;;  %v4629_v49 = vrot.slane %v12535_v33, %v12527_v25  ;;  %v3407_v21 = vcombine.high %v3399_v30, %v3399_v30 }
0x169a   :  { %v4740_v2 = vpop.permute.xlu1 %4739  ;;  %v2899_v60 = vpop.permute.xlu0 %2898  ;;  %v1594_v30 = vcombine.high %v12969_v26, %v12969_v26  ;;  %v1561_v57 = vrot.slane %v1547_v62, %v12527_v25 }
0x169b   :  { %4785 = vst.msk [vmem:[#allocation3 + $0x16] sm:$0x1] %vm1092_vm11, %v4740_v2  ;;  %2942 = vst.msk [vmem:[#allocation3 + $0x23] sm:$0x1] %vm1092_vm11, %v2899_v60  ;;  %v2246_v2 = vrot.slane %v13016_v5, %v11594_v56  ;;  %v13034_v10 = vrot.slane %v4629_v49, %v12527_v25  ;;  %v4637_v14 = vcombine.high %v4629_v49, %v4629_v49 }
0x169c   :  { %v13057_v29 = vrot.slane %v3407_v21, %v12527_v25  ;;  %v4007_v21 = vcombine.high %v12425_v8, %v12425_v8 }
0x169d   :  { %2287 = vrot.lane.b32.xlu1 %v2238_v19, %s11333_s21  ;;  %1676 = vrot.lane.b32.xlu0 %v1631_v55, %s11333_s21  ;;  %v946_v55 = vcombine.high %v938_v36, %v938_v36  ;;  %v3476_v19 = vrot.slane %v13025_v31, %v11594_v56 }
0x169e   :  { %v1051_v44 = vpop.permute.xlu1 %1050  ;;  %v4129_v4 = vpop.permute.xlu0 %4128  ;;  %v4021_v8 = vrot.slane %v4007_v21, %v12527_v25 }
0x169f   :  { %1096 = vst.msk [vmem:[#allocation3 + $0x18] sm:$0x1] %vm1092_vm11, %v1051_v44  ;;  %4172 = vst.msk [vmem:[#allocation3 + $0x25] sm:$0x1] %vm1092_vm11, %v4129_v4  ;;  %v4706_v44 = vrot.slane %v13034_v10, %v11594_v56  ;;  %v13044_v4 = vrot.slane %v946_v55, %v12527_v25  ;;  %v2777_v55 = vcombine.high %v12227_v27, %v12227_v27 }
0x16a0   :  { %v13122_v27 = vrot.slane %v1561_v57, %v12527_v25 }
0x16a1   :  { %3517 = vrot.lane.b32.xlu1 %v3468_v12, %s11333_s21  ;;  %2906 = vrot.lane.b32.xlu0 %v2861_v18, %s11333_s21  ;;  %v1019_v18 = vrot.slane %v13044_v4, %v11594_v56 }
0x16a2   :  { %v2282_v22 = vpop.permute.xlu1 %2281  ;;  %v1671_v53 = vpop.permute.xlu0 %1670 }
0x16a3   :  { %2326 = vst.msk [vmem:[#allocation3 + $0x1a] sm:$0x1] %vm1092_vm11, %v2282_v22  ;;  %1713 = vst.msk [vmem:[#allocation3 + $0x29] sm:$0x1] %vm1092_vm11, %v1671_v53  ;;  %v13051_v22 = vrot.slane %v2177_v28, %v12527_v25 }
0x16a5   :  { %4747 = vrot.lane.b32.xlu1 %v4698_v47, %s11333_s21  ;;  %4136 = vrot.lane.b32.xlu0 %v4091_v9, %s11333_s21  ;;  %v2250_v53 = vrot.slane %v13051_v22, %v11594_v56  ;;  %v3480_v47 = vrot.slane %v13057_v29, %v11594_v56  ;;  %v13063_v9 = vrot.slane %v4637_v14, %v12527_v25 }
0x16a6   :  { %v3512_v61 = vpop.permute.xlu1 %3511  ;;  %v2901_v32 = vpop.permute.xlu0 %2900 }
0x16a7   :  { %3556 = vst.msk [vmem:[#allocation3 + $0x1c] sm:$0x1] %vm1092_vm11, %v3512_v61  ;;  %2943 = vst.msk [vmem:[#allocation3 + $0x2b] sm:$0x1] %vm1092_vm11, %v2901_v32  ;;  %v4710_v61 = vrot.slane %v13063_v9, %v11594_v56 }
0x16a9   :  { %1058 = vrot.lane.b32.xlu1 %v1011_v7, %s11333_s21  ;;  %1678 = vrot.lane.b32.xlu0 %v1635_v48, %s11333_s21  ;;  %v5153_v7 = vmul.f32 %v12712_v20, %v12517_v45  ;;  %v5152_v45 = vmul.f32 %v12753_v13, %v14282_v63  ;;  %v13153_v63 = vrot.slane %v4021_v8, %v12527_v25 }
0x16aa   :  { %v4742_v40 = vpop.permute.xlu1 %4741  ;;  %v4131_v11 = vpop.permute.xlu0 %4130 }
0x16ab   :  { %4786 = vst.msk [vmem:[#allocation3 + $0x1e] sm:$0x1] %vm1092_vm11, %v4742_v40  ;;  %4173 = vst.msk [vmem:[#allocation3 + $0x2d] sm:$0x1] %vm1092_vm11, %v4131_v11  ;;  %v1592_v11 = vcombine.high %v12923_v52, %v12923_v52  ;;  %v4053_v21 = vcombine.high %v13153_v63, %v13153_v63 }
0x16ad   :  { %2289 = vrot.lane.b32.xlu1 %v2242_v24, %s11333_s21  ;;  %2908 = vrot.lane.b32.xlu0 %v2865_v35, %s11333_s21  ;;  %v1639_v36 = vrot.slane %v1592_v11, %v11594_v56  ;;  %v978_v11 = vcombine.high %v13044_v4, %v13044_v4 }
0x16ae   :  { %v1053_v59 = vpop.permute.xlu1 %1052 }
0x16af   :  { %1097 = vst.msk [vmem:[#allocation3 + $0x20] sm:$0x1] %vm1092_vm11, %v1053_v59 }
0x16b1   :  { %3519 = vrot.lane.b32.xlu1 %v3472_v17, %s11333_s21  ;;  %4138 = vrot.lane.b32.xlu0 %v4095_v34, %s11333_s21  ;;  %v2822_v17 = vcombine.high %v12938_v3, %v12938_v3 }
0x16b2   :  { %v2284_v1 = vpop.permute.xlu1 %2283 }
0x16b3   :  { %2327 = vst.msk [vmem:[#allocation3 + $0x22] sm:$0x1] %vm1092_vm11, %v2284_v1  ;;  %v2869_v1 = vrot.slane %v2822_v17, %v11594_v56 }
0x16b5   :  { %4749 = vrot.lane.b32.xlu1 %v4702_v51, %s11333_s21 }
0x16b6   :  { %v3514_v46 = vpop.permute.xlu1 %3513 }
0x16b7   :  { %3557 = vst.msk [vmem:[#allocation3 + $0x24] sm:$0x1] %vm1092_vm11, %v3514_v46  ;;  %v4099_v46 = vrot.slane %v4052_v15, %v11594_v56 }
0x16b9   :  { %1060 = vrot.lane.b32.xlu1 %v1015_v37, %s11333_s21 }
0x16ba   :  { %v4744_v16 = vpop.permute.xlu1 %4743 }
0x16bb   :  { %4787 = vst.msk [vmem:[#allocation3 + $0x26] sm:$0x1] %vm1092_vm11, %v4744_v16  ;;  %v976_v16 = vcombine.high %v13008_v41, %v13008_v41  ;;  %v2207_v41 = vcombine.high %v13016_v5, %v13016_v5 }
0x16bd   :  { %2291 = vrot.lane.b32.xlu1 %v2246_v2, %s11333_s21  ;;  %v1643_v2 = vrot.slane %v1594_v30, %v11594_v56  ;;  %v2254_v5 = vrot.slane %v2207_v41, %v11594_v56 }
0x16be   :  { %v1055_v60 = vpop.permute.xlu1 %1054 }
0x16bf   :  { %1098 = vst.msk [vmem:[#allocation3 + $0x28] sm:$0x1] %vm1092_vm11, %v1055_v60  ;;  %v2824_v60 = vcombine.high %v12981_v6, %v12981_v6  ;;  %v1023_v6 = vrot.slane %v976_v16, %v11594_v56 }
0x16c1   :  { %3521 = vrot.lane.b32.xlu1 %v3476_v19, %s11333_s21  ;;  %v2873_v28 = vrot.slane %v2824_v60, %v11594_v56 }
0x16c2   :  { %v2286_v0 = vpop.permute.xlu1 %2285 }
0x16c3   :  { %2328 = vst.msk [vmem:[#allocation3 + $0x2a] sm:$0x1] %vm1092_vm11, %v2286_v0 }
0x16c5   :  { %4751 = vrot.lane.b32.xlu1 %v4706_v44, %s11333_s21  ;;  %v4054_v44 = vcombine.high %v12993_v50, %v12993_v50  ;;  %v3437_v50 = vcombine.high %v13025_v31, %v13025_v31  ;;  %v4667_v31 = vcombine.high %v13034_v10, %v13034_v10 }
0x16c6   :  { %v3516_v12 = vpop.permute.xlu1 %3515 }
0x16c7   :  { %3558 = vst.msk [vmem:[#allocation3 + $0x2c] sm:$0x1] %vm1092_vm11, %v3516_v12  ;;  %v2791_v12 = vrot.slane %v2777_v55, %v12527_v25 }
0x16c9   :  { %1062 = vrot.lane.b32.xlu1 %v1019_v18, %s11333_s21 }
0x16cd   :  { %2293 = vrot.lane.b32.xlu1 %v2250_v53, %s11333_s21  ;;  %v4103_v53 = vrot.slane %v4054_v44, %v11594_v56 }
0x16d1   :  { %3523 = vrot.lane.b32.xlu1 %v3480_v47, %s11333_s21  ;;  %v1647_v47 = vrot.slane %v13122_v27, %v11594_v56 }
0x16d5   :  { %4753 = vrot.lane.b32.xlu1 %v4710_v61, %s11333_s21 }
0x16f3   :  { %v5169_v32 = vpop.permute.xlu0 %5168 }
0x16f4   :  { %v5173_v42 = vadd.f32 %v5169_v32, %v5153_v7  ;;  %v3484_v7 = vrot.slane %v3437_v50, %v11594_v56 }
0x16f6   :  { %10499 = vtanh.f32 %v5173_v42  ;;  %v13141_v42 = vrot.slane %v2791_v12, %v12527_v25 }
0x16f7   :  { %v1673_v38 = vpop.permute.xlu0 %1672 }
0x16f8   :  { %1714 = vst.msk [vmem:[#allocation3 + $0x31] sm:$0x1] %vm1092_vm11, %v1673_v38  ;;  %v1563_v38 = vcombine.high %v1561_v57, %v1561_v57  ;;  %v1593_v57 = vcombine.high %v13122_v27, %v13122_v27 }
0x16fb   :  { %v2903_v48 = vpop.permute.xlu0 %2902 }
0x16fc   :  { %2944 = vst.msk [vmem:[#allocation3 + $0x33] sm:$0x1] %vm1092_vm11, %v2903_v48 }
0x16ff   :  { %v4133_v40 = vpop.permute.xlu0 %4132 }
0x1700   :  { %v10500_v24 = vpop.eup %10499  ;;  %4174 = vst.msk [vmem:[#allocation3 + $0x35] sm:$0x1] %vm1092_vm11, %v4133_v40  ;;  %v4714_v40 = vrot.slane %v4667_v31, %v11594_v56 }
0x1701   :  { %5180 = vrot.lane.b32.xlu0 %v10500_v24, %s11332_s20  ;;  %v2877_v24 = vrot.slane %v13141_v42, %v11594_v56 }
0x1703   :  { %v5167_v35 = vpop.permute.xlu1 %5166  ;;  %v1675_v59 = vpop.permute.xlu0 %1674 }
0x1704   :  { %v5172_v58 = vadd.f32 %v5167_v35, %v5152_v45  ;;  %1715 = vst.msk [vmem:[#allocation3 + $0x39] sm:$0x1] %vm1092_vm11, %v1675_v59  ;;  %v13160_v45 = vrot.slane %v1563_v38, %v12527_v25  ;;  %v2793_v35 = vcombine.high %v2791_v12, %v2791_v12  ;;  %v1027_v59 = vrot.slane %v978_v11, %v11594_v56 }
0x1705   :  { %1680 = vrot.lane.b32.xlu0 %v1639_v36, %s11333_s21  ;;  %v2209_v36 = vcombine.high %v13051_v22, %v13051_v22 }
0x1706   :  { %10501 = vtanh.f32 %v5172_v58  ;;  %v4107_v58 = vrot.slane %v13153_v63, %v11594_v56 }
0x1707   :  { %v4746_v52 = vpop.permute.xlu1 %4745  ;;  %v2905_v34 = vpop.permute.xlu0 %2904  ;;  %v2258_v15 = vrot.slane %v2209_v36, %v11594_v56 }
0x1708   :  { %4788 = vst.msk [vmem:[#allocation3 + $0x2e] sm:$0x1] %vm1092_vm11, %v4746_v52  ;;  %2945 = vst.msk [vmem:[#allocation3 + $0x3b] sm:$0x1] %vm1092_vm11, %v2905_v34  ;;  %v931_v52 = vcombine.high %v11931_v39, %v11931_v39  ;;  %v1651_v34 = vrot.slane %v13160_v45, %v11594_v56 }
0x1709   :  { %2910 = vrot.lane.b32.xlu0 %v2869_v1, %s11333_s21  ;;  %v4023_v1 = vcombine.high %v4021_v8, %v4021_v8 }
0x170a   :  { %v945_v39 = vrot.slane %v931_v52, %v12527_v25 }
0x170b   :  { %v1057_v3 = vpop.permute.xlu1 %1056  ;;  %v4135_v51 = vpop.permute.xlu0 %4134  ;;  %v13193_v16 = vrot.slane %v4023_v1, %v12527_v25 }
0x170c   :  { %1099 = vst.msk [vmem:[#allocation3 + $0x30] sm:$0x1] %vm1092_vm11, %v1057_v3  ;;  %4175 = vst.msk [vmem:[#allocation3 + $0x3d] sm:$0x1] %vm1092_vm11, %v4135_v51  ;;  %v3439_v3 = vcombine.high %v13057_v29, %v13057_v29  ;;  %v13179_v51 = vrot.slane %v2793_v35, %v12527_v25  ;;  %v4669_v29 = vcombine.high %v13063_v9, %v13063_v9 }
0x170d   :  { %4140 = vrot.lane.b32.xlu0 %v4099_v46, %s11333_s21  ;;  %v2162_v46 = vcombine.high %v12127_v54, %v12127_v54 }
0x170e   :  { %v3488_v62 = vrot.slane %v3439_v3, %v11594_v56  ;;  %v4718_v60 = vrot.slane %v4669_v29, %v11594_v56 }
0x170f   :  { %v2288_v37 = vpop.permute.xlu1 %2287  ;;  %v1677_v49 = vpop.permute.xlu0 %1676  ;;  %v2176_v54 = vrot.slane %v2162_v46, %v12527_v25 }
0x1710   :  { %v10502_v26 = vpop.eup %10501  ;;  %2329 = vst.msk [vmem:[#allocation3 + $0x32] sm:$0x1] %vm1092_vm11, %v2288_v37  ;;  %1716 = vst.msk [vmem:[#allocation3 + $0x41] sm:$0x1] %vm1092_vm11, %v1677_v49  ;;  %v2881_v37 = vrot.slane %v13179_v51, %v11594_v56  ;;  %v961_v49 = vrot.slane %v945_v39, %v12527_v25 }
0x1711   :  { %5178 = vrot.lane.b32.xlu1 %v10502_v26, %s11332_s20  ;;  %1682 = vrot.lane.b32.xlu0 %v1643_v2, %s11333_s21  ;;  %v3392_v2 = vcombine.high %v12326_v43, %v12326_v43  ;;  %v4111_v26 = vrot.slane %v13193_v16, %v11594_v56  ;;  %v2192_v55 = vrot.slane %v2176_v54, %v12527_v25 }
0x1712   :  { %v1031_v41 = vrot.slane %v961_v49, %v11594_v56  ;;  %v2178_v8 = vcombine.high %v2176_v54, %v2176_v54 }
0x1713   :  { %v3518_v19 = vpop.permute.xlu1 %3517  ;;  %v2907_v0 = vpop.permute.xlu0 %2906  ;;  %v3406_v43 = vrot.slane %v3392_v2, %v12527_v25  ;;  %v2262_v44 = vrot.slane %v2192_v55, %v11594_v56 }
0x1714   :  { %3559 = vst.msk [vmem:[#allocation3 + $0x34] sm:$0x1] %vm1092_vm11, %v3518_v19  ;;  %2946 = vst.msk [vmem:[#allocation3 + $0x43] sm:$0x1] %vm1092_vm11, %v2907_v0  ;;  %v4622_v19 = vcombine.high %v12535_v33, %v12535_v33  ;;  %v1655_v0 = vrot.slane %v1593_v57, %v11594_v56 }
0x1715   :  { %1064 = vrot.lane.b32.xlu1 %v1023_v6, %s11333_s21  ;;  %2912 = vrot.lane.b32.xlu0 %v2873_v28, %s11333_s21  ;;  %v2823_v28 = vcombine.high %v13141_v42, %v13141_v42  ;;  %v3422_v12 = vrot.slane %v3406_v43, %v12527_v25 }
0x1717   :  { %v4748_v18 = vpop.permute.xlu1 %4747  ;;  %v4137_v14 = vpop.permute.xlu0 %4136  ;;  %v2885_v33 = vrot.slane %v2823_v28, %v11594_v56  ;;  %v3438_v52 = vcombine.high %v3422_v12, %v3422_v12 }
0x1718   :  { %4789 = vst.msk [vmem:[#allocation3 + $0x36] sm:$0x1] %vm1092_vm11, %v4748_v18  ;;  %4176 = vst.msk [vmem:[#allocation3 + $0x45] sm:$0x1] %vm1092_vm11, %v4137_v14  ;;  %v947_v18 = vcombine.high %v945_v39, %v945_v39  ;;  %v3492_v14 = vrot.slane %v3422_v12, %v11594_v56 }
0x1719   :  { %2295 = vrot.lane.b32.xlu1 %v2254_v5, %s11333_s21  ;;  %4142 = vrot.lane.b32.xlu0 %v4103_v53, %s11333_s21  ;;  %v4636_v5 = vrot.slane %v4622_v19, %v12527_v25 }
0x171a   :  { %v975_v31 = vrot.slane %v947_v18, %v12527_v25 }
0x171b   :  { %v1059_v61 = vpop.permute.xlu1 %1058  ;;  %v1679_v32 = vpop.permute.xlu0 %1678  ;;  %v4652_v53 = vrot.slane %v4636_v5, %v12527_v25 }
0x171c   :  { %1100 = vst.msk [vmem:[#allocation3 + $0x38] sm:$0x1] %vm1092_vm11, %v1059_v61  ;;  %1717 = vst.msk [vmem:[#allocation3 + $0x49] sm:$0x1] %vm1092_vm11, %v1679_v32  ;;  %v3408_v32 = vcombine.high %v3406_v43, %v3406_v43  ;;  %v1035_v38 = vrot.slane %v975_v31, %v11594_v56 }
0x171d   :  { %3525 = vrot.lane.b32.xlu1 %v3484_v7, %s11333_s21  ;;  %1684 = vrot.lane.b32.xlu0 %v1647_v47, %s11333_s21  ;;  %v4115_v47 = vrot.slane %v4053_v21, %v11594_v56  ;;  %v4722_v7 = vrot.slane %v4652_v53, %v11594_v56  ;;  %v4668_v1 = vcombine.high %v4652_v53, %v4652_v53 }
0x171f   :  { %v2290_v48 = vpop.permute.xlu1 %2289  ;;  %v2909_v10 = vpop.permute.xlu0 %2908 }
0x1720   :  { %2330 = vst.msk [vmem:[#allocation3 + $0x3a] sm:$0x1] %vm1092_vm11, %v2290_v48  ;;  %2947 = vst.msk [vmem:[#allocation3 + $0x4b] sm:$0x1] %vm1092_vm11, %v2909_v10  ;;  %v2206_v48 = vrot.slane %v2178_v8, %v12527_v25  ;;  %v5432_v8 = vld [vmem:[%s14271_s2 + $0x8] sm:$0xff] }
0x1721   :  { %4755 = vrot.lane.b32.xlu1 %v4714_v40, %s11333_s21  ;;  %2914 = vrot.lane.b32.xlu0 %v2877_v24, %s11333_s21  ;;  %v4638_v40 = vcombine.high %v4636_v5, %v4636_v5  ;;  %v3436_v24 = vrot.slane %v3408_v32, %v12527_v25 }
0x1722   :  { %v2266_v10 = vrot.slane %v2206_v48, %v11594_v56  ;;  %v2210_v39 = vcombine.high %v2206_v48, %v2206_v48  ;;  %v5433_v48 = vld [vmem:[%s14271_s2 + $0x10] sm:$0xff] }
0x1723   :  { %v3520_v4 = vpop.permute.xlu1 %3519  ;;  %v4139_v17 = vpop.permute.xlu0 %4138  ;;  %v3496_v63 = vrot.slane %v3436_v24, %v11594_v56  ;;  %v4666_v35 = vrot.slane %v4638_v40, %v12527_v25  ;;  %v5434_v40 = vld [vmem:[%s14271_s2 + $0x18] sm:$0xff] }
0x1724   :  { %3560 = vst.msk [vmem:[#allocation3 + $0x3c] sm:$0x1] %vm1092_vm11, %v3520_v4  ;;  %4177 = vst.msk [vmem:[#allocation3 + $0x4d] sm:$0x1] %vm1092_vm11, %v4139_v17  ;;  %v2208_v17 = vcombine.high %v2192_v55, %v2192_v55  ;;  %v2274_v46 = vrot.slane %v2210_v39, %v11594_v56 }
0x1725   :  { %1066 = vrot.lane.b32.xlu1 %v1027_v59, %s11333_s21  ;;  %4144 = vrot.lane.b32.xlu0 %v4107_v58, %s11333_s21  ;;  %v4726_v4 = vrot.slane %v4666_v35, %v11594_v56  ;;  %v977_v59 = vcombine.high %v961_v49, %v961_v49  ;;  %v4670_v29 = vcombine.high %v4666_v35, %v4666_v35 }
0x1726   :  { %v2270_v58 = vrot.slane %v2208_v17, %v11594_v56 }
0x1727   :  { %v4750_v22 = vpop.permute.xlu1 %4749  ;;  %v1039_v36 = vrot.slane %v977_v59, %v11594_v56 }
0x1728   :  { %4790 = vst.msk [vmem:[#allocation3 + $0x3e] sm:$0x1] %vm1092_vm11, %v4750_v22  ;;  %v4730_v22 = vrot.slane %v4668_v1, %v11594_v56 }
0x1729   :  { %2297 = vrot.lane.b32.xlu1 %v2258_v15, %s11333_s21  ;;  %1686 = vrot.lane.b32.xlu0 %v1651_v34, %s11333_s21  ;;  %v3500_v34 = vrot.slane %v3438_v52, %v11594_v56  ;;  %v979_v15 = vcombine.high %v975_v31, %v975_v31  ;;  %v9032_v52 = vld [vmem:[%s14272_s3 + $0x38] sm:$0xff] }
0x172b   :  { %v1061_v30 = vpop.permute.xlu1 %1060  ;;  %v1043_v3 = vrot.slane %v979_v15, %v11594_v56 }
0x172c   :  { %1101 = vst.msk [vmem:[#allocation3 + $0x40] sm:$0x1] %vm1092_vm11, %v1061_v30  ;;  %v3440_v30 = vcombine.high %v3436_v24, %v3436_v24  ;;  %v9030_v24 = vld [vmem:[%s14272_s3 + $0x28] sm:$0xff] }
0x172d   :  { %3527 = vrot.lane.b32.xlu1 %v3488_v62, %s11333_s21  ;;  %2916 = vrot.lane.b32.xlu0 %v2881_v37, %s11333_s21  ;;  %v4734_v37 = vrot.slane %v4670_v29, %v11594_v56 }
0x172e   :  { %v3504_v62 = vrot.slane %v3440_v30, %v11594_v56 }
0x172f   :  { %v2292_v9 = vpop.permute.xlu1 %2291 }
0x1730   :  { %2331 = vst.msk [vmem:[#allocation3 + $0x42] sm:$0x1] %vm1092_vm11, %v2292_v9 }
0x1731   :  { %4757 = vrot.lane.b32.xlu1 %v4718_v60, %s11333_s21  ;;  %4146 = vrot.lane.b32.xlu0 %v4111_v26, %s11333_s21 }
0x1733   :  { %v3522_v6 = vpop.permute.xlu1 %3521 }
0x1734   :  { %3561 = vst.msk [vmem:[#allocation3 + $0x44] sm:$0x1] %vm1092_vm11, %v3522_v6 }
0x1735   :  { %1068 = vrot.lane.b32.xlu1 %v1031_v41, %s11333_s21  ;;  %1688 = vrot.lane.b32.xlu0 %v1655_v0, %s11333_s21 }
0x1737   :  { %v4752_v27 = vpop.permute.xlu1 %4751 }
0x1738   :  { %4791 = vst.msk [vmem:[#allocation3 + $0x46] sm:$0x1] %vm1092_vm11, %v4752_v27 }
0x1739   :  { %2299 = vrot.lane.b32.xlu1 %v2262_v44, %s11333_s21  ;;  %2918 = vrot.lane.b32.xlu0 %v2885_v33, %s11333_s21 }
0x173b   :  { %v1063_v50 = vpop.permute.xlu1 %1062 }
0x173c   :  { %1102 = vst.msk [vmem:[#allocation3 + $0x48] sm:$0x1] %vm1092_vm11, %v1063_v50 }
0x173d   :  { %3529 = vrot.lane.b32.xlu1 %v3492_v14, %s11333_s21  ;;  %4148 = vrot.lane.b32.xlu0 %v4115_v47, %s11333_s21  ;;  %v5431_v47 = vld [vmem:[%s14271_s2] sm:$0xff] }
0x173f   :  { %v2294_v61 = vpop.permute.xlu1 %2293 }
0x1740   :  { %2332 = vst.msk [vmem:[#allocation3 + $0x4a] sm:$0x1] %vm1092_vm11, %v2294_v61  ;;  %v9583_v61 = vpack.c.bf16 %v5432_v8, %v5431_v47 }
0x1741   :  { %4759 = vrot.lane.b32.xlu1 %v4722_v7, %s11333_s21 }
0x1742   :  { %9584 = vmatprep.subr.bf16.mxu0 %v9583_v61 }
0x1743   :  { %v3524_v42 = vpop.permute.xlu1 %3523  ;;  %9586 = vmatpush3.bf16.msra.mxu0 %v9583_v61  ;;  %v1595_v61 = vcombine.high %v13160_v45, %v13160_v45  ;;  %v4055_v45 = vcombine.high %v13193_v16, %v13193_v16 }
0x1744   :  { %3562 = vst.msk [vmem:[#allocation3 + $0x4c] sm:$0x1] %vm1092_vm11, %v3524_v42 }
0x1745   :  { %1070 = vrot.lane.b32.xlu1 %v1035_v38, %s11333_s21 }
0x1747   :  { %v4754_v11 = vpop.permute.xlu1 %4753 }
0x1748   :  { %4792 = vst.msk [vmem:[#allocation3 + $0x4e] sm:$0x1] %vm1092_vm11, %v4754_v11  ;;  %v9029_v11 = vld [vmem:[%s14272_s3 + $0x20] sm:$0xff] }
0x1749   :  { %2301 = vrot.lane.b32.xlu1 %v2266_v10, %s11333_s21  ;;  %v9587_v10 = vpack.c.bf16 %v5434_v40, %v5433_v48  ;;  %v4119_v40 = vrot.slane %v4055_v45, %v11594_v56 }
0x174b   :  { %9588 = vmatprep.subr.bf16.mxu0 %v9587_v10 }
0x174c   :  { %9590 = vmatpush3.bf16.msra.mxu0 %v9587_v10 }
0x174d   :  { %3531 = vrot.lane.b32.xlu1 %v3496_v63, %s11333_s21  ;;  %v13327_v63 = vpack.c.bf16 %v9030_v24, %v9029_v11 }
0x174f   :  { %9592 = vmatprep.subr.bf16.mxu1 %v13327_v63  ;;  %9624 = vmatprep.subr.bf16.mxu0 %v13327_v63 }
0x1750   :  { %9594 = vmatpush3.bf16.msra.mxu1 %v13327_v63 }
0x1751   :  { %4761 = vrot.lane.b32.xlu1 %v4726_v4, %s11333_s21 }
0x1755   :  { %1072 = vrot.lane.b32.xlu1 %v1039_v36, %s11333_s21 }
0x1759   :  { %2303 = vrot.lane.b32.xlu1 %v2270_v58, %s11333_s21  ;;  %v9031_v58 = vld [vmem:[%s14272_s3 + $0x30] sm:$0xff] }
0x175d   :  { %3533 = vrot.lane.b32.xlu1 %v3500_v34, %s11333_s21  ;;  %v13345_v34 = vpack.c.bf16 %v9032_v52, %v9031_v58 }
0x175f   :  { %9596 = vmatprep.subr.bf16.mxu1 %v13345_v34 }
0x1760   :  { %9598 = vmatpush3.bf16.msra.mxu1 %v13345_v34 }
0x1761   :  { %4763 = vrot.lane.b32.xlu1 %v4730_v22, %s11333_s21  ;;  %9600 = vmatprep.subr.bf16.mxu1 %v13327_v63 }
0x1765   :  { %1074 = vrot.lane.b32.xlu1 %v1043_v3, %s11333_s21 }
0x1769   :  { %2305 = vrot.lane.b32.xlu1 %v2274_v46, %s11333_s21 }
0x176d   :  { %3535 = vrot.lane.b32.xlu1 %v3504_v62, %s11333_s21 }
0x1771   :  { %4765 = vrot.lane.b32.xlu1 %v4734_v37, %s11333_s21  ;;  %v14283_v37 = vmov 0.0  }
0x1772   :  { %9429 = vmatmul.mubr.f32.vlgmr.msra.gmra.mrb[8].mxu1 %v14283_v37 }
0x1773   :  { %v5181_v54 = vpop.permute.xlu0 %5180  ;;  %9602 = vmatpush3.bf16.msra.mxu1 %v13327_v63 }
0x1774   :  { %v5185_v49 = vmul.f32 %v5181_v54, %v12712_v20  ;;  %9604 = vmatprep.subr.bf16.mxu1 %v13345_v34 }
0x1776   :  { %v5244_v2 = vrot.slane %v5185_v49, %v12527_v25  ;;  %v5237_v5 = vcombine.high %v5185_v49, %v5185_v49 }
0x1777   :  { %v1681_v9 = vpop.permute.xlu0 %1680  ;;  %9606 = vmatpush3.bf16.msra.mxu1 %v13345_v34 }
0x1778   :  { %v5260_v60 = vrot.slane %v5244_v2, %v12527_v25  ;;  %1718 = vst.msk [vmem:[#allocation3 + $0x51] sm:$0x1] %vm1092_vm11, %v1681_v9  ;;  %v5252_v6 = vcombine.high %v5244_v2, %v5244_v2  ;;  %v13294_v21 = vrot.slane %v5237_v5, %v12527_v25  ;;  %9608 = vmatprep.subr.bf16.mxu1 %v13327_v63 }
0x177a   :  { %v5321_v57 = vrot.slane %v5260_v60, %v11594_v56  ;;  %v13286_v27 = vrot.slane %v5252_v6, %v12527_v25  ;;  %v5282_v18 = vcombine.high %v5260_v60, %v5260_v60  ;;  %v13309_v7 = vrot.slane %v13294_v21, %v12527_v25 }
0x177b   :  { %v2911_v26 = vpop.permute.xlu0 %2910  ;;  %v5253_v54 = vcombine.high %v13294_v21, %v13294_v21 }
0x177c   :  { %2948 = vst.msk [vmem:[#allocation3 + $0x53] sm:$0x1] %vm1092_vm11, %v2911_v26  ;;  %5366 = vrot.lane.b32.xlu0 %v5321_v57, %s11333_s21  ;;  %v5325_v14 = vrot.slane %v13286_v27, %v11594_v56  ;;  %v5329_v42 = vrot.slane %v5282_v18, %v11594_v56  ;;  %v5337_v36 = vrot.slane %v13309_v7, %v11594_v56 }
0x177d   :  { %v5284_v9 = vcombine.high %v13286_v27, %v13286_v27 }
0x177f   :  { %v4141_v41 = vpop.permute.xlu0 %4140  ;;  %v5333_v57 = vrot.slane %v5284_v9, %v11594_v56 }
0x1780   :  { %4178 = vst.msk [vmem:[#allocation3 + $0x55] sm:$0x1] %vm1092_vm11, %v4141_v41  ;;  %v5281_v41 = vrot.slane %v5253_v54, %v12527_v25 }
0x1782   :  { %v5285_v11 = vcombine.high %v5281_v41, %v5281_v41 }
0x1783   :  { %v5179_v55 = vpop.permute.xlu1 %5178  ;;  %v1683_v43 = vpop.permute.xlu0 %1682 }
0x1784   :  { %v5184_v20 = vmul.f32 %v5179_v55, %v12753_v13  ;;  %1719 = vst.msk [vmem:[#allocation3 + $0x59] sm:$0x1] %vm1092_vm11, %v1683_v43  ;;  %v5349_v10 = vrot.slane %v5285_v11, %v11594_v56 }
0x1786   :  { %v5195_v19 = vrot.slane %v5184_v20, %v12527_v25  ;;  %v5188_v35 = vcombine.high %v5184_v20, %v5184_v20  ;;  %v5341_v20 = vrot.slane %v5281_v41, %v11594_v56 }
0x1787   :  { %v1065_v0 = vpop.permute.xlu1 %1064  ;;  %v2913_v28 = vpop.permute.xlu0 %2912 }
0x1788   :  { %v13281_v44 = vrot.slane %v5195_v19, %v12527_v25  ;;  %1103 = vst.msk [vmem:[#allocation3 + $0x50] sm:$0x1] %vm1092_vm11, %v1065_v0  ;;  %2949 = vst.msk [vmem:[#allocation3 + $0x5b] sm:$0x1] %vm1092_vm11, %v2913_v28  ;;  %v5203_v31 = vcombine.high %v5195_v19, %v5195_v19  ;;  %v5202_v1 = vrot.slane %v5188_v35, %v12527_v25 }
0x1789   :  { %v5283_v19 = vcombine.high %v13309_v7, %v13309_v7 }
0x178a   :  { %v5289_v13 = vrot.slane %v13281_v44, %v11594_v56  ;;  %v13330_v4 = vrot.slane %v5203_v31, %v12527_v25  ;;  %v5233_v22 = vcombine.high %v13281_v44, %v13281_v44  ;;  %v5218_v46 = vrot.slane %v5202_v1, %v12527_v25 }
0x178b   :  { %v2296_v12 = vpop.permute.xlu1 %2295  ;;  %v4143_v33 = vpop.permute.xlu0 %4142  ;;  %v5204_v0 = vcombine.high %v5202_v1, %v5202_v1  ;;  %v5345_v44 = vrot.slane %v5283_v19, %v11594_v56  ;;  %v1659_v31 = vrot.slane %v1595_v61, %v11594_v56 }
0x178c   :  { %2333 = vst.msk [vmem:[#allocation3 + $0x52] sm:$0x1] %vm1092_vm11, %v2296_v12  ;;  %4179 = vst.msk [vmem:[#allocation3 + $0x5d] sm:$0x1] %vm1092_vm11, %v4143_v33  ;;  %5350 = vrot.lane.b32.xlu0 %v5289_v13, %s11333_s21  ;;  %v5293_v3 = vrot.slane %v13330_v4, %v11594_v56  ;;  %v5297_v62 = vrot.slane %v5233_v22, %v11594_v56  ;;  %v5305_v2 = vrot.slane %v5218_v46, %v11594_v56 }
0x178d   :  { %v5235_v5 = vcombine.high %v13330_v4, %v13330_v4  ;;  %v5232_v33 = vrot.slane %v5204_v0, %v12527_v25 }
0x178f   :  { %v3526_v50 = vpop.permute.xlu1 %3525  ;;  %v1685_v53 = vpop.permute.xlu0 %1684  ;;  %v5301_v13 = vrot.slane %v5235_v5, %v11594_v56  ;;  %v5309_v18 = vrot.slane %v5232_v33, %v11594_v56  ;;  %v5236_v47 = vcombine.high %v5232_v33, %v5232_v33 }
0x1790   :  { %3563 = vst.msk [vmem:[#allocation3 + $0x54] sm:$0x1] %vm1092_vm11, %v3526_v50  ;;  %1720 = vst.msk [vmem:[#allocation3 + $0x61] sm:$0x1] %vm1092_vm11, %v1685_v53  ;;  %5368 = vrot.lane.b32.xlu0 %v5325_v14, %s11333_s21  ;;  %v5234_v50 = vcombine.high %v5218_v46, %v5218_v46 }
0x1791   :  { %v5317_v8 = vrot.slane %v5236_v47, %v11594_v56 }
0x1792   :  { %v5313_v53 = vrot.slane %v5234_v50, %v11594_v56 }
0x1793   :  { %v4756_v32 = vpop.permute.xlu1 %4755  ;;  %v2915_v38 = vpop.permute.xlu0 %2914 }
0x1794   :  { %4793 = vst.msk [vmem:[#allocation3 + $0x56] sm:$0x1] %vm1092_vm11, %v4756_v32  ;;  %2950 = vst.msk [vmem:[#allocation3 + $0x63] sm:$0x1] %vm1092_vm11, %v2915_v38  ;;  %5370 = vrot.lane.b32.xlu0 %v5329_v42, %s11333_s21  ;;  %v2825_v32 = vcombine.high %v13179_v51, %v13179_v51 }
0x1796   :  { %v2889_v38 = vrot.slane %v2825_v32, %v11594_v56 }
0x1797   :  { %v1067_v59 = vpop.permute.xlu1 %1066  ;;  %v4145_v17 = vpop.permute.xlu0 %4144 }
0x1798   :  { %1104 = vst.msk [vmem:[#allocation3 + $0x58] sm:$0x1] %vm1092_vm11, %v1067_v59  ;;  %4180 = vst.msk [vmem:[#allocation3 + $0x65] sm:$0x1] %vm1092_vm11, %v4145_v17  ;;  %5374 = vrot.lane.b32.xlu0 %v5337_v36, %s11333_s21 }
0x179b   :  { %v2298_v15 = vpop.permute.xlu1 %2297  ;;  %v1687_v39 = vpop.permute.xlu0 %1686 }
0x179c   :  { %2334 = vst.msk [vmem:[#allocation3 + $0x5a] sm:$0x1] %vm1092_vm11, %v2298_v15  ;;  %1721 = vst.msk [vmem:[#allocation3 + $0x69] sm:$0x1] %vm1092_vm11, %v1687_v39  ;;  %5352 = vrot.lane.b32.xlu0 %v5293_v3, %s11333_s21 }
0x179f   :  { %v3528_v30 = vpop.permute.xlu1 %3527  ;;  %v2917_v29 = vpop.permute.xlu0 %2916 }
0x17a0   :  { %3564 = vst.msk [vmem:[#allocation3 + $0x5c] sm:$0x1] %vm1092_vm11, %v3528_v30  ;;  %2951 = vst.msk [vmem:[#allocation3 + $0x6b] sm:$0x1] %vm1092_vm11, %v2917_v29  ;;  %5354 = vrot.lane.b32.xlu0 %v5297_v62, %s11333_s21 }
0x17a3   :  { %v4758_v49 = vpop.permute.xlu1 %4757  ;;  %v4147_v60 = vpop.permute.xlu0 %4146 }
0x17a4   :  { %4794 = vst.msk [vmem:[#allocation3 + $0x5e] sm:$0x1] %vm1092_vm11, %v4758_v49  ;;  %4181 = vst.msk [vmem:[#allocation3 + $0x6d] sm:$0x1] %vm1092_vm11, %v4147_v60  ;;  %5358 = vrot.lane.b32.xlu0 %v5305_v2, %s11333_s21 }
0x17a7   :  { %v1069_v26 = vpop.permute.xlu1 %1068  ;;  %v1689_v55 = vpop.permute.xlu0 %1688 }
0x17a8   :  { %1105 = vst.msk [vmem:[#allocation3 + $0x60] sm:$0x1] %vm1092_vm11, %v1069_v26  ;;  %1722 = vst.msk [vmem:[#allocation3 + $0x71] sm:$0x1] %vm1092_vm11, %v1689_v55  ;;  %5372 = vrot.lane.b32.xlu0 %v5333_v57, %s11333_s21 }
0x17ab   :  { %v2300_v43 = vpop.permute.xlu1 %2299  ;;  %v2919_v6 = vpop.permute.xlu0 %2918 }
0x17ac   :  { %2335 = vst.msk [vmem:[#allocation3 + $0x62] sm:$0x1] %vm1092_vm11, %v2300_v43  ;;  %2952 = vst.msk [vmem:[#allocation3 + $0x73] sm:$0x1] %vm1092_vm11, %v2919_v6  ;;  %5376 = vrot.lane.b32.xlu0 %v5341_v20, %s11333_s21 }
0x17af   :  { %v3530_v28 = vpop.permute.xlu1 %3529  ;;  %v4149_v27 = vpop.permute.xlu0 %4148 }
0x17b0   :  { %3565 = vst.msk [vmem:[#allocation3 + $0x64] sm:$0x1] %vm1092_vm11, %v3530_v28  ;;  %4182 = vst.msk [vmem:[#allocation3 + $0x75] sm:$0x1] %vm1092_vm11, %v4149_v27  ;;  %5378 = vrot.lane.b32.xlu0 %v5345_v44, %s11333_s21 }
0x17b3   :  { %v4760_v12 = vpop.permute.xlu1 %4759 }
0x17b4   :  { %4795 = vst.msk [vmem:[#allocation3 + $0x66] sm:$0x1] %vm1092_vm11, %v4760_v12  ;;  %5356 = vrot.lane.b32.xlu0 %v5301_v13, %s11333_s21 }
0x17b7   :  { %v1071_v21 = vpop.permute.xlu1 %1070 }
0x17b8   :  { %1106 = vst.msk [vmem:[#allocation3 + $0x68] sm:$0x1] %vm1092_vm11, %v1071_v21  ;;  %5360 = vrot.lane.b32.xlu0 %v5309_v18, %s11333_s21  ;;  %v13476_v18 = vld [vmem:[%s14273_s4 + $0x1] ss:$0 sm:$0xff] }
0x17bb   :  { %v2302_v14 = vpop.permute.xlu1 %2301 }
0x17bc   :  { %2336 = vst.msk [vmem:[#allocation3 + $0x6a] sm:$0x1] %vm1092_vm11, %v2302_v14  ;;  %5362 = vrot.lane.b32.xlu0 %v5313_v53, %s11333_s21 }
0x17bf   :  { %v3532_v25 = vpop.permute.xlu1 %3531 }
0x17c0   :  { %3566 = vst.msk [vmem:[#allocation3 + $0x6c] sm:$0x1] %vm1092_vm11, %v3532_v25  ;;  %5364 = vrot.lane.b32.xlu0 %v5317_v8, %s11333_s21 }
0x17c3   :  { %v4762_v7 = vpop.permute.xlu1 %4761 }
0x17c4   :  { %4796 = vst.msk [vmem:[#allocation3 + $0x6e] sm:$0x1] %vm1092_vm11, %v4762_v7  ;;  %1690 = vrot.lane.b32.xlu0 %v1659_v31, %s11333_s21 }
0x17c7   :  { %v1073_v42 = vpop.permute.xlu1 %1072 }
0x17c8   :  { %1107 = vst.msk [vmem:[#allocation3 + $0x70] sm:$0x1] %vm1092_vm11, %v1073_v42  ;;  %2920 = vrot.lane.b32.xlu0 %v2889_v38, %s11333_s21 }
0x17cb   :  { %v2304_v48 = vpop.permute.xlu1 %2303 }
0x17cc   :  { %2337 = vst.msk [vmem:[#allocation3 + $0x72] sm:$0x1] %vm1092_vm11, %v2304_v48  ;;  %4150 = vrot.lane.b32.xlu0 %v4119_v40, %s11333_s21 }
0x17cf   :  { %v3534_v51 = vpop.permute.xlu1 %3533 }
0x17d0   :  { %3567 = vst.msk [vmem:[#allocation3 + $0x74] sm:$0x1] %vm1092_vm11, %v3534_v51  ;;  %5380 = vrot.lane.b32.xlu0 %v5349_v10, %s11333_s21 }
0x17d3   :  { %v4764_v16 = vpop.permute.xlu1 %4763 }
0x17d4   :  { %4797 = vst.msk [vmem:[#allocation3 + $0x76] sm:$0x1] %vm1092_vm11, %v4764_v16 }
0x17d7   :  { %v1075_v24 = vpop.permute.xlu1 %1074 }
0x17d8   :  { %1108 = vst.msk [vmem:[#allocation3 + $0x78] sm:$0x1] %vm1092_vm11, %v1075_v24 }
0x17db   :  { %v2306_v35 = vpop.permute.xlu1 %2305 }
0x17dc   :  { %2338 = vst.msk [vmem:[#allocation3 + $0x7a] sm:$0x1] %vm1092_vm11, %v2306_v35 }
0x17df   :  { %v3536_v4 = vpop.permute.xlu1 %3535 }
0x17e0   :  { %3568 = vst.msk [vmem:[#allocation3 + $0x7c] sm:$0x1] %vm1092_vm11, %v3536_v4 }
0x17e3   :  { %v4766_v59 = vpop.permute.xlu1 %4765 }
0x17e4   :  { %4798 = vst.msk [vmem:[#allocation3 + $0x7e] sm:$0x1] %vm1092_vm11, %v4766_v59 }
0x17ee   :  { %v5367_v56 = vpop.permute.xlu0 %5366 }
0x17ef   :  { %5406 = vst.msk [vmem:[#allocation3 + $0x47] sm:$0x1] %vm1092_vm11, %v5367_v56 }
0x17f6   :  { %v5423_v20 = vld [vmem:[#allocation3 + $0x40] sm:$0xff] }
0x17fe   :  { %v5351_v36 = vpop.permute.xlu0 %5350 }
0x17ff   :  { %5398 = vst.msk [vmem:[#allocation3 + $0x7] sm:$0x1] %vm1092_vm11, %v5351_v36 }
0x1802   :  { %v5369_v17 = vpop.permute.xlu0 %5368 }
0x1803   :  { %5407 = vst.msk [vmem:[#allocation3 + $0x4f] sm:$0x1] %vm1092_vm11, %v5369_v17 }
0x1806   :  { %v5371_v58 = vpop.permute.xlu0 %5370  ;;  %v5415_v52 = vld [vmem:[#allocation3] sm:$0xff] }
0x1807   :  { %5408 = vst.msk [vmem:[#allocation3 + $0x57] sm:$0x1] %vm1092_vm11, %v5371_v58  ;;  %9396 = vmatprep.mubr.msk.f32.mxu0 %vm506_vm10, %v5415_v52 }
0x180a   :  { %v5375_v1 = vpop.permute.xlu0 %5374  ;;  %v5424_v6 = vld [vmem:[#allocation3 + $0x48] sm:$0xff] }
0x180b   :  { %5410 = vst.msk [vmem:[#allocation3 + $0x67] sm:$0x1] %vm1092_vm11, %v5375_v1 }
0x180e   :  { %v5353_v22 = vpop.permute.xlu0 %5352  ;;  %v5425_v0 = vld [vmem:[#allocation3 + $0x50] sm:$0xff] }
0x180f   :  { %5399 = vst.msk [vmem:[#allocation3 + $0xf] sm:$0x1] %vm1092_vm11, %v5353_v22 }
0x1812   :  { %v5355_v15 = vpop.permute.xlu0 %5354  ;;  %v5427_v5 = vld [vmem:[#allocation3 + $0x60] sm:$0xff] }
0x1813   :  { %5400 = vst.msk [vmem:[#allocation3 + $0x17] sm:$0x1] %vm1092_vm11, %v5355_v15 }
0x1816   :  { %v5359_v3 = vpop.permute.xlu0 %5358  ;;  %v5416_v39 = vld [vmem:[#allocation3 + $0x8] sm:$0xff] }
0x1817   :  { %5402 = vst.msk [vmem:[#allocation3 + $0x27] sm:$0x1] %vm1092_vm11, %v5359_v3  ;;  %9397 = vmatmul.mubr.msk.f32.vlgmr.msra.gmra.mrb[8].mxu0 %vm506_vm10, %v5416_v39 }
0x1818   :  { %9626 = vmatpush3.bf16.msra.mxu0 %v13327_v63 }
0x1819   :  { %9628 = vmatprep.subr.bf16.mxu0 %v13345_v34 }
0x181a   :  { %v5373_v46 = vpop.permute.xlu0 %5372  ;;  %v5417_v30 = vld [vmem:[#allocation3 + $0x10] sm:$0xff] }
0x181b   :  { %5409 = vst.msk [vmem:[#allocation3 + $0x5f] sm:$0x1] %vm1092_vm11, %v5373_v46  ;;  %9399 = vmatprep.mubr.msk.f32.mxu0 %vm506_vm10, %v5417_v30 }
0x181c   :  { %9630 = vmatpush3.bf16.msra.mxu0 %v13345_v34 }
0x181d   :  { %9640 = vmatprep.subr.bf16.mxu0 %v13327_v63 }
0x181e   :  { %v5377_v62 = vpop.permute.xlu0 %5376  ;;  %v5419_v9 = vld [vmem:[#allocation3 + $0x20] sm:$0xff] }
0x181f   :  { %5411 = vst.msk [vmem:[#allocation3 + $0x6f] sm:$0x1] %vm1092_vm11, %v5377_v62 }
0x1822   :  { %v5379_v29 = vpop.permute.xlu0 %5378  ;;  %v5426_v44 = vld [vmem:[#allocation3 + $0x58] sm:$0xff] }
0x1823   :  { %5412 = vst.msk [vmem:[#allocation3 + $0x77] sm:$0x1] %vm1092_vm11, %v5379_v29 }
0x1826   :  { %v5357_v37 = vpop.permute.xlu0 %5356  ;;  %v5428_v27 = vld [vmem:[#allocation3 + $0x68] sm:$0xff] }
0x1827   :  { %5401 = vst.msk [vmem:[#allocation3 + $0x1f] sm:$0x1] %vm1092_vm11, %v5357_v37 }
0x182a   :  { %v5361_v54 = vpop.permute.xlu0 %5360  ;;  %v5429_v12 = vld [vmem:[#allocation3 + $0x70] sm:$0xff] }
0x182b   :  { %5403 = vst.msk [vmem:[#allocation3 + $0x2f] sm:$0x1] %vm1092_vm11, %v5361_v54 }
0x182e   :  { %v5363_v49 = vpop.permute.xlu0 %5362  ;;  %v5418_v2 = vld [vmem:[#allocation3 + $0x18] sm:$0xff] }
0x182f   :  { %5404 = vst.msk [vmem:[#allocation3 + $0x37] sm:$0x1] %vm1092_vm11, %v5363_v49  ;;  %9400 = vmatmul.mubr.msk.f32.gmra.mrb[10].mxu0 %vm506_vm10, %v5418_v2 }
0x1830   :  { %9402 = vmatprep.mubr.msk.f32.mxu0 %vm506_vm10, %v5419_v9 }
0x1832   :  { %v5365_v60 = vpop.permute.xlu0 %5364  ;;  %v5420_v26 = vld [vmem:[#allocation3 + $0x28] sm:$0xff] }
0x1833   :  { %5405 = vst.msk [vmem:[#allocation3 + $0x3f] sm:$0x1] %vm1092_vm11, %v5365_v60  ;;  %9403 = vmatmul.mubr.msk.f32.gmra.mrb[12].mxu0 %vm506_vm10, %v5420_v26 }
0x1836   :  { %v1691_v57 = vpop.permute.xlu0 %1690  ;;  %v5421_v41 = vld [vmem:[#allocation3 + $0x30] sm:$0xff] }
0x1837   :  { %1723 = vst.msk [vmem:[#allocation3 + $0x79] sm:$0x1] %vm1092_vm11, %v1691_v57  ;;  %9405 = vmatprep.mubr.msk.f32.mxu0 %vm506_vm10, %v5421_v41 }
0x183a   :  { %v2921_v55 = vpop.permute.xlu0 %2920  ;;  %v5422_v43 = vld [vmem:[#allocation3 + $0x38] sm:$0xff] }
0x183b   :  { %2953 = vst.msk [vmem:[#allocation3 + $0x7b] sm:$0x1] %vm1092_vm11, %v2921_v55  ;;  %9406 = vmatmul.mubr.msk.f32.gmra.mrb[14].mxu0 %vm506_vm10, %v5422_v43 }
0x183c   :  { %9408 = vmatprep.mubr.msk.f32.mxu0 %vm506_vm10, %v5423_v20 }
0x183e   :  { %v4151_v19 = vpop.permute.xlu0 %4150 }
0x183f   :  { %4183 = vst.msk [vmem:[#allocation3 + $0x7d] sm:$0x1] %vm1092_vm11, %v4151_v19  ;;  %9409 = vmatmul.mubr.msk.f32.gmra.mrb[16].mxu0 %vm506_vm10, %v5424_v6 }
0x1840   :  { %9411 = vmatprep.mubr.msk.f32.mxu0 %vm506_vm10, %v5425_v0 }
0x1842   :  { %v5381_v28 = vpop.permute.xlu0 %5380 }
0x1843   :  { %5413 = vst.msk [vmem:[#allocation3 + $0x7f] sm:$0x1] %vm1092_vm11, %v5381_v28  ;;  %9412 = vmatmul.mubr.msk.f32.gmra.mrb[18].mxu0 %vm506_vm10, %v5426_v44 }
0x1844   :  { %9414 = vmatprep.mubr.msk.f32.mxu0 %vm506_vm10, %v5427_v5 }
0x1845   :  { %v13469_v33 = vpop.f32.mrb[8].mxu1 }
0x1846   :  { %v13471_v21 = vpop.f32.mrb[9].mxu1 }
0x1847   :  { %9415 = vmatmul.mubr.msk.f32.gmra.mrb[20].mxu0 %vm506_vm10, %v5428_v27  ;;  %v5746_v25 = vrot.slane %v13471_v21, 1  ;;  %v5748_v24 = vrot.slane %v13471_v21, 3  ;;  %v5747_v35 = vrot.slane %v13471_v21, 2  ;;  %v5750_v59 = vrot.slane %v13471_v21, 5 }
0x1848   :  { %9417 = vmatprep.mubr.msk.f32.mxu0 %vm506_vm10, %v5429_v12  ;;  %v5749_v17 = vrot.slane %v13471_v21, 4  ;;  %v5752_v41 = vrot.slane %v13471_v21, 7  ;;  %v5751_v43 = vrot.slane %v13471_v21, 6 }
0x184a   :  { %v5430_v13 = vld [vmem:[#allocation3 + $0x78] sm:$0xff] }
0x184b   :  { %9418 = vmatmul.mubr.msk.f32.gmra.mrb[22].mxu0 %vm506_vm10, %v5430_v13 }
0x18ea   :  { %v9398_v50 = vpop.f32.mrb[8].mxu0 }
0x18eb   :  { %v5559_v14 = vadd.f32 %v9398_v50, %v13476_v18  ;;  %v5553_v53 = vpop.f32.mrb[9].mxu0 }
0x18ec   :  { %v5554_v47 = vadd.f32 %v13476_v18, %v5553_v53 }
0x18ed   :  { %5633 = vst [vmem:[#allocation2 + $0x8] sm:$0xff] %v5559_v14 }
0x18ee   :  { %5632 = vst [vmem:[#allocation2] sm:$0xff] %v5554_v47 }
0x18f4   :  { %v5654_v8 = vld [vmem:[#allocation2 + $0x8] sm:$0x1] }
0x18f5   :  { %v5653_v61 = vld [vmem:[#allocation2] sm:$0x1]  ;;  %v5777_v7 = vadd.f32 %v5746_v25, %v5654_v8 }
0x18f6   :  { %v5776_v31 = vadd.f32 %v13471_v21, %v5653_v61 }
0x18f7   :  { %v9034_v48 = vmul.f32 -1.442695, %v5777_v7 }
0x18f8   :  { %v9033_v40 = vmul.f32 -1.442695, %v5776_v31 }
0x18f9   :  { %10503 = vpow2.f32 %v9034_v48 }
0x18fa   :  { %10505 = vpow2.f32 %v9033_v40 }
0x1902   :  { %v9401_v32 = vpop.f32.mrb[10].mxu0 }
0x1903   :  { %v5569_v42 = vadd.f32 %v9401_v32, %v13476_v18  ;;  %v5563_v38 = vpop.f32.mrb[11].mxu0  ;;  %v10504_v54 = vpop.eup %10503 }
0x1904   :  { %v5564_v45 = vadd.f32 %v13476_v18, %v5563_v38  ;;  %v10506_v60 = vpop.eup %10505  ;;  %v5857_v20 = vadd.f32 1.0, %v10504_v54 }
0x1905   :  { %5635 = vst [vmem:[#allocation2 + $0x18] sm:$0xff] %v5569_v42  ;;  %v5856_v19 = vadd.f32 1.0, %v10506_v60 }
0x1906   :  { %5634 = vst [vmem:[#allocation2 + $0x10] sm:$0xff] %v5564_v45  ;;  %v9404_v11 = vpop.f32.mrb[12].mxu0 }
0x1907   :  { %v5579_v51 = vadd.f32 %v9404_v11, %v13476_v18  ;;  %v5573_v10 = vpop.f32.mrb[13].mxu0 }
0x1908   :  { %v5574_v16 = vadd.f32 %v13476_v18, %v5573_v10 }
0x1909   :  { %5637 = vst [vmem:[#allocation2 + $0x28] sm:$0xff] %v5579_v51 }
0x190a   :  { %5636 = vst [vmem:[#allocation2 + $0x20] sm:$0xff] %v5574_v16  ;;  %v5753_v16 = vrot.slane %v13469_v33, 1 }
0x190c   :  { %v5656_v4 = vld [vmem:[#allocation2 + $0x18] sm:$0x1] }
0x190d   :  { %v5655_v56 = vld [vmem:[#allocation2 + $0x10] sm:$0x1]  ;;  %v13489_v36 = vadd.f32 %v5748_v24, %v5656_v4 }
0x190e   :  { %v9407_v58 = vpop.f32.mrb[14].mxu0  ;;  %v5778_v52 = vadd.f32 %v5747_v35, %v5655_v56  ;;  %v5754_v35 = vrot.slane %v13469_v33, 2 }
0x190f   :  { %v5589_v1 = vadd.f32 %v9407_v58, %v13476_v18  ;;  %v5583_v22 = vpop.f32.mrb[15].mxu0  ;;  %v9036_v15 = vmul.f32 -1.442695, %v13489_v36 }
0x1910   :  { %v5584_v3 = vadd.f32 %v13476_v18, %v5583_v22  ;;  %v5658_v39 = vld [vmem:[#allocation2 + $0x28] sm:$0x1]  ;;  %v9035_v46 = vmul.f32 -1.442695, %v5778_v52  ;;  %v5756_v22 = vrot.slane %v13469_v33, 4 }
0x1911   :  { %5639 = vst [vmem:[#allocation2 + $0x38] sm:$0xff] %v5589_v1  ;;  %v5657_v30 = vld [vmem:[#allocation2 + $0x20] sm:$0x1]  ;;  %v13495_v62 = vadd.f32 %v5750_v59, %v5658_v39  ;;  %v5755_v59 = vrot.slane %v13469_v33, 3 }
0x1912   :  { %5638 = vst [vmem:[#allocation2 + $0x30] sm:$0xff] %v5584_v3  ;;  %v9410_v29 = vpop.f32.mrb[16].mxu0  ;;  %v5780_v37 = vadd.f32 %v5749_v17, %v5657_v30  ;;  %10507 = vpow2.f32 %v9035_v46  ;;  %v5757_v46 = vrot.slane %v13469_v33, 5 }
0x1913   :  { %v5599_v49 = vadd.f32 %v9410_v29, %v13476_v18  ;;  %v5593_v2 = vpop.f32.mrb[17].mxu0  ;;  %10509 = vpow2.f32 %v9036_v15  ;;  %v9038_v9 = vmul.f32 -1.442695, %v13495_v62 }
0x1914   :  { %v5594_v26 = vadd.f32 %v13476_v18, %v5593_v2  ;;  %v9037_v57 = vmul.f32 -1.442695, %v5780_v37 }
0x1915   :  { %5641 = vst [vmem:[#allocation2 + $0x48] sm:$0xff] %v5599_v49  ;;  %v5759_v49 = vrot.slane %v13469_v33, 7 }
0x1916   :  { %5640 = vst [vmem:[#allocation2 + $0x40] sm:$0xff] %v5594_v26  ;;  %v9413_v55 = vpop.f32.mrb[18].mxu0  ;;  %10511 = vpow2.f32 %v9037_v57 }
0x1917   :  { %v5609_v6 = vadd.f32 %v9413_v55, %v13476_v18  ;;  %v5603_v0 = vpop.f32.mrb[19].mxu0  ;;  %10513 = vpow2.f32 %v9038_v9 }
0x1918   :  { %10515 = vtanh.f32 %v5777_v7  ;;  %v5604_v28 = vadd.f32 %v13476_v18, %v5603_v0  ;;  %v5660_v44 = vld [vmem:[#allocation2 + $0x38] sm:$0x1] }
0x1919   :  { %10517 = vtanh.f32 %v5776_v31  ;;  %5643 = vst [vmem:[#allocation2 + $0x58] sm:$0xff] %v5609_v6  ;;  %v5659_v5 = vld [vmem:[#allocation2 + $0x30] sm:$0x1]  ;;  %v5783_v27 = vadd.f32 %v5752_v41, %v5660_v44 }
0x191a   :  { %5642 = vst [vmem:[#allocation2 + $0x50] sm:$0xff] %v5604_v28  ;;  %v9416_v12 = vpop.f32.mrb[20].mxu0  ;;  %v5782_v13 = vadd.f32 %v5751_v43, %v5659_v5  ;;  %10519 = vrcp.f32 %v5857_v20 }
0x191b   :  { %10521 = vrcp.f32 %v5856_v19  ;;  %v5619_v21 = vadd.f32 %v9416_v12, %v13476_v18  ;;  %v5613_v50 = vpop.f32.mrb[21].mxu0  ;;  %v9040_v14 = vmul.f32 -1.442695, %v5783_v27 }
0x191c   :  { %v10508_v53 = vpop.eup %10507  ;;  %v5614_v47 = vadd.f32 %v13476_v18, %v5613_v50  ;;  %10523 = vtanh.f32 %v5778_v52  ;;  %v9039_v25 = vmul.f32 -1.442695, %v5782_v13 }
0x191d   :  { %v10510_v8 = vpop.eup %10509  ;;  %5645 = vst [vmem:[#allocation2 + $0x68] sm:$0xff] %v5619_v21  ;;  %10525 = vpow2.f32 %v9040_v14  ;;  %v5858_v61 = vadd.f32 1.0, %v10508_v53  ;;  %v5661_v31 = vld [vmem:[#allocation2 + $0x40] sm:$0x1] }
0x191e   :  { %5644 = vst [vmem:[#allocation2 + $0x60] sm:$0xff] %v5614_v47  ;;  %v9419_v7 = vpop.f32.mrb[22].mxu0  ;;  %10527 = vpow2.f32 %v9039_v25  ;;  %v5859_v48 = vadd.f32 1.0, %v10510_v8  ;;  %v5784_v51 = vadd.f32 %v13469_v33, %v5661_v31 }
0x191f   :  { %v5629_v32 = vadd.f32 %v9419_v7, %v13476_v18  ;;  %v5623_v42 = vpop.f32.mrb[23].mxu0  ;;  %10529 = vrcp.f32 %v5858_v61 }
0x1920   :  { %v10512_v38 = vpop.eup %10511  ;;  %v5624_v45 = vadd.f32 %v13476_v18, %v5623_v42  ;;  %10531 = vtanh.f32 %v13489_v36  ;;  %v5662_v18 = vld [vmem:[#allocation2 + $0x48] sm:$0x1]  ;;  %v5664_v58 = vld [vmem:[#allocation2 + $0x58] sm:$0x1]  ;;  %v9041_v52 = vmul.f32 -1.442695, %v5784_v51 }
0x1921   :  { %v10514_v40 = vpop.eup %10513  ;;  %5647 = vst [vmem:[#allocation2 + $0x78] sm:$0xff] %v5629_v32  ;;  %10533 = vtanh.f32 %v5780_v37  ;;  %v5860_v11 = vadd.f32 1.0, %v10512_v38  ;;  %v5663_v36 = vld [vmem:[#allocation2 + $0x50] sm:$0x1]  ;;  %v5785_v3 = vadd.f32 %v5753_v16, %v5662_v18  ;;  %v5787_v2 = vadd.f32 %v5755_v59, %v5664_v58 }
0x1922   :  { %v10516_v10 = vpop.eup %10515  ;;  %5646 = vst [vmem:[#allocation2 + $0x70] sm:$0xff] %v5624_v45  ;;  %10535 = vtanh.f32 %v13495_v62  ;;  %v5861_v56 = vadd.f32 1.0, %v10514_v40  ;;  %v5758_v62 = vrot.slane %v13469_v33, 6  ;;  %v5786_v29 = vadd.f32 %v5754_v35, %v5663_v36 }
0x1923   :  { %v10518_v24 = vpop.eup %10517  ;;  %10537 = vrcp.f32 %v5860_v11  ;;  %v5920_v26 = vrot.slane %v10516_v10, 7  ;;  %v9042_v6 = vmul.f32 -1.442695, %v5785_v3 }
0x1924   :  { %v10520_v4 = vpop.eup %10519  ;;  %10539 = vrcp.f32 %v5859_v48  ;;  %v5666_v30 = vld [vmem:[#allocation2 + $0x68] sm:$0x1]  ;;  %v9043_v5 = vmul.f32 -1.442695, %v5786_v29 }
0x1925   :  { %v10522_v17 = vpop.eup %10521  ;;  %10541 = vtanh.f32 %v5782_v13  ;;  %v5665_v15 = vld [vmem:[#allocation2 + $0x60] sm:$0x1]  ;;  %v5789_v19 = vadd.f32 %v5757_v46, %v5666_v30  ;;  %v5966_v28 = vrot.slane %v10520_v4, 7  ;;  %v9044_v13 = vmul.f32 -1.442695, %v5787_v2 }
0x1926   :  { %v10524_v1 = vpop.eup %10523  ;;  %10543 = vtanh.f32 %v5783_v27  ;;  %v5788_v55 = vadd.f32 %v5756_v22, %v5665_v15  ;;  %v5921_v50 = vsel %vm762_vm0, %v5920_v26, %v10518_v24 }
0x1927   :  { %v10526_v39 = vpop.eup %10525  ;;  %10545 = vtanh.f32 %v5784_v51  ;;  %v5922_v20 = vrot.slane %v10524_v1, 6  ;;  %v9046_v8 = vmul.f32 -1.442695, %v5789_v19  ;;  %v5967_v31 = vsel %vm762_vm0, %v5966_v28, %v10522_v17 }
0x1928   :  { %v10528_v37 = vpop.eup %10527  ;;  %v5863_v54 = vadd.f32 1.0, %v10526_v39  ;;  %10547 = vrcp.f32 %v5861_v56  ;;  %v5668_v41 = vld [vmem:[#allocation2 + $0x78] sm:$0x1]  ;;  %v9045_v14 = vmul.f32 -1.442695, %v5788_v55 }
0x1929   :  { %v10530_v9 = vpop.eup %10529  ;;  %v5862_v60 = vadd.f32 1.0, %v10528_v37  ;;  %v5667_v57 = vld [vmem:[#allocation2 + $0x70] sm:$0x1]  ;;  %10549 = vpow2.f32 %v9041_v52  ;;  %v5791_v12 = vadd.f32 %v5759_v49, %v5668_v41  ;;  %v5923_v47 = vsel %vm765_vm1, %v5922_v20, %v5921_v50 }
0x192a   :  { %v10532_v43 = vpop.eup %10531  ;;  %10551 = vrcp.f32 %v5863_v54  ;;  %v5790_v44 = vadd.f32 %v5758_v62, %v5667_v57  ;;  %v5968_v33 = vrot.slane %v10530_v9, 6 }
0x192b   :  { %v10534_v0 = vpop.eup %10533  ;;  %10553 = vrcp.f32 %v5862_v60  ;;  %v5924_v7 = vrot.slane %v10532_v43, 5  ;;  %v9048_v48 = vmul.f32 -1.442695, %v5791_v12 }
0x192c   :  { %v10536_v27 = vpop.eup %10535  ;;  %10555 = vtanh.f32 %v5785_v3  ;;  %v5926_v25 = vrot.slane %v10534_v0, 4  ;;  %v9047_v32 = vmul.f32 -1.442695, %v5790_v44  ;;  %v5969_v38 = vsel %vm765_vm1, %v5968_v33, %v5967_v31 }
0x192d   :  { %v10538_v21 = vpop.eup %10537  ;;  %10557 = vtanh.f32 %v5786_v29  ;;  %v5925_v11 = vsel %vm768_vm2, %v5924_v7, %v5923_v47  ;;  %v5928_v18 = vrot.slane %v10536_v27, 3 }
0x192e   :  { %v10540_v53 = vpop.eup %10539  ;;  %10559 = vpow2.f32 %v9042_v6  ;;  %v5972_v45 = vrot.slane %v10538_v21, 4  ;;  %v5927_v16 = vsel %vm771_vm5, %v5926_v25, %v5925_v11 }
0x192f   :  { %v10542_v61 = vpop.eup %10541  ;;  %10561 = vpow2.f32 %v9043_v5  ;;  %v5970_v51 = vrot.slane %v10540_v53, 5  ;;  %v5929_v17 = vsel %vm774_vm6, %v5928_v18, %v5927_v16 }
0x1930   :  { %v10544_v42 = vpop.eup %10543  ;;  %10563 = vpow2.f32 %v9044_v13  ;;  %v5930_v24 = vrot.slane %v10542_v61, 2 }
0x1931   :  { %v13522_v40 = vpop.eup %10545  ;;  %10565 = vpow2.f32 %v9045_v14  ;;  %v5971_v4 = vsel %vm768_vm2, %v5970_v51, %v5969_v38  ;;  %v5932_v39 = vrot.slane %v10544_v42, 1 }
0x1932   :  { %v10548_v10 = vpop.eup %10547  ;;  %10567 = vpow2.f32 %v9046_v8  ;;  %v5973_v56 = vsel %vm771_vm5, %v5972_v45, %v5971_v4  ;;  %v5931_v1 = vsel %vm777_vm7, %v5930_v24, %v5929_v17 }
0x1933   :  { %v10550_v35 = vpop.eup %10549  ;;  %10569 = vpow2.f32 %v9047_v32  ;;  %v5974_v58 = vrot.slane %v10548_v10, 3  ;;  %v5933_v54 = vsel %vm780_vm8, %v5932_v39, %v5931_v1 }
0x1934   :  { %v10552_v59 = vpop.eup %10551  ;;  %10571 = vpow2.f32 %v9048_v48  ;;  %v5864_v15 = vadd.f32 1.0, %v10550_v35 }
0x1935   :  { %v10554_v36 = vpop.eup %10553  ;;  %10573 = vtanh.f32 %v5787_v2  ;;  %v5975_v46 = vsel %vm774_vm6, %v5974_v58, %v5973_v56  ;;  %v5978_v30 = vrot.slane %v10552_v59, 1 }
0x1936   :  { %v10556_v52 = vpop.eup %10555  ;;  %v5976_v22 = vrot.slane %v10554_v36, 2  ;;  %10575 = vtanh.f32 %v5788_v55 }
0x1937   :  { %v10558_v3 = vpop.eup %10557  ;;  %10577 = vtanh.f32 %v5789_v19  ;;  %v5934_v28 = vrot.slane %v10556_v52, 7 }
0x1938   :  { %v10560_v62 = vpop.eup %10559  ;;  %v5977_v29 = vsel %vm777_vm7, %v5976_v22, %v5975_v46  ;;  %10579 = vtanh.f32 %v5790_v44  ;;  %v5936_v27 = vrot.slane %v10558_v3, 6 }
0x1939   :  { %v10562_v37 = vpop.eup %10561  ;;  %v5979_v49 = vsel %vm780_vm8, %v5978_v30, %v5977_v29  ;;  %10581 = vtanh.f32 %v5791_v12  ;;  %v5865_v2 = vadd.f32 1.0, %v10560_v62  ;;  %v5935_v21 = vsel %vm762_vm0, %v5934_v28, %v13522_v40 }
0x193a   :  { %v10564_v9 = vpop.eup %10563  ;;  %v13536_v60 = vsel %vm11893_vm9, %v5933_v54, %v5979_v49  ;;  %v5866_v26 = vadd.f32 1.0, %v10562_v37  ;;  %10583 = vrcp.f32 %v5864_v15  ;;  %v5937_v14 = vsel %vm765_vm1, %v5936_v27, %v5935_v21  ;;  %v6041_v21 = vld [vmem:[#allocation2 + $0x49] sm:$0x1] }
0x193b   :  { %v10566_v57 = vpop.eup %10565  ;;  %6002 = vrot.lane.b32.xlu1 %v13536_v60, %s11332_s20  ;;  %v5867_v41 = vadd.f32 1.0, %v10564_v9  ;;  %10585 = vrcp.f32 %v5865_v2  ;;  %v5998_v54 = vmul.f32 0.0, %v13536_v60 }
0x193c   :  { %v10568_v55 = vpop.eup %10567  ;;  %v5868_v43 = vadd.f32 1.0, %v10566_v57  ;;  %10587 = vrcp.f32 %v5866_v26 }
0x193d   :  { %v10570_v20 = vpop.eup %10569  ;;  %v5869_v19 = vadd.f32 1.0, %v10568_v55  ;;  %10589 = vrcp.f32 %v5867_v41 }
0x193e   :  { %v10572_v6 = vpop.eup %10571  ;;  %v5870_v0 = vadd.f32 1.0, %v10570_v20  ;;  %10591 = vrcp.f32 %v5868_v43 }
0x193f   :  { %v10574_v44 = vpop.eup %10573  ;;  %v5871_v5 = vadd.f32 1.0, %v10572_v6  ;;  %10593 = vrcp.f32 %v5869_v19 }
0x1940   :  { %v10576_v33 = vpop.eup %10575  ;;  %10595 = vrcp.f32 %v5870_v0  ;;  %v5938_v25 = vrot.slane %v10574_v44, 5  ;;  %v6040_v44 = vld [vmem:[#allocation2 + $0x41] sm:$0x1] }
0x1941   :  { %v10578_v12 = vpop.eup %10577  ;;  %10597 = vrcp.f32 %v5871_v5  ;;  %v5940_v53 = vrot.slane %v10576_v33, 4 }
0x1942   :  { %v10580_v13 = vpop.eup %10579  ;;  %v5939_v7 = vsel %vm768_vm2, %v5938_v25, %v5937_v14  ;;  %v5942_v11 = vrot.slane %v10578_v12, 3 }
0x1943   :  { %v10582_v50 = vpop.eup %10581  ;;  %v5941_v42 = vsel %vm771_vm5, %v5940_v53, %v5939_v7  ;;  %v5944_v38 = vrot.slane %v10580_v13, 2  ;;  %v6043_v53 = vld [vmem:[#allocation2 + $0x59] sm:$0x1] }
0x1944   :  { %v10584_v47 = vpop.eup %10583  ;;  %v5943_v18 = vsel %vm774_vm6, %v5942_v11, %v5941_v42  ;;  %v5946_v52 = vrot.slane %v10582_v50, 1  ;;  %v6042_v50 = vld [vmem:[#allocation2 + $0x51] sm:$0x1]  ;;  %v6032_v42 = vld [vmem:[#allocation2 + $0x1] sm:$0x1] }
0x1945   :  { %v10586_v8 = vpop.eup %10585  ;;  %v5945_v36 = vsel %vm777_vm7, %v5944_v38, %v5943_v18 }
0x1946   :  { %v10588_v61 = vpop.eup %10587  ;;  %v5980_v31 = vrot.slane %v10586_v8, 7  ;;  %v5947_v3 = vsel %vm780_vm8, %v5946_v52, %v5945_v36  ;;  %v6044_v36 = vld [vmem:[#allocation2 + $0x61] sm:$0x1] }
0x1947   :  { %v10590_v32 = vpop.eup %10589  ;;  %v5982_v45 = vrot.slane %v10588_v61, 6 }
0x1948   :  { %v10592_v48 = vpop.eup %10591  ;;  %v5981_v40 = vsel %vm762_vm0, %v5980_v31, %v10584_v47  ;;  %v5984_v51 = vrot.slane %v10590_v32, 5 }
0x1949   :  { %v10594_v10 = vpop.eup %10593  ;;  %v5983_v16 = vsel %vm765_vm1, %v5982_v45, %v5981_v40  ;;  %v5986_v24 = vrot.slane %v10592_v48, 4  ;;  %v6033_v48 = vld [vmem:[#allocation2 + $0x9] sm:$0x1]  ;;  %v6034_v40 = vld [vmem:[#allocation2 + $0x11] sm:$0x1] }
0x194a   :  { %v10596_v35 = vpop.eup %10595  ;;  %v5985_v4 = vsel %vm768_vm2, %v5984_v51, %v5983_v16  ;;  %v5988_v59 = vrot.slane %v10594_v10, 3  ;;  %v6035_v16 = vld [vmem:[#allocation2 + $0x19] sm:$0x1] }
0x194b   :  { %v10598_v56 = vpop.eup %10597  ;;  %v5987_v17 = vsel %vm771_vm5, %v5986_v24, %v5985_v4  ;;  %v5990_v58 = vrot.slane %v10596_v35, 2 }
0x194c   :  { %v5989_v1 = vsel %vm774_vm6, %v5988_v59, %v5987_v17  ;;  %v5992_v22 = vrot.slane %v10598_v56, 1 }
0x194d   :  { %v5991_v15 = vsel %vm777_vm7, %v5990_v58, %v5989_v1  ;;  %v6045_v58 = vld [vmem:[#allocation2 + $0x69] sm:$0x1] }
0x194e   :  { %v5993_v39 = vsel %vm780_vm8, %v5992_v22, %v5991_v15  ;;  %v6046_v15 = vld [vmem:[#allocation2 + $0x71] sm:$0x1] }
0x194f   :  { %v5997_v46 = vsel %vm11893_vm9, %v5947_v3, %v5993_v39 }
0x1950   :  { %6004 = vrot.lane.b32.xlu0 %v5997_v46, %s11332_s20  ;;  %v5999_v26 = vmul.f32 0.0, %v5997_v46 }
0x19ad   :  { %v6003_v30 = vpop.permute.xlu1 %6002 }
0x19ae   :  { %v6008_v62 = vmul.f32 %v6003_v30, %v13536_v60 }
0x19b0   :  { %6012 = vrot.lane.b32.xlu1 %v6008_v62, %s11333_s21  ;;  %v6047_v62 = vld [vmem:[#allocation2 + $0x79] sm:$0x1] }
0x19c2   :  { %v6005_v29 = vpop.permute.xlu0 %6004 }
0x19c3   :  { %v6009_v37 = vmul.f32 %v6005_v29, %v5997_v46 }
0x19c5   :  { %6014 = vrot.lane.b32.xlu0 %v6009_v37, %s11333_s21 }
0x1a22   :  { %v6013_v49 = vpop.permute.xlu1 %6012 }
0x1a23   :  { %v13562_v2 = vadd.f32 %v6013_v49, %v5998_v54 }
0x1a25   :  { %10599 = vtanh.f32 %v13562_v2 }
0x1a2f   :  { %v10600_v9 = vpop.eup %10599 }
0x1a30   :  { %6024 = vrot.lane.b32.xlu1 %v10600_v9, %s11332_s20 }
0x1a37   :  { %v6015_v57 = vpop.permute.xlu0 %6014 }
0x1a38   :  { %v13566_v41 = vadd.f32 %v6015_v57, %v5999_v26 }
0x1a3a   :  { %10601 = vtanh.f32 %v13566_v41 }
0x1a44   :  { %v10602_v55 = vpop.eup %10601 }
0x1a45   :  { %6026 = vrot.lane.b32.xlu0 %v10602_v55, %s11332_s20 }
0x1aa2   :  { %v6025_v43 = vpop.permute.xlu1 %6024 }
0x1aa3   :  { %v6030_v20 = vmul.f32 %v6025_v43, %v13536_v60 }
0x1aa5   :  { %6050 = vrot.lane.b32.xlu1 %v6030_v20, %s11333_s21 }
0x1ab7   :  { %v6027_v19 = vpop.permute.xlu0 %6026 }
0x1ab8   :  { %v6031_v6 = vmul.f32 %v6027_v19, %v5997_v46 }
0x1aba   :  { %6052 = vrot.lane.b32.xlu0 %v6031_v6, %s11333_s21 }
0x1b17   :  { %v6051_v0 = vpop.permute.xlu1 %6050 }
0x1b18   :  { %9439 = vmatprep.mubr.msk.f32.mxu1 %vm506_vm10, %v6051_v0 }
0x1b2c   :  { %v6053_v28 = vpop.permute.xlu0 %6052 }
0x1b2d   :  { %9440 = vmatmul.mubr.msk.f32.vlgmr.msra.gmra.mrb[10].mxu1 %vm506_vm10, %v6053_v28 }
0x1b2e   :  { %9610 = vmatpush3.bf16.msra.mxu1 %v13327_v63 }
0x1b2f   :  { %9612 = vmatprep.subr.bf16.mxu1 %v13345_v34 }
0x1b32   :  { %9614 = vmatpush3.bf16.msra.mxu1 %v13345_v34 }
0x1b33   :  { %9616 = vmatprep.subr.bf16.mxu1 %v13327_v63 }
0x1c00   :  { %v9441_v60 = vpop.f32.mrb[10].mxu1 }
0x1c01   :  { %v6142_v5 = vrot.slane %v9441_v60, 1  ;;  %v6143_v27 = vrot.slane %v9441_v60, 2  ;;  %v13579_v33 = vpop.f32.mrb[11].mxu1  ;;  %v6144_v12 = vrot.slane %v9441_v60, 3  ;;  %v6173_v13 = vadd.f32 %v9441_v60, %v6040_v44 }
0x1c02   :  { %v6135_v61 = vrot.slane %v13579_v33, 1  ;;  %v6136_v31 = vrot.slane %v13579_v33, 2  ;;  %v6137_v38 = vrot.slane %v13579_v33, 3  ;;  %v6165_v11 = vadd.f32 %v13579_v33, %v6032_v42  ;;  %v6038_v42 = vld [vmem:[#allocation2 + $0x31] sm:$0x1] }
0x1c03   :  { %v6174_v14 = vadd.f32 %v6142_v5, %v6041_v21  ;;  %v6175_v47 = vadd.f32 %v6143_v27, %v6042_v50  ;;  %v6176_v25 = vadd.f32 %v6144_v12, %v6043_v53  ;;  %v9059_v8 = vmul.f32 -1.442695, %v6173_v13 }
0x1c04   :  { %10603 = vtanh.f32 %v6173_v13  ;;  %v6166_v51 = vadd.f32 %v6135_v61, %v6033_v48  ;;  %v6145_v10 = vrot.slane %v9441_v60, 4  ;;  %v6167_v24 = vadd.f32 %v6136_v31, %v6034_v40 }
0x1c05   :  { %v9060_v7 = vmul.f32 -1.442695, %v6174_v14  ;;  %10605 = vtanh.f32 %v6174_v14  ;;  %v9061_v32 = vmul.f32 -1.442695, %v6175_v47  ;;  %v9062_v45 = vmul.f32 -1.442695, %v6176_v25 }
0x1c06   :  { %10607 = vpow2.f32 %v9059_v8  ;;  %v6146_v35 = vrot.slane %v9441_v60, 5  ;;  %v13585_v18 = vadd.f32 %v6137_v38, %v6035_v16  ;;  %v9051_v4 = vmul.f32 -1.442695, %v6165_v11 }
0x1c07   :  { %10609 = vtanh.f32 %v6175_v47  ;;  %v6147_v59 = vrot.slane %v9441_v60, 6  ;;  %v9052_v56 = vmul.f32 -1.442695, %v6166_v51  ;;  %v9053_v17 = vmul.f32 -1.442695, %v6167_v24 }
0x1c08   :  { %10611 = vpow2.f32 %v9060_v7  ;;  %v6148_v52 = vrot.slane %v9441_v60, 7  ;;  %v6177_v1 = vadd.f32 %v6145_v10, %v6044_v36  ;;  %v9054_v22 = vmul.f32 -1.442695, %v13585_v18  ;;  %v6036_v47 = vld [vmem:[#allocation2 + $0x21] sm:$0x1] }
0x1c09   :  { %10613 = vpow2.f32 %v9061_v32  ;;  %v6178_v3 = vadd.f32 %v6146_v35, %v6045_v58  ;;  %v6179_v46 = vadd.f32 %v6147_v59, %v6046_v15  ;;  %v6138_v27 = vrot.slane %v13579_v33, 4  ;;  %v6037_v32 = vld [vmem:[#allocation2 + $0x29] sm:$0x1] }
0x1c0a   :  { %10615 = vpow2.f32 %v9062_v45  ;;  %v6180_v37 = vadd.f32 %v6148_v52, %v6047_v62  ;;  %v9063_v54 = vmul.f32 -1.442695, %v6177_v1  ;;  %v6139_v50 = vrot.slane %v13579_v33, 5  ;;  %v6039_v45 = vld [vmem:[#allocation2 + $0x39] sm:$0x1] }
0x1c0b   :  { %10617 = vtanh.f32 %v6165_v11  ;;  %v9064_v9 = vmul.f32 -1.442695, %v6178_v3  ;;  %v9065_v57 = vmul.f32 -1.442695, %v6179_v46  ;;  %v6140_v14 = vrot.slane %v13579_v33, 6 }
0x1c0c   :  { %10619 = vtanh.f32 %v6166_v51  ;;  %v9066_v19 = vmul.f32 -1.442695, %v6180_v37  ;;  %v6169_v7 = vadd.f32 %v6138_v27, %v6036_v47  ;;  %v6170_v48 = vadd.f32 %v6139_v50, %v6037_v32 }
0x1c0d   :  { %10621 = vtanh.f32 %v6167_v24  ;;  %v13605_v11 = vadd.f32 %v6140_v14, %v6038_v42 }
0x1c0e   :  { %v13588_v39 = vpop.eup %10603  ;;  %10623 = vpow2.f32 %v9051_v4  ;;  %v9055_v4 = vmul.f32 -1.442695, %v6169_v7 }
0x1c0f   :  { %v13590_v30 = vpop.eup %10605  ;;  %10625 = vpow2.f32 %v9052_v56 }
0x1c10   :  { %v10608_v29 = vpop.eup %10607  ;;  %10627 = vpow2.f32 %v9053_v17  ;;  %v6323_v61 = vrot.slane %v13590_v30, 7  ;;  %v9056_v17 = vmul.f32 -1.442695, %v6170_v48 }
0x1c11   :  { %v13592_v49 = vpop.eup %10609  ;;  %10629 = vpow2.f32 %v9054_v22  ;;  %v6253_v43 = vadd.f32 1.0, %v10608_v29 }
0x1c12   :  { %v10612_v26 = vpop.eup %10611  ;;  %10631 = vtanh.f32 %v6176_v25  ;;  %v6141_v25 = vrot.slane %v13579_v33, 7  ;;  %v6325_v10 = vrot.slane %v13592_v49, 6  ;;  %v6324_v35 = vsel %vm762_vm0, %v6323_v61, %v13588_v39 }
0x1c13   :  { %v10614_v55 = vpop.eup %10613  ;;  %10633 = vtanh.f32 %v6177_v1  ;;  %v6254_v0 = vadd.f32 1.0, %v10612_v26 }
0x1c14   :  { %v10616_v20 = vpop.eup %10615  ;;  %10635 = vpow2.f32 %v9063_v54  ;;  %v6255_v60 = vadd.f32 1.0, %v10614_v55  ;;  %v13608_v33 = vadd.f32 %v6141_v25, %v6039_v45  ;;  %v6326_v1 = vsel %vm765_vm1, %v6325_v10, %v6324_v35 }
0x1c15   :  { %v13594_v6 = vpop.eup %10617  ;;  %10637 = vpow2.f32 %v9064_v9  ;;  %v6256_v12 = vadd.f32 1.0, %v10616_v20 }
0x1c16   :  { %v13596_v28 = vpop.eup %10619  ;;  %10639 = vpow2.f32 %v9065_v57  ;;  %v9058_v39 = vmul.f32 -1.442695, %v13608_v33 }
0x1c17   :  { %v13598_v44 = vpop.eup %10621  ;;  %10641 = vrcp.f32 %v6253_v43 }
0x1c18   :  { %v10624_v5 = vpop.eup %10623  ;;  %10643 = vpow2.f32 %v9066_v19  ;;  %v6311_v32 = vrot.slane %v13598_v44, 6 }
0x1c19   :  { %v10626_v13 = vpop.eup %10625  ;;  %10645 = vrcp.f32 %v6254_v0  ;;  %v6245_v26 = vadd.f32 1.0, %v10624_v5  ;;  %v6309_v5 = vrot.slane %v13596_v28, 7 }
0x1c1a   :  { %v10628_v21 = vpop.eup %10627  ;;  %10647 = vrcp.f32 %v6255_v60  ;;  %v6246_v62 = vadd.f32 1.0, %v10626_v13 }
0x1c1b   :  { %v10630_v53 = vpop.eup %10629  ;;  %10649 = vtanh.f32 %v6178_v3  ;;  %v6247_v49 = vadd.f32 1.0, %v10628_v21 }
0x1c1c   :  { %v10632_v8 = vpop.eup %10631  ;;  %10651 = vrcp.f32 %v6256_v12  ;;  %v6248_v20 = vadd.f32 1.0, %v10630_v53 }
0x1c1d   :  { %v10634_v31 = vpop.eup %10633  ;;  %10653 = vtanh.f32 %v6179_v46  ;;  %v6327_v15 = vrot.slane %v10632_v8, 5 }
0x1c1e   :  { %v10636_v38 = vpop.eup %10635  ;;  %10655 = vtanh.f32 %v6180_v37  ;;  %v6329_v57 = vrot.slane %v10634_v31, 4 }
0x1c1f   :  { %v10638_v40 = vpop.eup %10637  ;;  %v6257_v51 = vadd.f32 1.0, %v10636_v38  ;;  %10657 = vtanh.f32 %v13585_v18  ;;  %v9057_v18 = vmul.f32 -1.442695, %v13605_v11  ;;  %v6328_v37 = vsel %vm768_vm2, %v6327_v15, %v6326_v1 }
0x1c20   :  { %v10640_v16 = vpop.eup %10639  ;;  %v6258_v24 = vadd.f32 1.0, %v10638_v40  ;;  %10659 = vtanh.f32 %v6169_v7  ;;  %v6330_v0 = vsel %vm771_vm5, %v6329_v57, %v6328_v37  ;;  %v6310_v40 = vsel %vm762_vm0, %v6309_v5, %v13594_v6 }
0x1c21   :  { %v10642_v59 = vpop.eup %10641  ;;  %v6259_v56 = vadd.f32 1.0, %v10640_v16  ;;  %10661 = vrcp.f32 %v6257_v51 }
0x1c22   :  { %v10644_v36 = vpop.eup %10643  ;;  %10663 = vrcp.f32 %v6258_v24 }
0x1c23   :  { %v10646_v58 = vpop.eup %10645  ;;  %v6260_v52 = vadd.f32 1.0, %v10644_v36  ;;  %10665 = vrcp.f32 %v6259_v56 }
0x1c24   :  { %v10648_v22 = vpop.eup %10647  ;;  %v6369_v3 = vrot.slane %v10646_v58, 7  ;;  %10667 = vpow2.f32 %v9055_v4  ;;  %v6312_v58 = vsel %vm765_vm1, %v6311_v32, %v6310_v40 }
0x1c25   :  { %v10650_v46 = vpop.eup %10649  ;;  %10669 = vrcp.f32 %v6260_v52  ;;  %v6371_v30 = vrot.slane %v10648_v22, 6 }
0x1c26   :  { %v10652_v29 = vpop.eup %10651  ;;  %v6370_v54 = vsel %vm762_vm0, %v6369_v3, %v10642_v59  ;;  %10671 = vpow2.f32 %v9056_v17  ;;  %v6331_v12 = vrot.slane %v10650_v46, 3 }
0x1c27   :  { %v10654_v9 = vpop.eup %10653  ;;  %10673 = vpow2.f32 %v9057_v18  ;;  %v6372_v43 = vsel %vm765_vm1, %v6371_v30, %v6370_v54  ;;  %v6373_v60 = vrot.slane %v10652_v29, 5 }
0x1c28   :  { %v10656_v55 = vpop.eup %10655  ;;  %10675 = vpow2.f32 %v9058_v39  ;;  %v6332_v14 = vsel %vm774_vm6, %v6331_v12, %v6330_v0  ;;  %v6333_v25 = vrot.slane %v10654_v9, 2 }
0x1c29   :  { %v10658_v19 = vpop.eup %10657  ;;  %10677 = vrcp.f32 %v6246_v62  ;;  %v6374_v21 = vsel %vm768_vm2, %v6373_v60, %v6372_v43  ;;  %v6335_v10 = vrot.slane %v10656_v55, 1 }
0x1c2a   :  { %v10660_v27 = vpop.eup %10659  ;;  %10679 = vrcp.f32 %v6247_v49  ;;  %v6334_v38 = vsel %vm777_vm7, %v6333_v25, %v6332_v14  ;;  %v6313_v52 = vrot.slane %v10658_v19, 5 }
0x1c2b   :  { %v10662_v13 = vpop.eup %10661  ;;  %10681 = vrcp.f32 %v6245_v26  ;;  %v6336_v4 = vsel %vm780_vm8, %v6335_v10, %v6334_v38  ;;  %v6315_v46 = vrot.slane %v10660_v27, 4 }
0x1c2c   :  { %v10664_v50 = vpop.eup %10663  ;;  %v6375_v47 = vrot.slane %v10662_v13, 4  ;;  %10683 = vrcp.f32 %v6248_v20 }
0x1c2d   :  { %v10666_v53 = vpop.eup %10665  ;;  %v6377_v8 = vrot.slane %v10664_v50, 3  ;;  %10685 = vtanh.f32 %v6170_v48 }
0x1c2e   :  { %v10668_v61 = vpop.eup %10667  ;;  %v6376_v7 = vsel %vm771_vm5, %v6375_v47, %v6374_v21  ;;  %v6379_v31 = vrot.slane %v10666_v53, 2  ;;  %10687 = vtanh.f32 %v13605_v11 }
0x1c2f   :  { %v10670_v42 = vpop.eup %10669  ;;  %v6378_v28 = vsel %vm774_vm6, %v6377_v8, %v6376_v7  ;;  %v6249_v45 = vadd.f32 1.0, %v10668_v61 }
0x1c30   :  { %v10672_v51 = vpop.eup %10671  ;;  %v6380_v16 = vsel %vm777_vm7, %v6379_v31, %v6378_v28  ;;  %v6381_v48 = vrot.slane %v10670_v42, 1 }
0x1c31   :  { %v10674_v24 = vpop.eup %10673  ;;  %v6250_v35 = vadd.f32 1.0, %v10672_v51  ;;  %10689 = vrcp.f32 %v6249_v45 }
0x1c32   :  { %v10676_v44 = vpop.eup %10675  ;;  %v6382_v59 = vsel %vm780_vm8, %v6381_v48, %v6380_v16  ;;  %10691 = vtanh.f32 %v13608_v33  ;;  %v6251_v56 = vadd.f32 1.0, %v10674_v24  ;;  %v6314_v33 = vsel %vm768_vm2, %v6313_v52, %v6312_v58  ;;  %v6430_v58 = vld [vmem:[#allocation2 + $0x4a] sm:$0x1] }
0x1c33   :  { %v10678_v36 = vpop.eup %10677  ;;  %v6386_v6 = vsel %vm11893_vm9, %v6336_v4, %v6382_v59  ;;  %v6252_v17 = vadd.f32 1.0, %v10676_v44  ;;  %10693 = vrcp.f32 %v6250_v35  ;;  %v6316_v62 = vsel %vm771_vm5, %v6315_v46, %v6314_v33  ;;  %v6429_v4 = vld [vmem:[#allocation2 + $0x42] sm:$0x1] }
0x1c34   :  { %v10680_v11 = vpop.eup %10679  ;;  %6393 = vrot.lane.b32.xlu0 %v6386_v6, %s11332_s20  ;;  %10695 = vrcp.f32 %v6251_v56  ;;  %v6355_v1 = vrot.slane %v10678_v36, 7  ;;  %v6388_v32 = vmul.f32 %v6386_v6, %v13566_v41 }
0x1c35   :  { %v10682_v18 = vpop.eup %10681  ;;  %10697 = vrcp.f32 %v6252_v17  ;;  %v6357_v22 = vrot.slane %v10680_v11, 6  ;;  %v6431_v11 = vld [vmem:[#allocation2 + $0x52] sm:$0x1] }
0x1c36   :  { %v10684_v15 = vpop.eup %10683  ;;  %v6356_v3 = vsel %vm762_vm0, %v6355_v1, %v10682_v18  ;;  %v6432_v1 = vld [vmem:[#allocation2 + $0x5a] sm:$0x1] }
0x1c37   :  { %v10686_v39 = vpop.eup %10685  ;;  %v6358_v30 = vsel %vm765_vm1, %v6357_v22, %v6356_v3  ;;  %v6359_v29 = vrot.slane %v10684_v15, 5 }
0x1c38   :  { %v10688_v37 = vpop.eup %10687  ;;  %v6317_v54 = vrot.slane %v10686_v39, 3 }
0x1c39   :  { %v6360_v9 = vsel %vm768_vm2, %v6359_v29, %v6358_v30  ;;  %v6319_v20 = vrot.slane %v10688_v37, 2  ;;  %v6421_v30 = vld [vmem:[#allocation2 + $0x2] sm:$0x1]  ;;  %v6422_v37 = vld [vmem:[#allocation2 + $0xa] sm:$0x1] }
0x1c3a   :  { %v6318_v57 = vsel %vm774_vm6, %v6317_v54, %v6316_v62 }
0x1c3b   :  { %v10690_v49 = vpop.eup %10689  ;;  %v6320_v12 = vsel %vm777_vm7, %v6319_v20, %v6318_v57  ;;  %v6424_v57 = vld [vmem:[#allocation2 + $0x1a] sm:$0x1] }
0x1c3c   :  { %v10692_v26 = vpop.eup %10691  ;;  %v6361_v55 = vrot.slane %v10690_v49, 4  ;;  %v6423_v49 = vld [vmem:[#allocation2 + $0x12] sm:$0x1] }
0x1c3d   :  { %v10694_v43 = vpop.eup %10693  ;;  %v6321_v21 = vrot.slane %v10692_v26, 1 }
0x1c3e   :  { %v10696_v19 = vpop.eup %10695  ;;  %v6362_v0 = vsel %vm771_vm5, %v6361_v55, %v6360_v9  ;;  %v6363_v60 = vrot.slane %v10694_v43, 3 }
0x1c3f   :  { %v10698_v27 = vpop.eup %10697  ;;  %v6365_v13 = vrot.slane %v10696_v19, 2  ;;  %v6322_v47 = vsel %vm780_vm8, %v6321_v21, %v6320_v12 }
0x1c40   :  { %v6364_v5 = vsel %vm774_vm6, %v6363_v60, %v6362_v0  ;;  %v6367_v50 = vrot.slane %v10698_v27, 1  ;;  %v6433_v27 = vld [vmem:[#allocation2 + $0x62] sm:$0x1] }
0x1c41   :  { %v6366_v14 = vsel %vm777_vm7, %v6365_v13, %v6364_v5  ;;  %v6434_v13 = vld [vmem:[#allocation2 + $0x6a] sm:$0x1] }
0x1c42   :  { %v6368_v53 = vsel %vm780_vm8, %v6367_v50, %v6366_v14  ;;  %v6435_v14 = vld [vmem:[#allocation2 + $0x72] sm:$0x1] }
0x1c43   :  { %v6385_v25 = vsel %vm11893_vm9, %v6322_v47, %v6368_v53 }
0x1c44   :  { %6391 = vrot.lane.b32.xlu1 %v6385_v25, %s11332_s20  ;;  %v6387_v45 = vmul.f32 %v6385_v25, %v13562_v2 }
0x1ca6   :  { %v6394_v8 = vpop.permute.xlu0 %6393 }
0x1ca7   :  { %v6398_v61 = vmul.f32 %v6394_v8, %v6386_v6 }
0x1ca9   :  { %6403 = vrot.lane.b32.xlu0 %v6398_v61, %s11333_s21  ;;  %v6436_v61 = vld [vmem:[#allocation2 + $0x7a] sm:$0x1] }
0x1cb6   :  { %v6392_v7 = vpop.permute.xlu1 %6391 }
0x1cb7   :  { %v6397_v31 = vmul.f32 %v6392_v7, %v6385_v25 }
0x1cb9   :  { %6401 = vrot.lane.b32.xlu1 %v6397_v31, %s11333_s21 }
0x1d1b   :  { %v6404_v42 = vpop.permute.xlu0 %6403 }
0x1d1c   :  { %v13656_v38 = vadd.f32 %v6404_v42, %v6388_v32 }
0x1d1e   :  { %10699 = vtanh.f32 %v13656_v38 }
0x1d28   :  { %v10700_v28 = vpop.eup %10699 }
0x1d29   :  { %6415 = vrot.lane.b32.xlu0 %v10700_v28, %s11332_s20 }
0x1d2b   :  { %v6402_v40 = vpop.permute.xlu1 %6401 }
0x1d2c   :  { %v13661_v51 = vadd.f32 %v6402_v40, %v6387_v45 }
0x1d2e   :  { %10701 = vtanh.f32 %v13661_v51 }
0x1d38   :  { %v10702_v10 = vpop.eup %10701 }
0x1d39   :  { %6413 = vrot.lane.b32.xlu1 %v10702_v10, %s11332_s20 }
0x1d9b   :  { %v6416_v16 = vpop.permute.xlu0 %6415 }
0x1d9c   :  { %v6420_v41 = vmul.f32 %v6416_v16, %v6386_v6 }
0x1d9e   :  { %6441 = vrot.lane.b32.xlu0 %v6420_v41, %s11333_s21 }
0x1dab   :  { %v6414_v48 = vpop.permute.xlu1 %6413 }
0x1dac   :  { %v6419_v24 = vmul.f32 %v6414_v48, %v6385_v25 }
0x1dae   :  { %6439 = vrot.lane.b32.xlu1 %v6419_v24, %s11333_s21 }
0x1e10   :  { %v6442_v44 = vpop.permute.xlu0 %6441 }
0x1e20   :  { %v6440_v35 = vpop.permute.xlu1 %6439 }
0x1e21   :  { %9450 = vmatprep.mubr.msk.f32.mxu1 %vm506_vm10, %v6440_v35 }
0x1e22   :  { %9451 = vmatmul.mubr.msk.f32.vlgmr.msra.gmra.mrb[12].mxu1 %vm506_vm10, %v6442_v44 }
0x1e23   :  { %9618 = vmatpush3.bf16.msra.mxu1 %v13327_v63 }
0x1e24   :  { %9620 = vmatprep.subr.bf16.mxu1 %v13345_v34 }
0x1e27   :  { %9622 = vmatpush3.bf16.msra.mxu1 %v13345_v34 }
0x1e28   :  { %9632 = vmatprep.subr.bf16.mxu1 %v13327_v63 }
0x1ef5   :  { %v9452_v2 = vpop.f32.mrb[12].mxu1 }
0x1ef6   :  { %v6531_v59 = vrot.slane %v9452_v2, 1  ;;  %v6532_v56 = vrot.slane %v9452_v2, 2  ;;  %v13673_v36 = vpop.f32.mrb[13].mxu1  ;;  %v6533_v6 = vrot.slane %v9452_v2, 3  ;;  %v6562_v17 = vadd.f32 %v9452_v2, %v6429_v4 }
0x1ef7   :  { %v6524_v33 = vrot.slane %v13673_v36, 1  ;;  %v6525_v39 = vrot.slane %v13673_v36, 2  ;;  %v6526_v62 = vrot.slane %v13673_v36, 3  ;;  %v6554_v54 = vadd.f32 %v13673_v36, %v6421_v30  ;;  %v6427_v30 = vld [vmem:[#allocation2 + $0x32] sm:$0x1] }
0x1ef8   :  { %v6563_v52 = vadd.f32 %v6531_v59, %v6430_v58  ;;  %v6564_v18 = vadd.f32 %v6532_v56, %v6431_v11  ;;  %v6565_v22 = vadd.f32 %v6533_v6, %v6432_v1  ;;  %v9077_v15 = vmul.f32 -1.442695, %v6562_v17 }
0x1ef9   :  { %10703 = vtanh.f32 %v6562_v17  ;;  %v6555_v9 = vadd.f32 %v6524_v33, %v6422_v37  ;;  %v6534_v26 = vrot.slane %v9452_v2, 4  ;;  %v6556_v55 = vadd.f32 %v6525_v39, %v6423_v49 }
0x1efa   :  { %v9078_v3 = vmul.f32 -1.442695, %v6563_v52  ;;  %10705 = vtanh.f32 %v6563_v52  ;;  %v9079_v46 = vmul.f32 -1.442695, %v6564_v18  ;;  %v9080_v29 = vmul.f32 -1.442695, %v6565_v22 }
0x1efb   :  { %10707 = vpow2.f32 %v9077_v15  ;;  %v6535_v43 = vrot.slane %v9452_v2, 5  ;;  %v13679_v20 = vadd.f32 %v6526_v62, %v6424_v57  ;;  %v9069_v19 = vmul.f32 -1.442695, %v6554_v54 }
0x1efc   :  { %10709 = vtanh.f32 %v6564_v18  ;;  %v6536_v0 = vrot.slane %v9452_v2, 6  ;;  %v9070_v60 = vmul.f32 -1.442695, %v6555_v9  ;;  %v9071_v12 = vmul.f32 -1.442695, %v6556_v55 }
0x1efd   :  { %10711 = vpow2.f32 %v9078_v3  ;;  %v6537_v21 = vrot.slane %v9452_v2, 7  ;;  %v6566_v5 = vadd.f32 %v6534_v26, %v6433_v27  ;;  %v9072_v50 = vmul.f32 -1.442695, %v13679_v20  ;;  %v6425_v18 = vld [vmem:[#allocation2 + $0x22] sm:$0x1] }
0x1efe   :  { %10713 = vpow2.f32 %v9079_v46  ;;  %v6567_v47 = vadd.f32 %v6535_v43, %v6434_v13  ;;  %v6568_v25 = vadd.f32 %v6536_v0, %v6435_v14  ;;  %v6527_v56 = vrot.slane %v13673_v36, 4  ;;  %v6426_v46 = vld [vmem:[#allocation2 + $0x2a] sm:$0x1] }
0x1eff   :  { %10715 = vpow2.f32 %v9080_v29  ;;  %v6569_v31 = vadd.f32 %v6537_v21, %v6436_v61  ;;  %v9081_v32 = vmul.f32 -1.442695, %v6566_v5  ;;  %v6528_v11 = vrot.slane %v13673_v36, 5  ;;  %v6428_v29 = vld [vmem:[#allocation2 + $0x3a] sm:$0x1] }
0x1f00   :  { %10717 = vtanh.f32 %v6554_v54  ;;  %v9082_v28 = vmul.f32 -1.442695, %v6567_v47  ;;  %v9083_v40 = vmul.f32 -1.442695, %v6568_v25  ;;  %v6529_v52 = vrot.slane %v13673_v36, 6 }
0x1f01   :  { %10719 = vtanh.f32 %v6555_v9  ;;  %v9084_v48 = vmul.f32 -1.442695, %v6569_v31  ;;  %v6558_v3 = vadd.f32 %v6527_v56, %v6425_v18  ;;  %v6559_v37 = vadd.f32 %v6528_v11, %v6426_v46 }
0x1f02   :  { %10721 = vtanh.f32 %v6556_v55  ;;  %v13699_v54 = vadd.f32 %v6529_v52, %v6427_v30 }
0x1f03   :  { %v13682_v53 = vpop.eup %10703  ;;  %10723 = vpow2.f32 %v9069_v19  ;;  %v9073_v19 = vmul.f32 -1.442695, %v6558_v3 }
0x1f04   :  { %v13684_v8 = vpop.eup %10705  ;;  %10725 = vpow2.f32 %v9070_v60 }
0x1f05   :  { %v10708_v7 = vpop.eup %10707  ;;  %10727 = vpow2.f32 %v9071_v12  ;;  %v6712_v33 = vrot.slane %v13684_v8, 7  ;;  %v9074_v12 = vmul.f32 -1.442695, %v6559_v37 }
0x1f06   :  { %v13686_v42 = vpop.eup %10709  ;;  %10729 = vpow2.f32 %v9072_v50  ;;  %v6642_v16 = vadd.f32 1.0, %v10708_v7 }
0x1f07   :  { %v10712_v45 = vpop.eup %10711  ;;  %10731 = vtanh.f32 %v6565_v22  ;;  %v6530_v22 = vrot.slane %v13673_v36, 7  ;;  %v6714_v26 = vrot.slane %v13686_v42, 6  ;;  %v6713_v43 = vsel %vm762_vm0, %v6712_v33, %v13682_v53 }
0x1f08   :  { %v10714_v10 = vpop.eup %10713  ;;  %10733 = vtanh.f32 %v6566_v5  ;;  %v6643_v35 = vadd.f32 1.0, %v10712_v45 }
0x1f09   :  { %v10716_v41 = vpop.eup %10715  ;;  %10735 = vpow2.f32 %v9081_v32  ;;  %v6644_v2 = vadd.f32 1.0, %v10714_v10  ;;  %v13702_v36 = vadd.f32 %v6530_v22, %v6428_v29  ;;  %v6715_v5 = vsel %vm765_vm1, %v6714_v26, %v6713_v43 }
0x1f0a   :  { %v13688_v24 = vpop.eup %10717  ;;  %10737 = vpow2.f32 %v9082_v28  ;;  %v6645_v6 = vadd.f32 1.0, %v10716_v41 }
0x1f0b   :  { %v13690_v44 = vpop.eup %10719  ;;  %10739 = vpow2.f32 %v9083_v40  ;;  %v9076_v53 = vmul.f32 -1.442695, %v13702_v36 }
0x1f0c   :  { %v13692_v4 = vpop.eup %10721  ;;  %10741 = vrcp.f32 %v6642_v16 }
0x1f0d   :  { %v10724_v59 = vpop.eup %10723  ;;  %10743 = vpow2.f32 %v9084_v48  ;;  %v6700_v46 = vrot.slane %v13692_v4, 6 }
0x1f0e   :  { %v10726_v17 = vpop.eup %10725  ;;  %10745 = vrcp.f32 %v6643_v35  ;;  %v6634_v45 = vadd.f32 1.0, %v10724_v59  ;;  %v6698_v59 = vrot.slane %v13690_v44, 7 }
0x1f0f   :  { %v10728_v58 = vpop.eup %10727  ;;  %10747 = vrcp.f32 %v6644_v2  ;;  %v6635_v61 = vadd.f32 1.0, %v10726_v17 }
0x1f10   :  { %v10730_v1 = vpop.eup %10729  ;;  %10749 = vtanh.f32 %v6567_v47  ;;  %v6636_v42 = vadd.f32 1.0, %v10728_v58 }
0x1f11   :  { %v10732_v15 = vpop.eup %10731  ;;  %10751 = vrcp.f32 %v6645_v6  ;;  %v6637_v41 = vadd.f32 1.0, %v10730_v1 }
0x1f12   :  { %v10734_v39 = vpop.eup %10733  ;;  %10753 = vtanh.f32 %v6568_v25  ;;  %v6716_v14 = vrot.slane %v10732_v15, 5 }
0x1f13   :  { %v10736_v62 = vpop.eup %10735  ;;  %10755 = vtanh.f32 %v6569_v31  ;;  %v6718_v40 = vrot.slane %v10734_v39, 4 }
0x1f14   :  { %v10738_v49 = vpop.eup %10737  ;;  %v6646_v9 = vadd.f32 1.0, %v10736_v62  ;;  %10757 = vtanh.f32 %v13679_v20  ;;  %v9075_v20 = vmul.f32 -1.442695, %v13699_v54  ;;  %v6717_v31 = vsel %vm768_vm2, %v6716_v14, %v6715_v5 }
0x1f15   :  { %v10740_v57 = vpop.eup %10739  ;;  %v6647_v55 = vadd.f32 1.0, %v10738_v49  ;;  %10759 = vtanh.f32 %v6558_v3  ;;  %v6719_v35 = vsel %vm771_vm5, %v6718_v40, %v6717_v31  ;;  %v6699_v49 = vsel %vm762_vm0, %v6698_v59, %v13688_v24 }
0x1f16   :  { %v10742_v0 = vpop.eup %10741  ;;  %v6648_v60 = vadd.f32 1.0, %v10740_v57  ;;  %10761 = vrcp.f32 %v6646_v9 }
0x1f17   :  { %v10744_v27 = vpop.eup %10743  ;;  %10763 = vrcp.f32 %v6647_v55 }
0x1f18   :  { %v10746_v13 = vpop.eup %10745  ;;  %v6649_v21 = vadd.f32 1.0, %v10744_v27  ;;  %10765 = vrcp.f32 %v6648_v60 }
0x1f19   :  { %v10748_v50 = vpop.eup %10747  ;;  %v6758_v47 = vrot.slane %v10746_v13, 7  ;;  %10767 = vpow2.f32 %v9073_v19  ;;  %v6701_v13 = vsel %vm765_vm1, %v6700_v46, %v6699_v49 }
0x1f1a   :  { %v10750_v25 = vpop.eup %10749  ;;  %10769 = vrcp.f32 %v6649_v21  ;;  %v6760_v8 = vrot.slane %v10748_v50, 6 }
0x1f1b   :  { %v10752_v7 = vpop.eup %10751  ;;  %v6759_v32 = vsel %vm762_vm0, %v6758_v47, %v10742_v0  ;;  %10771 = vpow2.f32 %v9074_v12  ;;  %v6720_v6 = vrot.slane %v10750_v25, 3 }
0x1f1c   :  { %v10754_v28 = vpop.eup %10753  ;;  %10773 = vpow2.f32 %v9075_v20  ;;  %v6761_v16 = vsel %vm765_vm1, %v6760_v8, %v6759_v32  ;;  %v6762_v2 = vrot.slane %v10752_v7, 5 }
0x1f1d   :  { %v10756_v10 = vpop.eup %10755  ;;  %10775 = vpow2.f32 %v9076_v53  ;;  %v6721_v52 = vsel %vm774_vm6, %v6720_v6, %v6719_v35  ;;  %v6722_v22 = vrot.slane %v10754_v28, 2 }
0x1f1e   :  { %v10758_v48 = vpop.eup %10757  ;;  %10777 = vrcp.f32 %v6635_v61  ;;  %v6763_v58 = vsel %vm768_vm2, %v6762_v2, %v6761_v16  ;;  %v6724_v26 = vrot.slane %v10756_v10, 1 }
0x1f1f   :  { %v10760_v56 = vpop.eup %10759  ;;  %10779 = vrcp.f32 %v6636_v42  ;;  %v6723_v62 = vsel %vm777_vm7, %v6722_v22, %v6721_v52  ;;  %v6702_v21 = vrot.slane %v10758_v48, 5 }
0x1f20   :  { %v10762_v17 = vpop.eup %10761  ;;  %10781 = vrcp.f32 %v6634_v45  ;;  %v6725_v19 = vsel %vm780_vm8, %v6724_v26, %v6723_v62  ;;  %v6704_v25 = vrot.slane %v10760_v56, 4 }
0x1f21   :  { %v10764_v11 = vpop.eup %10763  ;;  %v6764_v18 = vrot.slane %v10762_v17, 4  ;;  %10783 = vrcp.f32 %v6637_v41 }
0x1f22   :  { %v10766_v1 = vpop.eup %10765  ;;  %v6766_v15 = vrot.slane %v10764_v11, 3  ;;  %10785 = vtanh.f32 %v6559_v37 }
0x1f23   :  { %v10768_v33 = vpop.eup %10767  ;;  %v6765_v3 = vsel %vm771_vm5, %v6764_v18, %v6763_v58  ;;  %v6768_v39 = vrot.slane %v10766_v1, 2  ;;  %10787 = vtanh.f32 %v13699_v54 }
0x1f24   :  { %v10770_v30 = vpop.eup %10769  ;;  %v6767_v44 = vsel %vm774_vm6, %v6766_v15, %v6765_v3  ;;  %v6638_v29 = vadd.f32 1.0, %v10768_v33 }
0x1f25   :  { %v10772_v9 = vpop.eup %10771  ;;  %v6769_v57 = vsel %vm777_vm7, %v6768_v39, %v6767_v44  ;;  %v6770_v37 = vrot.slane %v10770_v30, 1 }
0x1f26   :  { %v10774_v55 = vpop.eup %10773  ;;  %v6639_v43 = vadd.f32 1.0, %v10772_v9  ;;  %10789 = vrcp.f32 %v6638_v29 }
0x1f27   :  { %v10776_v4 = vpop.eup %10775  ;;  %v6771_v0 = vsel %vm780_vm8, %v6770_v37, %v6769_v57  ;;  %10791 = vtanh.f32 %v13702_v36  ;;  %v6640_v60 = vadd.f32 1.0, %v10774_v55  ;;  %v6703_v36 = vsel %vm768_vm2, %v6702_v21, %v6701_v13  ;;  %v6819_v13 = vld [vmem:[#allocation2 + $0x4b] sm:$0x1] }
0x1f28   :  { %v10778_v27 = vpop.eup %10777  ;;  %v6775_v24 = vsel %vm11893_vm9, %v6725_v19, %v6771_v0  ;;  %v6641_v12 = vadd.f32 1.0, %v10776_v4  ;;  %10793 = vrcp.f32 %v6639_v43  ;;  %v6705_v61 = vsel %vm771_vm5, %v6704_v25, %v6703_v36  ;;  %v6818_v19 = vld [vmem:[#allocation2 + $0x43] sm:$0x1] }
0x1f29   :  { %v10780_v54 = vpop.eup %10779  ;;  %6782 = vrot.lane.b32.xlu0 %v6775_v24, %s11332_s20  ;;  %10795 = vrcp.f32 %v6640_v60  ;;  %v6744_v5 = vrot.slane %v10778_v27, 7  ;;  %v6777_v46 = vmul.f32 %v6775_v24, %v13656_v38 }
0x1f2a   :  { %v10782_v20 = vpop.eup %10781  ;;  %10797 = vrcp.f32 %v6641_v12  ;;  %v6746_v50 = vrot.slane %v10780_v54, 6  ;;  %v6820_v54 = vld [vmem:[#allocation2 + $0x53] sm:$0x1] }
0x1f2b   :  { %v10784_v14 = vpop.eup %10783  ;;  %v6745_v47 = vsel %vm762_vm0, %v6744_v5, %v10782_v20  ;;  %v6821_v5 = vld [vmem:[#allocation2 + $0x5b] sm:$0x1] }
0x1f2c   :  { %v10786_v53 = vpop.eup %10785  ;;  %v6747_v8 = vsel %vm765_vm1, %v6746_v50, %v6745_v47  ;;  %v6748_v7 = vrot.slane %v10784_v14, 5 }
0x1f2d   :  { %v10788_v31 = vpop.eup %10787  ;;  %v6706_v32 = vrot.slane %v10786_v53, 3 }
0x1f2e   :  { %v6749_v28 = vsel %vm768_vm2, %v6748_v7, %v6747_v8  ;;  %v6708_v41 = vrot.slane %v10788_v31, 2  ;;  %v6810_v8 = vld [vmem:[#allocation2 + $0x3] sm:$0x1]  ;;  %v6811_v31 = vld [vmem:[#allocation2 + $0xb] sm:$0x1] }
0x1f2f   :  { %v6707_v40 = vsel %vm774_vm6, %v6706_v32, %v6705_v61 }
0x1f30   :  { %v10790_v42 = vpop.eup %10789  ;;  %v6709_v6 = vsel %vm777_vm7, %v6708_v41, %v6707_v40  ;;  %v6813_v40 = vld [vmem:[#allocation2 + $0x1b] sm:$0x1] }
0x1f31   :  { %v10792_v45 = vpop.eup %10791  ;;  %v6750_v10 = vrot.slane %v10790_v42, 4  ;;  %v6812_v42 = vld [vmem:[#allocation2 + $0x13] sm:$0x1] }
0x1f32   :  { %v10794_v16 = vpop.eup %10793  ;;  %v6710_v58 = vrot.slane %v10792_v45, 1 }
0x1f33   :  { %v10796_v48 = vpop.eup %10795  ;;  %v6751_v35 = vsel %vm771_vm5, %v6750_v10, %v6749_v28  ;;  %v6752_v2 = vrot.slane %v10794_v16, 3 }
0x1f34   :  { %v10798_v56 = vpop.eup %10797  ;;  %v6754_v17 = vrot.slane %v10796_v48, 2  ;;  %v6711_v18 = vsel %vm780_vm8, %v6710_v58, %v6709_v6 }
0x1f35   :  { %v6753_v59 = vsel %vm774_vm6, %v6752_v2, %v6751_v35  ;;  %v6756_v11 = vrot.slane %v10798_v56, 1  ;;  %v6822_v56 = vld [vmem:[#allocation2 + $0x63] sm:$0x1] }
0x1f36   :  { %v6755_v52 = vsel %vm777_vm7, %v6754_v17, %v6753_v59  ;;  %v6823_v17 = vld [vmem:[#allocation2 + $0x6b] sm:$0x1] }
0x1f37   :  { %v6757_v1 = vsel %vm780_vm8, %v6756_v11, %v6755_v52  ;;  %v6824_v52 = vld [vmem:[#allocation2 + $0x73] sm:$0x1] }
0x1f38   :  { %v6774_v22 = vsel %vm11893_vm9, %v6711_v18, %v6757_v1 }
0x1f39   :  { %6780 = vrot.lane.b32.xlu1 %v6774_v22, %s11332_s20  ;;  %v6776_v29 = vmul.f32 %v6774_v22, %v13661_v51 }
0x1f9b   :  { %v6783_v15 = vpop.permute.xlu0 %6782 }
0x1f9c   :  { %v6787_v33 = vmul.f32 %v6783_v15, %v6775_v24 }
0x1f9e   :  { %6792 = vrot.lane.b32.xlu0 %v6787_v33, %s11333_s21  ;;  %v6825_v33 = vld [vmem:[#allocation2 + $0x7b] sm:$0x1] }
0x1fab   :  { %v6781_v3 = vpop.permute.xlu1 %6780 }
0x1fac   :  { %v6786_v39 = vmul.f32 %v6781_v3, %v6774_v22 }
0x1fae   :  { %6790 = vrot.lane.b32.xlu1 %v6786_v39, %s11333_s21 }
0x2010   :  { %v6793_v30 = vpop.permute.xlu0 %6792 }
0x2011   :  { %v13750_v62 = vadd.f32 %v6793_v30, %v6777_v46 }
0x2013   :  { %10799 = vtanh.f32 %v13750_v62 }
0x201d   :  { %v10800_v44 = vpop.eup %10799 }
0x201e   :  { %6804 = vrot.lane.b32.xlu0 %v10800_v44, %s11332_s20 }
0x2020   :  { %v6791_v49 = vpop.permute.xlu1 %6790 }
0x2021   :  { %v13755_v9 = vadd.f32 %v6791_v49, %v6776_v29 }
0x2023   :  { %10801 = vtanh.f32 %v13755_v9 }
0x202d   :  { %v10802_v26 = vpop.eup %10801 }
0x202e   :  { %6802 = vrot.lane.b32.xlu1 %v10802_v26, %s11332_s20 }
0x2090   :  { %v6805_v57 = vpop.permute.xlu0 %6804 }
0x2091   :  { %v6809_v38 = vmul.f32 %v6805_v57, %v6775_v24 }
0x2093   :  { %6830 = vrot.lane.b32.xlu0 %v6809_v38, %s11333_s21 }
0x20a0   :  { %v6803_v37 = vpop.permute.xlu1 %6802 }
0x20a1   :  { %v6808_v55 = vmul.f32 %v6803_v37, %v6774_v22 }
0x20a3   :  { %6828 = vrot.lane.b32.xlu1 %v6808_v55, %s11333_s21 }
0x2105   :  { %v6831_v4 = vpop.permute.xlu0 %6830 }
0x2115   :  { %v6829_v43 = vpop.permute.xlu1 %6828 }
0x2116   :  { %9461 = vmatprep.mubr.msk.f32.mxu1 %vm506_vm10, %v6829_v43 }
0x2117   :  { %9462 = vmatmul.mubr.msk.f32.vlgmr.msra.gmra.mrb[14].mxu1 %vm506_vm10, %v6831_v4 }
0x2118   :  { %9634 = vmatpush3.bf16.msra.mxu1 %v13327_v63 }
0x2119   :  { %9636 = vmatprep.subr.bf16.mxu1 %v13345_v34 }
0x211c   :  { %9638 = vmatpush3.bf16.msra.mxu1 %v13345_v34 }
0x211d   :  { %9648 = vmatprep.subr.bf16.mxu1 %v13327_v63 }
0x21ea   :  { %v9463_v51 = vpop.f32.mrb[14].mxu1 }
0x21eb   :  { %v6920_v0 = vrot.slane %v9463_v51, 1  ;;  %v6921_v60 = vrot.slane %v9463_v51, 2  ;;  %v13767_v27 = vpop.f32.mrb[15].mxu1  ;;  %v6922_v24 = vrot.slane %v9463_v51, 3  ;;  %v6951_v12 = vadd.f32 %v9463_v51, %v6818_v19 }
0x21ec   :  { %v6913_v36 = vrot.slane %v13767_v27, 1  ;;  %v6914_v53 = vrot.slane %v13767_v27, 2  ;;  %v6915_v61 = vrot.slane %v13767_v27, 3  ;;  %v6943_v32 = vadd.f32 %v13767_v27, %v6810_v8  ;;  %v6816_v8 = vld [vmem:[#allocation2 + $0x33] sm:$0x1] }
0x21ed   :  { %v6952_v21 = vadd.f32 %v6920_v0, %v6819_v13  ;;  %v6953_v20 = vadd.f32 %v6921_v60, %v6820_v54  ;;  %v6954_v50 = vadd.f32 %v6922_v24, %v6821_v5  ;;  %v9095_v14 = vmul.f32 -1.442695, %v6951_v12 }
0x21ee   :  { %10803 = vtanh.f32 %v6951_v12  ;;  %v6944_v28 = vadd.f32 %v6913_v36, %v6811_v31  ;;  %v6923_v45 = vrot.slane %v9463_v51, 4  ;;  %v6945_v10 = vadd.f32 %v6914_v53, %v6812_v42 }
0x21ef   :  { %v9096_v47 = vmul.f32 -1.442695, %v6952_v21  ;;  %10805 = vtanh.f32 %v6952_v21  ;;  %v9097_v25 = vmul.f32 -1.442695, %v6953_v20  ;;  %v9098_v7 = vmul.f32 -1.442695, %v6954_v50 }
0x21f0   :  { %10807 = vpow2.f32 %v9095_v14  ;;  %v6924_v16 = vrot.slane %v9463_v51, 5  ;;  %v13773_v41 = vadd.f32 %v6915_v61, %v6813_v40  ;;  %v9087_v48 = vmul.f32 -1.442695, %v6943_v32 }
0x21f1   :  { %10809 = vtanh.f32 %v6953_v20  ;;  %v6925_v35 = vrot.slane %v9463_v51, 6  ;;  %v9088_v2 = vmul.f32 -1.442695, %v6944_v28  ;;  %v9089_v6 = vmul.f32 -1.442695, %v6945_v10 }
0x21f2   :  { %10811 = vpow2.f32 %v9096_v47  ;;  %v6926_v58 = vrot.slane %v9463_v51, 7  ;;  %v6955_v59 = vadd.f32 %v6923_v45, %v6822_v56  ;;  %v9090_v11 = vmul.f32 -1.442695, %v13773_v41  ;;  %v6814_v20 = vld [vmem:[#allocation2 + $0x23] sm:$0x1] }
0x21f3   :  { %10813 = vpow2.f32 %v9097_v25  ;;  %v6956_v18 = vadd.f32 %v6924_v16, %v6823_v17  ;;  %v6957_v22 = vadd.f32 %v6925_v35, %v6824_v52  ;;  %v6916_v60 = vrot.slane %v13767_v27, 4  ;;  %v6815_v25 = vld [vmem:[#allocation2 + $0x2b] sm:$0x1] }
0x21f4   :  { %10815 = vpow2.f32 %v9098_v7  ;;  %v6958_v39 = vadd.f32 %v6926_v58, %v6825_v33  ;;  %v9099_v46 = vmul.f32 -1.442695, %v6955_v59  ;;  %v6917_v54 = vrot.slane %v13767_v27, 5  ;;  %v6817_v7 = vld [vmem:[#allocation2 + $0x3b] sm:$0x1] }
0x21f5   :  { %10817 = vtanh.f32 %v6943_v32  ;;  %v9100_v44 = vmul.f32 -1.442695, %v6956_v18  ;;  %v9101_v49 = vmul.f32 -1.442695, %v6957_v22  ;;  %v6918_v21 = vrot.slane %v13767_v27, 6 }
0x21f6   :  { %10819 = vtanh.f32 %v6944_v28  ;;  %v9102_v37 = vmul.f32 -1.442695, %v6958_v39  ;;  %v6947_v47 = vadd.f32 %v6916_v60, %v6814_v20  ;;  %v6948_v31 = vadd.f32 %v6917_v54, %v6815_v25 }
0x21f7   :  { %10821 = vtanh.f32 %v6945_v10  ;;  %v13793_v32 = vadd.f32 %v6918_v21, %v6816_v8 }
0x21f8   :  { %v13776_v1 = vpop.eup %10803  ;;  %10823 = vpow2.f32 %v9087_v48  ;;  %v9091_v48 = vmul.f32 -1.442695, %v6947_v47 }
0x21f9   :  { %v13778_v15 = vpop.eup %10805  ;;  %10825 = vpow2.f32 %v9088_v2 }
0x21fa   :  { %v10808_v3 = vpop.eup %10807  ;;  %10827 = vpow2.f32 %v9089_v6  ;;  %v7101_v36 = vrot.slane %v13778_v15, 7  ;;  %v9092_v6 = vmul.f32 -1.442695, %v6948_v31 }
0x21fb   :  { %v13780_v30 = vpop.eup %10809  ;;  %10829 = vpow2.f32 %v9090_v11  ;;  %v7031_v57 = vadd.f32 1.0, %v10808_v3 }
0x21fc   :  { %v10812_v29 = vpop.eup %10811  ;;  %10831 = vtanh.f32 %v6954_v50  ;;  %v6919_v50 = vrot.slane %v13767_v27, 7  ;;  %v7103_v45 = vrot.slane %v13780_v30, 6  ;;  %v7102_v16 = vsel %vm762_vm0, %v7101_v36, %v13776_v1 }
0x21fd   :  { %v10814_v26 = vpop.eup %10813  ;;  %10833 = vtanh.f32 %v6955_v59  ;;  %v7032_v43 = vadd.f32 1.0, %v10812_v29 }
0x21fe   :  { %v10816_v38 = vpop.eup %10815  ;;  %10835 = vpow2.f32 %v9099_v46  ;;  %v7033_v51 = vadd.f32 1.0, %v10814_v26  ;;  %v13796_v27 = vadd.f32 %v6919_v50, %v6817_v7  ;;  %v7104_v59 = vsel %vm765_vm1, %v7103_v45, %v7102_v16 }
0x21ff   :  { %v13782_v55 = vpop.eup %10817  ;;  %10837 = vpow2.f32 %v9100_v44  ;;  %v7034_v24 = vadd.f32 1.0, %v10816_v38 }
0x2200   :  { %v13784_v4 = vpop.eup %10819  ;;  %10839 = vpow2.f32 %v9101_v49  ;;  %v9094_v1 = vmul.f32 -1.442695, %v13796_v27 }
0x2201   :  { %v13786_v19 = vpop.eup %10821  ;;  %10841 = vrcp.f32 %v7031_v57 }
0x2202   :  { %v10824_v0 = vpop.eup %10823  ;;  %10843 = vpow2.f32 %v9102_v37  ;;  %v7089_v25 = vrot.slane %v13786_v19, 6 }
0x2203   :  { %v10826_v12 = vpop.eup %10825  ;;  %10845 = vrcp.f32 %v7032_v43  ;;  %v7023_v29 = vadd.f32 1.0, %v10824_v0  ;;  %v7087_v0 = vrot.slane %v13784_v4, 7 }
0x2204   :  { %v10828_v13 = vpop.eup %10827  ;;  %10847 = vrcp.f32 %v7033_v51  ;;  %v7024_v33 = vadd.f32 1.0, %v10826_v12 }
0x2205   :  { %v10830_v5 = vpop.eup %10829  ;;  %10849 = vtanh.f32 %v6956_v18  ;;  %v7025_v30 = vadd.f32 1.0, %v10828_v13 }
0x2206   :  { %v10832_v14 = vpop.eup %10831  ;;  %10851 = vrcp.f32 %v7034_v24  ;;  %v7026_v38 = vadd.f32 1.0, %v10830_v5 }
0x2207   :  { %v10834_v53 = vpop.eup %10833  ;;  %10853 = vtanh.f32 %v6957_v22  ;;  %v7105_v52 = vrot.slane %v10832_v14, 5 }
0x2208   :  { %v10836_v61 = vpop.eup %10835  ;;  %10855 = vtanh.f32 %v6958_v39  ;;  %v7107_v49 = vrot.slane %v10834_v53, 4 }
0x2209   :  { %v10838_v42 = vpop.eup %10837  ;;  %v7035_v28 = vadd.f32 1.0, %v10836_v61  ;;  %10857 = vtanh.f32 %v13773_v41  ;;  %v9093_v41 = vmul.f32 -1.442695, %v13793_v32  ;;  %v7106_v39 = vsel %vm768_vm2, %v7105_v52, %v7104_v59 }
0x220a   :  { %v10840_v40 = vpop.eup %10839  ;;  %v7036_v10 = vadd.f32 1.0, %v10838_v42  ;;  %10859 = vtanh.f32 %v6947_v47  ;;  %v7108_v43 = vsel %vm771_vm5, %v7107_v49, %v7106_v39  ;;  %v7088_v42 = vsel %vm762_vm0, %v7087_v0, %v13782_v55 }
0x220b   :  { %v10842_v35 = vpop.eup %10841  ;;  %v7037_v2 = vadd.f32 1.0, %v10840_v40  ;;  %10861 = vrcp.f32 %v7035_v28 }
0x220c   :  { %v10844_v56 = vpop.eup %10843  ;;  %10863 = vrcp.f32 %v7036_v10 }
0x220d   :  { %v10846_v17 = vpop.eup %10845  ;;  %v7038_v58 = vadd.f32 1.0, %v10844_v56  ;;  %10865 = vrcp.f32 %v7037_v2 }
0x220e   :  { %v10848_v11 = vpop.eup %10847  ;;  %v7147_v18 = vrot.slane %v10846_v17, 7  ;;  %10867 = vpow2.f32 %v9091_v48  ;;  %v7090_v17 = vsel %vm765_vm1, %v7089_v25, %v7088_v42 }
0x220f   :  { %v10850_v22 = vpop.eup %10849  ;;  %10869 = vrcp.f32 %v7038_v58  ;;  %v7149_v15 = vrot.slane %v10848_v11, 6 }
0x2210   :  { %v10852_v3 = vpop.eup %10851  ;;  %v7148_v46 = vsel %vm762_vm0, %v7147_v18, %v10842_v35  ;;  %10871 = vpow2.f32 %v9092_v6  ;;  %v7109_v24 = vrot.slane %v10850_v22, 3 }
0x2211   :  { %v10854_v44 = vpop.eup %10853  ;;  %10873 = vpow2.f32 %v9093_v41  ;;  %v7150_v57 = vsel %vm765_vm1, %v7149_v15, %v7148_v46  ;;  %v7151_v51 = vrot.slane %v10852_v3, 5 }
0x2212   :  { %v10856_v26 = vpop.eup %10855  ;;  %10875 = vpow2.f32 %v9094_v1  ;;  %v7110_v21 = vsel %vm774_vm6, %v7109_v24, %v7108_v43  ;;  %v7111_v50 = vrot.slane %v10854_v44, 2 }
0x2213   :  { %v10858_v37 = vpop.eup %10857  ;;  %10877 = vrcp.f32 %v7024_v33  ;;  %v7152_v13 = vsel %vm768_vm2, %v7151_v51, %v7150_v57  ;;  %v7113_v45 = vrot.slane %v10856_v26, 1 }
0x2214   :  { %v10860_v60 = vpop.eup %10859  ;;  %10879 = vrcp.f32 %v7025_v30  ;;  %v7112_v61 = vsel %vm777_vm7, %v7111_v50, %v7110_v21  ;;  %v7091_v58 = vrot.slane %v10858_v37, 5 }
0x2215   :  { %v10862_v12 = vpop.eup %10861  ;;  %10881 = vrcp.f32 %v7023_v29  ;;  %v7114_v48 = vsel %vm780_vm8, %v7113_v45, %v7112_v61  ;;  %v7093_v22 = vrot.slane %v10860_v60, 4 }
0x2216   :  { %v10864_v54 = vpop.eup %10863  ;;  %v7153_v20 = vrot.slane %v10862_v12, 4  ;;  %10883 = vrcp.f32 %v7026_v38 }
0x2217   :  { %v10866_v5 = vpop.eup %10865  ;;  %v7155_v14 = vrot.slane %v10864_v54, 3  ;;  %10885 = vtanh.f32 %v6948_v31 }
0x2218   :  { %v10868_v36 = vpop.eup %10867  ;;  %v7154_v47 = vsel %vm771_vm5, %v7153_v20, %v7152_v13  ;;  %v7157_v53 = vrot.slane %v10866_v5, 2  ;;  %10887 = vtanh.f32 %v13793_v32 }
0x2219   :  { %v10870_v8 = vpop.eup %10869  ;;  %v7156_v4 = vsel %vm774_vm6, %v7155_v14, %v7154_v47  ;;  %v7027_v7 = vadd.f32 1.0, %v10868_v36 }
0x221a   :  { %v10872_v28 = vpop.eup %10871  ;;  %v7158_v40 = vsel %vm777_vm7, %v7157_v53, %v7156_v4  ;;  %v7159_v31 = vrot.slane %v10870_v8, 1 }
0x221b   :  { %v10874_v10 = vpop.eup %10873  ;;  %v7028_v16 = vadd.f32 1.0, %v10872_v28  ;;  %10889 = vrcp.f32 %v7027_v7 }
0x221c   :  { %v10876_v19 = vpop.eup %10875  ;;  %v7160_v35 = vsel %vm780_vm8, %v7159_v31, %v7158_v40  ;;  %10891 = vtanh.f32 %v13796_v27  ;;  %v7029_v2 = vadd.f32 1.0, %v10874_v10  ;;  %v7092_v27 = vsel %vm768_vm2, %v7091_v58, %v7090_v17  ;;  %v7208_v17 = vld [vmem:[#allocation2 + $0x4c] sm:$0x1] }
0x221d   :  { %v10878_v56 = vpop.eup %10877  ;;  %v7164_v55 = vsel %vm11893_vm9, %v7114_v48, %v7160_v35  ;;  %v7030_v6 = vadd.f32 1.0, %v10876_v19  ;;  %10893 = vrcp.f32 %v7028_v16  ;;  %v7094_v33 = vsel %vm771_vm5, %v7093_v22, %v7092_v27  ;;  %v7207_v48 = vld [vmem:[#allocation2 + $0x44] sm:$0x1] }
0x221e   :  { %v10880_v32 = vpop.eup %10879  ;;  %7171 = vrot.lane.b32.xlu0 %v7164_v55, %s11332_s20  ;;  %10895 = vrcp.f32 %v7029_v2  ;;  %v7133_v59 = vrot.slane %v10878_v56, 7  ;;  %v7166_v25 = vmul.f32 %v7164_v55, %v13750_v62 }
0x221f   :  { %v10882_v41 = vpop.eup %10881  ;;  %10897 = vrcp.f32 %v7030_v6  ;;  %v7135_v11 = vrot.slane %v10880_v32, 6  ;;  %v7209_v32 = vld [vmem:[#allocation2 + $0x54] sm:$0x1] }
0x2220   :  { %v10884_v52 = vpop.eup %10883  ;;  %v7134_v18 = vsel %vm762_vm0, %v7133_v59, %v10882_v41  ;;  %v7210_v59 = vld [vmem:[#allocation2 + $0x5c] sm:$0x1] }
0x2221   :  { %v10886_v1 = vpop.eup %10885  ;;  %v7136_v15 = vsel %vm765_vm1, %v7135_v11, %v7134_v18  ;;  %v7137_v3 = vrot.slane %v10884_v52, 5 }
0x2222   :  { %v10888_v39 = vpop.eup %10887  ;;  %v7095_v46 = vrot.slane %v10886_v1, 3 }
0x2223   :  { %v7138_v44 = vsel %vm768_vm2, %v7137_v3, %v7136_v15  ;;  %v7097_v38 = vrot.slane %v10888_v39, 2  ;;  %v7199_v15 = vld [vmem:[#allocation2 + $0x4] sm:$0x1]  ;;  %v7200_v39 = vld [vmem:[#allocation2 + $0xc] sm:$0x1] }
0x2224   :  { %v7096_v49 = vsel %vm774_vm6, %v7095_v46, %v7094_v33 }
0x2225   :  { %v10890_v30 = vpop.eup %10889  ;;  %v7098_v24 = vsel %vm777_vm7, %v7097_v38, %v7096_v49  ;;  %v7202_v49 = vld [vmem:[#allocation2 + $0x1c] sm:$0x1] }
0x2226   :  { %v10892_v29 = vpop.eup %10891  ;;  %v7139_v26 = vrot.slane %v10890_v30, 4  ;;  %v7201_v30 = vld [vmem:[#allocation2 + $0x14] sm:$0x1] }
0x2227   :  { %v10894_v57 = vpop.eup %10893  ;;  %v7099_v13 = vrot.slane %v10892_v29, 1 }
0x2228   :  { %v10896_v37 = vpop.eup %10895  ;;  %v7140_v43 = vsel %vm771_vm5, %v7139_v26, %v7138_v44  ;;  %v7141_v51 = vrot.slane %v10894_v57, 3 }
0x2229   :  { %v10898_v60 = vpop.eup %10897  ;;  %v7143_v12 = vrot.slane %v10896_v37, 2  ;;  %v7100_v20 = vsel %vm780_vm8, %v7099_v13, %v7098_v24 }
0x222a   :  { %v7142_v0 = vsel %vm774_vm6, %v7141_v51, %v7140_v43  ;;  %v7145_v54 = vrot.slane %v10898_v60, 1  ;;  %v7211_v60 = vld [vmem:[#allocation2 + $0x64] sm:$0x1] }
0x222b   :  { %v7144_v21 = vsel %vm777_vm7, %v7143_v12, %v7142_v0  ;;  %v7212_v12 = vld [vmem:[#allocation2 + $0x6c] sm:$0x1] }
0x222c   :  { %v7146_v5 = vsel %vm780_vm8, %v7145_v54, %v7144_v21  ;;  %v7213_v21 = vld [vmem:[#allocation2 + $0x74] sm:$0x1] }
0x222d   :  { %v7163_v50 = vsel %vm11893_vm9, %v7100_v20, %v7146_v5 }
0x222e   :  { %7169 = vrot.lane.b32.xlu1 %v7163_v50, %s11332_s20  ;;  %v7165_v7 = vmul.f32 %v7163_v50, %v13755_v9 }
0x2290   :  { %v7172_v14 = vpop.permute.xlu0 %7171 }
0x2291   :  { %v7176_v36 = vmul.f32 %v7172_v14, %v7164_v55 }
0x2293   :  { %7181 = vrot.lane.b32.xlu0 %v7176_v36, %s11333_s21  ;;  %v7214_v36 = vld [vmem:[#allocation2 + $0x7c] sm:$0x1] }
0x22a0   :  { %v7170_v47 = vpop.permute.xlu1 %7169 }
0x22a1   :  { %v7175_v53 = vmul.f32 %v7170_v47, %v7163_v50 }
0x22a3   :  { %7179 = vrot.lane.b32.xlu1 %v7175_v53, %s11333_s21 }
0x2305   :  { %v7182_v8 = vpop.permute.xlu0 %7181 }
0x2306   :  { %v13844_v61 = vadd.f32 %v7182_v8, %v7166_v25 }
0x2308   :  { %10899 = vtanh.f32 %v13844_v61 }
0x2312   :  { %v10900_v4 = vpop.eup %10899 }
0x2313   :  { %7193 = vrot.lane.b32.xlu0 %v10900_v4, %s11332_s20 }
0x2315   :  { %v7180_v42 = vpop.permute.xlu1 %7179 }
0x2316   :  { %v13849_v28 = vadd.f32 %v7180_v42, %v7165_v7 }
0x2318   :  { %10901 = vtanh.f32 %v13849_v28 }
0x2322   :  { %v10902_v45 = vpop.eup %10901 }
0x2323   :  { %7191 = vrot.lane.b32.xlu1 %v10902_v45, %s11332_s20 }
0x2385   :  { %v7194_v40 = vpop.permute.xlu0 %7193 }
0x2386   :  { %v7198_v62 = vmul.f32 %v7194_v40, %v7164_v55 }
0x2388   :  { %7219 = vrot.lane.b32.xlu0 %v7198_v62, %s11333_s21 }
0x2395   :  { %v7192_v31 = vpop.permute.xlu1 %7191 }
0x2396   :  { %v7197_v10 = vmul.f32 %v7192_v31, %v7163_v50 }
0x2398   :  { %7217 = vrot.lane.b32.xlu1 %v7197_v10, %s11333_s21 }
0x23fa   :  { %v7220_v19 = vpop.permute.xlu0 %7219 }
0x240a   :  { %v7218_v16 = vpop.permute.xlu1 %7217 }
0x240b   :  { %9472 = vmatprep.mubr.msk.f32.mxu0 %vm506_vm10, %v7218_v16 }
0x240c   :  { %9473 = vmatmul.mubr.msk.f32.vlgmr.msra.gmra.mrb[24].mxu0 %vm506_vm10, %v7220_v19 }
0x240d   :  { %9642 = vmatpush3.bf16.msra.mxu0 %v13327_v63 }
0x240e   :  { %9644 = vmatprep.subr.bf16.mxu0 %v13345_v34 }
0x2411   :  { %9646 = vmatpush3.bf16.msra.mxu0 %v13345_v34 }
0x24df   :  { %v9474_v9 = vpop.f32.mrb[24].mxu0 }
0x24e0   :  { %v7309_v35 = vrot.slane %v9474_v9, 1  ;;  %v7310_v2 = vrot.slane %v9474_v9, 2  ;;  %v13860_v56 = vpop.f32.mrb[25].mxu0  ;;  %v7311_v55 = vrot.slane %v9474_v9, 3  ;;  %v7340_v6 = vadd.f32 %v9474_v9, %v7207_v48 }
0x24e1   :  { %v7302_v27 = vrot.slane %v13860_v56, 1  ;;  %v7303_v1 = vrot.slane %v13860_v56, 2  ;;  %v7304_v33 = vrot.slane %v13860_v56, 3  ;;  %v7332_v46 = vadd.f32 %v13860_v56, %v7199_v15  ;;  %v7205_v15 = vld [vmem:[#allocation2 + $0x34] sm:$0x1] }
0x24e2   :  { %v7341_v58 = vadd.f32 %v7309_v35, %v7208_v17  ;;  %v7342_v41 = vadd.f32 %v7310_v2, %v7209_v32  ;;  %v7343_v11 = vadd.f32 %v7311_v55, %v7210_v59  ;;  %v9113_v52 = vmul.f32 -1.442695, %v7340_v6 }
0x24e3   :  { %10903 = vtanh.f32 %v7340_v6  ;;  %v7333_v44 = vadd.f32 %v7302_v27, %v7200_v39  ;;  %v7312_v29 = vrot.slane %v9474_v9, 4  ;;  %v7334_v26 = vadd.f32 %v7303_v1, %v7201_v30 }
0x24e4   :  { %v9114_v18 = vmul.f32 -1.442695, %v7341_v58  ;;  %10905 = vtanh.f32 %v7341_v58  ;;  %v9115_v22 = vmul.f32 -1.442695, %v7342_v41  ;;  %v9116_v3 = vmul.f32 -1.442695, %v7343_v11 }
0x24e5   :  { %10907 = vpow2.f32 %v9113_v52  ;;  %v7313_v57 = vrot.slane %v9474_v9, 5  ;;  %v13866_v38 = vadd.f32 %v7304_v33, %v7202_v49  ;;  %v9105_v37 = vmul.f32 -1.442695, %v7332_v46 }
0x24e6   :  { %10909 = vtanh.f32 %v7342_v41  ;;  %v7314_v43 = vrot.slane %v9474_v9, 6  ;;  %v9106_v51 = vmul.f32 -1.442695, %v7333_v44  ;;  %v9107_v24 = vmul.f32 -1.442695, %v7334_v26 }
0x24e7   :  { %10911 = vpow2.f32 %v9114_v18  ;;  %v7315_v13 = vrot.slane %v9474_v9, 7  ;;  %v7344_v0 = vadd.f32 %v7312_v29, %v7211_v60  ;;  %v9108_v54 = vmul.f32 -1.442695, %v13866_v38  ;;  %v7203_v41 = vld [vmem:[#allocation2 + $0x24] sm:$0x1] }
0x24e8   :  { %10913 = vpow2.f32 %v9115_v22  ;;  %v7345_v20 = vadd.f32 %v7313_v57, %v7212_v12  ;;  %v7346_v50 = vadd.f32 %v7314_v43, %v7213_v21  ;;  %v7305_v2 = vrot.slane %v13860_v56, 4  ;;  %v7204_v22 = vld [vmem:[#allocation2 + $0x2c] sm:$0x1] }
0x24e9   :  { %10915 = vpow2.f32 %v9116_v3  ;;  %v7347_v53 = vadd.f32 %v7315_v13, %v7214_v36  ;;  %v9117_v25 = vmul.f32 -1.442695, %v7344_v0  ;;  %v7306_v32 = vrot.slane %v13860_v56, 5  ;;  %v7206_v3 = vld [vmem:[#allocation2 + $0x3c] sm:$0x1] }
0x24ea   :  { %10917 = vtanh.f32 %v7332_v46  ;;  %v9118_v4 = vmul.f32 -1.442695, %v7345_v20  ;;  %v9119_v42 = vmul.f32 -1.442695, %v7346_v50  ;;  %v7307_v58 = vrot.slane %v13860_v56, 6 }
0x24eb   :  { %10919 = vtanh.f32 %v7333_v44  ;;  %v9120_v31 = vmul.f32 -1.442695, %v7347_v53  ;;  %v7336_v18 = vadd.f32 %v7305_v2, %v7203_v41  ;;  %v7337_v39 = vadd.f32 %v7306_v32, %v7204_v22 }
0x24ec   :  { %10921 = vtanh.f32 %v7334_v26  ;;  %v13886_v46 = vadd.f32 %v7307_v58, %v7205_v15 }
0x24ed   :  { %v13869_v5 = vpop.eup %10903  ;;  %10923 = vpow2.f32 %v9105_v37  ;;  %v9109_v37 = vmul.f32 -1.442695, %v7336_v18 }
0x24ee   :  { %v13871_v14 = vpop.eup %10905  ;;  %10925 = vpow2.f32 %v9106_v51 }
0x24ef   :  { %v10908_v47 = vpop.eup %10907  ;;  %10927 = vpow2.f32 %v9107_v24  ;;  %v7490_v27 = vrot.slane %v13871_v14, 7  ;;  %v9110_v24 = vmul.f32 -1.442695, %v7337_v39 }
0x24f0   :  { %v13873_v8 = vpop.eup %10909  ;;  %10929 = vpow2.f32 %v9108_v54  ;;  %v7420_v40 = vadd.f32 1.0, %v10908_v47 }
0x24f1   :  { %v10912_v7 = vpop.eup %10911  ;;  %10931 = vtanh.f32 %v7343_v11  ;;  %v7308_v11 = vrot.slane %v13860_v56, 7  ;;  %v7492_v29 = vrot.slane %v13873_v8, 6  ;;  %v7491_v57 = vsel %vm762_vm0, %v7490_v27, %v13869_v5 }
0x24f2   :  { %v10914_v45 = vpop.eup %10913  ;;  %10933 = vtanh.f32 %v7344_v0  ;;  %v7421_v16 = vadd.f32 1.0, %v10912_v7 }
0x24f3   :  { %v10916_v62 = vpop.eup %10915  ;;  %10935 = vpow2.f32 %v9117_v25  ;;  %v7422_v9 = vadd.f32 1.0, %v10914_v45  ;;  %v13889_v56 = vadd.f32 %v7308_v11, %v7206_v3  ;;  %v7493_v0 = vsel %vm765_vm1, %v7492_v29, %v7491_v57 }
0x24f4   :  { %v13875_v10 = vpop.eup %10917  ;;  %10937 = vpow2.f32 %v9118_v4  ;;  %v7423_v55 = vadd.f32 1.0, %v10916_v62 }
0x24f5   :  { %v13877_v19 = vpop.eup %10919  ;;  %10939 = vpow2.f32 %v9119_v42  ;;  %v9112_v5 = vmul.f32 -1.442695, %v13889_v56 }
0x24f6   :  { %v13879_v48 = vpop.eup %10921  ;;  %10941 = vrcp.f32 %v7420_v40 }
0x24f7   :  { %v10924_v35 = vpop.eup %10923  ;;  %10943 = vpow2.f32 %v9120_v31  ;;  %v7478_v22 = vrot.slane %v13879_v48, 6 }
0x24f8   :  { %v10926_v6 = vpop.eup %10925  ;;  %10945 = vrcp.f32 %v7421_v16  ;;  %v7412_v7 = vadd.f32 1.0, %v10924_v35  ;;  %v7476_v35 = vrot.slane %v13877_v19, 7 }
0x24f9   :  { %v10928_v17 = vpop.eup %10927  ;;  %10947 = vrcp.f32 %v7422_v9  ;;  %v7413_v36 = vadd.f32 1.0, %v10926_v6 }
0x24fa   :  { %v10930_v59 = vpop.eup %10929  ;;  %10949 = vtanh.f32 %v7345_v20  ;;  %v7414_v8 = vadd.f32 1.0, %v10928_v17 }
0x24fb   :  { %v10932_v52 = vpop.eup %10931  ;;  %10951 = vrcp.f32 %v7423_v55  ;;  %v7415_v62 = vadd.f32 1.0, %v10930_v59 }
0x24fc   :  { %v10934_v1 = vpop.eup %10933  ;;  %10953 = vtanh.f32 %v7346_v50  ;;  %v7494_v21 = vrot.slane %v10932_v52, 5 }
0x24fd   :  { %v10936_v33 = vpop.eup %10935  ;;  %10955 = vtanh.f32 %v7347_v53  ;;  %v7496_v42 = vrot.slane %v10934_v1, 4 }
0x24fe   :  { %v10938_v30 = vpop.eup %10937  ;;  %v7424_v44 = vadd.f32 1.0, %v10936_v33  ;;  %10957 = vtanh.f32 %v13866_v38  ;;  %v9111_v38 = vmul.f32 -1.442695, %v13886_v46  ;;  %v7495_v53 = vsel %vm768_vm2, %v7494_v21, %v7493_v0 }
0x24ff   :  { %v10940_v49 = vpop.eup %10939  ;;  %v7425_v26 = vadd.f32 1.0, %v10938_v30  ;;  %10959 = vtanh.f32 %v7336_v18  ;;  %v7497_v16 = vsel %vm771_vm5, %v7496_v42, %v7495_v53  ;;  %v7477_v30 = vsel %vm762_vm0, %v7476_v35, %v13875_v10 }
0x2500   :  { %v10942_v43 = vpop.eup %10941  ;;  %v7426_v51 = vadd.f32 1.0, %v10940_v49  ;;  %10961 = vrcp.f32 %v7424_v44 }
0x2501   :  { %v10944_v60 = vpop.eup %10943  ;;  %10963 = vrcp.f32 %v7425_v26 }
0x2502   :  { %v10946_v12 = vpop.eup %10945  ;;  %v7427_v13 = vadd.f32 1.0, %v10944_v60  ;;  %10965 = vrcp.f32 %v7426_v51 }
0x2503   :  { %v10948_v54 = vpop.eup %10947  ;;  %v7536_v20 = vrot.slane %v10946_v12, 7  ;;  %10967 = vpow2.f32 %v9109_v37  ;;  %v7479_v12 = vsel %vm765_vm1, %v7478_v22, %v7477_v30 }
0x2504   :  { %v10950_v50 = vpop.eup %10949  ;;  %10969 = vrcp.f32 %v7427_v13  ;;  %v7538_v14 = vrot.slane %v10948_v54, 6 }
0x2505   :  { %v10952_v47 = vpop.eup %10951  ;;  %v7537_v25 = vsel %vm762_vm0, %v7536_v20, %v10942_v43  ;;  %10971 = vpow2.f32 %v9110_v24  ;;  %v7498_v55 = vrot.slane %v10950_v50, 3 }
0x2506   :  { %v10954_v4 = vpop.eup %10953  ;;  %10973 = vpow2.f32 %v9111_v38  ;;  %v7539_v40 = vsel %vm765_vm1, %v7538_v14, %v7537_v25  ;;  %v7540_v9 = vrot.slane %v10952_v47, 5 }
0x2507   :  { %v10956_v45 = vpop.eup %10955  ;;  %10975 = vpow2.f32 %v9112_v5  ;;  %v7499_v58 = vsel %vm774_vm6, %v7498_v55, %v7497_v16  ;;  %v7500_v11 = vrot.slane %v10954_v4, 2 }
0x2508   :  { %v10958_v31 = vpop.eup %10957  ;;  %10977 = vrcp.f32 %v7413_v36  ;;  %v7541_v17 = vsel %vm768_vm2, %v7540_v9, %v7539_v40  ;;  %v7502_v29 = vrot.slane %v10956_v45, 1 }
0x2509   :  { %v10960_v2 = vpop.eup %10959  ;;  %10979 = vrcp.f32 %v7414_v8  ;;  %v7501_v33 = vsel %vm777_vm7, %v7500_v11, %v7499_v58  ;;  %v7480_v13 = vrot.slane %v10958_v31, 5 }
0x250a   :  { %v10962_v6 = vpop.eup %10961  ;;  %10981 = vrcp.f32 %v7412_v7  ;;  %v7503_v37 = vsel %vm780_vm8, %v7502_v29, %v7501_v33  ;;  %v7482_v50 = vrot.slane %v10960_v2, 4 }
0x250b   :  { %v10964_v32 = vpop.eup %10963  ;;  %v7542_v41 = vrot.slane %v10962_v6, 4  ;;  %10983 = vrcp.f32 %v7415_v62 }
0x250c   :  { %v10966_v59 = vpop.eup %10965  ;;  %v7544_v52 = vrot.slane %v10964_v32, 3  ;;  %10985 = vtanh.f32 %v7337_v39 }
0x250d   :  { %v10968_v27 = vpop.eup %10967  ;;  %v7543_v18 = vsel %vm771_vm5, %v7542_v41, %v7541_v17  ;;  %v7546_v1 = vrot.slane %v10966_v59, 2  ;;  %10987 = vtanh.f32 %v13886_v46 }
0x250e   :  { %v10970_v15 = vpop.eup %10969  ;;  %v7545_v19 = vsel %vm774_vm6, %v7544_v52, %v7543_v18  ;;  %v7416_v3 = vadd.f32 1.0, %v10968_v27 }
0x250f   :  { %v10972_v44 = vpop.eup %10971  ;;  %v7547_v49 = vsel %vm777_vm7, %v7546_v1, %v7545_v19  ;;  %v7548_v39 = vrot.slane %v10970_v15, 1 }
0x2510   :  { %v10974_v26 = vpop.eup %10973  ;;  %v7417_v57 = vadd.f32 1.0, %v10972_v44  ;;  %10989 = vrcp.f32 %v7416_v3 }
0x2511   :  { %v10976_v48 = vpop.eup %10975  ;;  %v7549_v43 = vsel %vm780_vm8, %v7548_v39, %v7547_v49  ;;  %10991 = vtanh.f32 %v13889_v56  ;;  %v7418_v51 = vadd.f32 1.0, %v10974_v26  ;;  %v7481_v56 = vsel %vm768_vm2, %v7480_v13, %v7479_v12  ;;  %v7597_v12 = vld [vmem:[#allocation2 + $0x4d] sm:$0x1] }
0x2512   :  { %v10978_v60 = vpop.eup %10977  ;;  %v7553_v10 = vsel %vm11893_vm9, %v7503_v37, %v7549_v43  ;;  %v7419_v24 = vadd.f32 1.0, %v10976_v48  ;;  %10993 = vrcp.f32 %v7417_v57  ;;  %v7483_v36 = vsel %vm771_vm5, %v7482_v50, %v7481_v56  ;;  %v7596_v37 = vld [vmem:[#allocation2 + $0x45] sm:$0x1] }
0x2513   :  { %v10980_v46 = vpop.eup %10979  ;;  %7560 = vrot.lane.b32.xlu0 %v7553_v10, %s11332_s20  ;;  %10995 = vrcp.f32 %v7418_v51  ;;  %v7522_v0 = vrot.slane %v10978_v60, 7  ;;  %v7555_v22 = vmul.f32 %v7553_v10, %v13844_v61 }
0x2514   :  { %v10982_v38 = vpop.eup %10981  ;;  %10997 = vrcp.f32 %v7419_v24  ;;  %v7524_v54 = vrot.slane %v10980_v46, 6  ;;  %v7598_v46 = vld [vmem:[#allocation2 + $0x55] sm:$0x1] }
0x2515   :  { %v10984_v21 = vpop.eup %10983  ;;  %v7523_v20 = vsel %vm762_vm0, %v7522_v0, %v10982_v38  ;;  %v7599_v0 = vld [vmem:[#allocation2 + $0x5d] sm:$0x1] }
0x2516   :  { %v10986_v5 = vpop.eup %10985  ;;  %v7525_v14 = vsel %vm765_vm1, %v7524_v54, %v7523_v20  ;;  %v7526_v47 = vrot.slane %v10984_v21, 5 }
0x2517   :  { %v10988_v53 = vpop.eup %10987  ;;  %v7484_v25 = vrot.slane %v10986_v5, 3  ;;  %v7588_v5 = vld [vmem:[#allocation2 + $0x5] sm:$0x1] }
0x2518   :  { %v7527_v4 = vsel %vm768_vm2, %v7526_v47, %v7525_v14  ;;  %v7486_v62 = vrot.slane %v10988_v53, 2  ;;  %v7590_v53 = vld [vmem:[#allocation2 + $0x15] sm:$0x1] }
0x2519   :  { %v7485_v42 = vsel %vm774_vm6, %v7484_v25, %v7483_v36  ;;  %v7589_v36 = vld [vmem:[#allocation2 + $0xd] sm:$0x1] }
0x251a   :  { %v10990_v8 = vpop.eup %10989  ;;  %v7487_v55 = vsel %vm777_vm7, %v7486_v62, %v7485_v42 }
0x251b   :  { %v10992_v7 = vpop.eup %10991  ;;  %v7528_v45 = vrot.slane %v10990_v8, 4 }
0x251c   :  { %v10994_v40 = vpop.eup %10993  ;;  %v7488_v17 = vrot.slane %v10992_v7, 1 }
0x251d   :  { %v10996_v31 = vpop.eup %10995  ;;  %v7529_v16 = vsel %vm771_vm5, %v7528_v45, %v7527_v4  ;;  %v7530_v9 = vrot.slane %v10994_v40, 3  ;;  %v7591_v4 = vld [vmem:[#allocation2 + $0x1d] sm:$0x1] }
0x251e   :  { %v10998_v2 = vpop.eup %10997  ;;  %v7532_v6 = vrot.slane %v10996_v31, 2  ;;  %v7489_v41 = vsel %vm780_vm8, %v7488_v17, %v7487_v55 }
0x251f   :  { %v7531_v35 = vsel %vm774_vm6, %v7530_v9, %v7529_v16  ;;  %v7534_v32 = vrot.slane %v10998_v2, 1  ;;  %v7600_v16 = vld [vmem:[#allocation2 + $0x65] sm:$0x1]  ;;  %v7601_v2 = vld [vmem:[#allocation2 + $0x6d] sm:$0x1] }
0x2520   :  { %v7533_v58 = vsel %vm777_vm7, %v7532_v6, %v7531_v35  ;;  %v7602_v35 = vld [vmem:[#allocation2 + $0x75] sm:$0x1] }
0x2521   :  { %v7535_v59 = vsel %vm780_vm8, %v7534_v32, %v7533_v58 }
0x2522   :  { %v7552_v11 = vsel %vm11893_vm9, %v7489_v41, %v7535_v59 }
0x2523   :  { %7558 = vrot.lane.b32.xlu1 %v7552_v11, %s11332_s20  ;;  %v7554_v3 = vmul.f32 %v7552_v11, %v13849_v28 }
0x2585   :  { %v7561_v52 = vpop.permute.xlu0 %7560 }
0x2586   :  { %v7565_v27 = vmul.f32 %v7561_v52, %v7553_v10 }
0x2588   :  { %7570 = vrot.lane.b32.xlu0 %v7565_v27, %s11333_s21 }
0x2595   :  { %v7559_v18 = vpop.permute.xlu1 %7558 }
0x2596   :  { %v7564_v1 = vmul.f32 %v7559_v18, %v7552_v11 }
0x2598   :  { %7568 = vrot.lane.b32.xlu1 %v7564_v1, %s11333_s21 }
0x25fa   :  { %v7571_v15 = vpop.permute.xlu0 %7570 }
0x25fb   :  { %v13937_v33 = vadd.f32 %v7571_v15, %v7555_v22 }
0x25fd   :  { %10999 = vtanh.f32 %v13937_v33 }
0x2607   :  { %v11000_v19 = vpop.eup %10999 }
0x2608   :  { %7582 = vrot.lane.b32.xlu0 %v11000_v19, %s11332_s20 }
0x260a   :  { %v7569_v30 = vpop.permute.xlu1 %7568 }
0x260b   :  { %v13942_v44 = vadd.f32 %v7569_v30, %v7554_v3 }
0x260d   :  { %11001 = vtanh.f32 %v13942_v44 }
0x2617   :  { %v11002_v29 = vpop.eup %11001 }
0x2618   :  { %7580 = vrot.lane.b32.xlu1 %v11002_v29, %s11332_s20 }
0x267a   :  { %v7583_v49 = vpop.permute.xlu0 %7582 }
0x267b   :  { %v7587_v61 = vmul.f32 %v7583_v49, %v7553_v10 }
0x267d   :  { %7608 = vrot.lane.b32.xlu0 %v7587_v61, %s11333_s21 }
0x268a   :  { %v7581_v39 = vpop.permute.xlu1 %7580 }
0x268b   :  { %v7586_v26 = vmul.f32 %v7581_v39, %v7552_v11  ;;  %v7603_v11 = vld [vmem:[#allocation2 + $0x7d] sm:$0x1] }
0x268d   :  { %7606 = vrot.lane.b32.xlu1 %v7586_v26, %s11333_s21 }
0x26ef   :  { %v7609_v48 = vpop.permute.xlu0 %7608 }
0x26ff   :  { %v7607_v57 = vpop.permute.xlu1 %7606 }
0x2700   :  { %9483 = vmatprep.mubr.msk.f32.mxu1 %vm506_vm10, %v7607_v57 }
0x2701   :  { %9484 = vmatmul.mubr.msk.f32.vlgmr.msra.gmra.mrb[16].mxu1 %vm506_vm10, %v7609_v48 }
0x2702   :  { %9650 = vmatpush3.bf16.msra.mxu1 %v13327_v63 }
0x2703   :  { %9652 = vmatprep.subr.bf16.mxu1 %v13345_v34 }
0x2706   :  { %9654 = vmatpush3.bf16.msra.mxu1 %v13345_v34 }
0x27d4   :  { %v9485_v28 = vpop.f32.mrb[16].mxu1 }
0x27d5   :  { %v7698_v43 = vrot.slane %v9485_v28, 1  ;;  %v7699_v51 = vrot.slane %v9485_v28, 2  ;;  %v13953_v60 = vpop.f32.mrb[17].mxu1  ;;  %v7700_v10 = vrot.slane %v9485_v28, 3  ;;  %v7729_v24 = vadd.f32 %v9485_v28, %v7596_v37 }
0x27d6   :  { %v7691_v63 = vrot.slane %v13953_v60, 1  ;;  %v7692_v34 = vrot.slane %v13953_v60, 2  ;;  %v7693_v50 = vrot.slane %v13953_v60, 3  ;;  %v7721_v47 = vadd.f32 %v13953_v60, %v7588_v5  ;;  %v7595_v5 = vld [vmem:[#allocation2 + $0x3d] sm:$0x1] }
0x27d7   :  { %v7730_v13 = vadd.f32 %v7698_v43, %v7597_v12  ;;  %v7731_v38 = vadd.f32 %v7699_v51, %v7598_v46  ;;  %v7732_v54 = vadd.f32 %v7700_v10, %v7599_v0  ;;  %v9131_v21 = vmul.f32 -1.442695, %v7729_v24 }
0x27d8   :  { %11003 = vtanh.f32 %v7729_v24  ;;  %v7722_v25 = vadd.f32 %v7691_v63, %v7589_v36  ;;  %v7701_v8 = vrot.slane %v9485_v28, 4  ;;  %v7723_v7 = vadd.f32 %v7692_v34, %v7590_v53  ;;  %v7594_v34 = vld [vmem:[#allocation2 + $0x35] sm:$0x1] }
0x27d9   :  { %v9132_v56 = vmul.f32 -1.442695, %v7730_v13  ;;  %11005 = vtanh.f32 %v7730_v13  ;;  %v9133_v20 = vmul.f32 -1.442695, %v7731_v38  ;;  %v9134_v14 = vmul.f32 -1.442695, %v7732_v54 }
0x27da   :  { %11007 = vpow2.f32 %v9131_v21  ;;  %v7702_v42 = vrot.slane %v9485_v28, 5  ;;  %v13959_v45 = vadd.f32 %v7693_v50, %v7591_v4  ;;  %v9123_v40 = vmul.f32 -1.442695, %v7721_v47  ;;  %v7592_v13 = vld [vmem:[#allocation2 + $0x25] sm:$0x1] }
0x27db   :  { %11009 = vtanh.f32 %v7731_v38  ;;  %v7703_v62 = vrot.slane %v9485_v28, 6  ;;  %v9124_v31 = vmul.f32 -1.442695, %v7722_v25  ;;  %v9125_v9 = vmul.f32 -1.442695, %v7723_v7 }
0x27dc   :  { %11011 = vpow2.f32 %v9132_v56  ;;  %v7704_v55 = vrot.slane %v9485_v28, 7  ;;  %v7733_v6 = vadd.f32 %v7701_v8, %v7600_v16  ;;  %v9126_v17 = vmul.f32 -1.442695, %v13959_v45  ;;  %v7593_v56 = vld [vmem:[#allocation2 + $0x2d] sm:$0x1] }
0x27dd   :  { %11013 = vpow2.f32 %v9133_v20  ;;  %v7734_v32 = vadd.f32 %v7702_v42, %v7601_v2  ;;  %v7735_v41 = vadd.f32 %v7703_v62, %v7602_v35  ;;  %v7694_v37 = vrot.slane %v13953_v60, 4 }
0x27de   :  { %11015 = vpow2.f32 %v9134_v14  ;;  %v7736_v27 = vadd.f32 %v7704_v55, %v7603_v11  ;;  %v9135_v18 = vmul.f32 -1.442695, %v7733_v6  ;;  %v7695_v24 = vrot.slane %v13953_v60, 5 }
0x27df   :  { %11017 = vtanh.f32 %v7721_v47  ;;  %v9136_v22 = vmul.f32 -1.442695, %v7734_v32  ;;  %v9137_v19 = vmul.f32 -1.442695, %v7735_v41  ;;  %v7696_v12 = vrot.slane %v13953_v60, 6 }
0x27e0   :  { %11019 = vtanh.f32 %v7722_v25  ;;  %v9138_v49 = vmul.f32 -1.442695, %v7736_v27  ;;  %v7697_v0 = vrot.slane %v13953_v60, 7  ;;  %v7725_v21 = vadd.f32 %v7694_v37, %v7592_v13 }
0x27e1   :  { %11021 = vtanh.f32 %v7723_v7  ;;  %v7726_v50 = vadd.f32 %v7695_v24, %v7593_v56  ;;  %v13979_v14 = vadd.f32 %v7696_v12, %v7594_v34 }
0x27e2   :  { %v13962_v58 = vpop.eup %11003  ;;  %11023 = vpow2.f32 %v9123_v40  ;;  %v13982_v60 = vadd.f32 %v7697_v0, %v7595_v5  ;;  %v9127_v7 = vmul.f32 -1.442695, %v7725_v21 }
0x27e3   :  { %v13964_v59 = vpop.eup %11005  ;;  %11025 = vpow2.f32 %v9124_v31  ;;  %v9128_v31 = vmul.f32 -1.442695, %v7726_v50 }
0x27e4   :  { %v11008_v52 = vpop.eup %11007  ;;  %11027 = vpow2.f32 %v9125_v9  ;;  %v9130_v35 = vmul.f32 -1.442695, %v13982_v60 }
0x27e5   :  { %v13966_v1 = vpop.eup %11009  ;;  %11029 = vpow2.f32 %v9126_v17  ;;  %v7809_v30 = vadd.f32 1.0, %v11008_v52 }
0x27e6   :  { %v11012_v15 = vpop.eup %11011  ;;  %11031 = vtanh.f32 %v7732_v54  ;;  %v7879_v54 = vrot.slane %v13964_v59, 7  ;;  %v7881_v53 = vrot.slane %v13966_v1, 6 }
0x27e7   :  { %v11014_v3 = vpop.eup %11013  ;;  %11033 = vtanh.f32 %v7733_v6  ;;  %v7810_v39 = vadd.f32 1.0, %v11012_v15 }
0x27e8   :  { %v11016_v29 = vpop.eup %11015  ;;  %11035 = vpow2.f32 %v9135_v18  ;;  %v7811_v57 = vadd.f32 1.0, %v11014_v3  ;;  %v7880_v4 = vsel %vm762_vm0, %v7879_v54, %v13962_v58 }
0x27e9   :  { %v13968_v61 = vpop.eup %11017  ;;  %11037 = vpow2.f32 %v9136_v22  ;;  %v7812_v43 = vadd.f32 1.0, %v11016_v29  ;;  %v7882_v2 = vsel %vm765_vm1, %v7881_v53, %v7880_v4 }
0x27ea   :  { %v13970_v26 = vpop.eup %11019  ;;  %11039 = vpow2.f32 %v9137_v19 }
0x27eb   :  { %v13972_v48 = vpop.eup %11021  ;;  %11041 = vrcp.f32 %v7809_v30 }
0x27ec   :  { %v11024_v28 = vpop.eup %11023  ;;  %11043 = vpow2.f32 %v9138_v49 }
0x27ed   :  { %v11026_v51 = vpop.eup %11025  ;;  %11045 = vrcp.f32 %v7810_v39  ;;  %v7801_v1 = vadd.f32 1.0, %v11024_v28  ;;  %v7865_v28 = vrot.slane %v13970_v26, 7 }
0x27ee   :  { %v11028_v10 = vpop.eup %11027  ;;  %11047 = vrcp.f32 %v7811_v57 }
0x27ef   :  { %v11030_v46 = vpop.eup %11029  ;;  %11049 = vtanh.f32 %v7734_v32 }
0x27f0   :  { %v11032_v38 = vpop.eup %11031  ;;  %11051 = vrcp.f32 %v7812_v43  ;;  %v7804_v3 = vadd.f32 1.0, %v11030_v46 }
0x27f1   :  { %v11034_v63 = vpop.eup %11033  ;;  %11053 = vtanh.f32 %v7735_v41  ;;  %v7883_v6 = vrot.slane %v11032_v38, 5  ;;  %v7802_v41 = vadd.f32 1.0, %v11026_v51 }
0x27f2   :  { %v11036_v20 = vpop.eup %11035  ;;  %11055 = vtanh.f32 %v7736_v27  ;;  %v7803_v27 = vadd.f32 1.0, %v11028_v10  ;;  %v7885_v22 = vrot.slane %v11034_v63, 4 }
0x27f3   :  { %v11038_v36 = vpop.eup %11037  ;;  %v7813_v47 = vadd.f32 1.0, %v11036_v20  ;;  %11057 = vtanh.f32 %v13959_v45  ;;  %v9129_v45 = vmul.f32 -1.442695, %v13979_v14  ;;  %v7884_v11 = vsel %vm768_vm2, %v7883_v6, %v7882_v2 }
0x27f4   :  { %v11040_v25 = vpop.eup %11039  ;;  %v7814_v8 = vadd.f32 1.0, %v11038_v36  ;;  %11059 = vtanh.f32 %v7725_v21  ;;  %v7886_v29 = vsel %vm771_vm5, %v7885_v22, %v7884_v11  ;;  %v7867_v21 = vrot.slane %v13972_v48, 6 }
0x27f5   :  { %v11042_v42 = vpop.eup %11041  ;;  %v7815_v40 = vadd.f32 1.0, %v11040_v25  ;;  %11061 = vrcp.f32 %v7813_v47  ;;  %v7866_v20 = vsel %vm762_vm0, %v7865_v28, %v13968_v61 }
0x27f6   :  { %v11044_v62 = vpop.eup %11043  ;;  %11063 = vrcp.f32 %v7814_v8 }
0x27f7   :  { %v11046_v16 = vpop.eup %11045  ;;  %v7816_v9 = vadd.f32 1.0, %v11044_v62  ;;  %11065 = vrcp.f32 %v7815_v40  ;;  %v7868_v62 = vsel %vm765_vm1, %v7867_v21, %v7866_v20 }
0x27f8   :  { %v11048_v55 = vpop.eup %11047  ;;  %v7925_v17 = vrot.slane %v11046_v16, 7  ;;  %11067 = vpow2.f32 %v9127_v7 }
0x27f9   :  { %v11050_v32 = vpop.eup %11049  ;;  %11069 = vrcp.f32 %v7816_v9  ;;  %v7927_v58 = vrot.slane %v11048_v55, 6 }
0x27fa   :  { %v11052_v59 = vpop.eup %11051  ;;  %v7926_v52 = vsel %vm762_vm0, %v7925_v17, %v11042_v42  ;;  %11071 = vpow2.f32 %v9128_v31  ;;  %v7887_v57 = vrot.slane %v11050_v32, 3 }
0x27fb   :  { %v11054_v18 = vpop.eup %11053  ;;  %11073 = vpow2.f32 %v9129_v45  ;;  %v7928_v19 = vsel %vm765_vm1, %v7927_v58, %v7926_v52  ;;  %v7929_v49 = vrot.slane %v11052_v59, 5 }
0x27fc   :  { %v11056_v15 = vpop.eup %11055  ;;  %11075 = vpow2.f32 %v9130_v35  ;;  %v7888_v10 = vsel %vm774_vm6, %v7887_v57, %v7886_v29  ;;  %v7889_v46 = vrot.slane %v11054_v18, 2 }
0x27fd   :  { %v11058_v30 = vpop.eup %11057  ;;  %11077 = vrcp.f32 %v7802_v41  ;;  %v7930_v43 = vsel %vm768_vm2, %v7929_v49, %v7928_v19  ;;  %v7891_v36 = vrot.slane %v11056_v15, 1 }
0x27fe   :  { %v11060_v39 = vpop.eup %11059  ;;  %11079 = vrcp.f32 %v7803_v27  ;;  %v7890_v56 = vsel %vm777_vm7, %v7889_v46, %v7888_v10  ;;  %v7869_v31 = vrot.slane %v11058_v30, 5 }
0x27ff   :  { %v11062_v37 = vpop.eup %11061  ;;  %11081 = vrcp.f32 %v7801_v1  ;;  %v7892_v8 = vsel %vm780_vm8, %v7891_v36, %v7890_v56  ;;  %v7871_v17 = vrot.slane %v11060_v39, 4 }
0x2800   :  { %v11064_v51 = vpop.eup %11063  ;;  %v7931_v24 = vrot.slane %v11062_v37, 4  ;;  %11083 = vrcp.f32 %v7804_v3 }
0x2801   :  { %v11066_v12 = vpop.eup %11065  ;;  %v7933_v13 = vrot.slane %v11064_v51, 3  ;;  %11085 = vtanh.f32 %v7726_v50 }
0x2802   :  { %v11068_v0 = vpop.eup %11067  ;;  %v7932_v38 = vsel %vm771_vm5, %v7931_v24, %v7930_v43  ;;  %v7935_v54 = vrot.slane %v11066_v12, 2  ;;  %11087 = vtanh.f32 %v13979_v14 }
0x2803   :  { %v11070_v63 = vpop.eup %11069  ;;  %v7934_v26 = vsel %vm774_vm6, %v7933_v13, %v7932_v38  ;;  %v7805_v34 = vadd.f32 1.0, %v11068_v0 }
0x2804   :  { %v11072_v5 = vpop.eup %11071  ;;  %v7936_v47 = vsel %vm777_vm7, %v7935_v54, %v7934_v26  ;;  %v7937_v50 = vrot.slane %v11070_v63, 1 }
0x2805   :  { %v11074_v53 = vpop.eup %11073  ;;  %v7806_v25 = vadd.f32 1.0, %v11072_v5  ;;  %11089 = vrcp.f32 %v7805_v34 }
0x2806   :  { %v11076_v48 = vpop.eup %11075  ;;  %v7938_v4 = vsel %vm780_vm8, %v7937_v50, %v7936_v47  ;;  %11091 = vtanh.f32 %v13982_v60  ;;  %v7807_v7 = vadd.f32 1.0, %v11074_v53  ;;  %v7870_v60 = vsel %vm768_vm2, %v7869_v31, %v7868_v62 }
0x2807   :  { %v11078_v42 = vpop.eup %11077  ;;  %v7942_v61 = vsel %vm11893_vm9, %v7892_v8, %v7938_v4  ;;  %v7808_v40 = vadd.f32 1.0, %v11076_v48  ;;  %11093 = vrcp.f32 %v7806_v25  ;;  %v7872_v32 = vsel %vm771_vm5, %v7871_v17, %v7870_v60  ;;  %v7985_v25 = vld [vmem:[#allocation2 + $0x46] sm:$0x1] }
0x2808   :  { %v11080_v14 = vpop.eup %11079  ;;  %7949 = vrot.lane.b32.xlu0 %v7942_v61, %s11332_s20  ;;  %11095 = vrcp.f32 %v7807_v7  ;;  %v7911_v16 = vrot.slane %v11078_v42, 7  ;;  %v7944_v38 = vmul.f32 %v7942_v61, %v13937_v33 }
0x2809   :  { %v11082_v9 = vpop.eup %11081  ;;  %11097 = vrcp.f32 %v7808_v40  ;;  %v7913_v2 = vrot.slane %v11080_v14, 6  ;;  %v7987_v40 = vld [vmem:[#allocation2 + $0x56] sm:$0x1]  ;;  %v7988_v14 = vld [vmem:[#allocation2 + $0x5e] sm:$0x1] }
0x280a   :  { %v11084_v45 = vpop.eup %11083  ;;  %v7912_v55 = vsel %vm762_vm0, %v7911_v16, %v11082_v9 }
0x280b   :  { %v11086_v6 = vpop.eup %11085  ;;  %v7914_v35 = vsel %vm765_vm1, %v7913_v2, %v7912_v55  ;;  %v7915_v58 = vrot.slane %v11084_v45, 5 }
0x280c   :  { %v11088_v41 = vpop.eup %11087  ;;  %v7873_v59 = vrot.slane %v11086_v6, 3  ;;  %v7977_v6 = vld [vmem:[#allocation2 + $0x6] sm:$0x1] }
0x280d   :  { %v7916_v52 = vsel %vm768_vm2, %v7915_v58, %v7914_v35  ;;  %v7875_v15 = vrot.slane %v11088_v41, 2  ;;  %v7979_v41 = vld [vmem:[#allocation2 + $0x16] sm:$0x1] }
0x280e   :  { %v7874_v18 = vsel %vm774_vm6, %v7873_v59, %v7872_v32  ;;  %v7978_v32 = vld [vmem:[#allocation2 + $0xe] sm:$0x1] }
0x280f   :  { %v11090_v11 = vpop.eup %11089  ;;  %v7876_v49 = vsel %vm777_vm7, %v7875_v15, %v7874_v18 }
0x2810   :  { %v11092_v27 = vpop.eup %11091  ;;  %v7917_v1 = vrot.slane %v11090_v11, 4 }
0x2811   :  { %v11094_v22 = vpop.eup %11093  ;;  %v7877_v57 = vrot.slane %v11092_v27, 1 }
0x2812   :  { %v11096_v19 = vpop.eup %11095  ;;  %v7918_v3 = vsel %vm771_vm5, %v7917_v1, %v7916_v52  ;;  %v7919_v30 = vrot.slane %v11094_v22, 3  ;;  %v7980_v52 = vld [vmem:[#allocation2 + $0x1e] sm:$0x1] }
0x2813   :  { %v11098_v29 = vpop.eup %11097  ;;  %v7921_v39 = vrot.slane %v11096_v19, 2  ;;  %v7878_v51 = vsel %vm780_vm8, %v7877_v57, %v7876_v49 }
0x2814   :  { %v7920_v37 = vsel %vm774_vm6, %v7919_v30, %v7918_v3  ;;  %v7923_v43 = vrot.slane %v11098_v29, 1  ;;  %v7989_v3 = vld [vmem:[#allocation2 + $0x66] sm:$0x1]  ;;  %v7990_v29 = vld [vmem:[#allocation2 + $0x6e] sm:$0x1] }
0x2815   :  { %v7922_v28 = vsel %vm777_vm7, %v7921_v39, %v7920_v37  ;;  %v7991_v37 = vld [vmem:[#allocation2 + $0x76] sm:$0x1] }
0x2816   :  { %v7924_v10 = vsel %vm780_vm8, %v7923_v43, %v7922_v28 }
0x2817   :  { %v7941_v24 = vsel %vm11893_vm9, %v7878_v51, %v7924_v10 }
0x2818   :  { %7947 = vrot.lane.b32.xlu1 %v7941_v24, %s11332_s20  ;;  %v7943_v56 = vmul.f32 %v7941_v24, %v13942_v44 }
0x287a   :  { %v7950_v12 = vpop.permute.xlu0 %7949 }
0x287b   :  { %v7954_v46 = vmul.f32 %v7950_v12, %v7942_v61 }
0x287d   :  { %7959 = vrot.lane.b32.xlu0 %v7954_v46, %s11333_s21 }
0x288a   :  { %v7948_v13 = vpop.permute.xlu1 %7947 }
0x288b   :  { %v7953_v0 = vmul.f32 %v7948_v13, %v7941_v24 }
0x288d   :  { %7957 = vrot.lane.b32.xlu1 %v7953_v0, %s11333_s21 }
0x28ef   :  { %v7960_v54 = vpop.permute.xlu0 %7959 }
0x28f0   :  { %v14030_v21 = vadd.f32 %v7960_v54, %v7944_v38 }
0x28f2   :  { %11099 = vtanh.f32 %v14030_v21 }
0x28fc   :  { %v11100_v63 = vpop.eup %11099 }
0x28fd   :  { %7971 = vrot.lane.b32.xlu0 %v11100_v63, %s11332_s20 }
0x28ff   :  { %v7958_v26 = vpop.permute.xlu1 %7957 }
0x2900   :  { %v14035_v34 = vadd.f32 %v7958_v26, %v7943_v56 }
0x2902   :  { %11101 = vtanh.f32 %v14035_v34 }
0x290c   :  { %v11102_v20 = vpop.eup %11101 }
0x290d   :  { %7969 = vrot.lane.b32.xlu1 %v11102_v20, %s11332_s20 }
0x296f   :  { %v7972_v5 = vpop.permute.xlu0 %7971 }
0x2970   :  { %v7976_v33 = vmul.f32 %v7972_v5, %v7942_v61  ;;  %v7986_v61 = vld [vmem:[#allocation2 + $0x4e] sm:$0x1] }
0x2972   :  { %7997 = vrot.lane.b32.xlu0 %v7976_v33, %s11333_s21 }
0x297f   :  { %v7970_v36 = vpop.permute.xlu1 %7969 }
0x2980   :  { %v7975_v47 = vmul.f32 %v7970_v36, %v7941_v24  ;;  %v7992_v24 = vld [vmem:[#allocation2 + $0x7e] sm:$0x1] }
0x2982   :  { %7995 = vrot.lane.b32.xlu1 %v7975_v47, %s11333_s21 }
0x29e4   :  { %v7998_v53 = vpop.permute.xlu0 %7997 }
0x29f4   :  { %v7996_v50 = vpop.permute.xlu1 %7995 }
0x29f5   :  { %9494 = vmatprep.mubr.msk.f32.mxu0 %vm506_vm10, %v7996_v50 }
0x29f6   :  { %9495 = vmatmul.mubr.msk.f32.vlgmr.msra.gmra.mrb[26].mxu0 %vm506_vm10, %v7998_v53 }
0x2ac9   :  { %v9496_v44 = vpop.f32.mrb[26].mxu0 }
0x2aca   :  { %v8087_v48 = vrot.slane %v9496_v44, 1  ;;  %v8088_v8 = vrot.slane %v9496_v44, 2  ;;  %v14043_v4 = vpop.f32.mrb[27].mxu0  ;;  %v8089_v7 = vrot.slane %v9496_v44, 3  ;;  %v8118_v42 = vadd.f32 %v9496_v44, %v7985_v25 }
0x2acb   :  { %v8080_v2 = vrot.slane %v14043_v4, 1  ;;  %v8081_v60 = vrot.slane %v14043_v4, 2  ;;  %v8082_v17 = vrot.slane %v14043_v4, 3  ;;  %v8110_v58 = vadd.f32 %v14043_v4, %v7977_v6  ;;  %v7984_v6 = vld [vmem:[#allocation2 + $0x3e] sm:$0x1] }
0x2acc   :  { %v8119_v62 = vadd.f32 %v8087_v48, %v7986_v61  ;;  %v8120_v31 = vadd.f32 %v8088_v8, %v7987_v40  ;;  %v8121_v16 = vadd.f32 %v8089_v7, %v7988_v14  ;;  %v9149_v9 = vmul.f32 -1.442695, %v8118_v42 }
0x2acd   :  { %11103 = vtanh.f32 %v8118_v42  ;;  %v8111_v59 = vadd.f32 %v8080_v2, %v7978_v32  ;;  %v8090_v11 = vrot.slane %v9496_v44, 4  ;;  %v8112_v27 = vadd.f32 %v8081_v60, %v7979_v41  ;;  %v7983_v60 = vld [vmem:[#allocation2 + $0x36] sm:$0x1] }
0x2ace   :  { %v9150_v45 = vmul.f32 -1.442695, %v8119_v62  ;;  %11105 = vtanh.f32 %v8119_v62  ;;  %v9151_v55 = vmul.f32 -1.442695, %v8120_v31  ;;  %v9152_v35 = vmul.f32 -1.442695, %v8121_v16 }
0x2acf   :  { %11107 = vpow2.f32 %v9149_v9  ;;  %v8091_v18 = vrot.slane %v9496_v44, 5  ;;  %v14049_v1 = vadd.f32 %v8082_v17, %v7980_v52  ;;  %v9141_v22 = vmul.f32 -1.442695, %v8110_v58  ;;  %v7981_v62 = vld [vmem:[#allocation2 + $0x26] sm:$0x1] }
0x2ad0   :  { %11109 = vtanh.f32 %v8120_v31  ;;  %v8092_v15 = vrot.slane %v9496_v44, 6  ;;  %v9142_v19 = vmul.f32 -1.442695, %v8111_v59  ;;  %v9143_v30 = vmul.f32 -1.442695, %v8112_v27 }
0x2ad1   :  { %11111 = vpow2.f32 %v9150_v45  ;;  %v8093_v49 = vrot.slane %v9496_v44, 7  ;;  %v8122_v39 = vadd.f32 %v8090_v11, %v7989_v3  ;;  %v9144_v57 = vmul.f32 -1.442695, %v14049_v1  ;;  %v7982_v45 = vld [vmem:[#allocation2 + $0x2e] sm:$0x1] }
0x2ad2   :  { %11113 = vpow2.f32 %v9151_v55  ;;  %v8123_v43 = vadd.f32 %v8091_v18, %v7990_v29  ;;  %v8124_v51 = vadd.f32 %v8092_v15, %v7991_v37  ;;  %v8083_v25 = vrot.slane %v14043_v4, 4 }
0x2ad3   :  { %11115 = vpow2.f32 %v9152_v35  ;;  %v8125_v46 = vadd.f32 %v8093_v49, %v7992_v24  ;;  %v9153_v13 = vmul.f32 -1.442695, %v8122_v39  ;;  %v8084_v42 = vrot.slane %v14043_v4, 5 }
0x2ad4   :  { %11117 = vtanh.f32 %v8110_v58  ;;  %v9154_v38 = vmul.f32 -1.442695, %v8123_v43  ;;  %v9155_v63 = vmul.f32 -1.442695, %v8124_v51  ;;  %v8085_v61 = vrot.slane %v14043_v4, 6 }
0x2ad5   :  { %11119 = vtanh.f32 %v8111_v59  ;;  %v9156_v5 = vmul.f32 -1.442695, %v8125_v46  ;;  %v8086_v14 = vrot.slane %v14043_v4, 7  ;;  %v8114_v9 = vadd.f32 %v8083_v25, %v7981_v62 }
0x2ad6   :  { %11121 = vtanh.f32 %v8112_v27  ;;  %v8115_v17 = vadd.f32 %v8084_v42, %v7982_v45  ;;  %v14069_v35 = vadd.f32 %v8085_v61, %v7983_v60 }
0x2ad7   :  { %v14052_v28 = vpop.eup %11103  ;;  %11123 = vpow2.f32 %v9141_v22  ;;  %v14072_v4 = vadd.f32 %v8086_v14, %v7984_v6  ;;  %v9145_v27 = vmul.f32 -1.442695, %v8114_v9 }
0x2ad8   :  { %v14054_v10 = vpop.eup %11105  ;;  %11125 = vpow2.f32 %v9142_v19  ;;  %v9146_v19 = vmul.f32 -1.442695, %v8115_v17 }
0x2ad9   :  { %v11108_v12 = vpop.eup %11107  ;;  %11127 = vpow2.f32 %v9143_v30  ;;  %v9148_v37 = vmul.f32 -1.442695, %v14072_v4 }
0x2ada   :  { %v14056_v0 = vpop.eup %11109  ;;  %11129 = vpow2.f32 %v9144_v57  ;;  %v8198_v26 = vadd.f32 1.0, %v11108_v12 }
0x2adb   :  { %v11112_v54 = vpop.eup %11111  ;;  %11131 = vtanh.f32 %v8121_v16  ;;  %v8268_v16 = vrot.slane %v14054_v10, 7  ;;  %v8270_v41 = vrot.slane %v14056_v0, 6 }
0x2adc   :  { %v11114_v56 = vpop.eup %11113  ;;  %11133 = vtanh.f32 %v8122_v39  ;;  %v8199_v36 = vadd.f32 1.0, %v11112_v54 }
0x2add   :  { %v11116_v20 = vpop.eup %11115  ;;  %11135 = vpow2.f32 %v9153_v13  ;;  %v8200_v50 = vadd.f32 1.0, %v11114_v56  ;;  %v8269_v52 = vsel %vm762_vm0, %v8268_v16, %v14052_v28 }
0x2ade   :  { %v14058_v33 = vpop.eup %11117  ;;  %11137 = vpow2.f32 %v9154_v38  ;;  %v8201_v48 = vadd.f32 1.0, %v11116_v20  ;;  %v8271_v29 = vsel %vm765_vm1, %v8270_v41, %v8269_v52 }
0x2adf   :  { %v14060_v47 = vpop.eup %11119  ;;  %11139 = vpow2.f32 %v9155_v63 }
0x2ae0   :  { %v14062_v53 = vpop.eup %11121  ;;  %11141 = vrcp.f32 %v8198_v26 }
0x2ae1   :  { %v11124_v44 = vpop.eup %11123  ;;  %11143 = vpow2.f32 %v9156_v5 }
0x2ae2   :  { %v11126_v8 = vpop.eup %11125  ;;  %11145 = vrcp.f32 %v8199_v36  ;;  %v8190_v0 = vadd.f32 1.0, %v11124_v44  ;;  %v8254_v44 = vrot.slane %v14060_v47, 7 }
0x2ae3   :  { %v11128_v7 = vpop.eup %11127  ;;  %11147 = vrcp.f32 %v8200_v50 }
0x2ae4   :  { %v11130_v40 = vpop.eup %11129  ;;  %11149 = vtanh.f32 %v8123_v43 }
0x2ae5   :  { %v11132_v31 = vpop.eup %11131  ;;  %11151 = vrcp.f32 %v8201_v48  ;;  %v8193_v56 = vadd.f32 1.0, %v11130_v40 }
0x2ae6   :  { %v11134_v2 = vpop.eup %11133  ;;  %11153 = vtanh.f32 %v8124_v51  ;;  %v8272_v39 = vrot.slane %v11132_v31, 5  ;;  %v8191_v51 = vadd.f32 1.0, %v11126_v8 }
0x2ae7   :  { %v11136_v55 = vpop.eup %11135  ;;  %11155 = vtanh.f32 %v8125_v46  ;;  %v8192_v46 = vadd.f32 1.0, %v11128_v7  ;;  %v8274_v38 = vrot.slane %v11134_v2, 4 }
0x2ae8   :  { %v11138_v32 = vpop.eup %11137  ;;  %v8202_v58 = vadd.f32 1.0, %v11136_v55  ;;  %11157 = vtanh.f32 %v14049_v1  ;;  %v9147_v1 = vmul.f32 -1.442695, %v14069_v35  ;;  %v8273_v24 = vsel %vm768_vm2, %v8272_v39, %v8271_v29 }
0x2ae9   :  { %v11140_v59 = vpop.eup %11139  ;;  %v8203_v11 = vadd.f32 1.0, %v11138_v32  ;;  %11159 = vtanh.f32 %v8114_v9  ;;  %v8275_v20 = vsel %vm771_vm5, %v8274_v38, %v8273_v24  ;;  %v8256_v9 = vrot.slane %v14062_v53, 6 }
0x2aea   :  { %v11142_v18 = vpop.eup %11141  ;;  %v8204_v22 = vadd.f32 1.0, %v11140_v59  ;;  %11161 = vrcp.f32 %v8202_v58  ;;  %v8255_v55 = vsel %vm762_vm0, %v8254_v44, %v14058_v33 }
0x2aeb   :  { %v11144_v15 = vpop.eup %11143  ;;  %11163 = vrcp.f32 %v8203_v11 }
0x2aec   :  { %v11146_v3 = vpop.eup %11145  ;;  %v8205_v30 = vadd.f32 1.0, %v11144_v15  ;;  %11165 = vrcp.f32 %v8204_v22  ;;  %v8257_v15 = vsel %vm765_vm1, %v8256_v9, %v8255_v55 }
0x2aed   :  { %v11148_v49 = vpop.eup %11147  ;;  %v8314_v57 = vrot.slane %v11146_v3, 7  ;;  %11167 = vpow2.f32 %v9145_v27 }
0x2aee   :  { %v11150_v43 = vpop.eup %11149  ;;  %11169 = vrcp.f32 %v8205_v30  ;;  %v8316_v28 = vrot.slane %v11148_v49, 6 }
0x2aef   :  { %v11152_v10 = vpop.eup %11151  ;;  %v8315_v12 = vsel %vm762_vm0, %v8314_v57, %v11142_v18  ;;  %11171 = vpow2.f32 %v9146_v19  ;;  %v8276_v50 = vrot.slane %v11150_v43, 3 }
0x2af0   :  { %v11154_v13 = vpop.eup %11153  ;;  %11173 = vpow2.f32 %v9147_v1  ;;  %v8317_v63 = vsel %vm765_vm1, %v8316_v28, %v8315_v12  ;;  %v8318_v5 = vrot.slane %v11152_v10, 5 }
0x2af1   :  { %v11156_v54 = vpop.eup %11155  ;;  %11175 = vpow2.f32 %v9148_v37  ;;  %v8277_v7 = vsel %vm774_vm6, %v8276_v50, %v8275_v20  ;;  %v8278_v40 = vrot.slane %v11154_v13, 2 }
0x2af2   :  { %v11158_v26 = vpop.eup %11157  ;;  %11177 = vrcp.f32 %v8191_v51  ;;  %v8319_v48 = vsel %vm768_vm2, %v8318_v5, %v8317_v63  ;;  %v8280_v32 = vrot.slane %v11156_v54, 1 }
0x2af3   :  { %v11160_v36 = vpop.eup %11159  ;;  %11179 = vrcp.f32 %v8192_v46  ;;  %v8279_v45 = vsel %vm777_vm7, %v8278_v40, %v8277_v7  ;;  %v8258_v19 = vrot.slane %v11158_v26, 5 }
0x2af4   :  { %v11162_v25 = vpop.eup %11161  ;;  %11181 = vrcp.f32 %v8190_v0  ;;  %v8281_v11 = vsel %vm780_vm8, %v8280_v32, %v8279_v45  ;;  %v8260_v57 = vrot.slane %v11160_v36, 4 }
0x2af5   :  { %v11164_v8 = vpop.eup %11163  ;;  %v8320_v42 = vrot.slane %v11162_v25, 4  ;;  %11183 = vrcp.f32 %v8193_v56 }
0x2af6   :  { %v11166_v61 = vpop.eup %11165  ;;  %v8322_v62 = vrot.slane %v11164_v8, 3  ;;  %11185 = vtanh.f32 %v8115_v17 }
0x2af7   :  { %v11168_v14 = vpop.eup %11167  ;;  %v8321_v31 = vsel %vm771_vm5, %v8320_v42, %v8319_v48  ;;  %v8324_v16 = vrot.slane %v11166_v61, 2  ;;  %11187 = vtanh.f32 %v14069_v35 }
0x2af8   :  { %v11170_v2 = vpop.eup %11169  ;;  %v8323_v47 = vsel %vm774_vm6, %v8322_v62, %v8321_v31  ;;  %v8194_v60 = vadd.f32 1.0, %v11168_v14 }
0x2af9   :  { %v11172_v6 = vpop.eup %11171  ;;  %v8325_v58 = vsel %vm777_vm7, %v8324_v16, %v8323_v47  ;;  %v8326_v17 = vrot.slane %v11170_v2, 1 }
0x2afa   :  { %v11174_v41 = vpop.eup %11173  ;;  %v8195_v59 = vadd.f32 1.0, %v11172_v6  ;;  %11189 = vrcp.f32 %v8194_v60 }
0x2afb   :  { %v11176_v53 = vpop.eup %11175  ;;  %v8327_v52 = vsel %vm780_vm8, %v8326_v17, %v8325_v58  ;;  %11191 = vtanh.f32 %v14072_v4  ;;  %v8196_v27 = vadd.f32 1.0, %v11174_v41  ;;  %v8259_v4 = vsel %vm768_vm2, %v8258_v19, %v8257_v15  ;;  %v8377_v15 = vld [vmem:[#allocation2 + $0x5f] sm:$0x1] }
0x2afc   :  { %v11178_v18 = vpop.eup %11177  ;;  %v8331_v33 = vsel %vm11893_vm9, %v8281_v11, %v8327_v52  ;;  %v8197_v22 = vadd.f32 1.0, %v11176_v53  ;;  %11193 = vrcp.f32 %v8195_v59  ;;  %v8261_v43 = vsel %vm771_vm5, %v8260_v57, %v8259_v4  ;;  %v8374_v59 = vld [vmem:[#allocation2 + $0x47] sm:$0x1] }
0x2afd   :  { %v11180_v35 = vpop.eup %11179  ;;  %8338 = vrot.lane.b32.xlu0 %v8331_v33, %s11332_s20  ;;  %11195 = vrcp.f32 %v8196_v27  ;;  %v8300_v3 = vrot.slane %v11178_v18, 7  ;;  %v8333_v31 = vmul.f32 %v8331_v33, %v14030_v21  ;;  %v8375_v18 = vld [vmem:[#allocation2 + $0x4f] sm:$0x1] }
0x2afe   :  { %v11182_v30 = vpop.eup %11181  ;;  %11197 = vrcp.f32 %v8197_v22  ;;  %v8302_v29 = vrot.slane %v11180_v35, 6 }
0x2aff   :  { %v11184_v1 = vpop.eup %11183  ;;  %v8301_v49 = vsel %vm762_vm0, %v8300_v3, %v11182_v30 }
0x2b00   :  { %v11186_v39 = vpop.eup %11185  ;;  %v8303_v37 = vsel %vm765_vm1, %v8302_v29, %v8301_v49  ;;  %v8304_v28 = vrot.slane %v11184_v1, 5  ;;  %v8366_v49 = vld [vmem:[#allocation2 + $0x7] sm:$0x1] }
0x2b01   :  { %v11188_v51 = vpop.eup %11187  ;;  %v8262_v10 = vrot.slane %v11186_v39, 3 }
0x2b02   :  { %v8305_v12 = vsel %vm768_vm2, %v8304_v28, %v8303_v37  ;;  %v8264_v54 = vrot.slane %v11188_v51, 2  ;;  %v8367_v37 = vld [vmem:[#allocation2 + $0xf] sm:$0x1] }
0x2b03   :  { %v8263_v13 = vsel %vm774_vm6, %v8262_v10, %v8261_v43  ;;  %v8368_v10 = vld [vmem:[#allocation2 + $0x17] sm:$0x1] }
0x2b04   :  { %v11190_v24 = vpop.eup %11189  ;;  %v8265_v5 = vsel %vm777_vm7, %v8264_v54, %v8263_v13 }
0x2b05   :  { %v11192_v46 = vpop.eup %11191  ;;  %v8306_v0 = vrot.slane %v11190_v24, 4 }
0x2b06   :  { %v11194_v38 = vpop.eup %11193  ;;  %v8266_v50 = vrot.slane %v11192_v46, 1 }
0x2b07   :  { %v11196_v63 = vpop.eup %11195  ;;  %v8307_v56 = vsel %vm771_vm5, %v8306_v0, %v8305_v12  ;;  %v8308_v26 = vrot.slane %v11194_v38, 3  ;;  %v8369_v12 = vld [vmem:[#allocation2 + $0x1f] sm:$0x1]  ;;  %v8370_v38 = vld [vmem:[#allocation2 + $0x27] sm:$0x1] }
0x2b08   :  { %v11198_v20 = vpop.eup %11197  ;;  %v8310_v36 = vrot.slane %v11196_v63, 2  ;;  %v8267_v8 = vsel %vm780_vm8, %v8266_v50, %v8265_v5 }
0x2b09   :  { %v8309_v25 = vsel %vm774_vm6, %v8308_v26, %v8307_v56  ;;  %v8312_v48 = vrot.slane %v11198_v20, 1  ;;  %v8371_v56 = vld [vmem:[#allocation2 + $0x2f] sm:$0x1] }
0x2b0a   :  { %v8311_v44 = vsel %vm777_vm7, %v8310_v36, %v8309_v25 }
0x2b0b   :  { %v8313_v7 = vsel %vm780_vm8, %v8312_v48, %v8311_v44 }
0x2b0c   :  { %v8330_v42 = vsel %vm11893_vm9, %v8267_v8, %v8313_v7 }
0x2b0d   :  { %8336 = vrot.lane.b32.xlu1 %v8330_v42, %s11332_s20  ;;  %v8332_v45 = vmul.f32 %v8330_v42, %v14035_v34 }
0x2b6f   :  { %v8339_v61 = vpop.permute.xlu0 %8338 }
0x2b70   :  { %v8343_v40 = vmul.f32 %v8339_v61, %v8331_v33 }
0x2b72   :  { %8348 = vrot.lane.b32.xlu0 %v8343_v40, %s11333_s21  ;;  %v8378_v40 = vld [vmem:[#allocation2 + $0x67] sm:$0x1] }
0x2b7f   :  { %v8337_v62 = vpop.permute.xlu1 %8336 }
0x2b80   :  { %v8342_v14 = vmul.f32 %v8337_v62, %v8330_v42 }
0x2b82   :  { %8346 = vrot.lane.b32.xlu1 %v8342_v14, %s11333_s21 }
0x2be4   :  { %v8349_v16 = vpop.permute.xlu0 %8348 }
0x2be5   :  { %v14120_v9 = vadd.f32 %v8349_v16, %v8333_v31 }
0x2be7   :  { %11199 = vtanh.f32 %v14120_v9 }
0x2bf1   :  { %v11200_v2 = vpop.eup %11199 }
0x2bf2   :  { %8360 = vrot.lane.b32.xlu0 %v11200_v2, %s11332_s20 }
0x2bf4   :  { %v8347_v47 = vpop.permute.xlu1 %8346 }
0x2bf5   :  { %v14125_v60 = vadd.f32 %v8347_v47, %v8332_v45  ;;  %v8379_v47 = vld [vmem:[#allocation2 + $0x6f] sm:$0x1] }
0x2bf7   :  { %11201 = vtanh.f32 %v14125_v60 }
0x2c01   :  { %v11202_v55 = vpop.eup %11201 }
0x2c02   :  { %8358 = vrot.lane.b32.xlu1 %v11202_v55, %s11332_s20 }
0x2c64   :  { %v8361_v6 = vpop.permute.xlu0 %8360 }
0x2c65   :  { %v8365_v21 = vmul.f32 %v8361_v6, %v8331_v33  ;;  %v8376_v33 = vld [vmem:[#allocation2 + $0x57] sm:$0x1] }
0x2c67   :  { %8386 = vrot.lane.b32.xlu0 %v8365_v21, %s11333_s21 }
0x2c74   :  { %v8359_v32 = vpop.permute.xlu1 %8358 }
0x2c75   :  { %v8364_v58 = vmul.f32 %v8359_v32, %v8330_v42 }
0x2c77   :  { %8384 = vrot.lane.b32.xlu1 %v8364_v58, %s11333_s21  ;;  %v8380_v58 = vld [vmem:[#allocation2 + $0x77] sm:$0x1] }
0x2cd9   :  { %v8387_v41 = vpop.permute.xlu0 %8386 }
0x2ce9   :  { %v8385_v17 = vpop.permute.xlu1 %8384 }
0x2cea   :  { %9505 = vmatprep.mubr.msk.f32.mxu1 %vm506_vm10, %v8385_v17 }
0x2ceb   :  { %9506 = vmatmul.mubr.msk.f32.vlgmr.msra.gmra.mrb[18].mxu1 %vm506_vm10, %v8387_v41 }
0x2dbe   :  { %v14133_v34 = vpop.f32.mrb[18].mxu1 }
0x2dbf   :  { %v8476_v53 = vrot.slane %v14133_v34, 1  ;;  %v8477_v11 = vrot.slane %v14133_v34, 2  ;;  %v8478_v52 = vrot.slane %v14133_v34, 3  ;;  %v14138_v27 = vpop.f32.mrb[19].mxu1  ;;  %v8507_v22 = vadd.f32 %v14133_v34, %v8374_v59  ;;  %v8381_v59 = vld [vmem:[#allocation2 + $0x7f] sm:$0x1] }
0x2dc0   :  { %v8469_v29 = vrot.slane %v14138_v27, 1  ;;  %v8470_v39 = vrot.slane %v14138_v27, 2  ;;  %v8471_v43 = vrot.slane %v14138_v27, 3  ;;  %v8499_v28 = vadd.f32 %v14138_v27, %v8366_v49 }
0x2dc1   :  { %v8508_v35 = vadd.f32 %v8476_v53, %v8375_v18  ;;  %v8509_v19 = vadd.f32 %v8477_v11, %v8376_v33  ;;  %v14141_v3 = vadd.f32 %v8478_v52, %v8377_v15  ;;  %v9167_v30 = vmul.f32 -1.442695, %v8507_v22 }
0x2dc2   :  { %11203 = vtanh.f32 %v8507_v22  ;;  %v8500_v51 = vadd.f32 %v8469_v29, %v8367_v37  ;;  %v8472_v24 = vrot.slane %v14138_v27, 4  ;;  %v8501_v46 = vadd.f32 %v8470_v39, %v8368_v10  ;;  %v8373_v10 = vld [vmem:[#allocation2 + $0x3f] sm:$0x1] }
0x2dc3   :  { %v9168_v1 = vmul.f32 -1.442695, %v8508_v35  ;;  %11205 = vpow2.f32 %v9167_v30  ;;  %v9169_v4 = vmul.f32 -1.442695, %v8509_v19  ;;  %v9170_v57 = vmul.f32 -1.442695, %v14141_v3 }
0x2dc4   :  { %11207 = vtanh.f32 %v8508_v35  ;;  %v8473_v13 = vrot.slane %v14138_v27, 5  ;;  %v8502_v0 = vadd.f32 %v8471_v43, %v8369_v12  ;;  %v9160_v54 = vmul.f32 -1.442695, %v8500_v51  ;;  %v8372_v43 = vld [vmem:[#allocation2 + $0x37] sm:$0x1] }
0x2dc5   :  { %11209 = vtanh.f32 %v8509_v19  ;;  %v8503_v63 = vadd.f32 %v8472_v24, %v8370_v38  ;;  %v9159_v26 = vmul.f32 -1.442695, %v8499_v28  ;;  %v8479_v5 = vrot.slane %v14133_v34, 4 }
0x2dc6   :  { %11211 = vpow2.f32 %v9168_v1  ;;  %v14153_v36 = vadd.f32 %v8473_v13, %v8371_v56  ;;  %v9161_v50 = vmul.f32 -1.442695, %v8501_v46  ;;  %v9162_v48 = vmul.f32 -1.442695, %v8502_v0 }
0x2dc7   :  { %11213 = vpow2.f32 %v9169_v4  ;;  %v8480_v42 = vrot.slane %v14133_v34, 5  ;;  %v9163_v61 = vmul.f32 -1.442695, %v8503_v63  ;;  %v8511_v31 = vadd.f32 %v8479_v5, %v8378_v40 }
0x2dc8   :  { %11215 = vpow2.f32 %v9170_v57  ;;  %v9164_v14 = vmul.f32 -1.442695, %v14153_v36  ;;  %v8481_v2 = vrot.slane %v14133_v34, 6  ;;  %v8482_v55 = vrot.slane %v14133_v34, 7 }
0x2dc9   :  { %11217 = vtanh.f32 %v8499_v28  ;;  %v8512_v21 = vadd.f32 %v8480_v42, %v8379_v47  ;;  %v9171_v17 = vmul.f32 -1.442695, %v8511_v31  ;;  %v8474_v30 = vrot.slane %v14138_v27, 6 }
0x2dca   :  { %11219 = vtanh.f32 %v8500_v51  ;;  %v8513_v53 = vadd.f32 %v8481_v2, %v8380_v58  ;;  %v8514_v52 = vadd.f32 %v8482_v55, %v8381_v59  ;;  %v8475_v1 = vrot.slane %v14138_v27, 7 }
0x2dcb   :  { %11221 = vtanh.f32 %v8501_v46  ;;  %v9172_v22 = vmul.f32 -1.442695, %v8512_v21  ;;  %v8505_v24 = vadd.f32 %v8474_v30, %v8372_v43 }
0x2dcc   :  { %v14150_v20 = vpop.eup %11203  ;;  %11223 = vtanh.f32 %v8502_v0  ;;  %v9173_v35 = vmul.f32 -1.442695, %v8513_v53  ;;  %v9174_v29 = vmul.f32 -1.442695, %v8514_v52  ;;  %v14176_v13 = vadd.f32 %v8475_v1, %v8373_v10 }
0x2dcd   :  { %v11206_v25 = vpop.eup %11205  ;;  %11225 = vpow2.f32 %v9160_v54 }
0x2dce   :  { %v14155_v44 = vpop.eup %11207  ;;  %v8587_v8 = vadd.f32 1.0, %v11206_v25  ;;  %11227 = vtanh.f32 %v8503_v63  ;;  %v9165_v63 = vmul.f32 -1.442695, %v8505_v24  ;;  %v9166_v5 = vmul.f32 -1.442695, %v14176_v13 }
0x2dcf   :  { %v14157_v7 = vpop.eup %11209  ;;  %11229 = vpow2.f32 %v9159_v26  ;;  %v8657_v54 = vrot.slane %v14155_v44, 7 }
0x2dd0   :  { %v11212_v62 = vpop.eup %11211  ;;  %11231 = vpow2.f32 %v9161_v50 }
0x2dd1   :  { %v11214_v16 = vpop.eup %11213  ;;  %11233 = vpow2.f32 %v9162_v48  ;;  %v8588_v4 = vadd.f32 1.0, %v11212_v62  ;;  %v8658_v44 = vsel %vm762_vm0, %v8657_v54, %v14150_v20 }
0x2dd2   :  { %v11216_v45 = vpop.eup %11215  ;;  %11235 = vrcp.f32 %v8587_v8  ;;  %v8589_v39 = vadd.f32 1.0, %v11214_v16  ;;  %v8659_v8 = vrot.slane %v14157_v7, 6 }
0x2dd3   :  { %v14163_v6 = vpop.eup %11217  ;;  %11237 = vpow2.f32 %v9163_v61  ;;  %v8590_v37 = vadd.f32 1.0, %v11216_v45 }
0x2dd4   :  { %v14165_v32 = vpop.eup %11219  ;;  %11239 = vpow2.f32 %v9164_v14 }
0x2dd5   :  { %v14167_v41 = vpop.eup %11221  ;;  %11241 = vtanh.f32 %v14141_v3  ;;  %v8643_v20 = vrot.slane %v14165_v32, 7 }
0x2dd6   :  { %v14170_v11 = vpop.eup %11223  ;;  %11243 = vtanh.f32 %v8511_v31 }
0x2dd7   :  { %v11226_v34 = vpop.eup %11225  ;;  %11245 = vtanh.f32 %v8512_v21 }
0x2dd8   :  { %v14172_v18 = vpop.eup %11227  ;;  %v8580_v33 = vadd.f32 1.0, %v11226_v34  ;;  %11247 = vpow2.f32 %v9171_v17 }
0x2dd9   :  { %v11230_v15 = vpop.eup %11229  ;;  %11249 = vtanh.f32 %v8513_v53 }
0x2dda   :  { %v11232_v19 = vpop.eup %11231  ;;  %11251 = vtanh.f32 %v8514_v52  ;;  %v8579_v51 = vadd.f32 1.0, %v11230_v15 }
0x2ddb   :  { %v11234_v3 = vpop.eup %11233  ;;  %11253 = vrcp.f32 %v8580_v33  ;;  %v8581_v46 = vadd.f32 1.0, %v11232_v19  ;;  %v8645_v19 = vrot.slane %v14167_v41, 6 }
0x2ddc   :  { %v11236_v49 = vpop.eup %11235  ;;  %11255 = vpow2.f32 %v9172_v22  ;;  %v8582_v25 = vadd.f32 1.0, %v11234_v3 }
0x2ddd   :  { %v11238_v57 = vpop.eup %11237  ;;  %11257 = vpow2.f32 %v9173_v35 }
0x2dde   :  { %v11240_v28 = vpop.eup %11239  ;;  %11259 = vpow2.f32 %v9174_v29  ;;  %v8583_v31 = vadd.f32 1.0, %v11238_v57  ;;  %v8644_v29 = vsel %vm762_vm0, %v8643_v20, %v14163_v6 }
0x2ddf   :  { %v11242_v12 = vpop.eup %11241  ;;  %11261 = vrcp.f32 %v8588_v4  ;;  %v8584_v55 = vadd.f32 1.0, %v11240_v28  ;;  %v8646_v10 = vsel %vm765_vm1, %v8645_v19, %v8644_v29 }
0x2de0   :  { %v11244_v27 = vpop.eup %11243  ;;  %11263 = vrcp.f32 %v8589_v39  ;;  %v8661_v7 = vrot.slane %v11242_v12, 5 }
0x2de1   :  { %v14178_v0 = vpop.eup %11245  ;;  %11265 = vrcp.f32 %v8590_v37  ;;  %v8663_v34 = vrot.slane %v11244_v27, 4 }
0x2de2   :  { %v11248_v38 = vpop.eup %11247  ;;  %11267 = vrcp.f32 %v8579_v51  ;;  %v8665_v1 = vrot.slane %v14178_v0, 3 }
0x2de3   :  { %v14181_v56 = vpop.eup %11249  ;;  %11269 = vrcp.f32 %v8581_v46  ;;  %v8591_v26 = vadd.f32 1.0, %v11248_v38  ;;  %v8647_v46 = vrot.slane %v14170_v11, 5  ;;  %v8649_v11 = vrot.slane %v14172_v18, 4 }
0x2de4   :  { %v14184_v50 = vpop.eup %11251  ;;  %11271 = vtanh.f32 %v14153_v36  ;;  %v8660_v36 = vsel %vm765_vm1, %v8659_v8, %v8658_v44 }
0x2de5   :  { %v11254_v48 = vpop.eup %11253  ;;  %11273 = vrcp.f32 %v8591_v26  ;;  %v8662_v59 = vsel %vm768_vm2, %v8661_v7, %v8660_v36  ;;  %v8648_v26 = vsel %vm768_vm2, %v8647_v46, %v8646_v10  ;;  %v9175_v46 = vld [vmem:[%s14275_s6] ss:$0 sm:$0xff] }
0x2de6   :  { %v11256_v42 = vpop.eup %11255  ;;  %11275 = vpow2.f32 %v9165_v63  ;;  %v8689_v22 = vrot.slane %v11254_v48, 7  ;;  %v8664_v32 = vsel %vm771_vm5, %v8663_v34, %v8662_v59 }
0x2de7   :  { %v11258_v61 = vpop.eup %11257  ;;  %v8592_v40 = vadd.f32 1.0, %v11256_v42  ;;  %11277 = vpow2.f32 %v9166_v5  ;;  %v8666_v41 = vsel %vm774_vm6, %v8665_v1, %v8664_v32 }
0x2de8   :  { %v11260_v62 = vpop.eup %11259  ;;  %v8593_v14 = vadd.f32 1.0, %v11258_v61  ;;  %11279 = vrcp.f32 %v8582_v25 }
0x2de9   :  { %v11262_v16 = vpop.eup %11261  ;;  %v8594_v2 = vadd.f32 1.0, %v11260_v62  ;;  %11281 = vrcp.f32 %v8592_v40 }
0x2dea   :  { %v11264_v45 = vpop.eup %11263  ;;  %11283 = vrcp.f32 %v8593_v14  ;;  %v8703_v47 = vrot.slane %v11262_v16, 7  ;;  %v8650_v14 = vsel %vm771_vm5, %v8649_v11, %v8648_v26 }
0x2deb   :  { %v11266_v21 = vpop.eup %11265  ;;  %11285 = vrcp.f32 %v8594_v2  ;;  %v8705_v58 = vrot.slane %v11264_v45, 6 }
0x2dec   :  { %v11268_v17 = vpop.eup %11267  ;;  %v8704_v53 = vsel %vm762_vm0, %v8703_v47, %v11236_v49  ;;  %11287 = vrcp.f32 %v8583_v31  ;;  %v8707_v35 = vrot.slane %v11266_v21, 5 }
0x2ded   :  { %v11270_v52 = vpop.eup %11269  ;;  %v8706_v33 = vsel %vm765_vm1, %v8705_v58, %v8704_v53  ;;  %11289 = vrcp.f32 %v8584_v55  ;;  %v8690_v43 = vsel %vm762_vm0, %v8689_v22, %v11268_v17 }
0x2dee   :  { %v11272_v15 = vpop.eup %11271  ;;  %11291 = vtanh.f32 %v8505_v24  ;;  %v8708_v4 = vsel %vm768_vm2, %v8707_v35, %v8706_v33  ;;  %v8691_v49 = vrot.slane %v11270_v52, 6  ;;  %v8667_v24 = vrot.slane %v14181_v56, 2 }
0x2def   :  { %v11274_v30 = vpop.eup %11273  ;;  %11293 = vtanh.f32 %v14176_v13  ;;  %v8669_v56 = vrot.slane %v14184_v50, 1  ;;  %v8651_v2 = vrot.slane %v11272_v15, 3 }
0x2df0   :  { %v11276_v3 = vpop.eup %11275  ;;  %v8709_v57 = vrot.slane %v11274_v30, 4  ;;  %v8692_v38 = vsel %vm765_vm1, %v8691_v49, %v8690_v43  ;;  %v8668_v63 = vsel %vm777_vm7, %v8667_v24, %v8666_v41  ;;  %v8755_v49 = vld [vmem:[%s14274_s5] sm:$0xff] }
0x2df1   :  { %v11278_v39 = vpop.eup %11277  ;;  %v8585_v37 = vadd.f32 1.0, %v11276_v3  ;;  %v8670_v40 = vsel %vm780_vm8, %v8669_v56, %v8668_v63  ;;  %v8652_v36 = vsel %vm774_vm6, %v8651_v2, %v8650_v14 }
0x2df2   :  { %v11280_v28 = vpop.eup %11279  ;;  %v8586_v51 = vadd.f32 1.0, %v11278_v39  ;;  %v8710_v12 = vsel %vm771_vm5, %v8709_v57, %v8708_v4  ;;  %v8756_v39 = vld [vmem:[%s14274_s5 + $0x8] sm:$0xff] }
0x2df3   :  { %v11282_v6 = vpop.eup %11281  ;;  %11295 = vrcp.f32 %v8585_v37  ;;  %v8693_v5 = vrot.slane %v11280_v28, 5  ;;  %v9655_v37 = vpack.c.bf16 %v8756_v39, %v8755_v49 }
0x2df4   :  { %v11284_v27 = vpop.eup %11283  ;;  %v8711_v0 = vrot.slane %v11282_v6, 3  ;;  %11297 = vrcp.f32 %v8586_v51 }
0x2df5   :  { %v11286_v54 = vpop.eup %11285  ;;  %v8713_v13 = vrot.slane %v11284_v27, 2  ;;  %v8694_v44 = vsel %vm768_vm2, %v8693_v5, %v8692_v38  ;;  %9656 = vmatprep.subr.bf16.mxu0 %v9655_v37 }
0x2df6   :  { %v11288_v25 = vpop.eup %11287  ;;  %v8712_v48 = vsel %vm774_vm6, %v8711_v0, %v8710_v12  ;;  %v8715_v8 = vrot.slane %v11286_v54, 1  ;;  %9658 = vmatpush3.bf16.msra.mxu0 %v9655_v37 }
0x2df7   :  { %v8714_v42 = vsel %vm777_vm7, %v8713_v13, %v8712_v48  ;;  %v11290_v61 = vpop.eup %11289  ;;  %v8695_v31 = vrot.slane %v11288_v25, 4 }
0x2df8   :  { %v8716_v62 = vsel %vm780_vm8, %v8715_v8, %v8714_v42  ;;  %v11292_v16 = vpop.eup %11291  ;;  %v8697_v45 = vrot.slane %v11290_v61, 3 }
0x2df9   :  { %v8720_v50 = vsel %vm11893_vm9, %v8670_v40, %v8716_v62  ;;  %v8696_v18 = vsel %vm771_vm5, %v8695_v31, %v8694_v44  ;;  %v11294_v7 = vpop.eup %11293  ;;  %v8653_v47 = vrot.slane %v11292_v16, 2 }
0x2dfa   :  { %8727 = vrot.lane.b32.xlu0 %v8720_v50, %s11332_s20  ;;  %v8698_v21 = vsel %vm774_vm6, %v8697_v45, %v8696_v18  ;;  %v8655_v59 = vrot.slane %v11294_v7, 1  ;;  %v8722_v32 = vmul.f32 %v8720_v50, %v14120_v9  ;;  %v8757_v9 = vld [vmem:[%s14274_s5 + $0x10] sm:$0xff] }
0x2dfb   :  { %v8654_v58 = vsel %vm777_vm7, %v8653_v47, %v8652_v36 }
0x2dfc   :  { %v8656_v34 = vsel %vm780_vm8, %v8655_v59, %v8654_v58 }
0x2dfd   :  { %v11296_v55 = vpop.eup %11295 }
0x2dfe   :  { %v11298_v20 = vpop.eup %11297  ;;  %v8699_v17 = vrot.slane %v11296_v55, 2 }
0x2dff   :  { %v8701_v53 = vrot.slane %v11298_v20, 1 }
0x2e00   :  { %v8700_v52 = vsel %vm777_vm7, %v8699_v17, %v8698_v21 }
0x2e01   :  { %v8702_v33 = vsel %vm780_vm8, %v8701_v53, %v8700_v52 }
0x2e02   :  { %v8719_v22 = vsel %vm11893_vm9, %v8656_v34, %v8702_v33 }
0x2e03   :  { %8725 = vrot.lane.b32.xlu1 %v8719_v22, %s11332_s20  ;;  %v8721_v1 = vmul.f32 %v8719_v22, %v14125_v60  ;;  %v8758_v60 = vld [vmem:[%s14274_s5 + $0x18] sm:$0xff] }
0x2e04   :  { %v9659_v43 = vpack.c.bf16 %v8758_v60, %v8757_v9 }
0x2e06   :  { %9660 = vmatprep.subr.bf16.mxu0 %v9659_v43 }
0x2e07   :  { %9662 = vmatpush3.bf16.msra.mxu0 %v9659_v43 }
0x2e6c   :  { %v8728_v15 = vpop.permute.xlu0 %8727 }
0x2e6d   :  { %v8732_v35 = vmul.f32 %v8728_v15, %v8720_v50 }
0x2e6f   :  { %8737 = vrot.lane.b32.xlu0 %v8732_v35, %s11333_s21 }
0x2e75   :  { %v8726_v19 = vpop.permute.xlu1 %8725 }
0x2e76   :  { %v8731_v30 = vmul.f32 %v8726_v19, %v8719_v22 }
0x2e78   :  { %8735 = vrot.lane.b32.xlu1 %v8731_v30, %s11333_s21 }
0x2ee1   :  { %v8738_v29 = vpop.permute.xlu0 %8737 }
0x2ee2   :  { %v8742_v3 = vadd.f32 %v8738_v29, %v8722_v32 }
0x2ee4   :  { %11299 = vtanh.f32 %v8742_v3 }
0x2eea   :  { %v8736_v4 = vpop.permute.xlu1 %8735 }
0x2eeb   :  { %v8741_v23 = vadd.f32 %v8736_v4, %v8721_v1 }
0x2eed   :  { %11301 = vtanh.f32 %v8741_v23 }
0x2eee   :  { %v11300_v57 = vpop.eup %11299 }
0x2eef   :  { %8749 = vrot.lane.b32.xlu0 %v11300_v57, %s11332_s20 }
0x2ef7   :  { %v11302_v28 = vpop.eup %11301 }
0x2ef8   :  { %8747 = vrot.lane.b32.xlu1 %v11302_v28, %s11332_s20  ;;  %s8858_s20 = sshll.u32 %s11335_s23, 4  ;;  %s8859_s20 = int_to_ptr.vmem [resolvable:$true] %s8858_s20 }
0x2ef9   :  { %p11308_p1 = scmp.lt.s32.totalorder %s8859_s20, %s8859_s20 }
0x2f61   :  { %v8750_v41 = vpop.permute.xlu0 %8749 }
0x2f62   :  { %v8754_v51 = vmul.f32 %v8750_v41, %v8720_v50 }
0x2f64   :  { %8770 = vrot.lane.b32.xlu0 %v8754_v51, %s11333_s21 }
0x2f6a   :  { %v8748_v10 = vpop.permute.xlu1 %8747 }
0x2f6b   :  { %v8753_v6 = vmul.f32 %v8748_v10, %v8719_v22 }
0x2f6d   :  { %8768 = vrot.lane.b32.xlu1 %v8753_v6, %s11333_s21  ;;  %s11303_s21 = scalar_lea.vmem %s8859_s20, 256 }
0x2f6e   :  { %p11304_p0 = scmp.ne.s32.totalorder %s8859_s20, %s11303_s21  ;;  %p11309_p2 = scmp.lt.s32.totalorder %s11303_s21, %s11303_s21 }
0x2f70   :  { %p11310_p3 = por %p11309_p2, %p11308_p1 }
0x2f72   :  { %p11311_p4 = pnand %p11310_p3, %p11304_p0 }
0x2fd6   :  { %v8771_v12 = vpop.permute.xlu0 %8770 }
0x2fdf   :  { %v8769_v24 = vpop.permute.xlu1 %8768 }
0x2fe0   :  { %9516 = vmatprep.mubr.msk.f32.mxu0 %vm506_vm10, %v8769_v24 }
0x2fe1   :  { %9517 = vmatmul.mubr.msk.f32.vlgmr.msra.gmra.mrb[28].mxu0 %vm506_vm10, %v8771_v12 }
0x30b4   :  { %v9518_v27 = vpop.f32.mrb[28].mxu0 }
0x30b5   :  { %v8848_v0 = vadd.f32 %v9518_v27, %v9175_v46  ;;  %v8842_v38 = vpop.f32.mrb[29].mxu0 }
0x30b6   :  { %v8843_v54 = vadd.f32 %v9175_v46, %v8842_v38 }
0x30b7   :  { %8852 = vst [vmem:[#allocation4 + $0x8] sm:$0xff] %v8848_v0 }
0x30b8   :  { %8851 = vst [vmem:[#allocation4] sm:$0xff] %v8843_v54 }
0x30b9   :  { %11314 = shalt.err (!%p11311_p4)
}
0x30ba   :  { %s11315_s6 = scalar_lea.hbm %s14276_s7, 256 }
0x30bb   :  { %p11316_p5 = scmp.ne.s32.totalorder %s14276_s7, %s11315_s6  ;;  %p11319_p6 = scmp.lt.u32.totalorder %s11315_s6, %s14276_s7 }
0x30bd   :  { %p11321_p7 = pnand %p11319_p6, %p11316_p5 }
0x30bf   :  { %11324 = shalt.err (!%p11321_p7)
}
0x30c0   :  { %s11336_s30 = smov 128   ;;  %s11337_s8 = smov 8  }
0x30c1   :  { %8864 = dma.vmem_to_hbm [thread:$0]  %s8859_s20, 256, %s14276_s7, [#allocation5], %s11336_s30, %s11336_s30, %s11337_s8  }
0x30c2   :  { %11325 = dma.done.wait [#allocation5], 256  }
0x30c3   :  { %11326 = vsyncadd [#allocation5], 4294967040 }
0x30c4   :  { %8868 = vsyncpa [#allocation5], 1 }

</bundles_post_ra>
